<compile_context>
chip_gen: v7x
topology: tpu7x:2x2x1
jax: 0.10.0
libtpu: 0.0.40
codegen_flags: <defaults>
</compile_context>

<pallas_src>
import jax
import jax.numpy as jnp
from jax.experimental import pallas as pl
from jax.experimental.pallas import tpu as pltpu

C_IN = 3            # greyScale=False -> 3 input channels
C_OUT = 32
IN_SIZE = 32        # inSize from the module
KS = 3
H2 = IN_SIZE        # conv output spatial size (k=3, s=1, p=1)
H3 = H2 // 2        # after 2x2 / stride-2 max pool
P3 = H3 * H3        # 256 pooled positions per channel
FEAT = C_OUT * P3   # 32 * 16 * 16 = 8192
HID = 64
NCLS = 3
NTAPS = KS * KS * C_IN   # 27
KDIM = 32                # contraction dim padded 27 -> 32 (sublane aligned)
LOGIT_PAD = 128          # lane-dense logits, sliced to NCLS in the wrapper
BT = 8                   # images per grid step


def fused_cnn_kernel(xc_ref, wc_ref, bc_ref, w1_ref, b1_ref, w2_ref, b2_ref,
                     o_ref):
    # xc_ref: (KDIM, BT*1024) pre-packed im2col block; lane index =
    #         phase*(BT*256) + b_local*256 + (h3*16 + w3)
    # wc_ref: (C_OUT, KDIM)   conv weight, K zero-padded 27->32
    # bc_ref: (C_OUT, 1)
    # w1_ref: (C_OUT, P3, HID)  fc1 weight split per conv output channel
    # b1_ref: (1, HID)
    # w2_ref: (HID, LOGIT_PAD)  zero-padded fc2 weight
    # b2_ref: (1, LOGIT_PAD)
    # o_ref : (BT, LOGIT_PAD)
    conv = jnp.dot(wc_ref[...], xc_ref[...],
                   preferred_element_type=jnp.float32)      # (C_OUT, BT*1024)
    conv = jnp.maximum(conv + bc_ref[...], 0.0)              # bias + ReLU

    # 2x2 max pool: the four pool phases are contiguous 128-aligned lane blocks.
    q = BT * P3
    pooled = jnp.maximum(
        jnp.maximum(conv[:, 0 * q:1 * q], conv[:, 1 * q:2 * q]),
        jnp.maximum(conv[:, 2 * q:3 * q], conv[:, 3 * q:4 * q]))  # (C_OUT, BT*P3)

    # Only relayout in the kernel: move batch onto sublanes (smallest tensor).
    feats = pooled.reshape(C_OUT, BT, P3)                     # (C_OUT, BT, P3)

    # fc1 == sum over c_out of (BT, 256) @ (256, HID)  (batched MXU matmul).
    hb = jax.lax.dot_general(
        feats, w1_ref[...],
        dimension_numbers=(((2,), (1,)), ((0,), (0,))),
        preferred_element_type=jnp.float32)                   # (C_OUT, BT, HID)
    h = jnp.maximum(jnp.sum(hb, axis=0) + b1_ref[...], 0.0)   # (BT, HID)

    logits = jnp.dot(h, w2_ref[...],
                     preferred_element_type=jnp.float32) + b2_ref[...]
    o_ref[...] = logits.astype(o_ref.dtype)                   # (BT, LOGIT_PAD)


def _pack_inputs(x, w_conv, b_conv, w1, b1, w2, b2):
    """XLA-side packing: batch pad, im2col with pool-phase-major lane order,
    weight repacks/zero-pads."""
    B = x.shape[0]
    B_pad = ((B + BT - 1) // BT) * BT
    if B_pad != B:
        x = jnp.pad(x, ((0, B_pad - B), (0, 0), (0, 0), (0, 0)))
    nb = B_pad // BT

    xp = jnp.pad(x, ((0, 0), (0, 0), (1, 1), (1, 1)))          # (B_pad,3,34,34)
    taps = [xp[:, :, dy:dy + H2, dx:dx + H2]
            for dy in range(KS) for dx in range(KS)]            # 9 x (B_pad,3,32,32)
    col = jnp.stack(taps, axis=1)                               # (B_pad,9,3,32,32)
    col = col.reshape(B_pad, NTAPS, H2, H2)                     # k=(dy*3+dx)*3+c_in
    # Split spatial into the four pooling phases: h=2r+a, w=2s+pb.
    col = col.reshape(B_pad, NTAPS, H3, 2, H3, 2)               # (b,k,r,a,s,pb)
    col = col.transpose(0, 1, 3, 5, 2, 4)                       # (b,k,a,pb,r,s)
    col = col.reshape(B_pad, NTAPS, 4, P3)                      # (b,k,phase,p)
    # Group into grid blocks of BT images, phase-major within a block.
    col = col.reshape(nb, BT, NTAPS, 4, P3)
    col = col.transpose(2, 0, 3, 1, 4)                          # (k,nb,phase,BT,p)
    col = col.reshape(NTAPS, B_pad * H2 * H2)                   # (27, B_pad*1024)
    col = jnp.pad(col, ((0, KDIM - NTAPS), (0, 0)))             # (32, B_pad*1024)

    # Conv weight: (c_out,c_in,dy,dx) -> (c_out, (dy,dx,c_in)) -> pad K to 32.
    w_mat = jnp.transpose(w_conv, (0, 2, 3, 1)).reshape(C_OUT, NTAPS)
    w_mat = jnp.pad(w_mat, ((0, 0), (0, KDIM - NTAPS)))         # (32, 32)
    bc = b_conv.reshape(C_OUT, 1)
    w1r = w1.reshape(C_OUT, P3, HID)                            # f = c*256+p
    b1r = b1.reshape(1, HID)
    w2p = jnp.pad(w2, ((0, 0), (0, LOGIT_PAD - NCLS)))          # (HID, 128)
    b2p = jnp.pad(b2.reshape(1, NCLS), ((0, 0), (0, LOGIT_PAD - NCLS)))
    return col, w_mat, bc, w1r, b1r, w2p, b2p, B_pad, nb


@jax.jit
def simple_convolutional_network(x, params):
    w_conv, b_conv, w1, b1, w2, b2 = params
    B = x.shape[0]
    col, w_mat, bc, w1r, b1r, w2p, b2p, B_pad, nb = _pack_inputs(
        x, w_conv, b_conv, w1, b1, w2, b2)

    grid_spec = pltpu.PrefetchScalarGridSpec(
        num_scalar_prefetch=0,
        grid=(nb,),
        in_specs=[
            pl.BlockSpec((KDIM, BT * H2 * H2), lambda i: (0, i)),   # im2col block
            pl.BlockSpec((C_OUT, KDIM), lambda i: (0, 0)),          # conv weight
            pl.BlockSpec((C_OUT, 1), lambda i: (0, 0)),             # conv bias
            pl.BlockSpec((C_OUT, P3, HID), lambda i: (0, 0, 0)),    # fc1 weight
            pl.BlockSpec((1, HID), lambda i: (0, 0)),               # fc1 bias
            pl.BlockSpec((HID, LOGIT_PAD), lambda i: (0, 0)),       # fc2 weight
            pl.BlockSpec((1, LOGIT_PAD), lambda i: (0, 0)),         # fc2 bias
        ],
        out_specs=pl.BlockSpec((BT, LOGIT_PAD), lambda i: (i, 0)),
    )
    out = pl.pallas_call(
        fused_cnn_kernel,
        out_shape=jax.ShapeDtypeStruct((B_pad, LOGIT_PAD), jnp.float32),
        grid_spec=grid_spec,
        compiler_params=pltpu.CompilerParams(
            dimension_semantics=("parallel",)),
    )(col, w_mat, bc, w1r, b1r, w2p, b2p)
    return out[:B, :NCLS]


def reference(x, params):
    """Pure-XLA reference matching the PyTorch forward pass."""
    w_conv, b_conv, w1, b1, w2, b2 = params
    conv = jax.lax.conv_general_dilated(
        x, w_conv, window_strides=(1, 1), padding=((1, 1), (1, 1)),
        dimension_numbers=("NCHW", "OIHW", "NCHW"))
    conv = jnp.maximum(conv + b_conv.reshape(1, C_OUT, 1, 1), 0.0)
    pooled = jax.lax.reduce_window(
        conv, -jnp.inf, jax.lax.max,
        window_dimensions=(1, 1, 2, 2), window_strides=(1, 1, 2, 2),
        padding="VALID")
    flat = pooled.reshape(x.shape[0], FEAT)
    h = jnp.maximum(flat @ w1 + b1, 0.0)
    return h @ w2 + b2


if __name__ == "__main__":
    key = jax.random.PRNGKey(0)
    kx, kwc, kbc, kw1, kb1, kw2, kb2 = jax.random.split(key, 7)
    B = 2
    x = jax.random.normal(kx, (B, C_IN, IN_SIZE, IN_SIZE), dtype=jnp.float32)
    # Deterministic synthetic parameters (same shapes as the nn.Module;
    # w1/w2 are fc1.weight.T / fc2.weight.T).
    w_conv = jax.random.normal(kwc, (C_OUT, C_IN, KS, KS), jnp.float32) * 0.1
    b_conv = jax.random.normal(kbc, (C_OUT,), jnp.float32) * 0.1
    w1 = jax.random.normal(kw1, (FEAT, HID), jnp.float32) * 0.02
    b1 = jax.random.normal(kb1, (HID,), jnp.float32) * 0.02
    w2 = jax.random.normal(kw2, (HID, NCLS), jnp.float32) * 0.1
    b2 = jax.random.normal(kb2, (NCLS,), jnp.float32) * 0.1
    params = (w_conv, b_conv, w1, b1, w2, b2)

    out = jax.block_until_ready(simple_convolutional_network(x, params))
    ref = jax.block_until_ready(reference(x, params))
    assert out.shape == (B, NCLS)
    assert jnp.allclose(out, ref, rtol=2e-3, atol=2e-3), (
        float(jnp.max(jnp.abs(out - ref))))
    print("KERNEL_OK")
</pallas_src>

<mosaic_0001>
module attributes {stable_mosaic.version = 11 : i64} {
  func.func @fused_cnn_kernel(%arg0: i32, %arg1: memref<32x8192xf32, #tpu.memory_space<vmem>>, %arg2: memref<32x32xf32, #tpu.memory_space<vmem>>, %arg3: memref<32x1xf32, #tpu.memory_space<vmem>>, %arg4: memref<32x256x64xf32, #tpu.memory_space<vmem>>, %arg5: memref<1x64xf32, #tpu.memory_space<vmem>>, %arg6: memref<64x128xf32, #tpu.memory_space<vmem>>, %arg7: memref<1x128xf32, #tpu.memory_space<vmem>>, %arg8: memref<8x128xf32, #tpu.memory_space<vmem>>) attributes {dimension_semantics = [#tpu.dimension_semantics<parallel>], iteration_bounds = array<i64: 1>, scalar_prefetch = 0 : i64, scratch_operands = 0 : i64, tpu.core_type = #tpu.core_type<tc>, window_params = [{transform_indices = @transform_0, window_bounds = array<i64: 32, 8192>}, {pipeline_mode = #tpu.pipeline_mode<synchronous>, transform_indices = @transform_1, window_bounds = array<i64: 32, 32>}, {pipeline_mode = #tpu.pipeline_mode<synchronous>, transform_indices = @transform_2, window_bounds = array<i64: 32, 1>}, {pipeline_mode = #tpu.pipeline_mode<synchronous>, transform_indices = @transform_3, window_bounds = array<i64: 32, 256, 64>}, {pipeline_mode = #tpu.pipeline_mode<synchronous>, transform_indices = @transform_4, window_bounds = array<i64: 1, 64>}, {pipeline_mode = #tpu.pipeline_mode<synchronous>, transform_indices = @transform_5, window_bounds = array<i64: 64, 128>}, {pipeline_mode = #tpu.pipeline_mode<synchronous>, transform_indices = @transform_6, window_bounds = array<i64: 1, 128>}, {transform_indices = @transform_7, window_bounds = array<i64: 8, 128>}]} {
    %c0 = arith.constant 0 : index
    %c0_0 = arith.constant 0 : index
    %0 = vector.load %arg2[%c0, %c0_0] : memref<32x32xf32, #tpu.memory_space<vmem>>, vector<32x32xf32>
    %c0_1 = arith.constant 0 : index
    %c0_2 = arith.constant 0 : index
    %1 = vector.load %arg1[%c0_1, %c0_2] : memref<32x8192xf32, #tpu.memory_space<vmem>>, vector<32x8192xf32>
    %cst = arith.constant dense<0.000000e+00> : vector<32x8192xf32>
    %2 = tpu.matmul %0, %1, %cst {dimension_numbers = #tpu.dot_dimension_numbers<[1], [0], [0], [1], [0, 0, 1, 1], [], []>} : vector<32x32xf32>, vector<32x8192xf32>, vector<32x8192xf32> -> vector<32x8192xf32>
    %c0_3 = arith.constant 0 : index
    %c0_4 = arith.constant 0 : index
    %3 = vector.load %arg3[%c0_3, %c0_4] : memref<32x1xf32, #tpu.memory_space<vmem>>, vector<32x1xf32>
    %4 = vector.broadcast %3 : vector<32x1xf32> to vector<32x8192xf32>
    %5 = arith.addf %2, %4 : vector<32x8192xf32>
    %cst_5 = arith.constant 0.000000e+00 : f32
    %6 = vector.broadcast %cst_5 : f32 to vector<32x8192xf32>
    %7 = arith.maximumf %5, %6 : vector<32x8192xf32>
    %8 = vector.extract_strided_slice %7 {offsets = [0, 0], sizes = [32, 2048], strides = [1, 1]} : vector<32x8192xf32> to vector<32x2048xf32>
    %9 = vector.extract_strided_slice %7 {offsets = [0, 2048], sizes = [32, 2048], strides = [1, 1]} : vector<32x8192xf32> to vector<32x2048xf32>
    %10 = arith.maximumf %8, %9 : vector<32x2048xf32>
    %11 = vector.extract_strided_slice %7 {offsets = [0, 4096], sizes = [32, 2048], strides = [1, 1]} : vector<32x8192xf32> to vector<32x2048xf32>
    %12 = vector.extract_strided_slice %7 {offsets = [0, 6144], sizes = [32, 2048], strides = [1, 1]} : vector<32x8192xf32> to vector<32x2048xf32>
    %13 = arith.maximumf %11, %12 : vector<32x2048xf32>
    %14 = arith.maximumf %10, %13 : vector<32x2048xf32>
    %15 = vector.shape_cast %14 : vector<32x2048xf32> to vector<32x8x256xf32>
    %c0_6 = arith.constant 0 : index
    %c0_7 = arith.constant 0 : index
    %c0_8 = arith.constant 0 : index
    %16 = vector.load %arg4[%c0_6, %c0_7, %c0_8] : memref<32x256x64xf32, #tpu.memory_space<vmem>>, vector<32x256x64xf32>
    %cst_9 = arith.constant dense<0.000000e+00> : vector<32x8x64xf32>
    %17 = tpu.matmul %15, %16, %cst_9 {dimension_numbers = #tpu.dot_dimension_numbers<[2], [1], [1], [2], [0, 0, 0, 1, 1, 2], [0], [0]>} : vector<32x8x256xf32>, vector<32x256x64xf32>, vector<32x8x64xf32> -> vector<32x8x64xf32>
    %cst_10 = arith.constant dense<0.000000e+00> : vector<8x64xf32>
    %18 = vector.multi_reduction <add>, %17, %cst_10 [0] : vector<32x8x64xf32> to vector<8x64xf32>
    %c0_11 = arith.constant 0 : index
    %c0_12 = arith.constant 0 : index
    %19 = vector.load %arg5[%c0_11, %c0_12] : memref<1x64xf32, #tpu.memory_space<vmem>>, vector<1x64xf32>
    %20 = vector.broadcast %19 : vector<1x64xf32> to vector<8x64xf32>
    %21 = arith.addf %18, %20 : vector<8x64xf32>
    %cst_13 = arith.constant 0.000000e+00 : f32
    %22 = vector.broadcast %cst_13 : f32 to vector<8x64xf32>
    %23 = arith.maximumf %21, %22 : vector<8x64xf32>
    %c0_14 = arith.constant 0 : index
    %c0_15 = arith.constant 0 : index
    %24 = vector.load %arg6[%c0_14, %c0_15] : memref<64x128xf32, #tpu.memory_space<vmem>>, vector<64x128xf32>
    %cst_16 = arith.constant dense<0.000000e+00> : vector<8x128xf32>
    %25 = tpu.matmul %23, %24, %cst_16 {dimension_numbers = #tpu.dot_dimension_numbers<[1], [0], [0], [1], [0, 0, 1, 1], [], []>} : vector<8x64xf32>, vector<64x128xf32>, vector<8x128xf32> -> vector<8x128xf32>
    %c0_17 = arith.constant 0 : index
    %c0_18 = arith.constant 0 : index
    %26 = vector.load %arg7[%c0_17, %c0_18] : memref<1x128xf32, #tpu.memory_space<vmem>>, vector<1x128xf32>
    %27 = vector.broadcast %26 : vector<1x128xf32> to vector<8x128xf32>
    %28 = arith.addf %25, %27 : vector<8x128xf32>
    %c0_19 = arith.constant 0 : index
    %c0_20 = arith.constant 0 : index
    %29 = vector.load %arg8[%c0_19, %c0_20] : memref<8x128xf32, #tpu.memory_space<vmem>>, vector<8x128xf32>
    tpu.vector_store %arg8[%c0_19, %c0_20], %28 {strides = array<i32>} : memref<8x128xf32, #tpu.memory_space<vmem>>, vector<8x128xf32>,
    return
  }
  func.func @transform_0(%arg0: i32) -> (i32, i32) {
    %c0_i32 = arith.constant 0 : i32
    %c0_i32_0 = arith.constant 0 : i32
    return %c0_i32, %arg0 : i32, i32
  }
  func.func @transform_1(%arg0: i32) -> (i32, i32) {
    %c0_i32 = arith.constant 0 : i32
    %c0_i32_0 = arith.constant 0 : i32
    %c0_i32_1 = arith.constant 0 : i32
    return %c0_i32, %c0_i32_0 : i32, i32
  }
  func.func @transform_2(%arg0: i32) -> (i32, i32) {
    %c0_i32 = arith.constant 0 : i32
    %c0_i32_0 = arith.constant 0 : i32
    %c0_i32_1 = arith.constant 0 : i32
    return %c0_i32, %c0_i32_0 : i32, i32
  }
  func.func @transform_3(%arg0: i32) -> (i32, i32, i32) {
    %c0_i32 = arith.constant 0 : i32
    %c0_i32_0 = arith.constant 0 : i32
    %c0_i32_1 = arith.constant 0 : i32
    %c0_i32_2 = arith.constant 0 : i32
    return %c0_i32, %c0_i32_0, %c0_i32_1 : i32, i32, i32
  }
  func.func @transform_4(%arg0: i32) -> (i32, i32) {
    %c0_i32 = arith.constant 0 : i32
    %c0_i32_0 = arith.constant 0 : i32
    %c0_i32_1 = arith.constant 0 : i32
    return %c0_i32, %c0_i32_0 : i32, i32
  }
  func.func @transform_5(%arg0: i32) -> (i32, i32) {
    %c0_i32 = arith.constant 0 : i32
    %c0_i32_0 = arith.constant 0 : i32
    %c0_i32_1 = arith.constant 0 : i32
    return %c0_i32, %c0_i32_0 : i32, i32
  }
  func.func @transform_6(%arg0: i32) -> (i32, i32) {
    %c0_i32 = arith.constant 0 : i32
    %c0_i32_0 = arith.constant 0 : i32
    %c0_i32_1 = arith.constant 0 : i32
    return %c0_i32, %c0_i32_0 : i32, i32
  }
  func.func @transform_7(%arg0: i32) -> (i32, i32) {
    %c0_i32 = arith.constant 0 : i32
    %c0_i32_0 = arith.constant 0 : i32
    return %arg0, %c0_i32 : i32, i32
  }
}

</mosaic_0001>

<bundles_post_ra>
// kernel: simple_convolutional_network.1
= control target key start
LH: loop header
LB: loop body
LE: loop exit
PB: predicated region body
PF: predicated region fallthrough
CT: control target
= control target key end

     0   :  { %v18024_v3 = vmov 0.0   ;;  %v10725_v8 = vmov 0   ;;  %vm310_vm0 = vcmask 261120   ;;  %vm7971_vm1 = vcmask 523264   ;;  %s18016_s0 = inlined_call_operand.vmem [shape: f32[32,8192], index: 0, kind: input, shape index: {}]   ;;  %s18017_s1 = inlined_call_operand.vmem [shape: f32[32,32], index: 1, kind: input, shape index: {}]   ;;  %s18018_s2 = inlined_call_operand.vmem [shape: f32[32,1], index: 2, kind: input, shape index: {}]   ;;  %s18019_s3 = inlined_call_operand.vmem [shape: f32[32,256,64], index: 3, kind: input, shape index: {}]   ;;  %s18020_s5 = inlined_call_operand.vmem [shape: f32[64,128], index: 5, kind: input, shape index: {}]   ;;  %s18021_s4 = inlined_call_operand.vmem [shape: f32[1,64], index: 4, kind: input, shape index: {}]   ;;  %s18022_s6 = inlined_call_operand.vmem [shape: f32[1,128], index: 6, kind: input, shape index: {}]   ;;  %s18023_s7 = inlined_call_operand.vmem [shape: f32[8,128], index: 7, kind: output, shape index: {}]  }
   0x1   :  { %v31_v0 = vld [vmem:[%s18016_s0 + $0x8] sm:$0xff]  ;;  %v30_v2 = vld [vmem:[%s18016_s0] sm:$0xff]  ;;  %387 = vmatprep.mubr.f32.mxu0 %v18024_v3  ;;  %399 = vmatprep.mubr.f32.mxu1 %v18024_v3  ;;  %v33_v13 = vld [vmem:[%s18016_s0 + $0x18] sm:$0xff]  ;;  %vm10729_vm2 = vmmov 0  }
   0x2   :  { %v95_v1 = vld [vmem:[%s18016_s0 + $0x208] sm:$0xff]  ;;  %v94_v5 = vld [vmem:[%s18016_s0 + $0x200] sm:$0xff]  ;;  %10719 = vset.pattern.permute.xlu1 %v10725_v8  ;;  %10718 = vset.pattern.permute.xlu0 %v10725_v8  ;;  %v97_v14 = vld [vmem:[%s18016_s0 + $0x218] sm:$0xff] }
   0x3   :  { %v9416_v4 = vpack.c.bf16 %v95_v1, %v31_v0  ;;  %v159_v6 = vld [vmem:[%s18016_s0 + $0x408] sm:$0xff]  ;;  %v9418_v9 = vpack.c.bf16 %v94_v5, %v30_v2  ;;  %v158_v11 = vld [vmem:[%s18016_s0 + $0x400] sm:$0xff]  ;;  %v32_v18 = vld [vmem:[%s18016_s0 + $0x10] sm:$0xff]  ;;  %v9424_v19 = vpack.c.bf16 %v97_v14, %v33_v13 }
   0x4   :  { %v223_v7 = vld [vmem:[%s18016_s0 + $0x608] sm:$0xff]  ;;  %v222_v12 = vld [vmem:[%s18016_s0 + $0x600] sm:$0xff]  ;;  %v96_v21 = vld [vmem:[%s18016_s0 + $0x210] sm:$0xff] }
   0x5   :  { %v9420_v10 = vpack.c.bf16 %v223_v7, %v159_v6  ;;  %9417 = vmatprep.subr.bf16.mxu0 %v9416_v4  ;;  %10708 = vmatprep.subr.bf16.mxu1 %v9416_v4  ;;  %v9422_v15 = vpack.c.bf16 %v222_v12, %v158_v11  ;;  %v35_v16 = vld [vmem:[%s18016_s0 + $0x28] sm:$0xff]  ;;  %v34_v22 = vld [vmem:[%s18016_s0 + $0x20] sm:$0xff]  ;;  %v161_v24 = vld [vmem:[%s18016_s0 + $0x418] sm:$0xff]  ;;  %v9426_v30 = vpack.c.bf16 %v96_v21, %v32_v18 }
   0x6   :  { %9419 = vmatpush1.bf16.msra.mxu0 %v9418_v9  ;;  %10710 = vmatpush1.bf16.msra.mxu1 %v9418_v9  ;;  %v99_v17 = vld [vmem:[%s18016_s0 + $0x228] sm:$0xff]  ;;  %v98_v23 = vld [vmem:[%s18016_s0 + $0x220] sm:$0xff]  ;;  %v225_v25 = vld [vmem:[%s18016_s0 + $0x618] sm:$0xff] }
   0x7   :  { %9421 = vmatprep.subr.bf16.mxu0 %v9420_v10  ;;  %10709 = vmatprep.subr.bf16.mxu1 %v9420_v10  ;;  %v9432_v20 = vpack.c.bf16 %v99_v17, %v35_v16  ;;  %v163_v26 = vld [vmem:[%s18016_s0 + $0x428] sm:$0xff]  ;;  %v10835_v28 = vld [vmem:[%s18017_s1] sm:$0xff]  ;;  %v10840_v29 = vld [vmem:[%s18017_s1 + $0x10] sm:$0xff]  ;;  %v9434_v31 = vpack.c.bf16 %v98_v23, %v34_v22  ;;  %v9428_v36 = vpack.c.bf16 %v225_v25, %v161_v24 }
   0x8   :  { %v227_v27 = vld [vmem:[%s18016_s0 + $0x628] sm:$0xff]  ;;  %v160_v32 = vld [vmem:[%s18016_s0 + $0x410] sm:$0xff]  ;;  %v162_v34 = vld [vmem:[%s18016_s0 + $0x420] sm:$0xff] }
   0x9   :  { %v224_v33 = vld [vmem:[%s18016_s0 + $0x610] sm:$0xff]  ;;  %v226_v35 = vld [vmem:[%s18016_s0 + $0x620] sm:$0xff]  ;;  %v9436_v37 = vpack.c.bf16 %v227_v27, %v163_v26  ;;  %v37_v38 = vld [vmem:[%s18016_s0 + $0x38] sm:$0xff] }
   0xa   :  { %9423 = vmatpush1.bf16.msra.mxu0 %v9422_v15  ;;  %10711 = vmatpush1.bf16.msra.mxu1 %v9422_v15  ;;  %v101_v39 = vld [vmem:[%s18016_s0 + $0x238] sm:$0xff]  ;;  %v39_v40 = vld [vmem:[%s18016_s0 + $0x48] sm:$0xff]  ;;  %v9430_v44 = vpack.c.bf16 %v224_v33, %v160_v32  ;;  %v9438_v45 = vpack.c.bf16 %v226_v35, %v162_v34  ;;  %v36_v46 = vld [vmem:[%s18016_s0 + $0x30] sm:$0xff] }
   0xb   :  { %9425 = vmatprep.subr.bf16.mxu1 %v9424_v19  ;;  %9433 = vmatprep.subr.bf16.mxu0 %v9432_v20  ;;  %v103_v41 = vld [vmem:[%s18016_s0 + $0x248] sm:$0xff]  ;;  %v10878_v43 = vld [vmem:[%s18017_s1 + $0x18] sm:$0xff]  ;;  %v100_v47 = vld [vmem:[%s18016_s0 + $0x230] sm:$0xff]  ;;  %v9440_v48 = vpack.c.bf16 %v101_v39, %v37_v38 }
   0xc   :  { %v10873_v42 = vld [vmem:[%s18017_s1 + $0x8] sm:$0xff]  ;;  %v165_v49 = vld [vmem:[%s18016_s0 + $0x438] sm:$0xff]  ;;  %v9448_v51 = vpack.c.bf16 %v103_v41, %v39_v40  ;;  %v38_v52 = vld [vmem:[%s18016_s0 + $0x40] sm:$0xff]  ;;  %v9442_v54 = vpack.c.bf16 %v100_v47, %v36_v46 }
   0xd   :  { %8137 = vmatmul.mubr.msk.f32.vlgmr.msra.gmra.mrb[0].mxu0 %vm310_vm0, %v10835_v28  ;;  %8139 = vmatmul.mubr.msk.f32.vlgmr.msra.gmra.mrb[0].mxu1 %vm310_vm0, %v10840_v29  ;;  %v229_v50 = vld [vmem:[%s18016_s0 + $0x638] sm:$0xff]  ;;  %v102_v53 = vld [vmem:[%s18016_s0 + $0x240] sm:$0xff]  ;;  %v164_v56 = vld [vmem:[%s18016_s0 + $0x430] sm:$0xff] }
   0xe   :  { %9427 = vmatpush1.bf16.msra.mxu1 %v9426_v30  ;;  %9435 = vmatpush1.bf16.msra.mxu0 %v9434_v31  ;;  %v9444_v55 = vpack.c.bf16 %v229_v50, %v165_v49  ;;  %v228_v57 = vld [vmem:[%s18016_s0 + $0x630] sm:$0xff]  ;;  %v9450_v58 = vpack.c.bf16 %v102_v53, %v38_v52  ;;  %v167_v59 = vld [vmem:[%s18016_s0 + $0x448] sm:$0xff]  ;;  %v166_v61 = vld [vmem:[%s18016_s0 + $0x440] sm:$0xff] }
   0xf   :  { %393 = vmatprep.mubr.f32.mxu0 %v18024_v3  ;;  %405 = vmatprep.mubr.f32.mxu1 %v18024_v3  ;;  %v231_v60 = vld [vmem:[%s18016_s0 + $0x648] sm:$0xff]  ;;  %v230_v62 = vld [vmem:[%s18016_s0 + $0x640] sm:$0xff]  ;;  %v41_v63 = vld [vmem:[%s18016_s0 + $0x58] sm:$0xff]  ;;  %v9446_v1 = vpack.c.bf16 %v228_v57, %v164_v56 }
  0x10   :  { %9429 = vmatprep.subr.bf16.mxu1 %v9428_v36  ;;  %9437 = vmatprep.subr.bf16.mxu0 %v9436_v37  ;;  %v105_v0 = vld [vmem:[%s18016_s0 + $0x258] sm:$0xff]  ;;  %v9452_v2 = vpack.c.bf16 %v231_v60, %v167_v59  ;;  %v9454_v4 = vpack.c.bf16 %v230_v62, %v166_v61  ;;  %v43_v6 = vld [vmem:[%s18016_s0 + $0x68] sm:$0xff]  ;;  %v40_v9 = vld [vmem:[%s18016_s0 + $0x50] sm:$0xff] }
  0x11   :  { %8138 = vmatmul.mubr.msk.f32.gmra.mrb[2].mxu0 %vm310_vm0, %v10873_v42  ;;  %8140 = vmatmul.mubr.msk.f32.gmra.mrb[2].mxu1 %vm310_vm0, %v10878_v43  ;;  %v9456_v5 = vpack.c.bf16 %v105_v0, %v41_v63  ;;  %v107_v7 = vld [vmem:[%s18016_s0 + $0x268] sm:$0xff]  ;;  %v104_v10 = vld [vmem:[%s18016_s0 + $0x250] sm:$0xff]  ;;  %v169_v11 = vld [vmem:[%s18016_s0 + $0x458] sm:$0xff] }
  0x12   :  { %9431 = vmatpush1.bf16.msra.mxu1 %v9430_v44  ;;  %9439 = vmatpush1.bf16.msra.mxu0 %v9438_v45  ;;  %v9464_v8 = vpack.c.bf16 %v107_v7, %v43_v6  ;;  %v233_v12 = vld [vmem:[%s18016_s0 + $0x658] sm:$0xff]  ;;  %v42_v13 = vld [vmem:[%s18016_s0 + $0x60] sm:$0xff]  ;;  %v9458_v15 = vpack.c.bf16 %v104_v10, %v40_v9  ;;  %v168_v17 = vld [vmem:[%s18016_s0 + $0x450] sm:$0xff] }
  0x13   :  { %476 = vmatprep.mubr.f32.mxu1 %v18024_v3  ;;  %565 = vmatprep.mubr.f32.mxu0 %v18024_v3  ;;  %v106_v14 = vld [vmem:[%s18016_s0 + $0x260] sm:$0xff]  ;;  %v9460_v16 = vpack.c.bf16 %v233_v12, %v169_v11  ;;  %v232_v18 = vld [vmem:[%s18016_s0 + $0x650] sm:$0xff]  ;;  %v171_v19 = vld [vmem:[%s18016_s0 + $0x468] sm:$0xff] }
  0x14   :  { %9441 = vmatprep.subr.bf16.mxu1 %v9440_v48  ;;  %9449 = vmatprep.subr.bf16.mxu0 %v9448_v51  ;;  %v9466_v20 = vpack.c.bf16 %v106_v14, %v42_v13  ;;  %v235_v21 = vld [vmem:[%s18016_s0 + $0x668] sm:$0xff]  ;;  %v170_v22 = vld [vmem:[%s18016_s0 + $0x460] sm:$0xff]  ;;  %v45_v24 = vld [vmem:[%s18016_s0 + $0x78] sm:$0xff]  ;;  %v9462_v27 = vpack.c.bf16 %v232_v18, %v168_v17 }
  0x15   :  { %8141 = vmatmul.mubr.msk.f32.vlgmr.msra.gmra.mrb[4].mxu1 %vm310_vm0, %v10835_v28  ;;  %8145 = vmatmul.mubr.msk.f32.vlgmr.msra.gmra.mrb[4].mxu0 %vm310_vm0, %v10835_v28  ;;  %v234_v23 = vld [vmem:[%s18016_s0 + $0x660] sm:$0xff]  ;;  %v109_v25 = vld [vmem:[%s18016_s0 + $0x278] sm:$0xff]  ;;  %v288_v26 = vld [vmem:[%s18018_s2 + $0x10] sm:$0xff]  ;;  %v9468_v30 = vpack.c.bf16 %v235_v21, %v171_v19 }
  0x16   :  { %9443 = vmatpush1.bf16.msra.mxu1 %v9442_v54  ;;  %482 = vmatprep.mubr.f32.mxu1 %v18024_v3  ;;  %v9470_v31 = vpack.c.bf16 %v234_v23, %v170_v22  ;;  %v9472_v32 = vpack.c.bf16 %v109_v25, %v45_v24  ;;  %v47_v33 = vld [vmem:[%s18016_s0 + $0x88] sm:$0xff]  ;;  %v289_v36 = vld [vmem:[%s18018_s2 + $0x18] sm:$0xff]  ;;  %v286_v37 = vld [vmem:[%s18018_s2] sm:$0xff] }
  0x17   :  { %571 = vmatprep.mubr.f32.mxu0 %v18024_v3  ;;  %9445 = vmatprep.subr.bf16.mxu1 %v9444_v55  ;;  %v111_v34 = vld [vmem:[%s18016_s0 + $0x288] sm:$0xff]  ;;  %v44_v38 = vld [vmem:[%s18016_s0 + $0x70] sm:$0xff]  ;;  %v173_v40 = vld [vmem:[%s18016_s0 + $0x478] sm:$0xff] }
  0x18   :  { %9451 = vmatpush1.bf16.msra.mxu0 %v9450_v58  ;;  %302 = vperm.xlu1 %10719, %v288_v26   ;;  %v9480_v35 = vpack.c.bf16 %v111_v34, %v47_v33  ;;  %v108_v39 = vld [vmem:[%s18016_s0 + $0x270] sm:$0xff]  ;;  %v237_v41 = vld [vmem:[%s18016_s0 + $0x678] sm:$0xff]  ;;  %v46_v44 = vld [vmem:[%s18016_s0 + $0x80] sm:$0xff] }
  0x19   :  { %8142 = vmatmul.mubr.msk.f32.gmra.mrb[6].mxu1 %vm310_vm0, %v10873_v42  ;;  %8146 = vmatmul.mubr.msk.f32.gmra.mrb[6].mxu0 %vm310_vm0, %v10873_v42  ;;  %v110_v45 = vld [vmem:[%s18016_s0 + $0x280] sm:$0xff]  ;;  %v287_v46 = vld [vmem:[%s18018_s2 + $0x8] sm:$0xff]  ;;  %v9474_v47 = vpack.c.bf16 %v108_v39, %v44_v38  ;;  %v9476_v48 = vpack.c.bf16 %v237_v41, %v173_v40  ;;  %v172_v49 = vld [vmem:[%s18016_s0 + $0x470] sm:$0xff] }
  0x1a   :  { %488 = vmatprep.mubr.f32.mxu1 %v18024_v3  ;;  %577 = vmatprep.mubr.f32.mxu0 %v18024_v3  ;;  %v236_v50 = vld [vmem:[%s18016_s0 + $0x670] sm:$0xff]  ;;  %v9482_v51 = vpack.c.bf16 %v110_v45, %v46_v44  ;;  %v175_v52 = vld [vmem:[%s18016_s0 + $0x488] sm:$0xff]  ;;  %v174_v54 = vld [vmem:[%s18016_s0 + $0x480] sm:$0xff] }
  0x1b   :  { %9447 = vmatpush1.bf16.msra.mxu1 %v9446_v1  ;;  %9453 = vmatprep.subr.bf16.mxu0 %v9452_v2  ;;  %v239_v53 = vld [vmem:[%s18016_s0 + $0x688] sm:$0xff]  ;;  %v238_v55 = vld [vmem:[%s18016_s0 + $0x680] sm:$0xff]  ;;  %v49_v56 = vld [vmem:[%s18016_s0 + $0x98] sm:$0xff]  ;;  %v9478_v58 = vpack.c.bf16 %v236_v50, %v172_v49 }
  0x1c   :  { %9455 = vmatpush1.bf16.msra.mxu0 %v9454_v4  ;;  %9457 = vmatprep.subr.bf16.mxu1 %v9456_v5  ;;  %v113_v57 = vld [vmem:[%s18016_s0 + $0x298] sm:$0xff]  ;;  %v9484_v59 = vpack.c.bf16 %v239_v53, %v175_v52  ;;  %v9486_v60 = vpack.c.bf16 %v238_v55, %v174_v54  ;;  %v51_v62 = vld [vmem:[%s18016_s0 + $0xa8] sm:$0xff]  ;;  %v48_v1 = vld [vmem:[%s18016_s0 + $0x90] sm:$0xff] }
  0x1d   :  { %8143 = vmatmul.mubr.msk.f32.gmra.mrb[8].mxu1 %vm310_vm0, %v10840_v29  ;;  %8147 = vmatmul.mubr.msk.f32.gmra.mrb[8].mxu0 %vm310_vm0, %v10840_v29  ;;  %v9488_v61 = vpack.c.bf16 %v113_v57, %v49_v56  ;;  %v115_v63 = vld [vmem:[%s18016_s0 + $0x2a8] sm:$0xff]  ;;  %v112_v2 = vld [vmem:[%s18016_s0 + $0x290] sm:$0xff]  ;;  %v177_v4 = vld [vmem:[%s18016_s0 + $0x498] sm:$0xff] }
  0x1e   :  { %494 = vmatprep.mubr.f32.mxu1 %v18024_v3  ;;  %583 = vmatprep.mubr.f32.mxu0 %v18024_v3  ;;  %v9496_v0 = vpack.c.bf16 %v115_v63, %v51_v62  ;;  %v241_v5 = vld [vmem:[%s18016_s0 + $0x698] sm:$0xff]  ;;  %v50_v6 = vld [vmem:[%s18016_s0 + $0xa0] sm:$0xff]  ;;  %v176_v10 = vld [vmem:[%s18016_s0 + $0x490] sm:$0xff] }
  0x1f   :  { %9465 = vmatprep.subr.bf16.mxu0 %v9464_v8  ;;  %307 = vperm.xlu1 %10719, %v289_v36   ;;  %v114_v7 = vld [vmem:[%s18016_s0 + $0x2a0] sm:$0xff]  ;;  %v9490_v8 = vpack.c.bf16 %v112_v2, %v48_v1  ;;  %v9492_v9 = vpack.c.bf16 %v241_v5, %v177_v4  ;;  %v240_v11 = vld [vmem:[%s18016_s0 + $0x690] sm:$0xff]  ;;  %v179_v13 = vld [vmem:[%s18016_s0 + $0x4a8] sm:$0xff] }
  0x20   :  { %292 = vperm.xlu0 %10718, %v286_v37   ;;  %v9498_v12 = vpack.c.bf16 %v114_v7, %v50_v6  ;;  %v243_v14 = vld [vmem:[%s18016_s0 + $0x6a8] sm:$0xff]  ;;  %v53_v17 = vld [vmem:[%s18016_s0 + $0xb8] sm:$0xff]  ;;  %v9494_v19 = vpack.c.bf16 %v240_v11, %v176_v10  ;;  %v52_v26 = vld [vmem:[%s18016_s0 + $0xb0] sm:$0xff] }
  0x21   :  { %8144 = vmatmul.mubr.msk.f32.gmra.mrb[10].mxu1 %vm310_vm0, %v10878_v43  ;;  %8148 = vmatmul.mubr.msk.f32.gmra.mrb[10].mxu0 %vm310_vm0, %v10878_v43  ;;  %v117_v18 = vld [vmem:[%s18016_s0 + $0x2b8] sm:$0xff]  ;;  %v55_v23 = vld [vmem:[%s18016_s0 + $0xc8] sm:$0xff]  ;;  %v118_v33 = vld [vmem:[%s18016_s0 + $0x2c0] sm:$0xff] }
  0x22   :  { %654 = vmatprep.mubr.f32.mxu1 %v18024_v3  ;;  %743 = vmatprep.mubr.f32.mxu0 %v18024_v3  ;;  %v9504_v22 = vpack.c.bf16 %v117_v18, %v53_v17  ;;  %v119_v24 = vld [vmem:[%s18016_s0 + $0x2c8] sm:$0xff]  ;;  %v180_v36 = vld [vmem:[%s18016_s0 + $0x4b0] sm:$0xff]  ;;  %v182_v41 = vld [vmem:[%s18016_s0 + $0x4c0] sm:$0xff] }
  0x23   :  { %v9512_v25 = vpack.c.bf16 %v119_v24, %v55_v23  ;;  %v244_v37 = vld [vmem:[%s18016_s0 + $0x6b0] sm:$0xff]  ;;  %v183_v39 = vld [vmem:[%s18016_s0 + $0x4c8] sm:$0xff]  ;;  %v246_v44 = vld [vmem:[%s18016_s0 + $0x6c0] sm:$0xff] }
  0x24   :  { %297 = vperm.xlu0 %10718, %v287_v46   ;;  %v247_v40 = vld [vmem:[%s18016_s0 + $0x6c8] sm:$0xff]  ;;  %v57_v45 = vld [vmem:[%s18016_s0 + $0xd8] sm:$0xff]  ;;  %v9518_v49 = vpack.c.bf16 %v246_v44, %v182_v41  ;;  %v56_v54 = vld [vmem:[%s18016_s0 + $0xd0] sm:$0xff] }
  0x25   :  { %8149 = vmatmul.mubr.msk.f32.vlgmr.msra.gmra.mrb[12].mxu1 %vm310_vm0, %v10835_v28  ;;  %8153 = vmatmul.mubr.msk.f32.vlgmr.msra.gmra.mrb[12].mxu0 %vm310_vm0, %v10835_v28  ;;  %v121_v46 = vld [vmem:[%s18016_s0 + $0x2d8] sm:$0xff]  ;;  %v123_v52 = vld [vmem:[%s18016_s0 + $0x2e8] sm:$0xff]  ;;  %v120_v55 = vld [vmem:[%s18016_s0 + $0x2d0] sm:$0xff] }
  0x26   :  { %9459 = vmatpush1.bf16.msra.mxu1 %v9458_v15  ;;  %660 = vmatprep.mubr.f32.mxu1 %v18024_v3  ;;  %v178_v15 = vld [vmem:[%s18016_s0 + $0x4a0] sm:$0xff]  ;;  %v9520_v50 = vpack.c.bf16 %v121_v46, %v57_v45  ;;  %v185_v56 = vld [vmem:[%s18016_s0 + $0x4d8] sm:$0xff]  ;;  %v184_v62 = vld [vmem:[%s18016_s0 + $0x4d0] sm:$0xff] }
  0x27   :  { %749 = vmatprep.mubr.f32.mxu0 %v18024_v3  ;;  %9461 = vmatprep.subr.bf16.mxu1 %v9460_v16  ;;  %v242_v16 = vld [vmem:[%s18016_s0 + $0x6a0] sm:$0xff]  ;;  %v249_v57 = vld [vmem:[%s18016_s0 + $0x6d8] sm:$0xff]  ;;  %v248_v63 = vld [vmem:[%s18016_s0 + $0x6d0] sm:$0xff] }
  0x28   :  { %9467 = vmatpush1.bf16.msra.mxu0 %v9466_v20  ;;  %v9500_v20 = vpack.c.bf16 %v243_v14, %v179_v13  ;;  %v9502_v21 = vpack.c.bf16 %v242_v16, %v178_v15  ;;  %v187_v1 = vld [vmem:[%s18016_s0 + $0x4e8] sm:$0xff]  ;;  %v186_v4 = vld [vmem:[%s18016_s0 + $0x4e0] sm:$0xff]  ;;  %v61_v6 = vld [vmem:[%s18016_s0 + $0xf8] sm:$0xff] }
  0x29   :  { %8150 = vmatmul.mubr.msk.f32.gmra.mrb[14].mxu1 %vm310_vm0, %v10873_v42  ;;  %8154 = vmatmul.mubr.msk.f32.gmra.mrb[14].mxu0 %vm310_vm0, %v10873_v42  ;;  %v251_v2 = vld [vmem:[%s18016_s0 + $0x6e8] sm:$0xff]  ;;  %v250_v5 = vld [vmem:[%s18016_s0 + $0x6e0] sm:$0xff]  ;;  %v125_v7 = vld [vmem:[%s18016_s0 + $0x2f8] sm:$0xff] }
  0x2a   :  { %666 = vmatprep.mubr.f32.mxu1 %v18024_v3  ;;  %755 = vmatprep.mubr.f32.mxu0 %v18024_v3  ;;  %v9534_v10 = vpack.c.bf16 %v250_v5, %v186_v4  ;;  %v9536_v11 = vpack.c.bf16 %v125_v7, %v61_v6  ;;  %v127_v13 = vld [vmem:[%s18016_s0 + $0x308] sm:$0xff]  ;;  %v60_v15 = vld [vmem:[%s18016_s0 + $0xf0] sm:$0xff]  ;;  %v189_v17 = vld [vmem:[%s18016_s0 + $0x4f8] sm:$0xff] }
  0x2b   :  { %9463 = vmatpush1.bf16.msra.mxu1 %v9462_v27  ;;  %9469 = vmatprep.subr.bf16.mxu0 %v9468_v30  ;;  %v116_v27 = vld [vmem:[%s18016_s0 + $0x2b0] sm:$0xff]  ;;  %v181_v30 = vld [vmem:[%s18016_s0 + $0x4b8] sm:$0xff] }
  0x2c   :  { %9471 = vmatpush1.bf16.msra.mxu0 %v9470_v31  ;;  %9473 = vmatprep.subr.bf16.mxu1 %v9472_v32  ;;  %v245_v31 = vld [vmem:[%s18016_s0 + $0x6b8] sm:$0xff]  ;;  %v54_v32 = vld [vmem:[%s18016_s0 + $0xc0] sm:$0xff]  ;;  %v9506_v34 = vpack.c.bf16 %v116_v27, %v52_v26  ;;  %v124_v16 = vld [vmem:[%s18016_s0 + $0x2f0] sm:$0xff] }
  0x2d   :  { %8151 = vmatmul.mubr.msk.f32.gmra.mrb[16].mxu1 %vm310_vm0, %v10840_v29  ;;  %8155 = vmatmul.mubr.msk.f32.gmra.mrb[16].mxu0 %vm310_vm0, %v10840_v29  ;;  %v9514_v38 = vpack.c.bf16 %v118_v33, %v54_v32  ;;  %v253_v18 = vld [vmem:[%s18016_s0 + $0x6f8] sm:$0xff]  ;;  %v188_v23 = vld [vmem:[%s18016_s0 + $0x4f0] sm:$0xff]  ;;  %v191_v26 = vld [vmem:[%s18016_s0 + $0x508] sm:$0xff] }
  0x2e   :  { %672 = vmatprep.mubr.f32.mxu1 %v18024_v3  ;;  %761 = vmatprep.mubr.f32.mxu0 %v18024_v3  ;;  %v252_v24 = vld [vmem:[%s18016_s0 + $0x6f0] sm:$0xff]  ;;  %v255_v27 = vld [vmem:[%s18016_s0 + $0x708] sm:$0xff]  ;;  %v65_v32 = vld [vmem:[%s18016_s0 + $0x118] sm:$0xff] }
  0x2f   :  { %9481 = vmatprep.subr.bf16.mxu0 %v9480_v35  ;;  %v9508_v35 = vpack.c.bf16 %v245_v31, %v181_v30  ;;  %v190_v30 = vld [vmem:[%s18016_s0 + $0x500] sm:$0xff]  ;;  %v129_v33 = vld [vmem:[%s18016_s0 + $0x318] sm:$0xff]  ;;  %v64_v41 = vld [vmem:[%s18016_s0 + $0x110] sm:$0xff] }
  0x30   :  { %v254_v31 = vld [vmem:[%s18016_s0 + $0x700] sm:$0xff]  ;;  %v128_v44 = vld [vmem:[%s18016_s0 + $0x310] sm:$0xff]  ;;  %v193_v45 = vld [vmem:[%s18016_s0 + $0x518] sm:$0xff] }
  0x31   :  { %8152 = vmatmul.mubr.msk.f32.gmra.mrb[18].mxu1 %vm310_vm0, %v10878_v43  ;;  %8156 = vmatmul.mubr.msk.f32.gmra.mrb[18].mxu0 %vm310_vm0, %v10878_v43  ;;  %v257_v46 = vld [vmem:[%s18016_s0 + $0x718] sm:$0xff]  ;;  %v68_v4 = vld [vmem:[%s18016_s0 + $0x130] sm:$0xff] }
  0x32   :  { %832 = vmatprep.mubr.f32.mxu1 %v18024_v3  ;;  %921 = vmatprep.mubr.f32.mxu0 %v18024_v3  ;;  %v132_v5 = vld [vmem:[%s18016_s0 + $0x330] sm:$0xff]  ;;  %v197_v6 = vld [vmem:[%s18016_s0 + $0x538] sm:$0xff] }
  0x33   :  { %v261_v7 = vld [vmem:[%s18016_s0 + $0x738] sm:$0xff] }
  0x35   :  { %8157 = vmatmul.mubr.msk.f32.vlgmr.msra.gmra.mrb[20].mxu1 %vm310_vm0, %v10835_v28  ;;  %8161 = vmatmul.mubr.msk.f32.vlgmr.msra.gmra.mrb[20].mxu0 %vm310_vm0, %v10835_v28 }
  0x36   :  { %9475 = vmatpush1.bf16.msra.mxu1 %v9474_v47  ;;  %838 = vmatprep.mubr.f32.mxu1 %v18024_v3  ;;  %v9510_v47 = vpack.c.bf16 %v244_v37, %v180_v36  ;;  %v9550_v36 = vpack.c.bf16 %v254_v31, %v190_v30  ;;  %v9552_v37 = vpack.c.bf16 %v129_v33, %v65_v32  ;;  %v72_v30 = vld [vmem:[%s18016_s0 + $0x150] sm:$0xff]  ;;  %v201_v32 = vld [vmem:[%s18016_s0 + $0x558] sm:$0xff]  ;;  %v74_v33 = vld [vmem:[%s18016_s0 + $0x160] sm:$0xff] }
  0x37   :  { %927 = vmatprep.mubr.f32.mxu0 %v18024_v3  ;;  %9477 = vmatprep.subr.bf16.mxu1 %v9476_v48  ;;  %v9516_v48 = vpack.c.bf16 %v247_v40, %v183_v39  ;;  %v131_v39 = vld [vmem:[%s18016_s0 + $0x328] sm:$0xff]  ;;  %v136_v31 = vld [vmem:[%s18016_s0 + $0x350] sm:$0xff] }
  0x38   :  { %9483 = vmatpush1.bf16.msra.mxu0 %v9482_v51  ;;  %v59_v51 = vld [vmem:[%s18016_s0 + $0xe8] sm:$0xff] }
  0x39   :  { %8158 = vmatmul.mubr.msk.f32.gmra.mrb[22].mxu1 %vm310_vm0, %v10873_v42  ;;  %8162 = vmatmul.mubr.msk.f32.gmra.mrb[22].mxu0 %vm310_vm0, %v10873_v42  ;;  %v9528_v53 = vpack.c.bf16 %v123_v52, %v59_v51  ;;  %v192_v51 = vld [vmem:[%s18016_s0 + $0x510] sm:$0xff] }
  0x3a   :  { %844 = vmatprep.mubr.f32.mxu1 %v18024_v3  ;;  %933 = vmatprep.mubr.f32.mxu0 %v18024_v3  ;;  %v256_v52 = vld [vmem:[%s18016_s0 + $0x710] sm:$0xff] }
  0x3b   :  { %9479 = vmatpush1.bf16.msra.mxu1 %v9478_v58  ;;  %9485 = vmatprep.subr.bf16.mxu0 %v9484_v59  ;;  %v58_v58 = vld [vmem:[%s18016_s0 + $0xe0] sm:$0xff] }
  0x3c   :  { %9487 = vmatpush1.bf16.msra.mxu0 %v9486_v60  ;;  %9489 = vmatprep.subr.bf16.mxu1 %v9488_v61  ;;  %v122_v59 = vld [vmem:[%s18016_s0 + $0x2e0] sm:$0xff]  ;;  %v9522_v60 = vpack.c.bf16 %v120_v55, %v56_v54  ;;  %v9524_v61 = vpack.c.bf16 %v249_v57, %v185_v56  ;;  %v195_v54 = vld [vmem:[%s18016_s0 + $0x528] sm:$0xff] }
  0x3d   :  { %8159 = vmatmul.mubr.msk.f32.gmra.mrb[24].mxu1 %vm310_vm0, %v10840_v29  ;;  %8163 = vmatmul.mubr.msk.f32.gmra.mrb[24].mxu0 %vm310_vm0, %v10840_v29  ;;  %v259_v55 = vld [vmem:[%s18016_s0 + $0x728] sm:$0xff]  ;;  %v194_v56 = vld [vmem:[%s18016_s0 + $0x520] sm:$0xff] }
  0x3e   :  { %850 = vmatprep.mubr.f32.mxu1 %v18024_v3  ;;  %939 = vmatprep.mubr.f32.mxu0 %v18024_v3  ;;  %v258_v57 = vld [vmem:[%s18016_s0 + $0x720] sm:$0xff] }
  0x3f   :  { %9497 = vmatprep.subr.bf16.mxu0 %v9496_v0  ;;  %v9530_v0 = vpack.c.bf16 %v122_v59, %v58_v58  ;;  %v69_v58 = vld [vmem:[%s18016_s0 + $0x138] sm:$0xff] }
  0x40   :  { %v133_v59 = vld [vmem:[%s18016_s0 + $0x338] sm:$0xff] }
  0x41   :  { %8160 = vmatmul.mubr.msk.f32.gmra.mrb[26].mxu1 %vm310_vm0, %v10878_v43  ;;  %8164 = vmatmul.mubr.msk.f32.gmra.mrb[26].mxu0 %vm310_vm0, %v10878_v43 }
  0x42   :  { %1010 = vmatprep.mubr.f32.mxu1 %v18024_v3  ;;  %1099 = vmatprep.mubr.f32.mxu0 %v18024_v3 }
  0x45   :  { %8165 = vmatmul.mubr.msk.f32.vlgmr.msra.gmra.mrb[28].mxu1 %vm310_vm0, %v10835_v28  ;;  %8169 = vmatmul.mubr.msk.f32.vlgmr.msra.gmra.mrb[28].mxu0 %vm310_vm0, %v10835_v28 }
  0x46   :  { %9491 = vmatpush1.bf16.msra.mxu1 %v9490_v8  ;;  %1016 = vmatprep.mubr.f32.mxu1 %v18024_v3  ;;  %v9526_v8 = vpack.c.bf16 %v248_v63, %v184_v62  ;;  %v9566_v62 = vpack.c.bf16 %v258_v57, %v194_v56  ;;  %v9568_v63 = vpack.c.bf16 %v133_v59, %v69_v58  ;;  %v205_v56 = vld [vmem:[%s18016_s0 + $0x578] sm:$0xff]  ;;  %v78_v58 = vld [vmem:[%s18016_s0 + $0x180] sm:$0xff] }
  0x47   :  { %1105 = vmatprep.mubr.f32.mxu0 %v18024_v3  ;;  %9493 = vmatprep.subr.bf16.mxu1 %v9492_v9  ;;  %v9532_v9 = vpack.c.bf16 %v251_v2, %v187_v1  ;;  %v135_v1 = vld [vmem:[%s18016_s0 + $0x348] sm:$0xff]  ;;  %v269_v57 = vld [vmem:[%s18016_s0 + $0x778] sm:$0xff]  ;;  %v142_v59 = vld [vmem:[%s18016_s0 + $0x380] sm:$0xff] }
  0x48   :  { %9499 = vmatpush1.bf16.msra.mxu0 %v9498_v12  ;;  %v63_v12 = vld [vmem:[%s18016_s0 + $0x108] sm:$0xff] }
  0x49   :  { %8166 = vmatmul.mubr.msk.f32.gmra.mrb[30].mxu1 %vm310_vm0, %v10873_v42  ;;  %8170 = vmatmul.mubr.msk.f32.gmra.mrb[30].mxu0 %vm310_vm0, %v10873_v42  ;;  %v9544_v14 = vpack.c.bf16 %v127_v13, %v63_v12  ;;  %v196_v12 = vld [vmem:[%s18016_s0 + $0x530] sm:$0xff] }
  0x4a   :  { %1022 = vmatprep.mubr.f32.mxu1 %v18024_v3  ;;  %1111 = vmatprep.mubr.f32.mxu0 %v18024_v3  ;;  %v260_v13 = vld [vmem:[%s18016_s0 + $0x730] sm:$0xff] }
  0x4b   :  { %9495 = vmatpush1.bf16.msra.mxu1 %v9494_v19  ;;  %9501 = vmatprep.subr.bf16.mxu0 %v9500_v20  ;;  %v62_v19 = vld [vmem:[%s18016_s0 + $0x100] sm:$0xff] }
  0x4c   :  { %9503 = vmatpush1.bf16.msra.mxu0 %v9502_v21  ;;  %9505 = vmatprep.subr.bf16.mxu1 %v9504_v22  ;;  %v126_v20 = vld [vmem:[%s18016_s0 + $0x300] sm:$0xff]  ;;  %v9538_v21 = vpack.c.bf16 %v124_v16, %v60_v15  ;;  %v9540_v22 = vpack.c.bf16 %v253_v18, %v189_v17  ;;  %v199_v15 = vld [vmem:[%s18016_s0 + $0x548] sm:$0xff] }
  0x4d   :  { %8167 = vmatmul.mubr.msk.f32.gmra.mrb[32].mxu1 %vm310_vm0, %v10840_v29  ;;  %8171 = vmatmul.mubr.msk.f32.gmra.mrb[32].mxu0 %vm310_vm0, %v10840_v29  ;;  %v263_v16 = vld [vmem:[%s18016_s0 + $0x748] sm:$0xff]  ;;  %v198_v17 = vld [vmem:[%s18016_s0 + $0x540] sm:$0xff] }
  0x4e   :  { %1028 = vmatprep.mubr.f32.mxu1 %v18024_v3  ;;  %1117 = vmatprep.mubr.f32.mxu0 %v18024_v3  ;;  %v262_v18 = vld [vmem:[%s18016_s0 + $0x740] sm:$0xff] }
  0x4f   :  { %9513 = vmatprep.subr.bf16.mxu0 %v9512_v25  ;;  %v9546_v25 = vpack.c.bf16 %v126_v20, %v62_v19  ;;  %v73_v19 = vld [vmem:[%s18016_s0 + $0x158] sm:$0xff] }
  0x50   :  { %v137_v20 = vld [vmem:[%s18016_s0 + $0x358] sm:$0xff] }
  0x51   :  { %8168 = vmatmul.mubr.msk.f32.gmra.mrb[34].mxu1 %vm310_vm0, %v10878_v43  ;;  %8172 = vmatmul.mubr.msk.f32.gmra.mrb[34].mxu0 %vm310_vm0, %v10878_v43 }
  0x52   :  { %1188 = vmatprep.mubr.f32.mxu1 %v18024_v3  ;;  %1277 = vmatprep.mubr.f32.mxu0 %v18024_v3 }
  0x55   :  { %8173 = vmatmul.mubr.msk.f32.vlgmr.msra.gmra.mrb[36].mxu1 %vm310_vm0, %v10835_v28  ;;  %8177 = vmatmul.mubr.msk.f32.vlgmr.msra.gmra.mrb[36].mxu0 %vm310_vm0, %v10835_v28 }
  0x56   :  { %9507 = vmatpush1.bf16.msra.mxu1 %v9506_v34  ;;  %1194 = vmatprep.mubr.f32.mxu1 %v18024_v3  ;;  %v9542_v34 = vpack.c.bf16 %v252_v24, %v188_v23  ;;  %v9582_v23 = vpack.c.bf16 %v262_v18, %v198_v17  ;;  %v9584_v24 = vpack.c.bf16 %v137_v20, %v73_v19  ;;  %v144_v17 = vld [vmem:[%s18016_s0 + $0x390] sm:$0xff]  ;;  %v209_v18 = vld [vmem:[%s18016_s0 + $0x598] sm:$0xff] }
  0x57   :  { %1283 = vmatprep.mubr.f32.mxu0 %v18024_v3  ;;  %9509 = vmatprep.subr.bf16.mxu1 %v9508_v35  ;;  %v9548_v35 = vpack.c.bf16 %v255_v27, %v191_v26  ;;  %v139_v26 = vld [vmem:[%s18016_s0 + $0x368] sm:$0xff]  ;;  %v273_v19 = vld [vmem:[%s18016_s0 + $0x798] sm:$0xff] }
  0x58   :  { %9515 = vmatpush1.bf16.msra.mxu0 %v9514_v38  ;;  %v67_v38 = vld [vmem:[%s18016_s0 + $0x128] sm:$0xff]  ;;  %v11716_v20 = vld [vmem:[%s18017_s1 + $0x18] sm:$0xff] }
  0x59   :  { %8174 = vmatmul.mubr.msk.f32.gmra.mrb[38].mxu1 %vm310_vm0, %v10873_v42  ;;  %8178 = vmatmul.mubr.msk.f32.gmra.mrb[38].mxu0 %vm310_vm0, %v10873_v42  ;;  %v9560_v40 = vpack.c.bf16 %v131_v39, %v67_v38  ;;  %v264_v38 = vld [vmem:[%s18016_s0 + $0x750] sm:$0xff] }
  0x5a   :  { %1200 = vmatprep.mubr.f32.mxu1 %v18024_v3  ;;  %1289 = vmatprep.mubr.f32.mxu0 %v18024_v3 }
  0x5b   :  { %9511 = vmatpush1.bf16.msra.mxu1 %v9510_v47  ;;  %9517 = vmatprep.subr.bf16.mxu0 %v9516_v48  ;;  %v66_v47 = vld [vmem:[%s18016_s0 + $0x120] sm:$0xff] }
  0x5c   :  { %9519 = vmatpush1.bf16.msra.mxu0 %v9518_v49  ;;  %9521 = vmatprep.subr.bf16.mxu1 %v9520_v50  ;;  %v130_v48 = vld [vmem:[%s18016_s0 + $0x320] sm:$0xff]  ;;  %v9554_v49 = vpack.c.bf16 %v128_v44, %v64_v41  ;;  %v9556_v50 = vpack.c.bf16 %v257_v46, %v193_v45  ;;  %v267_v41 = vld [vmem:[%s18016_s0 + $0x768] sm:$0xff]  ;;  %v77_v46 = vld [vmem:[%s18016_s0 + $0x178] sm:$0xff] }
  0x5d   :  { %8175 = vmatmul.mubr.msk.f32.gmra.mrb[40].mxu1 %vm310_vm0, %v10840_v29  ;;  %8179 = vmatmul.mubr.msk.f32.gmra.mrb[40].mxu0 %vm310_vm0, %v10840_v29  ;;  %v202_v44 = vld [vmem:[%s18016_s0 + $0x560] sm:$0xff] }
  0x5e   :  { %1206 = vmatprep.mubr.f32.mxu1 %v18024_v3  ;;  %1295 = vmatprep.mubr.f32.mxu0 %v18024_v3  ;;  %v266_v45 = vld [vmem:[%s18016_s0 + $0x760] sm:$0xff] }
  0x5f   :  { %9529 = vmatprep.subr.bf16.mxu0 %v9528_v53  ;;  %v9562_v53 = vpack.c.bf16 %v130_v48, %v66_v47  ;;  %v141_v47 = vld [vmem:[%s18016_s0 + $0x378] sm:$0xff] }
  0x61   :  { %8176 = vmatmul.mubr.msk.f32.gmra.mrb[42].mxu1 %vm310_vm0, %v10878_v43  ;;  %8180 = vmatmul.mubr.msk.f32.gmra.mrb[42].mxu0 %vm310_vm0, %v10878_v43 }
  0x62   :  { %1366 = vmatprep.mubr.f32.mxu1 %v18024_v3  ;;  %1455 = vmatprep.mubr.f32.mxu0 %v18024_v3 }
  0x65   :  { %8181 = vmatmul.mubr.msk.f32.vlgmr.msra.gmra.mrb[44].mxu1 %vm310_vm0, %v10835_v28  ;;  %8185 = vmatmul.mubr.msk.f32.vlgmr.msra.gmra.mrb[44].mxu0 %vm310_vm0, %v10835_v28 }
  0x66   :  { %9523 = vmatpush1.bf16.msra.mxu1 %v9522_v60  ;;  %1372 = vmatprep.mubr.f32.mxu1 %v18024_v3  ;;  %v9558_v60 = vpack.c.bf16 %v256_v52, %v192_v51  ;;  %v79_v51 = vld [vmem:[%s18016_s0 + $0x188] sm:$0xff] }
  0x67   :  { %1461 = vmatprep.mubr.f32.mxu0 %v18024_v3  ;;  %9525 = vmatprep.subr.bf16.mxu1 %v9524_v61  ;;  %v9564_v61 = vpack.c.bf16 %v259_v55, %v195_v54  ;;  %v143_v52 = vld [vmem:[%s18016_s0 + $0x388] sm:$0xff]  ;;  %v11611_v54 = vld [vmem:[%s18017_s1 + $0x10] sm:$0xff] }
  0x68   :  { %9531 = vmatpush1.bf16.msra.mxu0 %v9530_v0  ;;  %v71_v0 = vld [vmem:[%s18016_s0 + $0x148] sm:$0xff]  ;;  %v140_v55 = vld [vmem:[%s18016_s0 + $0x370] sm:$0xff] }
  0x69   :  { %8182 = vmatmul.mubr.msk.f32.gmra.mrb[46].mxu1 %vm310_vm0, %v10873_v42  ;;  %8186 = vmatmul.mubr.msk.f32.gmra.mrb[46].mxu0 %vm310_vm0, %v10873_v42  ;;  %v9576_v2 = vpack.c.bf16 %v135_v1, %v71_v0  ;;  %v207_v0 = vld [vmem:[%s18016_s0 + $0x588] sm:$0xff] }
  0x6a   :  { %1378 = vmatprep.mubr.f32.mxu1 %v18024_v3  ;;  %1467 = vmatprep.mubr.f32.mxu0 %v18024_v3  ;;  %v271_v1 = vld [vmem:[%s18016_s0 + $0x788] sm:$0xff] }
  0x6b   :  { %9527 = vmatpush1.bf16.msra.mxu1 %v9526_v8  ;;  %9533 = vmatprep.subr.bf16.mxu0 %v9532_v9  ;;  %v70_v8 = vld [vmem:[%s18016_s0 + $0x140] sm:$0xff] }
  0x6c   :  { %9535 = vmatpush1.bf16.msra.mxu0 %v9534_v10  ;;  %9537 = vmatprep.subr.bf16.mxu1 %v9536_v11  ;;  %v134_v9 = vld [vmem:[%s18016_s0 + $0x340] sm:$0xff]  ;;  %v9570_v10 = vpack.c.bf16 %v132_v5, %v68_v4  ;;  %v9572_v11 = vpack.c.bf16 %v261_v7, %v197_v6  ;;  %v81_v6 = vld [vmem:[%s18016_s0 + $0x198] sm:$0xff] }
  0x6d   :  { %8183 = vmatmul.mubr.msk.f32.gmra.mrb[48].mxu1 %vm310_vm0, %v10840_v29  ;;  %8187 = vmatmul.mubr.msk.f32.gmra.mrb[48].mxu0 %vm310_vm0, %v10840_v29  ;;  %v11661_v4 = vld [vmem:[%s18017_s1] sm:$0xff]  ;;  %v145_v7 = vld [vmem:[%s18016_s0 + $0x398] sm:$0xff] }
  0x6e   :  { %1384 = vmatprep.mubr.f32.mxu1 %v18024_v3  ;;  %1473 = vmatprep.mubr.f32.mxu0 %v18024_v3  ;;  %v270_v5 = vld [vmem:[%s18016_s0 + $0x780] sm:$0xff] }
  0x6f   :  { %9545 = vmatprep.subr.bf16.mxu0 %v9544_v14  ;;  %v9578_v14 = vpack.c.bf16 %v134_v9, %v70_v8  ;;  %v9612_v9 = vpack.c.bf16 %v271_v1, %v207_v0  ;;  %v155_v0 = vld [vmem:[%s18016_s0 + $0x3e8] sm:$0xff] }
  0x71   :  { %8184 = vmatmul.mubr.msk.f32.gmra.mrb[50].mxu1 %vm310_vm0, %v10878_v43  ;;  %8188 = vmatmul.mubr.msk.f32.gmra.mrb[50].mxu0 %vm310_vm0, %v10878_v43 }
  0x72   :  { %1544 = vmatprep.mubr.f32.mxu1 %v18024_v3  ;;  %1633 = vmatprep.mubr.f32.mxu0 %v18024_v3 }
  0x75   :  { %8189 = vmatmul.mubr.msk.f32.vlgmr.msra.gmra.mrb[52].mxu1 %vm310_vm0, %v10835_v28  ;;  %8193 = vmatmul.mubr.msk.f32.vlgmr.msra.gmra.mrb[52].mxu0 %vm310_vm0, %v10835_v28 }
  0x76   :  { %9539 = vmatpush1.bf16.msra.mxu1 %v9538_v21  ;;  %1550 = vmatprep.mubr.f32.mxu1 %v18024_v3  ;;  %v9574_v21 = vpack.c.bf16 %v260_v13, %v196_v12  ;;  %v83_v12 = vld [vmem:[%s18016_s0 + $0x1a8] sm:$0xff] }
  0x77   :  { %1639 = vmatprep.mubr.f32.mxu0 %v18024_v3  ;;  %9541 = vmatprep.subr.bf16.mxu1 %v9540_v22  ;;  %v9580_v22 = vpack.c.bf16 %v263_v16, %v199_v15  ;;  %v147_v13 = vld [vmem:[%s18016_s0 + $0x3a8] sm:$0xff]  ;;  %v80_v16 = vld [vmem:[%s18016_s0 + $0x190] sm:$0xff] }
  0x78   :  { %9547 = vmatpush1.bf16.msra.mxu0 %v9546_v25  ;;  %v75_v25 = vld [vmem:[%s18016_s0 + $0x168] sm:$0xff]  ;;  %v9624_v15 = vpack.c.bf16 %v147_v13, %v83_v12  ;;  %v154_v12 = vld [vmem:[%s18016_s0 + $0x3e0] sm:$0xff] }
  0x79   :  { %8190 = vmatmul.mubr.msk.f32.gmra.mrb[54].mxu1 %vm310_vm0, %v10873_v42  ;;  %8194 = vmatmul.mubr.msk.f32.gmra.mrb[54].mxu0 %vm310_vm0, %v10873_v42  ;;  %v9592_v27 = vpack.c.bf16 %v139_v26, %v75_v25  ;;  %v208_v25 = vld [vmem:[%s18016_s0 + $0x590] sm:$0xff] }
  0x7a   :  { %1556 = vmatprep.mubr.f32.mxu1 %v18024_v3  ;;  %1645 = vmatprep.mubr.f32.mxu0 %v18024_v3  ;;  %v272_v26 = vld [vmem:[%s18016_s0 + $0x790] sm:$0xff] }
  0x7b   :  { %9543 = vmatpush1.bf16.msra.mxu1 %v9542_v34  ;;  %9549 = vmatprep.subr.bf16.mxu0 %v9548_v35  ;;  %v138_v34 = vld [vmem:[%s18016_s0 + $0x360] sm:$0xff]  ;;  %v9586_v35 = vpack.c.bf16 %v136_v31, %v72_v30  ;;  %v211_v30 = vld [vmem:[%s18016_s0 + $0x5a8] sm:$0xff] }
  0x7c   :  { %9551 = vmatpush1.bf16.msra.mxu0 %v9550_v36  ;;  %9553 = vmatprep.subr.bf16.mxu1 %v9552_v37  ;;  %v200_v37 = vld [vmem:[%s18016_s0 + $0x550] sm:$0xff]  ;;  %v9594_v39 = vpack.c.bf16 %v138_v34, %v74_v33  ;;  %v275_v31 = vld [vmem:[%s18016_s0 + $0x7a8] sm:$0xff]  ;;  %v85_v33 = vld [vmem:[%s18016_s0 + $0x1b8] sm:$0xff] }
  0x7d   :  { %8191 = vmatmul.mubr.msk.f32.gmra.mrb[56].mxu1 %vm310_vm0, %v10840_v29  ;;  %8195 = vmatmul.mubr.msk.f32.gmra.mrb[56].mxu0 %vm310_vm0, %v10840_v29  ;;  %v9590_v48 = vpack.c.bf16 %v264_v38, %v200_v37  ;;  %v149_v34 = vld [vmem:[%s18016_s0 + $0x3b8] sm:$0xff] }
  0x7e   :  { %1562 = vmatprep.mubr.f32.mxu1 %v18024_v3  ;;  %1651 = vmatprep.mubr.f32.mxu0 %v18024_v3  ;;  %v9632_v38 = vpack.c.bf16 %v149_v34, %v85_v33 }
  0x7f   :  { %9561 = vmatprep.subr.bf16.mxu0 %v9560_v40  ;;  %v203_v40 = vld [vmem:[%s18016_s0 + $0x568] sm:$0xff] }
  0x81   :  { %8192 = vmatmul.mubr.msk.f32.gmra.mrb[58].mxu1 %vm310_vm0, %v10878_v43  ;;  %8196 = vmatmul.mubr.msk.f32.gmra.mrb[58].mxu0 %vm310_vm0, %v10878_v43 }
  0x82   :  { %1722 = vmatprep.mubr.f32.mxu1 %v18024_v3  ;;  %1811 = vmatprep.mubr.f32.mxu0 %v18024_v3 }
  0x85   :  { %8197 = vmatmul.mubr.msk.f32.vlgmr.msra.gmra.mrb[60].mxu1 %vm310_vm0, %v10835_v28  ;;  %8201 = vmatmul.mubr.msk.f32.vlgmr.msra.gmra.mrb[60].mxu0 %vm310_vm0, %v10835_v28 }
  0x86   :  { %9555 = vmatpush1.bf16.msra.mxu1 %v9554_v49  ;;  %1728 = vmatprep.mubr.f32.mxu1 %v18024_v3  ;;  %v9598_v49 = vpack.c.bf16 %v266_v45, %v202_v44  ;;  %v84_v44 = vld [vmem:[%s18016_s0 + $0x1b0] sm:$0xff] }
  0x87   :  { %1817 = vmatprep.mubr.f32.mxu0 %v18024_v3  ;;  %9557 = vmatprep.subr.bf16.mxu1 %v9556_v50  ;;  %v9600_v50 = vpack.c.bf16 %v141_v47, %v77_v46  ;;  %v148_v45 = vld [vmem:[%s18016_s0 + $0x3b0] sm:$0xff]  ;;  %v213_v46 = vld [vmem:[%s18016_s0 + $0x5b8] sm:$0xff] }
  0x88   :  { %9563 = vmatpush1.bf16.msra.mxu0 %v9562_v53  ;;  %v9608_v53 = vpack.c.bf16 %v143_v52, %v79_v51  ;;  %v277_v47 = vld [vmem:[%s18016_s0 + $0x7b8] sm:$0xff]  ;;  %v212_v51 = vld [vmem:[%s18016_s0 + $0x5b0] sm:$0xff] }
  0x89   :  { %8198 = vmatmul.mubr.msk.f32.gmra.mrb[62].mxu1 %vm310_vm0, %v10873_v42  ;;  %8202 = vmatmul.mubr.msk.f32.gmra.mrb[62].mxu0 %vm310_vm0, %v10873_v42  ;;  %v276_v52 = vld [vmem:[%s18016_s0 + $0x7b0] sm:$0xff] }
  0x8a   :  { %1734 = vmatprep.mubr.f32.mxu1 %v18024_v3  ;;  %1823 = vmatprep.mubr.f32.mxu0 %v18024_v3 }
  0x8b   :  { %9559 = vmatpush1.bf16.msra.mxu1 %v9558_v60  ;;  %9565 = vmatprep.subr.bf16.mxu0 %v9564_v61  ;;  %v9604_v61 = vpack.c.bf16 %v269_v57, %v205_v56  ;;  %v214_v56 = vld [vmem:[%s18016_s0 + $0x5c0] sm:$0xff] }
  0x8c   :  { %9567 = vmatpush1.bf16.msra.mxu0 %v9566_v62  ;;  %9569 = vmatprep.subr.bf16.mxu1 %v9568_v63  ;;  %v204_v62 = vld [vmem:[%s18016_s0 + $0x570] sm:$0xff]  ;;  %v9610_v63 = vpack.c.bf16 %v142_v59, %v78_v58  ;;  %v278_v57 = vld [vmem:[%s18016_s0 + $0x7c0] sm:$0xff]  ;;  %v89_v58 = vld [vmem:[%s18016_s0 + $0x1d8] sm:$0xff] }
  0x8d   :  { %8199 = vmatmul.mubr.msk.f32.gmra.mrb[64].mxu1 %vm310_vm0, %v10840_v29  ;;  %8203 = vmatmul.mubr.msk.f32.gmra.mrb[64].mxu0 %vm310_vm0, %v10840_v29  ;;  %v153_v59 = vld [vmem:[%s18016_s0 + $0x3d8] sm:$0xff] }
  0x8e   :  { %1740 = vmatprep.mubr.f32.mxu1 %v18024_v3  ;;  %1829 = vmatprep.mubr.f32.mxu0 %v18024_v3 }
  0x8f   :  { %9577 = vmatprep.subr.bf16.mxu0 %v9576_v2  ;;  %v206_v2 = vld [vmem:[%s18016_s0 + $0x580] sm:$0xff] }
  0x91   :  { %8200 = vmatmul.mubr.msk.f32.gmra.mrb[66].mxu1 %vm310_vm0, %v10878_v43  ;;  %8204 = vmatmul.mubr.msk.f32.gmra.mrb[66].mxu0 %vm310_vm0, %v10878_v43 }
  0x92   :  { %1900 = vmatprep.mubr.f32.mxu1 %v18024_v3  ;;  %1989 = vmatprep.mubr.f32.mxu0 %v18024_v3 }
  0x95   :  { %8205 = vmatmul.mubr.msk.f32.vlgmr.msra.gmra.mrb[68].mxu1 %vm310_vm0, %v10835_v28  ;;  %8209 = vmatmul.mubr.msk.f32.vlgmr.msra.gmra.mrb[68].mxu0 %vm310_vm0, %v10835_v28 }
  0x96   :  { %9571 = vmatpush1.bf16.msra.mxu1 %v9570_v10  ;;  %1906 = vmatprep.mubr.f32.mxu1 %v18024_v3  ;;  %v9614_v10 = vpack.c.bf16 %v270_v5, %v206_v2  ;;  %v88_v2 = vld [vmem:[%s18016_s0 + $0x1d0] sm:$0xff] }
  0x97   :  { %1995 = vmatprep.mubr.f32.mxu0 %v18024_v3  ;;  %9573 = vmatprep.subr.bf16.mxu1 %v9572_v11  ;;  %v9616_v11 = vpack.c.bf16 %v145_v7, %v81_v6  ;;  %v152_v5 = vld [vmem:[%s18016_s0 + $0x3d0] sm:$0xff]  ;;  %v217_v7 = vld [vmem:[%s18016_s0 + $0x5d8] sm:$0xff] }
  0x98   :  { %9579 = vmatpush1.bf16.msra.mxu0 %v9578_v14  ;;  %v11687_v14 = vld [vmem:[%s18017_s1 + $0x8] sm:$0xff] }
  0x99   :  { %8206 = vmatmul.mubr.msk.f32.gmra.mrb[70].mxu1 %vm310_vm0, %v10873_v42  ;;  %8210 = vmatmul.mubr.msk.f32.gmra.mrb[70].mxu0 %vm310_vm0, %v10873_v42 }
  0x9a   :  { %1912 = vmatprep.mubr.f32.mxu1 %v18024_v3  ;;  %2001 = vmatprep.mubr.f32.mxu0 %v18024_v3 }
  0x9b   :  { %9575 = vmatpush1.bf16.msra.mxu1 %v9574_v21  ;;  %9581 = vmatprep.subr.bf16.mxu0 %v9580_v22  ;;  %v82_v21 = vld [vmem:[%s18016_s0 + $0x1a0] sm:$0xff] }
  0x9c   :  { %9583 = vmatpush1.bf16.msra.mxu0 %v9582_v23  ;;  %9585 = vmatprep.subr.bf16.mxu1 %v9584_v24  ;;  %v146_v22 = vld [vmem:[%s18016_s0 + $0x3a0] sm:$0xff]  ;;  %v9618_v23 = vpack.c.bf16 %v144_v17, %v80_v16  ;;  %v9620_v24 = vpack.c.bf16 %v273_v19, %v209_v18  ;;  %v216_v17 = vld [vmem:[%s18016_s0 + $0x5d0] sm:$0xff]  ;;  %v219_v18 = vld [vmem:[%s18016_s0 + $0x5e8] sm:$0xff] }
  0x9d   :  { %8207 = vmatmul.mubr.msk.f32.gmra.mrb[72].mxu1 %vm310_vm0, %v10840_v29  ;;  %8211 = vmatmul.mubr.msk.f32.gmra.mrb[72].mxu0 %vm310_vm0, %v10840_v29  ;;  %v265_v29 = vld [vmem:[%s18016_s0 + $0x758] sm:$0xff] }
  0x9e   :  { %1918 = vmatprep.mubr.f32.mxu1 %v18024_v3  ;;  %2007 = vmatprep.mubr.f32.mxu0 %v18024_v3  ;;  %v9588_v36 = vpack.c.bf16 %v265_v29, %v201_v32  ;;  %v210_v32 = vld [vmem:[%s18016_s0 + $0x5a0] sm:$0xff] }
  0x9f   :  { %9593 = vmatprep.subr.bf16.mxu0 %v9592_v27  ;;  %v9626_v27 = vpack.c.bf16 %v146_v22, %v82_v21  ;;  %v274_v29 = vld [vmem:[%s18016_s0 + $0x7a0] sm:$0xff]  ;;  %v280_v21 = vld [vmem:[%s18016_s0 + $0x7d0] sm:$0xff] }
  0xa0   :  { %v9630_v37 = vpack.c.bf16 %v274_v29, %v210_v32  ;;  %v157_v32 = vld [vmem:[%s18016_s0 + $0x3f8] sm:$0xff]  ;;  %v9654_v29 = vpack.c.bf16 %v280_v21, %v216_v17 }
  0xa1   :  { %8208 = vmatmul.mubr.msk.f32.gmra.mrb[74].mxu1 %vm310_vm0, %v10878_v43  ;;  %8212 = vmatmul.mubr.msk.f32.gmra.mrb[74].mxu0 %vm310_vm0, %v10878_v43 }
  0xa2   :  { %2078 = vmatprep.mubr.f32.mxu1 %v18024_v3  ;;  %2167 = vmatprep.mubr.f32.mxu0 %v18024_v3 }
  0xa5   :  { %8213 = vmatmul.mubr.msk.f32.vlgmr.msra.gmra.mrb[76].mxu1 %vm310_vm0, %v10835_v28  ;;  %8217 = vmatmul.mubr.msk.f32.vlgmr.msra.gmra.mrb[76].mxu0 %vm310_vm0, %v10835_v28  ;;  %v9596_v28 = vpack.c.bf16 %v267_v41, %v203_v40  ;;  %v151_v40 = vld [vmem:[%s18016_s0 + $0x3c8] sm:$0xff] }
  0xa6   :  { %9587 = vmatpush1.bf16.msra.mxu1 %v9586_v35  ;;  %2084 = vmatprep.mubr.f32.mxu1 %v18024_v3  ;;  %v9622_v35 = vpack.c.bf16 %v272_v26, %v208_v25 }
  0xa7   :  { %2173 = vmatprep.mubr.f32.mxu0 %v18024_v3  ;;  %9589 = vmatprep.subr.bf16.mxu1 %v9588_v36  ;;  %v9628_v36 = vpack.c.bf16 %v275_v31, %v211_v30  ;;  %v93_v31 = vld [vmem:[%s18016_s0 + $0x1f8] sm:$0xff] }
  0xa8   :  { %9595 = vmatpush1.bf16.msra.mxu0 %v9594_v39  ;;  %v87_v39 = vld [vmem:[%s18016_s0 + $0x1c8] sm:$0xff] }
  0xa9   :  { %8214 = vmatmul.mubr.msk.f32.gmra.mrb[78].mxu1 %vm310_vm0, %v10873_v42  ;;  %8218 = vmatmul.mubr.msk.f32.gmra.mrb[78].mxu0 %vm310_vm0, %v10873_v42  ;;  %v76_v42 = vld [vmem:[%s18016_s0 + $0x170] sm:$0xff]  ;;  %v9640_v41 = vpack.c.bf16 %v151_v40, %v87_v39 }
  0xaa   :  { %2090 = vmatprep.mubr.f32.mxu1 %v18024_v3  ;;  %2179 = vmatprep.mubr.f32.mxu0 %v18024_v3  ;;  %v9602_v60 = vpack.c.bf16 %v140_v55, %v76_v42  ;;  %v215_v42 = vld [vmem:[%s18016_s0 + $0x5c8] sm:$0xff] }
  0xab   :  { %9591 = vmatpush1.bf16.msra.mxu1 %v9590_v48  ;;  %9597 = vmatprep.subr.bf16.mxu0 %v9596_v28  ;;  %v86_v48 = vld [vmem:[%s18016_s0 + $0x1c0] sm:$0xff]  ;;  %v279_v55 = vld [vmem:[%s18016_s0 + $0x7c8] sm:$0xff] }
  0xac   :  { %9599 = vmatpush1.bf16.msra.mxu0 %v9598_v49  ;;  %9601 = vmatprep.subr.bf16.mxu1 %v9600_v50  ;;  %v150_v28 = vld [vmem:[%s18016_s0 + $0x3c0] sm:$0xff]  ;;  %v9634_v49 = vpack.c.bf16 %v148_v45, %v84_v44  ;;  %v9636_v50 = vpack.c.bf16 %v277_v47, %v213_v46  ;;  %v92_v46 = vld [vmem:[%s18016_s0 + $0x1f0] sm:$0xff] }
  0xad   :  { %8215 = vmatmul.mubr.msk.f32.gmra.mrb[80].mxu1 %vm310_vm0, %v11611_v54  ;;  %8219 = vmatmul.mubr.msk.f32.gmra.mrb[80].mxu0 %vm310_vm0, %v11611_v54  ;;  %v156_v47 = vld [vmem:[%s18016_s0 + $0x3f0] sm:$0xff] }
  0xae   :  { %2096 = vmatprep.mubr.f32.mxu1 %v18024_v3  ;;  %2185 = vmatprep.mubr.f32.mxu0 %v18024_v3 }
  0xaf   :  { %9609 = vmatprep.subr.bf16.mxu0 %v9608_v53  ;;  %v9642_v53 = vpack.c.bf16 %v150_v28, %v86_v48  ;;  %v221_v28 = vld [vmem:[%s18016_s0 + $0x5f8] sm:$0xff] }
  0xb1   :  { %8216 = vmatmul.mubr.msk.f32.gmra.mrb[82].mxu1 %vm310_vm0, %v10878_v43  ;;  %8220 = vmatmul.mubr.msk.f32.gmra.mrb[82].mxu0 %vm310_vm0, %v10878_v43  ;;  %v268_v43 = vld [vmem:[%s18016_s0 + $0x770] sm:$0xff] }
  0xb2   :  { %2256 = vmatprep.mubr.f32.mxu1 %v18024_v3  ;;  %2345 = vmatprep.mubr.f32.mxu0 %v18024_v3  ;;  %v9606_v8 = vpack.c.bf16 %v268_v43, %v204_v62  ;;  %v9646_v62 = vpack.c.bf16 %v278_v57, %v214_v56  ;;  %v9648_v43 = vpack.c.bf16 %v153_v59, %v89_v58  ;;  %v220_v56 = vld [vmem:[%s18016_s0 + $0x5f0] sm:$0xff] }
  0xb3   :  { %v284_v57 = vld [vmem:[%s18016_s0 + $0x7f0] sm:$0xff] }
  0xb5   :  { %8221 = vmatmul.mubr.msk.f32.vlgmr.msra.gmra.mrb[84].mxu1 %vm310_vm0, %v11661_v4  ;;  %8225 = vmatmul.mubr.msk.f32.vlgmr.msra.gmra.mrb[84].mxu0 %vm310_vm0, %v11661_v4 }
  0xb6   :  { %9603 = vmatpush1.bf16.msra.mxu1 %v9602_v60  ;;  %2262 = vmatprep.mubr.f32.mxu1 %v18024_v3  ;;  %v9638_v60 = vpack.c.bf16 %v276_v52, %v212_v51 }
  0xb7   :  { %2351 = vmatprep.mubr.f32.mxu0 %v18024_v3  ;;  %9605 = vmatprep.subr.bf16.mxu1 %v9604_v61  ;;  %v9644_v61 = vpack.c.bf16 %v279_v55, %v215_v42 }
  0xb8   :  { %9611 = vmatpush1.bf16.msra.mxu0 %v9610_v63  ;;  %v91_v63 = vld [vmem:[%s18016_s0 + $0x1e8] sm:$0xff] }
  0xb9   :  { %8222 = vmatmul.mubr.msk.f32.gmra.mrb[86].mxu1 %vm310_vm0, %v11687_v14  ;;  %8226 = vmatmul.mubr.msk.f32.gmra.mrb[86].mxu0 %vm310_vm0, %v11687_v14  ;;  %v9656_v1 = vpack.c.bf16 %v155_v0, %v91_v63 }
  0xba   :  { %2268 = vmatprep.mubr.f32.mxu1 %v18024_v3  ;;  %2357 = vmatprep.mubr.f32.mxu0 %v18024_v3 }
  0xbb   :  { %9607 = vmatpush1.bf16.msra.mxu1 %v9606_v8  ;;  %9613 = vmatprep.subr.bf16.mxu0 %v9612_v9  ;;  %v281_v8 = vld [vmem:[%s18016_s0 + $0x7d8] sm:$0xff] }
  0xbc   :  { %9615 = vmatpush1.bf16.msra.mxu0 %v9614_v10  ;;  %9617 = vmatprep.subr.bf16.mxu1 %v9616_v11  ;;  %v90_v11 = vld [vmem:[%s18016_s0 + $0x1e0] sm:$0xff]  ;;  %v9652_v16 = vpack.c.bf16 %v281_v8, %v217_v7 }
  0xbd   :  { %8223 = vmatmul.mubr.msk.f32.gmra.mrb[88].mxu1 %vm310_vm0, %v11611_v54  ;;  %8227 = vmatmul.mubr.msk.f32.gmra.mrb[88].mxu0 %vm310_vm0, %v11611_v54  ;;  %v9658_v22 = vpack.c.bf16 %v154_v12, %v90_v11 }
  0xbe   :  { %2274 = vmatprep.mubr.f32.mxu1 %v18024_v3  ;;  %2363 = vmatprep.mubr.f32.mxu0 %v18024_v3 }
  0xbf   :  { %9625 = vmatprep.subr.bf16.mxu0 %v9624_v15  ;;  %v9650_v15 = vpack.c.bf16 %v152_v5, %v88_v2 }
  0xc1   :  { %8224 = vmatmul.mubr.msk.f32.gmra.mrb[90].mxu1 %vm310_vm0, %v11716_v20  ;;  %8228 = vmatmul.mubr.msk.f32.gmra.mrb[90].mxu0 %vm310_vm0, %v11716_v20 }
  0xc2   :  { %2434 = vmatprep.mubr.f32.mxu1 %v18024_v3  ;;  %2523 = vmatprep.mubr.f32.mxu0 %v18024_v3 }
  0xc5   :  { %8229 = vmatmul.mubr.msk.f32.vlgmr.msra.gmra.mrb[92].mxu1 %vm310_vm0, %v11661_v4  ;;  %8233 = vmatmul.mubr.msk.f32.vlgmr.msra.gmra.mrb[92].mxu0 %vm310_vm0, %v11661_v4 }
  0xc6   :  { %9619 = vmatpush1.bf16.msra.mxu1 %v9618_v23  ;;  %2440 = vmatprep.mubr.f32.mxu1 %v18024_v3  ;;  %v283_v23 = vld [vmem:[%s18016_s0 + $0x7e8] sm:$0xff] }
  0xc7   :  { %2529 = vmatprep.mubr.f32.mxu0 %v18024_v3  ;;  %9621 = vmatprep.subr.bf16.mxu1 %v9620_v24  ;;  %v218_v24 = vld [vmem:[%s18016_s0 + $0x5e0] sm:$0xff]  ;;  %v9660_v33 = vpack.c.bf16 %v283_v23, %v219_v18 }
  0xc8   :  { %9627 = vmatpush1.bf16.msra.mxu0 %v9626_v27  ;;  %v282_v27 = vld [vmem:[%s18016_s0 + $0x7e0] sm:$0xff] }
  0xc9   :  { %8230 = vmatmul.mubr.msk.f32.gmra.mrb[94].mxu1 %vm310_vm0, %v11687_v14  ;;  %8234 = vmatmul.mubr.msk.f32.gmra.mrb[94].mxu0 %vm310_vm0, %v11687_v14 }
  0xca   :  { %2446 = vmatprep.mubr.f32.mxu1 %v18024_v3  ;;  %2535 = vmatprep.mubr.f32.mxu0 %v18024_v3 }
  0xcb   :  { %9623 = vmatpush1.bf16.msra.mxu1 %v9622_v35  ;;  %9629 = vmatprep.subr.bf16.mxu0 %v9628_v36  ;;  %v9662_v35 = vpack.c.bf16 %v282_v27, %v218_v24  ;;  %v9664_v36 = vpack.c.bf16 %v157_v32, %v93_v31 }
  0xcc   :  { %9631 = vmatpush1.bf16.msra.mxu0 %v9630_v37  ;;  %9633 = vmatprep.subr.bf16.mxu1 %v9632_v38 }
  0xcd   :  { %8231 = vmatmul.mubr.msk.f32.gmra.mrb[96].mxu1 %vm310_vm0, %v11611_v54  ;;  %8235 = vmatmul.mubr.msk.f32.gmra.mrb[96].mxu0 %vm310_vm0, %v11611_v54 }
  0xce   :  { %2452 = vmatprep.mubr.f32.mxu1 %v18024_v3  ;;  %2541 = vmatprep.mubr.f32.mxu0 %v18024_v3 }
  0xcf   :  { %9641 = vmatprep.subr.bf16.mxu0 %v9640_v41 }
  0xd1   :  { %8232 = vmatmul.mubr.msk.f32.gmra.mrb[98].mxu1 %vm310_vm0, %v11716_v20  ;;  %8236 = vmatmul.mubr.msk.f32.gmra.mrb[98].mxu0 %vm310_vm0, %v11716_v20 }
  0xd2   :  { %2612 = vmatprep.mubr.f32.mxu1 %v18024_v3  ;;  %2701 = vmatprep.mubr.f32.mxu0 %v18024_v3 }
  0xd5   :  { %8237 = vmatmul.mubr.msk.f32.vlgmr.msra.gmra.mrb[100].mxu1 %vm310_vm0, %v11661_v4  ;;  %8241 = vmatmul.mubr.msk.f32.vlgmr.msra.gmra.mrb[100].mxu0 %vm310_vm0, %v11661_v4 }
  0xd6   :  { %9635 = vmatpush1.bf16.msra.mxu1 %v9634_v49  ;;  %2618 = vmatprep.mubr.f32.mxu1 %v18024_v3  ;;  %v285_v49 = vld [vmem:[%s18016_s0 + $0x7f8] sm:$0xff] }
  0xd7   :  { %2707 = vmatprep.mubr.f32.mxu0 %v18024_v3  ;;  %9637 = vmatprep.subr.bf16.mxu1 %v9636_v50  ;;  %v9668_v42 = vpack.c.bf16 %v285_v49, %v221_v28 }
  0xd8   :  { %9643 = vmatpush1.bf16.msra.mxu0 %v9642_v53  ;;  %v9666_v53 = vpack.c.bf16 %v156_v47, %v92_v46 }
  0xd9   :  { %8238 = vmatmul.mubr.msk.f32.gmra.mrb[102].mxu1 %vm310_vm0, %v11687_v14  ;;  %8242 = vmatmul.mubr.msk.f32.gmra.mrb[102].mxu0 %vm310_vm0, %v11687_v14 }
  0xda   :  { %2624 = vmatprep.mubr.f32.mxu1 %v18024_v3  ;;  %2713 = vmatprep.mubr.f32.mxu0 %v18024_v3 }
  0xdb   :  { %9639 = vmatpush1.bf16.msra.mxu1 %v9638_v60  ;;  %9645 = vmatprep.subr.bf16.mxu0 %v9644_v61  ;;  %v9670_v61 = vpack.c.bf16 %v284_v57, %v220_v56 }
  0xdc   :  { %9647 = vmatpush1.bf16.msra.mxu0 %v9646_v62  ;;  %9649 = vmatprep.subr.bf16.mxu1 %v9648_v43 }
  0xdd   :  { %8239 = vmatmul.mubr.msk.f32.gmra.mrb[104].mxu1 %vm310_vm0, %v11611_v54  ;;  %8243 = vmatmul.mubr.msk.f32.gmra.mrb[104].mxu0 %vm310_vm0, %v11611_v54 }
  0xde   :  { %2630 = vmatprep.mubr.f32.mxu1 %v18024_v3  ;;  %2719 = vmatprep.mubr.f32.mxu0 %v18024_v3 }
  0xdf   :  { %9657 = vmatprep.subr.bf16.mxu0 %v9656_v1 }
  0xe0   :  { %v11856_v6 = vpop.f32.mrb[0].mxu1  ;;  %v11864_v9 = vpop.f32.mrb[0].mxu0 }
  0xe1   :  { %v11866_v10 = vpop.f32.mrb[1].mxu1  ;;  %8240 = vmatmul.mubr.msk.f32.gmra.mrb[106].mxu1 %vm310_vm0, %v11716_v20  ;;  %8244 = vmatmul.mubr.msk.f32.gmra.mrb[106].mxu0 %vm310_vm0, %v11716_v20  ;;  %v11878_v13 = vpop.f32.mrb[1].mxu0 }
  0xe2   :  { %2790 = vmatprep.mubr.f32.mxu1 %v18024_v3  ;;  %2879 = vmatprep.mubr.f32.mxu0 %v18024_v3 }
  0xe4   :  { %v11888_v19 = vpop.f32.mrb[2].mxu1  ;;  %v11899_v25 = vpop.f32.mrb[2].mxu0 }
  0xe5   :  { %v11901_v26 = vpop.f32.mrb[3].mxu1  ;;  %8245 = vmatmul.mubr.msk.f32.vlgmr.msra.gmra.mrb[108].mxu1 %vm310_vm0, %v11661_v4  ;;  %8249 = vmatmul.mubr.msk.f32.vlgmr.msra.gmra.mrb[108].mxu0 %vm310_vm0, %v11661_v4  ;;  %v11910_v30 = vpop.f32.mrb[3].mxu0 }
  0xe6   :  { %9651 = vmatpush1.bf16.msra.mxu1 %v9650_v15  ;;  %2796 = vmatprep.mubr.f32.mxu1 %v18024_v3 }
  0xe7   :  { %2885 = vmatprep.mubr.f32.mxu0 %v18024_v3  ;;  %9653 = vmatprep.subr.bf16.mxu1 %v9652_v16 }
  0xe8   :  { %v11920_v34 = vpop.f32.mrb[4].mxu1  ;;  %9659 = vmatpush1.bf16.msra.mxu0 %v9658_v22  ;;  %v11922_v37 = vpop.f32.mrb[4].mxu0 }
  0xe9   :  { %v11924_v38 = vpop.f32.mrb[5].mxu1  ;;  %8246 = vmatmul.mubr.msk.f32.gmra.mrb[110].mxu1 %vm310_vm0, %v11687_v14  ;;  %8250 = vmatmul.mubr.msk.f32.gmra.mrb[110].mxu0 %vm310_vm0, %v11687_v14  ;;  %v11930_v39 = vpop.f32.mrb[5].mxu0 }
  0xea   :  { %2802 = vmatprep.mubr.f32.mxu1 %v18024_v3  ;;  %2891 = vmatprep.mubr.f32.mxu0 %v18024_v3  ;;  %v12046_v22 = vpop.permute.xlu1 %302 }
  0xeb   :  { %9655 = vmatpush1.bf16.msra.mxu1 %v9654_v29  ;;  %9661 = vmatprep.subr.bf16.mxu0 %v9660_v33 }
  0xec   :  { %v11934_v40 = vpop.f32.mrb[6].mxu1  ;;  %9663 = vmatpush1.bf16.msra.mxu0 %v9662_v35  ;;  %9665 = vmatprep.subr.bf16.mxu1 %v9664_v36  ;;  %v11936_v41 = vpop.f32.mrb[6].mxu0 }
  0xed   :  { %v11938_v44 = vpop.f32.mrb[7].mxu1  ;;  %8247 = vmatmul.mubr.msk.f32.gmra.mrb[112].mxu1 %vm310_vm0, %v11611_v54  ;;  %8251 = vmatmul.mubr.msk.f32.gmra.mrb[112].mxu0 %vm310_vm0, %v11611_v54  ;;  %v11944_v45 = vpop.f32.mrb[7].mxu0 }
  0xee   :  { %2808 = vmatprep.mubr.f32.mxu1 %v18024_v3  ;;  %2897 = vmatprep.mubr.f32.mxu0 %v18024_v3 }
  0xf0   :  { %v11954_v48 = vpop.f32.mrb[8].mxu1  ;;  %v11962_v50 = vpop.f32.mrb[8].mxu0 }
  0xf1   :  { %v11964_v51 = vpop.f32.mrb[9].mxu1  ;;  %8248 = vmatmul.mubr.msk.f32.gmra.mrb[114].mxu1 %vm310_vm0, %v11716_v20  ;;  %8252 = vmatmul.mubr.msk.f32.gmra.mrb[114].mxu0 %vm310_vm0, %v11716_v20  ;;  %v11970_v52 = vpop.f32.mrb[9].mxu0 }
  0xf2   :  { %2968 = vmatprep.mubr.f32.mxu1 %v18024_v3  ;;  %3057 = vmatprep.mubr.f32.mxu0 %v18024_v3 }
  0xf4   :  { %v11974_v55 = vpop.f32.mrb[10].mxu1  ;;  %v11982_v58 = vpop.f32.mrb[10].mxu0 }
  0xf5   :  { %v11984_v59 = vpop.f32.mrb[11].mxu1  ;;  %8253 = vmatmul.mubr.msk.f32.vlgmr.msra.gmra.mrb[116].mxu1 %vm310_vm0, %v11661_v4  ;;  %8257 = vmatmul.mubr.msk.f32.vlgmr.msra.gmra.mrb[116].mxu0 %vm310_vm0, %v11661_v4  ;;  %v11990_v60 = vpop.f32.mrb[11].mxu0 }
  0xf6   :  { %9667 = vmatpush1.bf16.msra.mxu1 %v9666_v53  ;;  %2974 = vmatprep.mubr.f32.mxu1 %v18024_v3  ;;  %v12090_v53 = vadd.f32 %v11856_v6, %v12046_v22 }
  0xf7   :  { %3063 = vmatprep.mubr.f32.mxu0 %v18024_v3  ;;  %9669 = vmatprep.subr.bf16.mxu1 %v9668_v42  ;;  %v12094_v42 = vadd.f32 %v11866_v10, %v12046_v22 }
  0xf8   :  { %v11994_v62 = vpop.f32.mrb[12].mxu1  ;;  %v11996_v43 = vpop.f32.mrb[12].mxu0 }
  0xf9   :  { %v11998_v63 = vpop.f32.mrb[13].mxu1  ;;  %8254 = vmatmul.mubr.msk.f32.gmra.mrb[118].mxu1 %vm310_vm0, %v11687_v14  ;;  %8258 = vmatmul.mubr.msk.f32.gmra.mrb[118].mxu0 %vm310_vm0, %v11687_v14  ;;  %v12004_v0 = vpop.f32.mrb[13].mxu0 }
  0xfa   :  { %2980 = vmatprep.mubr.f32.mxu1 %v18024_v3  ;;  %3069 = vmatprep.mubr.f32.mxu0 %v18024_v3 }
  0xfb   :  { %9671 = vmatpush1.bf16.msra.mxu1 %v9670_v61 }
  0xfc   :  { %v12008_v1 = vpop.f32.mrb[14].mxu1  ;;  %v12010_v2 = vpop.f32.mrb[14].mxu0 }
  0xfd   :  { %v12012_v5 = vpop.f32.mrb[15].mxu1  ;;  %8255 = vmatmul.mubr.msk.f32.gmra.mrb[120].mxu1 %vm310_vm0, %v11611_v54  ;;  %8259 = vmatmul.mubr.msk.f32.gmra.mrb[120].mxu0 %vm310_vm0, %v11611_v54  ;;  %v12018_v7 = vpop.f32.mrb[15].mxu0 }
  0xfe   :  { %2986 = vmatprep.mubr.f32.mxu1 %v18024_v3  ;;  %3075 = vmatprep.mubr.f32.mxu0 %v18024_v3 }
 0x100   :  { %v12022_v8 = vpop.f32.mrb[16].mxu1  ;;  %v12024_v11 = vpop.f32.mrb[16].mxu0 }
 0x101   :  { %v12026_v12 = vpop.f32.mrb[17].mxu1  ;;  %8256 = vmatmul.mubr.msk.f32.gmra.mrb[122].mxu1 %vm310_vm0, %v11716_v20  ;;  %8260 = vmatmul.mubr.msk.f32.gmra.mrb[122].mxu0 %vm310_vm0, %v11716_v20  ;;  %v12032_v15 = vpop.f32.mrb[17].mxu0 }
 0x102   :  { %3146 = vmatprep.mubr.f32.mxu1 %v18024_v3 }
 0x104   :  { %v12035_v16 = vpop.f32.mrb[18].mxu1  ;;  %v12037_v17 = vpop.f32.mrb[18].mxu0 }
 0x105   :  { %v12039_v18 = vpop.f32.mrb[19].mxu1  ;;  %8261 = vmatmul.mubr.msk.f32.vlgmr.msra.gmra.mrb[124].mxu1 %vm310_vm0, %v11661_v4  ;;  %v12043_v21 = vpop.f32.mrb[19].mxu0 }
 0x106   :  { %3152 = vmatprep.mubr.f32.mxu1 %v18024_v3  ;;  %v12059_v4 = vpop.permute.xlu0 %292 }
 0x107   :  { %v392_v56 = vadd.f32 %v11878_v13, %v12059_v4  ;;  %v12120_v13 = vadd.f32 %v11922_v37, %v12059_v4 }
 0x108   :  { %v12048_v23 = vpop.f32.mrb[20].mxu1  ;;  %v12050_v24 = vpop.f32.mrb[20].mxu0 }
 0x109   :  { %v12052_v27 = vpop.f32.mrb[21].mxu1  ;;  %8262 = vmatmul.mubr.msk.f32.gmra.mrb[126].mxu1 %vm310_vm0, %v11687_v14  ;;  %v12056_v31 = vpop.f32.mrb[21].mxu0 }
 0x10a   :  { %3158 = vmatprep.mubr.f32.mxu1 %v18024_v3  ;;  %v12072_v14 = vpop.permute.xlu1 %307  ;;  %v12084_v49 = vpop.permute.xlu0 %297 }
 0x10b   :  { %v12104_v57 = vadd.f32 %v11888_v19, %v12072_v14  ;;  %v12112_v6 = vadd.f32 %v11910_v30, %v12084_v49  ;;  %v12132_v30 = vadd.f32 %v11924_v38, %v12059_v4  ;;  %v12146_v38 = vadd.f32 %v11936_v41, %v12084_v49 }
 0x10c   :  { %v12061_v32 = vpop.f32.mrb[22].mxu1  ;;  %v12063_v29 = vpop.f32.mrb[22].mxu0  ;;  %v12152_v37 = vadd.f32 %v11934_v40, %v12084_v49  ;;  %v12167_v40 = vadd.f32 %v11944_v45, %v12084_v49  ;;  %v12180_v41 = vadd.f32 %v11962_v50, %v12046_v22  ;;  %v12185_v45 = vadd.f32 %v11970_v52, %v12046_v22 }
 0x10d   :  { %v12065_v33 = vpop.f32.mrb[23].mxu1  ;;  %8263 = vmatmul.mubr.msk.f32.gmra.mrb[128].mxu1 %vm310_vm0, %v11611_v54  ;;  %v12069_v35 = vpop.f32.mrb[23].mxu0  ;;  %v390_v54 = vadd.f32 %v11864_v9, %v12059_v4  ;;  %v12108_v9 = vadd.f32 %v11901_v26, %v12072_v14  ;;  %v12128_v26 = vadd.f32 %v11920_v34, %v12059_v4 }
 0x10e   :  { %3164 = vmatprep.mubr.f32.mxu1 %v18024_v3 }
 0x10f   :  { %v3171_v3 = vmax.f32 %v390_v54, 0.0 }
 0x110   :  { %v12074_v36 = vpop.f32.mrb[24].mxu1  ;;  %v12076_v46 = vpop.f32.mrb[24].mxu0 }
 0x111   :  { %18163 = vst [vmem:[#allocation2_spill] sm:$0xff] %v12074_v36  ;;  %18164 = vst [vmem:[#allocation3_spill] sm:$0xff] %v12076_v46  ;;  %v12078_v47 = vpop.f32.mrb[25].mxu1  ;;  %8264 = vmatmul.mubr.msk.f32.gmra.mrb[130].mxu1 %vm310_vm0, %v11716_v20  ;;  %v12082_v28 = vpop.f32.mrb[25].mxu0  ;;  %v12100_v20 = vadd.f32 %v11899_v25, %v12084_v49  ;;  %v12193_v36 = vadd.f32 %v11974_v55, %v12072_v14 }
 0x112   :  { %18165 = vst [vmem:[#allocation4_spill] sm:$0xff] %v12078_v47  ;;  %18166 = vst [vmem:[#allocation5_spill] sm:$0xff] %v12082_v28  ;;  %v3236_v47 = vmax.f32 %v12112_v6, 0.0 }
 0x114   :  { %v12114_v10 = vpop.f32.mrb[26].mxu1  ;;  %v12116_v61 = vpop.f32.mrb[26].mxu0 }
 0x115   :  { %18167 = vst [vmem:[#allocation6_spill] sm:$0xff] %v12114_v10  ;;  %18168 = vst [vmem:[#allocation7_spill] sm:$0xff] %v12116_v61  ;;  %v12122_v25 = vpop.f32.mrb[27].mxu1  ;;  %v12124_v19 = vpop.f32.mrb[27].mxu0  ;;  %v12136_v61 = vadd.f32 %v11930_v39, %v12059_v4 }
 0x116   :  { %18169 = vst [vmem:[#allocation8_spill] sm:$0xff] %v12122_v25  ;;  %18170 = vst [vmem:[#allocation9_spill] sm:$0xff] %v12124_v19  ;;  %v3172_v25 = vmax.f32 %v392_v56, 0.0  ;;  %v3235_v19 = vmax.f32 %v12100_v20, 0.0  ;;  %v12156_v56 = vadd.f32 %v11938_v44, %v12084_v49  ;;  %v12172_v20 = vadd.f32 %v11954_v48, %v12046_v22 }
 0x118   :  { %v12148_v54 = vpop.f32.mrb[28].mxu1  ;;  %v1101_v39 = vpop.f32.mrb[28].mxu0 }
 0x119   :  { %18171 = vst [vmem:[#allocation10_spill] sm:$0xff] %v12148_v54  ;;  %v1102_v34 = vadd.f32 %v1101_v39, %v12059_v4  ;;  %v12160_v6 = vpop.f32.mrb[29].mxu1  ;;  %v1103_v28 = vpop.f32.mrb[29].mxu0  ;;  %v12176_v39 = vadd.f32 %v11964_v51, %v12046_v22 }
 0x11a   :  { %18172 = vst [vmem:[#allocation11_spill] sm:$0xff] %v12160_v6  ;;  %v1104_v44 = vadd.f32 %v1103_v28, %v12059_v4 }
 0x11b   :  { %v3187_v10 = vmax.f32 %v1102_v34, 0.0 }
 0x11c   :  { %v3188_v28 = vmax.f32 %v1104_v44, 0.0  ;;  %v12187_v6 = vpop.f32.mrb[30].mxu1  ;;  %v1107_v48 = vpop.f32.mrb[30].mxu0 }
 0x11d   :  { %18173 = vst [vmem:[#allocation12_spill] sm:$0xff] %v12187_v6  ;;  %v12195_v50 = vmax.f32 %v3171_v3, %v3187_v10  ;;  %v1108_v34 = vadd.f32 %v1107_v48, %v12084_v49  ;;  %v12198_v54 = vpop.f32.mrb[31].mxu1  ;;  %v1109_v52 = vpop.f32.mrb[31].mxu0  ;;  %v12203_v6 = vadd.f32 %v11982_v58, %v12072_v14  ;;  %v12218_v58 = vadd.f32 %v11990_v60, %v12072_v14 }
 0x11e   :  { %v12205_v46 = vmax.f32 %v3172_v25, %v3188_v28  ;;  %v1110_v51 = vadd.f32 %v1109_v52, %v12084_v49  ;;  %v12225_v3 = vadd.f32 %v11994_v62, %v12059_v4  ;;  %v12242_v62 = vadd.f32 %v11998_v63, %v12059_v4 }
 0x11f   :  { %18174 = vst [vmem:[#allocation13_spill] sm:$0xff] %v12195_v50  ;;  %v3251_v48 = vmax.f32 %v1108_v34, 0.0  ;;  %v12213_v50 = vadd.f32 %v11984_v59, %v12072_v14 }
 0x120   :  { %18175 = vst [vmem:[#allocation14_spill] sm:$0xff] %v12205_v46  ;;  %v3252_v25 = vmax.f32 %v1110_v51, 0.0  ;;  %v12220_v28 = vpop.f32.mrb[32].mxu1  ;;  %v1113_v52 = vpop.f32.mrb[32].mxu0  ;;  %v12235_v51 = vadd.f32 %v11996_v43, %v12059_v4 }
 0x121   :  { %v12227_v34 = vmax.f32 %v3235_v19, %v3251_v48  ;;  %v1114_v59 = vadd.f32 %v1113_v52, %v12046_v22  ;;  %v12230_v10 = vpop.f32.mrb[33].mxu1  ;;  %v1115_v44 = vpop.f32.mrb[33].mxu0  ;;  %v12246_v19 = vadd.f32 %v12008_v1, %v12084_v49  ;;  %v12250_v48 = vadd.f32 %v12004_v0, %v12059_v4 }
 0x122   :  { %18177 = vst [vmem:[#allocation16_spill] sm:$0xff] %v12230_v10  ;;  %v12237_v46 = vmax.f32 %v3236_v47, %v3252_v25  ;;  %v1116_v55 = vadd.f32 %v1115_v44, %v12046_v22  ;;  %v12256_v44 = vadd.f32 %v12010_v2, %v12084_v49  ;;  %v18180_v0 = vmax.f32 %v12090_v53, 0.0 }
 0x123   :  { %18176 = vst [vmem:[#allocation15_spill] sm:$0xff] %v12227_v34  ;;  %v3315_v52 = vmax.f32 %v1114_v59, 0.0  ;;  %v12275_v34 = vadd.f32 %v12018_v7, %v12084_v49  ;;  %v18183_v1 = vmax.f32 %v12094_v42, 0.0  ;;  %v12292_v42 = vadd.f32 %v12024_v11, %v12046_v22 }
 0x124   :  { %18178 = vst [vmem:[#allocation17_spill] sm:$0xff] %v12237_v46  ;;  %v3316_v25 = vmax.f32 %v1116_v55, 0.0  ;;  %v12258_v63 = vpop.f32.mrb[34].mxu1  ;;  %v1119_v60 = vpop.f32.mrb[34].mxu0  ;;  %v12263_v46 = vadd.f32 %v12012_v5, %v12084_v49  ;;  %v12287_v55 = vadd.f32 %v12022_v8, %v12046_v22  ;;  %v18187_v11 = vmax.f32 %v12108_v9, 0.0 }
 0x125   :  { %18179 = vst [vmem:[#allocation18_spill] sm:$0xff] %v12258_v63  ;;  %v12267_v59 = vmax.f32 %v18180_v0, %v3315_v52  ;;  %v1120_v47 = vadd.f32 %v1119_v60, %v12072_v14  ;;  %v12270_v43 = vpop.f32.mrb[35].mxu1  ;;  %v1121_v2 = vpop.f32.mrb[35].mxu0  ;;  %v18185_v52 = vmax.f32 %v12104_v57, 0.0  ;;  %v12310_v57 = vadd.f32 %v12026_v12, %v12046_v22 }
 0x126   :  { %18182 = vst [vmem:[#allocation20_spill] sm:$0xff] %v12270_v43  ;;  %v12279_v63 = vmax.f32 %v18183_v1, %v3316_v25  ;;  %v1122_v5 = vadd.f32 %v1121_v2, %v12072_v14  ;;  %v18190_v12 = vmax.f32 %v12120_v13, 0.0  ;;  %v18191_v9 = vmax.f32 %v12132_v30, 0.0 }
 0x127   :  { %18181 = vst [vmem:[#allocation19_spill] sm:$0xff] %v12267_v59  ;;  %v3379_v0 = vmax.f32 %v1120_v47, 0.0  ;;  %v12346_v30 = vadd.f32 %v12037_v17, %v12072_v14  ;;  %v18198_v17 = vmax.f32 %v12156_v56, 0.0 }
 0x128   :  { %18184 = vst [vmem:[#allocation21_spill] sm:$0xff] %v12279_v63  ;;  %v3380_v25 = vmax.f32 %v1122_v5, 0.0  ;;  %v1190_v1 = vpop.f32.mrb[36].mxu1  ;;  %v1279_v2 = vpop.f32.mrb[36].mxu0 }
 0x129   :  { %v12297_v63 = vmax.f32 %v18185_v52, %v3379_v0  ;;  %v1191_v47 = vadd.f32 %v1190_v1, %v12059_v4  ;;  %v1280_v8 = vadd.f32 %v1279_v2, %v12059_v4  ;;  %v1192_v60 = vpop.f32.mrb[37].mxu1  ;;  %v1281_v59 = vpop.f32.mrb[37].mxu0  ;;  %v12314_v52 = vadd.f32 %v12032_v15, %v12046_v22 }
 0x12a   :  { %v12304_v43 = vmax.f32 %v18187_v11, %v3380_v25  ;;  %v1193_v5 = vadd.f32 %v1192_v60, %v12059_v4  ;;  %v1282_v53 = vadd.f32 %v1281_v59, %v12059_v4  ;;  %v18189_v59 = vmax.f32 %v12128_v26, 0.0 }
 0x12b   :  { %18186 = vst [vmem:[#allocation22_spill] sm:$0xff] %v12297_v63  ;;  %v3189_v0 = vmax.f32 %v1191_v47, 0.0  ;;  %v3191_v1 = vmax.f32 %v1280_v8, 0.0 }
 0x12c   :  { %18188 = vst [vmem:[#allocation23_spill] sm:$0xff] %v12304_v43  ;;  %v3190_v25 = vmax.f32 %v1193_v5, 0.0  ;;  %v3192_v11 = vmax.f32 %v1282_v53, 0.0  ;;  %v1196_v7 = vpop.f32.mrb[38].mxu1  ;;  %v1285_v60 = vpop.f32.mrb[38].mxu0  ;;  %v18192_v53 = vmax.f32 %v12136_v61, 0.0 }
 0x12d   :  { %v12320_v43 = vmax.f32 %v18189_v59, %v3189_v0  ;;  %v12324_v63 = vmax.f32 %v18190_v12, %v3191_v1  ;;  %v1197_v15 = vadd.f32 %v1196_v7, %v12084_v49  ;;  %v1286_v47 = vadd.f32 %v1285_v60, %v12084_v49  ;;  %v1198_v8 = vpop.f32.mrb[39].mxu1  ;;  %v1287_v2 = vpop.f32.mrb[39].mxu0 }
 0x12e   :  { %v12330_v5 = vmax.f32 %v18191_v9, %v3190_v25  ;;  %v12334_v10 = vmax.f32 %v18192_v53, %v3192_v11  ;;  %v1199_v26 = vadd.f32 %v1198_v8, %v12084_v49  ;;  %v1288_v13 = vadd.f32 %v1287_v2, %v12084_v49 }
 0x12f   :  { %v3253_v1 = vmax.f32 %v1197_v15, 0.0  ;;  %v3255_v60 = vmax.f32 %v1286_v47, 0.0  ;;  %v12342_v59 = vadd.f32 %v12035_v16, %v12072_v14  ;;  %v18194_v2 = vmax.f32 %v12152_v37, 0.0 }
 0x130   :  { %18193 = vst [vmem:[#allocation24_spill] sm:$0xff] %v12334_v10  ;;  %v3254_v61 = vmax.f32 %v1199_v26, 0.0  ;;  %v3256_v9 = vmax.f32 %v1288_v13, 0.0  ;;  %v1202_v25 = vpop.f32.mrb[40].mxu1  ;;  %v1291_v11 = vpop.f32.mrb[40].mxu0  ;;  %v18196_v8 = vmax.f32 %v12146_v38, 0.0 }
 0x131   :  { %v12350_v12 = vmax.f32 %v18194_v2, %v3253_v1  ;;  %v1203_v47 = vadd.f32 %v1202_v25, %v12046_v22  ;;  %v1292_v16 = vadd.f32 %v1291_v11, %v12046_v22  ;;  %v1204_v53 = vpop.f32.mrb[41].mxu1  ;;  %v1293_v7 = vpop.f32.mrb[41].mxu0  ;;  %v18200_v13 = vmax.f32 %v12167_v40, 0.0 }
 0x132   :  { %v12354_v15 = vmax.f32 %v18196_v8, %v3255_v60  ;;  %v12360_v26 = vmax.f32 %v18198_v17, %v3254_v61  ;;  %v1205_v37 = vadd.f32 %v1204_v53, %v12046_v22  ;;  %v1294_v38 = vadd.f32 %v1293_v7, %v12046_v22 }
 0x133   :  { %18195 = vst [vmem:[#allocation25_spill] sm:$0xff] %v12350_v12  ;;  %v12364_v0 = vmax.f32 %v18200_v13, %v3256_v9  ;;  %v12370_v1 = vadd.f32 %v12039_v18, %v12072_v14  ;;  %v12374_v60 = vadd.f32 %v12043_v21, %v12072_v14  ;;  %v3317_v25 = vmax.f32 %v1203_v47, 0.0 }
 0x134   :  { %18197 = vst [vmem:[#allocation26_spill] sm:$0xff] %v12354_v15  ;;  %18199 = vst [vmem:[#allocation27_spill] sm:$0xff] %v12360_v26  ;;  %v3319_v56 = vmax.f32 %v1292_v16, 0.0  ;;  %v3318_v9 = vmax.f32 %v1205_v37, 0.0  ;;  %v3320_v11 = vmax.f32 %v1294_v38, 0.0  ;;  %v1208_v2 = vpop.f32.mrb[42].mxu1 }
 0x135   :  { %18201 = vst [vmem:[#allocation28_spill] sm:$0xff] %v12364_v0  ;;  %v1297_v8 = vpop.f32.mrb[42].mxu0  ;;  %v18202_v7 = vmax.f32 %v12172_v20, 0.0  ;;  %v18204_v18 = vmax.f32 %v12180_v41, 0.0  ;;  %v1209_v21 = vadd.f32 %v1208_v2, %v12072_v14  ;;  %v1210_v16 = vpop.f32.mrb[43].mxu1  ;;  %v18206_v40 = vmax.f32 %v12176_v39, 0.0 }
 0x136   :  { %v1298_v47 = vadd.f32 %v1297_v8, %v12072_v14  ;;  %v1299_v13 = vpop.f32.mrb[43].mxu0  ;;  %v18208_v38 = vmax.f32 %v12185_v45, 0.0  ;;  %v1211_v20 = vadd.f32 %v1210_v16, %v12072_v14  ;;  %v12406_v39 = vadd.f32 %v12050_v24, %v12059_v4  ;;  %v4753_v0 = vld [vmem:[%s18019_s3 + $0x170] sm:$0xff] }
 0x137   :  { %v12380_v53 = vmax.f32 %v18202_v7, %v3317_v25  ;;  %v12384_v17 = vmax.f32 %v18204_v18, %v3319_v56  ;;  %v12390_v37 = vmax.f32 %v18206_v40, %v3318_v9  ;;  %v1300_v41 = vadd.f32 %v1299_v13, %v12072_v14 }
 0x138   :  { %v12394_v61 = vmax.f32 %v18208_v38, %v3320_v11  ;;  %v3381_v2 = vmax.f32 %v1209_v21, 0.0  ;;  %v3383_v8 = vmax.f32 %v1298_v47, 0.0  ;;  %v12402_v7 = vadd.f32 %v12048_v23, %v12059_v4  ;;  %v1368_v9 = vpop.f32.mrb[44].mxu1  ;;  %v1457_v11 = vpop.f32.mrb[44].mxu0 }
 0x139   :  { %18203 = vst [vmem:[#allocation29_spill] sm:$0xff] %v12380_v53  ;;  %18205 = vst [vmem:[#allocation30_spill] sm:$0xff] %v12384_v17  ;;  %v3382_v45 = vmax.f32 %v1211_v20, 0.0  ;;  %v3384_v40 = vmax.f32 %v1300_v41, 0.0  ;;  %v18210_v18 = vmax.f32 %v12193_v36, 0.0  ;;  %v18212_v13 = vmax.f32 %v12203_v6, 0.0 }
 0x13a   :  { %18207 = vst [vmem:[#allocation31_spill] sm:$0xff] %v12390_v37  ;;  %18209 = vst [vmem:[#allocation32_spill] sm:$0xff] %v12394_v61  ;;  %v1369_v47 = vadd.f32 %v1368_v9, %v12059_v4  ;;  %v1458_v23 = vadd.f32 %v1457_v11, %v12059_v4  ;;  %v1370_v38 = vpop.f32.mrb[45].mxu1  ;;  %v1459_v56 = vpop.f32.mrb[45].mxu0  ;;  %v18214_v24 = vmax.f32 %v12213_v50, 0.0  ;;  %v18216_v41 = vmax.f32 %v12218_v58, 0.0 }
 0x13b   :  { %v12410_v16 = vmax.f32 %v18210_v18, %v3381_v2  ;;  %v12414_v21 = vmax.f32 %v18212_v13, %v3383_v8  ;;  %v1371_v36 = vadd.f32 %v1370_v38, %v12059_v4  ;;  %v1460_v6 = vadd.f32 %v1459_v56, %v12059_v4  ;;  %v4722_v53 = vld [vmem:[%s18019_s3 + $0x78] sm:$0xff] }
 0x13c   :  { %v12420_v20 = vmax.f32 %v18214_v24, %v3382_v45  ;;  %v12424_v25 = vmax.f32 %v18216_v41, %v3384_v40  ;;  %v12430_v2 = vadd.f32 %v12052_v27, %v12059_v4  ;;  %v12434_v8 = vadd.f32 %v12056_v31, %v12059_v4  ;;  %v1374_v18 = vpop.f32.mrb[46].mxu1  ;;  %v1463_v13 = vpop.f32.mrb[46].mxu0 }
 0x13d   :  { %18211 = vst [vmem:[#allocation33_spill] sm:$0xff] %v12410_v16  ;;  %18213 = vst [vmem:[#allocation34_spill] sm:$0xff] %v12414_v21  ;;  %v3193_v9 = vmax.f32 %v1369_v47, 0.0  ;;  %v3195_v50 = vmax.f32 %v1458_v23, 0.0  ;;  %v3194_v40 = vmax.f32 %v1371_v36, 0.0  ;;  %v3196_v11 = vmax.f32 %v1460_v6, 0.0 }
 0x13e   :  { %18215 = vst [vmem:[#allocation35_spill] sm:$0xff] %v12420_v20  ;;  %18217 = vst [vmem:[#allocation36_spill] sm:$0xff] %v12424_v25  ;;  %v18218_v56 = vmax.f32 %v12225_v3, 0.0  ;;  %v18220_v27 = vmax.f32 %v12235_v51, 0.0  ;;  %v1375_v31 = vadd.f32 %v1374_v18, %v12084_v49  ;;  %v1464_v47 = vadd.f32 %v1463_v13, %v12084_v49  ;;  %v1376_v23 = vpop.f32.mrb[47].mxu1  ;;  %v1465_v41 = vpop.f32.mrb[47].mxu0 }
 0x13f   :  { %v18222_v58 = vmax.f32 %v12242_v62, 0.0  ;;  %v18224_v6 = vmax.f32 %v12250_v48, 0.0  ;;  %v1377_v3 = vadd.f32 %v1376_v23, %v12084_v49  ;;  %v1466_v51 = vadd.f32 %v1465_v41, %v12084_v49 }
 0x140   :  { %v12440_v38 = vmax.f32 %v18218_v56, %v3193_v9  ;;  %v12444_v24 = vmax.f32 %v18220_v27, %v3195_v50  ;;  %v3257_v18 = vmax.f32 %v1375_v31, 0.0  ;;  %v3259_v13 = vmax.f32 %v1464_v47, 0.0 }
 0x141   :  { %v12450_v36 = vmax.f32 %v18222_v58, %v3194_v40  ;;  %v12454_v45 = vmax.f32 %v18224_v6, %v3196_v11  ;;  %v12462_v56 = vadd.f32 %v12061_v32, %v12084_v49  ;;  %v12466_v62 = vadd.f32 %v12063_v29, %v12084_v49  ;;  %v1380_v40 = vpop.f32.mrb[48].mxu1  ;;  %v1469_v11 = vpop.f32.mrb[48].mxu0 }
 0x142   :  { %18219 = vst [vmem:[#allocation37_spill] sm:$0xff] %v12440_v38  ;;  %18221 = vst [vmem:[#allocation38_spill] sm:$0xff] %v12444_v24  ;;  %v3258_v48 = vmax.f32 %v1377_v3, 0.0  ;;  %v3260_v58 = vmax.f32 %v1466_v51, 0.0  ;;  %v18226_v27 = vmax.f32 %v12246_v19, 0.0  ;;  %v18228_v41 = vmax.f32 %v12256_v44, 0.0 }
 0x143   :  { %18223 = vst [vmem:[#allocation39_spill] sm:$0xff] %v12450_v36  ;;  %18225 = vst [vmem:[#allocation40_spill] sm:$0xff] %v12454_v45  ;;  %v1381_v47 = vadd.f32 %v1380_v40, %v12046_v22  ;;  %v1470_v32 = vadd.f32 %v1469_v11, %v12046_v22  ;;  %v1382_v6 = vpop.f32.mrb[49].mxu1  ;;  %v1471_v50 = vpop.f32.mrb[49].mxu0  ;;  %v18230_v29 = vmax.f32 %v12263_v46, 0.0  ;;  %v18232_v51 = vmax.f32 %v12275_v34, 0.0 }
 0x144   :  { %v12470_v23 = vmax.f32 %v18226_v27, %v3257_v18  ;;  %v12474_v31 = vmax.f32 %v18228_v41, %v3259_v13  ;;  %v1383_v19 = vadd.f32 %v1382_v6, %v12046_v22  ;;  %v1472_v44 = vadd.f32 %v1471_v50, %v12046_v22  ;;  %v1386_v27 = vpop.f32.mrb[50].mxu1  ;;  %v1475_v41 = vpop.f32.mrb[50].mxu0 }
 0x145   :  { %v12480_v3 = vmax.f32 %v18230_v29, %v3258_v48  ;;  %v12484_v9 = vmax.f32 %v18232_v51, %v3260_v58  ;;  %v12490_v18 = vadd.f32 %v12065_v33, %v12084_v49  ;;  %v12494_v13 = vadd.f32 %v12069_v35, %v12084_v49  ;;  %v1477_v51 = vpop.f32.mrb[51].mxu0 }
 0x146   :  { %18227 = vst [vmem:[#allocation41_spill] sm:$0xff] %v12470_v23  ;;  %18229 = vst [vmem:[#allocation42_spill] sm:$0xff] %v12474_v31  ;;  %v3321_v40 = vmax.f32 %v1381_v47, 0.0  ;;  %v3323_v46 = vmax.f32 %v1470_v32, 0.0  ;;  %v3322_v58 = vmax.f32 %v1383_v19, 0.0  ;;  %v3324_v11 = vmax.f32 %v1472_v44, 0.0 }
 0x147   :  { %18231 = vst [vmem:[#allocation43_spill] sm:$0xff] %v12480_v3  ;;  %18233 = vst [vmem:[#allocation44_spill] sm:$0xff] %v12484_v9  ;;  %v18234_v50 = vmax.f32 %v12287_v55, 0.0  ;;  %v18236_v33 = vmax.f32 %v12292_v42, 0.0  ;;  %v1387_v35 = vadd.f32 %v1386_v27, %v12072_v14  ;;  %v1476_v47 = vadd.f32 %v1475_v41, %v12072_v14  ;;  %v1388_v32 = vpop.f32.mrb[51].mxu1  ;;  %v4749_v31 = vld [vmem:[%s18019_s3 + $0x150] sm:$0xff] }
 0x148   :  { %v18238_v34 = vmax.f32 %v12310_v57, 0.0  ;;  %v18240_v44 = vmax.f32 %v12314_v52, 0.0  ;;  %v1389_v55 = vadd.f32 %v1388_v32, %v12072_v14  ;;  %v1478_v42 = vadd.f32 %v1477_v51, %v12072_v14  ;;  %v18243_v57 = vld [vmem:[#allocation3_spill] sm:$0xff]  ;;  %v1635_v32 = vpop.f32.mrb[52].mxu0 }
 0x149   :  { %v12500_v6 = vmax.f32 %v18234_v50, %v3321_v40  ;;  %v12504_v29 = vmax.f32 %v18236_v33, %v3323_v46  ;;  %v3246_v40 = vmax.f32 %v12490_v18, 0.0  ;;  %v3248_v46 = vmax.f32 %v12494_v13, 0.0  ;;  %v18242_v50 = vld [vmem:[#allocation2_spill] sm:$0xff] }
 0x14a   :  { %v12510_v19 = vmax.f32 %v18238_v34, %v3322_v58  ;;  %v12514_v48 = vmax.f32 %v18240_v44, %v3324_v11  ;;  %v3385_v27 = vmax.f32 %v1387_v35, 0.0  ;;  %v3387_v41 = vmax.f32 %v1476_v47, 0.0  ;;  %v1546_v11 = vpop.f32.mrb[52].mxu1 }
 0x14b   :  { %18235 = vst [vmem:[#allocation45_spill] sm:$0xff] %v12500_v6  ;;  %18237 = vst [vmem:[#allocation46_spill] sm:$0xff] %v12504_v29  ;;  %v12522_v33 = vadd.f32 %v18242_v50, %v12046_v22  ;;  %v12526_v34 = vadd.f32 %v18243_v57, %v12046_v22  ;;  %v3386_v52 = vmax.f32 %v1389_v55, 0.0  ;;  %v3388_v58 = vmax.f32 %v1478_v42, 0.0  ;;  %v1548_v50 = vpop.f32.mrb[53].mxu1  ;;  %v4747_v29 = vld [vmem:[%s18019_s3 + $0x140] sm:$0xff] }
 0x14c   :  { %18239 = vst [vmem:[#allocation47_spill] sm:$0xff] %v12510_v19  ;;  %18241 = vst [vmem:[#allocation48_spill] sm:$0xff] %v12514_v48  ;;  %v18244_v51 = vmax.f32 %v12342_v59, 0.0  ;;  %v18246_v18 = vmax.f32 %v12346_v30, 0.0  ;;  %v1547_v35 = vadd.f32 %v1546_v11, %v12059_v4  ;;  %v1636_v47 = vadd.f32 %v1635_v32, %v12059_v4  ;;  %v1637_v48 = vpop.f32.mrb[53].mxu0  ;;  %v18253_v11 = vld [vmem:[#allocation5_spill] sm:$0xff] }
 0x14d   :  { %v18248_v57 = vmax.f32 %v12370_v1, 0.0  ;;  %v18250_v42 = vmax.f32 %v12374_v60, 0.0  ;;  %v1549_v59 = vadd.f32 %v1548_v50, %v12059_v4  ;;  %v1638_v30 = vadd.f32 %v1637_v48, %v12059_v4 }
 0x14e   :  { %v12530_v44 = vmax.f32 %v18244_v51, %v3385_v27  ;;  %v12534_v13 = vmax.f32 %v18246_v18, %v3387_v41  ;;  %v18252_v27 = vld [vmem:[#allocation4_spill] sm:$0xff]  ;;  %v938_v32 = vadd.f32 %v18253_v11, %v12046_v22  ;;  %v3197_v51 = vmax.f32 %v1547_v35, 0.0 }
 0x14f   :  { %v12540_v55 = vmax.f32 %v18248_v57, %v3386_v52  ;;  %v12544_v19 = vmax.f32 %v18250_v42, %v3388_v58  ;;  %v849_v41 = vadd.f32 %v18252_v27, %v12046_v22  ;;  %v3199_v18 = vmax.f32 %v1636_v47, 0.0  ;;  %v1552_v58 = vpop.f32.mrb[54].mxu1  ;;  %v1641_v42 = vpop.f32.mrb[54].mxu0 }
 0x150   :  { %18245 = vst [vmem:[#allocation2_spill] sm:$0xff] %v12530_v44  ;;  %18247 = vst [vmem:[#allocation3_spill] sm:$0xff] %v12534_v13  ;;  %v3309_v1 = vmax.f32 %v12522_v33, 0.0  ;;  %v3311_v52 = vmax.f32 %v12526_v34, 0.0  ;;  %v3198_v57 = vmax.f32 %v1549_v59, 0.0  ;;  %v3200_v60 = vmax.f32 %v1638_v30, 0.0 }
 0x151   :  { %18249 = vst [vmem:[#allocation49_spill] sm:$0xff] %v12540_v55  ;;  %18251 = vst [vmem:[#allocation50_spill] sm:$0xff] %v12544_v19  ;;  %v18254_v50 = vmax.f32 %v12402_v7, 0.0  ;;  %v18256_v48 = vmax.f32 %v12406_v39, 0.0  ;;  %v1553_v11 = vadd.f32 %v1552_v58, %v12084_v49  ;;  %v1642_v35 = vadd.f32 %v1641_v42, %v12084_v49  ;;  %v1554_v47 = vpop.f32.mrb[55].mxu1  ;;  %v1643_v33 = vpop.f32.mrb[55].mxu0 }
 0x152   :  { %v18258_v34 = vmax.f32 %v12430_v2, 0.0  ;;  %v18260_v30 = vmax.f32 %v12434_v8, 0.0  ;;  %v1555_v7 = vadd.f32 %v1554_v47, %v12084_v49  ;;  %v1644_v39 = vadd.f32 %v1643_v33, %v12084_v49  ;;  %v18262_v42 = vld [vmem:[#allocation6_spill] sm:$0xff]  ;;  %v1647_v8 = vpop.f32.mrb[56].mxu0 }
 0x153   :  { %v12556_v19 = vmax.f32 %v18254_v50, %v3197_v51  ;;  %v12560_v27 = vmax.f32 %v18256_v48, %v3199_v18  ;;  %v3310_v51 = vmax.f32 %v849_v41, 0.0  ;;  %v3312_v18 = vmax.f32 %v938_v32, 0.0  ;;  %v1649_v33 = vpop.f32.mrb[57].mxu0 }
 0x154   :  { %v12566_v59 = vmax.f32 %v18258_v34, %v3198_v57  ;;  %v12570_v55 = vmax.f32 %v18260_v30, %v3200_v60  ;;  %v3261_v50 = vmax.f32 %v1553_v11, 0.0  ;;  %v3263_v58 = vmax.f32 %v1642_v35, 0.0 }
 0x155   :  { %18255 = vst [vmem:[#allocation4_spill] sm:$0xff] %v12556_v19  ;;  %18257 = vst [vmem:[#allocation5_spill] sm:$0xff] %v12560_v27  ;;  %v853_v48 = vadd.f32 %v18262_v42, %v12072_v14  ;;  %v18263_v27 = vld [vmem:[#allocation7_spill] sm:$0xff]  ;;  %v3262_v57 = vmax.f32 %v1555_v7, 0.0  ;;  %v3264_v34 = vmax.f32 %v1644_v39, 0.0  ;;  %v18264_v60 = vmax.f32 %v12462_v56, 0.0 }
 0x156   :  { %18259 = vst [vmem:[#allocation51_spill] sm:$0xff] %v12566_v59  ;;  %18261 = vst [vmem:[#allocation52_spill] sm:$0xff] %v12570_v55  ;;  %v942_v2 = vadd.f32 %v18263_v27, %v12072_v14  ;;  %v1558_v59 = vpop.f32.mrb[56].mxu1  ;;  %v18266_v47 = vmax.f32 %v12466_v62, 0.0  ;;  %v1648_v11 = vadd.f32 %v1647_v8, %v12046_v22  ;;  %v1650_v56 = vadd.f32 %v1649_v33, %v12046_v22  ;;  %v18270_v39 = vld [vmem:[#allocation8_spill] sm:$0xff]  ;;  %v18271_v62 = vld [vmem:[#allocation9_spill] sm:$0xff] }
 0x157   :  { %v12580_v30 = vmax.f32 %v18264_v60, %v3261_v50  ;;  %v1559_v32 = vadd.f32 %v1558_v59, %v12046_v22  ;;  %v1560_v35 = vpop.f32.mrb[57].mxu1  ;;  %v12588_v42 = vmax.f32 %v3246_v40, %v3262_v57  ;;  %v12590_v27 = vmax.f32 %v3248_v46, %v3264_v34  ;;  %v1653_v57 = vpop.f32.mrb[58].mxu0  ;;  %v4731_v19 = vld [vmem:[%s18019_s3 + $0xc0] sm:$0xff] }
 0x158   :  { %v12584_v41 = vmax.f32 %v18266_v47, %v3263_v58  ;;  %v1561_v7 = vadd.f32 %v1560_v35, %v12046_v22  ;;  %v855_v50 = vadd.f32 %v18270_v39, %v12072_v14  ;;  %v944_v58 = vadd.f32 %v18271_v62, %v12072_v14  ;;  %v1564_v40 = vpop.f32.mrb[58].mxu1 }
 0x159   :  { %18265 = vst [vmem:[#allocation6_spill] sm:$0xff] %v12580_v30  ;;  %18268 = vst [vmem:[#allocation53_spill] sm:$0xff] %v12588_v42  ;;  %v3325_v60 = vmax.f32 %v1559_v32, 0.0  ;;  %v3327_v59 = vmax.f32 %v1648_v11, 0.0  ;;  %v3373_v47 = vmax.f32 %v853_v48, 0.0  ;;  %v3375_v8 = vmax.f32 %v942_v2, 0.0 }
 0x15a   :  { %18267 = vst [vmem:[#allocation7_spill] sm:$0xff] %v12584_v41  ;;  %18269 = vst [vmem:[#allocation54_spill] sm:$0xff] %v12590_v27  ;;  %v3326_v41 = vmax.f32 %v1561_v7, 0.0  ;;  %v3328_v30 = vmax.f32 %v1650_v56, 0.0  ;;  %v1565_v35 = vadd.f32 %v1564_v40, %v12072_v14  ;;  %v1654_v33 = vadd.f32 %v1653_v57, %v12072_v14  ;;  %v1566_v39 = vpop.f32.mrb[59].mxu1  ;;  %v1655_v27 = vpop.f32.mrb[59].mxu0 }
 0x15b   :  { %v12598_v46 = vmax.f32 %v3309_v1, %v3325_v60  ;;  %v12600_v34 = vmax.f32 %v3311_v52, %v3327_v59  ;;  %v1567_v48 = vadd.f32 %v1566_v39, %v12072_v14  ;;  %v1656_v2 = vadd.f32 %v1655_v27, %v12072_v14  ;;  %v18276_v1 = vld [vmem:[#allocation10_spill] sm:$0xff]  ;;  %v18277_v60 = vld [vmem:[#allocation11_spill] sm:$0xff] }
 0x15c   :  { %v12604_v42 = vmax.f32 %v3310_v51, %v3326_v41  ;;  %v12606_v32 = vmax.f32 %v3312_v18, %v3328_v30  ;;  %v3374_v11 = vmax.f32 %v855_v50, 0.0  ;;  %v1013_v7 = vadd.f32 %v18276_v1, %v12059_v4  ;;  %v1724_v51 = vpop.f32.mrb[60].mxu1  ;;  %v12614_v41 = vpop.f32.mrb[60].mxu0 }
 0x15d   :  { %18272 = vst [vmem:[#allocation8_spill] sm:$0xff] %v12598_v46  ;;  %18273 = vst [vmem:[#allocation9_spill] sm:$0xff] %v12600_v34  ;;  %v3389_v52 = vmax.f32 %v1565_v35, 0.0  ;;  %v3391_v56 = vmax.f32 %v1654_v33, 0.0  ;;  %v3376_v62 = vmax.f32 %v944_v58, 0.0  ;;  %v1015_v59 = vadd.f32 %v18277_v60, %v12059_v4  ;;  %v1726_v50 = vpop.f32.mrb[61].mxu1 }
 0x15e   :  { %18274 = vst [vmem:[#allocation55_spill] sm:$0xff] %v12604_v42  ;;  %18275 = vst [vmem:[#allocation56_spill] sm:$0xff] %v12606_v32  ;;  %v3390_v40 = vmax.f32 %v1567_v48, 0.0  ;;  %v3392_v57 = vmax.f32 %v1656_v2, 0.0  ;;  %v1725_v27 = vadd.f32 %v1724_v51, %v12059_v4  ;;  %v12621_v39 = vpop.f32.mrb[61].mxu0  ;;  %v18280_v35 = vld [vmem:[#allocation12_spill] sm:$0xff]  ;;  %v1727_v48 = vadd.f32 %v1726_v50, %v12059_v4 }
 0x15f   :  { %v12616_v18 = vmax.f32 %v3373_v47, %v3389_v52  ;;  %v12618_v30 = vmax.f32 %v3375_v8, %v3391_v56  ;;  %v1019_v58 = vadd.f32 %v18280_v35, %v12084_v49  ;;  %v3185_v2 = vmax.f32 %v1013_v7, 0.0  ;;  %v1730_v60 = vpop.f32.mrb[62].mxu1  ;;  %v12632_v51 = vpop.f32.mrb[62].mxu0 }
 0x160   :  { %v12625_v33 = vmax.f32 %v3374_v11, %v3390_v40  ;;  %v12627_v1 = vmax.f32 %v3376_v62, %v3392_v57  ;;  %v1021_v47 = vadd.f32 %v12198_v54, %v12084_v49  ;;  %v3201_v8 = vmax.f32 %v1725_v27, 0.0  ;;  %v1732_v11 = vpop.f32.mrb[63].mxu1  ;;  %v12637_v40 = vpop.f32.mrb[63].mxu0  ;;  %v4723_v54 = vld [vmem:[%s18019_s3 + $0x80] sm:$0xff] }
 0x161   :  { %18278 = vst [vmem:[#allocation10_spill] sm:$0xff] %v12616_v18  ;;  %18279 = vst [vmem:[#allocation11_spill] sm:$0xff] %v12618_v30  ;;  %v3186_v52 = vmax.f32 %v1015_v59, 0.0  ;;  %v3202_v56 = vmax.f32 %v1727_v48, 0.0  ;;  %v1731_v35 = vadd.f32 %v1730_v60, %v12084_v49  ;;  %v3249_v62 = vmax.f32 %v1019_v58, 0.0  ;;  %v4724_v59 = vld [vmem:[%s18019_s3 + $0x88] sm:$0xff] }
 0x162   :  { %18281 = vst [vmem:[#allocation12_spill] sm:$0xff] %v12625_v33  ;;  %18282 = vst [vmem:[#allocation57_spill] sm:$0xff] %v12627_v1  ;;  %v12634_v30 = vmax.f32 %v3185_v2, %v3201_v8  ;;  %v1733_v7 = vadd.f32 %v1732_v11, %v12084_v49  ;;  %v4755_v27 = vld [vmem:[%s18019_s3 + $0x180] sm:$0xff]  ;;  %v3250_v50 = vmax.f32 %v1021_v47, 0.0  ;;  %v1025_v58 = vadd.f32 %v12220_v28, %v12046_v22  ;;  %v4756_v8 = vld [vmem:[%s18019_s3 + $0x188] sm:$0xff]  ;;  %v12664_v28 = vpop.f32.mrb[64].mxu0 }
 0x163   :  { %v12639_v57 = vmax.f32 %v3186_v52, %v3202_v56  ;;  %v3265_v48 = vmax.f32 %v1731_v35, 0.0  ;;  %v9672_v2 = vpack.c.bf16 %v4724_v59, %v4723_v54  ;;  %v4707_v52 = vld [vmem:[%s18019_s3] sm:$0xff]  ;;  %v4708_v56 = vld [vmem:[%s18019_s3 + $0x8] sm:$0xff]  ;;  %v18285_v60 = vld [vmem:[#allocation16_spill] sm:$0xff]  ;;  %v9704_v35 = vpack.c.bf16 %v4756_v8, %v4755_v27 }
 0x164   :  { %18283 = vst [vmem:[#allocation58_spill] sm:$0xff] %v12634_v30  ;;  %v1027_v47 = vadd.f32 %v18285_v60, %v12046_v22  ;;  %v3266_v11 = vmax.f32 %v1733_v7, 0.0  ;;  %v9674_v54 = vpack.c.bf16 %v4708_v56, %v4707_v52  ;;  %v4739_v59 = vld [vmem:[%s18019_s3 + $0x100] sm:$0xff]  ;;  %v4740_v30 = vld [vmem:[%s18019_s3 + $0x108] sm:$0xff]  ;;  %v12675_v60 = vpop.f32.mrb[65].mxu0  ;;  %v3313_v8 = vmax.f32 %v1025_v58, 0.0 }
 0x165   :  { %18284 = vst [vmem:[#allocation59_spill] sm:$0xff] %v12639_v57  ;;  %v1736_v57 = vpop.f32.mrb[64].mxu1  ;;  %v12672_v1 = vmax.f32 %v3249_v62, %v3265_v48  ;;  %9673 = vmatprep.subr.bf16.mxu0 %v9672_v2  ;;  %v9706_v7 = vpack.c.bf16 %v4740_v30, %v4739_v59  ;;  %9705 = vmatprep.subr.bf16.mxu1 %v9704_v35  ;;  %v18288_v52 = vld [vmem:[#allocation18_spill] sm:$0xff]  ;;  %v12684_v2 = vpop.f32.mrb[66].mxu0  ;;  %v4726_v58 = vld [vmem:[%s18019_s3 + $0x98] sm:$0xff] }
 0x166   :  { %v1737_v33 = vadd.f32 %v1736_v57, %v12046_v22  ;;  %v1738_v18 = vpop.f32.mrb[65].mxu1  ;;  %v12677_v32 = vmax.f32 %v3250_v50, %v3266_v11  ;;  %9675 = vmatpush3.bf16.msra.mxu0 %v9674_v54  ;;  %v1031_v56 = vadd.f32 %v18288_v52, %v12072_v14  ;;  %v3314_v62 = vmax.f32 %v1027_v47, 0.0  ;;  %v18289_v57 = vld [vmem:[#allocation20_spill] sm:$0xff]  ;;  %v12689_v11 = vpop.f32.mrb[67].mxu0  ;;  %v4758_v54 = vld [vmem:[%s18019_s3 + $0x198] sm:$0xff] }
 0x167   :  { %18286 = vst [vmem:[#allocation16_spill] sm:$0xff] %v12672_v1  ;;  %v1739_v27 = vadd.f32 %v1738_v18, %v12046_v22  ;;  %9707 = vmatpush3.bf16.msra.mxu1 %v9706_v7  ;;  %v1033_v48 = vadd.f32 %v18289_v57, %v12072_v14  ;;  %v1742_v34 = vpop.f32.mrb[66].mxu1  ;;  %v4757_v47 = vld [vmem:[%s18019_s3 + $0x190] sm:$0xff]  ;;  %v4710_v52 = vld [vmem:[%s18019_s3 + $0x18] sm:$0xff]  ;;  %v10727_v25 = vmov 1934713408   ;;  %v12950_v26 = vadd.f32 %v12664_v28, %v12046_v22 }
 0x168   :  { %18287 = vst [vmem:[#allocation60_spill] sm:$0xff] %v12677_v32  ;;  %v3329_v42 = vmax.f32 %v1737_v33, 0.0  ;;  %v1743_v18 = vadd.f32 %v1742_v34, %v12072_v14  ;;  %v1744_v50 = vpop.f32.mrb[67].mxu1  ;;  %v4725_v33 = vld [vmem:[%s18019_s3 + $0x90] sm:$0xff]  ;;  %v3377_v59 = vmax.f32 %v1031_v56, 0.0  ;;  %v4746_v32 = vld [vmem:[%s18019_s3 + $0x138] sm:$0xff]  ;;  %v3686_v20 = vunpack.c.l.s4 %v10727_v25 }
 0x169   :  { %v3330_v1 = vmax.f32 %v1739_v27, 0.0  ;;  %v9676_v34 = vpack.c.bf16 %v4726_v58, %v4725_v33  ;;  %v9708_v27 = vpack.c.bf16 %v4758_v54, %v4757_v47  ;;  %v12717_v33 = vpop.f32.mrb[68].mxu0  ;;  %v12963_v15 = vadd.f32 %v12689_v11, %v12072_v14 }
 0x16a   :  { %v12686_v30 = vmax.f32 %v3313_v8, %v3329_v42  ;;  %v1745_v42 = vadd.f32 %v1744_v50, %v12072_v14  ;;  %v3393_v7 = vmax.f32 %v1743_v18, 0.0  ;;  %v4709_v8 = vld [vmem:[%s18019_s3 + $0x10] sm:$0xff]  ;;  %v12715_v50 = vpop.f32.mrb[68].mxu1  ;;  %v4742_v18 = vld [vmem:[%s18019_s3 + $0x118] sm:$0xff]  ;;  %v12726_v54 = vpop.f32.mrb[69].mxu0  ;;  %v3687_v17 = vunpack.c.0.s8 %v3686_v20 }
 0x16b   :  { %v12700_v35 = vmax.f32 %v3314_v62, %v3330_v1  ;;  %v4741_v1 = vld [vmem:[%s18019_s3 + $0x110] sm:$0xff]  ;;  %v3378_v62 = vmax.f32 %v1033_v48, 0.0  ;;  %9677 = vmatprep.subr.bf16.mxu0 %v9676_v34  ;;  %v9678_v56 = vpack.c.bf16 %v4710_v52, %v4709_v8  ;;  %v12724_v47 = vpop.f32.mrb[69].mxu1  ;;  %9709 = vmatprep.subr.bf16.mxu1 %v9708_v27  ;;  %v4728_v34 = vld [vmem:[%s18019_s3 + $0xa8] sm:$0xff]  ;;  %v4711_v8 = vld [vmem:[%s18019_s3 + $0x20] sm:$0xff] }
 0x16c   :  { %18290 = vst [vmem:[#allocation18_spill] sm:$0xff] %v12686_v30  ;;  %v3394_v57 = vmax.f32 %v1745_v42, 0.0  ;;  %v12722_v58 = vmax.f32 %v3377_v59, %v3393_v7  ;;  %v4727_v42 = vld [vmem:[%s18019_s3 + $0xa0] sm:$0xff]  ;;  %v4760_v27 = vld [vmem:[%s18019_s3 + $0x1a8] sm:$0xff]  ;;  %v4714_v30 = vld [vmem:[%s18019_s3 + $0x38] sm:$0xff] }
 0x16d   :  { %18291 = vst [vmem:[#allocation20_spill] sm:$0xff] %v12700_v35  ;;  %v9710_v35 = vpack.c.bf16 %v4742_v18, %v4741_v1  ;;  %9679 = vmatpush3.bf16.msra.mxu0 %v9678_v56  ;;  %v4759_v59 = vld [vmem:[%s18019_s3 + $0x1a0] sm:$0xff]  ;;  %v9680_v7 = vpack.c.bf16 %v4728_v34, %v4727_v42  ;;  %v4712_v52 = vld [vmem:[%s18019_s3 + $0x28] sm:$0xff]  ;;  %v12748_v1 = vpop.f32.mrb[70].mxu1  ;;  %v4769_v20 = vld [vmem:[%s18019_s3 + $0x1f0] sm:$0xff] }
 0x16e   :  { %18292 = vst [vmem:[#allocation61_spill] sm:$0xff] %v12722_v58  ;;  %v12728_v48 = vmax.f32 %v3378_v62, %v3394_v57  ;;  %v12750_v62 = vpop.f32.mrb[70].mxu0  ;;  %v9712_v57 = vpack.c.bf16 %v4760_v27, %v4759_v59  ;;  %v9682_v56 = vpack.c.bf16 %v4712_v52, %v4711_v8  ;;  %v4744_v18 = vld [vmem:[%s18019_s3 + $0x128] sm:$0xff]  ;;  %v12758_v42 = vpop.f32.mrb[71].mxu1  ;;  %v4729_v59 = vld [vmem:[%s18019_s3 + $0xb0] sm:$0xff]  ;;  %v4730_v27 = vld [vmem:[%s18019_s3 + $0xb8] sm:$0xff] }
 0x16f   :  { %9711 = vmatpush3.bf16.msra.mxu1 %v9710_v35  ;;  %v4743_v35 = vld [vmem:[%s18019_s3 + $0x120] sm:$0xff]  ;;  %v12760_v34 = vpop.f32.mrb[71].mxu0  ;;  %9681 = vmatprep.subr.bf16.mxu0 %v9680_v7  ;;  %v4761_v8 = vld [vmem:[%s18019_s3 + $0x1b0] sm:$0xff]  ;;  %v9684_v7 = vpack.c.bf16 %v4730_v27, %v4729_v59 }
 0x170   :  { %18293 = vst [vmem:[#allocation62_spill] sm:$0xff] %v12728_v48  ;;  %v9714_v48 = vpack.c.bf16 %v4744_v18, %v4743_v35  ;;  %9713 = vmatprep.subr.bf16.mxu1 %v9712_v57  ;;  %v12771_v52 = vpop.f32.mrb[72].mxu1  ;;  %v12773_v58 = vpop.f32.mrb[72].mxu0  ;;  %v4713_v18 = vld [vmem:[%s18019_s3 + $0x30] sm:$0xff] }
 0x171   :  { %9683 = vmatpush3.bf16.msra.mxu0 %v9682_v56  ;;  %v12778_v57 = vpop.f32.mrb[73].mxu1  ;;  %v12780_v56 = vpop.f32.mrb[73].mxu0  ;;  %v4745_v59 = vld [vmem:[%s18019_s3 + $0x130] sm:$0xff]  ;;  %v9686_v27 = vpack.c.bf16 %v4714_v30, %v4713_v18  ;;  %v4732_v30 = vld [vmem:[%s18019_s3 + $0xc8] sm:$0xff] }
 0x172   :  { %9685 = vmatprep.subr.bf16.mxu0 %v9684_v7  ;;  %v9688_v18 = vpack.c.bf16 %v4732_v30, %v4731_v19  ;;  %v4748_v19 = vld [vmem:[%s18019_s3 + $0x148] sm:$0xff] }
 0x173   :  { %9715 = vmatpush3.bf16.msra.mxu1 %v9714_v48  ;;  %v4762_v48 = vld [vmem:[%s18019_s3 + $0x1b8] sm:$0xff]  ;;  %v9722_v6 = vpack.c.bf16 %v4748_v19, %v4747_v29 }
 0x174   :  { %v9716_v35 = vpack.c.bf16 %v4762_v48, %v4761_v8  ;;  %v12794_v8 = vpop.f32.mrb[74].mxu1  ;;  %v12796_v7 = vpop.f32.mrb[74].mxu0  ;;  %v9718_v48 = vpack.c.bf16 %v4746_v32, %v4745_v59  ;;  %v4764_v32 = vld [vmem:[%s18019_s3 + $0x1c8] sm:$0xff]  ;;  %v4715_v59 = vld [vmem:[%s18019_s3 + $0x40] sm:$0xff] }
 0x175   :  { %v12798_v46 = vpop.f32.mrb[75].mxu1  ;;  %v12800_v55 = vpop.f32.mrb[75].mxu0  ;;  %9687 = vmatpush3.bf16.msra.mxu0 %v9686_v27  ;;  %v4716_v27 = vld [vmem:[%s18019_s3 + $0x48] sm:$0xff] }
 0x176   :  { %9717 = vmatprep.subr.bf16.mxu1 %v9716_v35  ;;  %v4763_v35 = vld [vmem:[%s18019_s3 + $0x1c0] sm:$0xff]  ;;  %v9690_v44 = vpack.c.bf16 %v4716_v27, %v4715_v59  ;;  %9689 = vmatprep.subr.bf16.mxu0 %v9688_v18  ;;  %v4765_v59 = vld [vmem:[%s18019_s3 + $0x1d0] sm:$0xff]  ;;  %v4766_v18 = vld [vmem:[%s18019_s3 + $0x1d8] sm:$0xff] }
 0x177   :  { %9719 = vmatpush3.bf16.msra.mxu1 %v9718_v48  ;;  %v9720_v13 = vpack.c.bf16 %v4764_v32, %v4763_v35  ;;  %v4733_v35 = vld [vmem:[%s18019_s3 + $0xd0] sm:$0xff]  ;;  %v4734_v32 = vld [vmem:[%s18019_s3 + $0xd8] sm:$0xff]  ;;  %v9724_v27 = vpack.c.bf16 %v4766_v18, %v4765_v59  ;;  %v4735_v59 = vld [vmem:[%s18019_s3 + $0xe0] sm:$0xff] }
 0x178   :  { %v12826_v48 = vpop.f32.mrb[76].mxu1  ;;  %v12828_v30 = vpop.f32.mrb[76].mxu0  ;;  %v9692_v29 = vpack.c.bf16 %v4734_v32, %v4733_v35  ;;  %v4736_v18 = vld [vmem:[%s18019_s3 + $0xe8] sm:$0xff] }
 0x179   :  { %v12830_v9 = vpop.f32.mrb[77].mxu1  ;;  %v12832_v3 = vpop.f32.mrb[77].mxu0  ;;  %9721 = vmatprep.subr.bf16.mxu1 %v9720_v13  ;;  %9691 = vmatpush3.bf16.msra.mxu0 %v9690_v44  ;;  %v4717_v44 = vld [vmem:[%s18019_s3 + $0x50] sm:$0xff]  ;;  %v4718_v13 = vld [vmem:[%s18019_s3 + $0x58] sm:$0xff] }
 0x17a   :  { %v9694_v19 = vpack.c.bf16 %v4718_v13, %v4717_v44  ;;  %9693 = vmatprep.subr.bf16.mxu0 %v9692_v29  ;;  %v4767_v44 = vld [vmem:[%s18019_s3 + $0x1e0] sm:$0xff]  ;;  %v10726_v29 = vmov 1983009808   ;;  %v3624_v13 = vlaneseq }
 0x17b   :  { %9723 = vmatpush3.bf16.msra.mxu1 %v9722_v6  ;;  %v4750_v6 = vld [vmem:[%s18019_s3 + $0x158] sm:$0xff] }
 0x17c   :  { %v12858_v35 = vpop.f32.mrb[78].mxu1  ;;  %v12860_v32 = vpop.f32.mrb[78].mxu0  ;;  %v9726_v23 = vpack.c.bf16 %v4750_v6, %v4749_v31  ;;  %9725 = vmatprep.subr.bf16.mxu1 %v9724_v27  ;;  %v3622_v31 = vunpack.c.l.s4 %v10726_v29  ;;  %v9696_v6 = vpack.c.bf16 %v4736_v18, %v4735_v59  ;;  %v4768_v27 = vld [vmem:[%s18019_s3 + $0x1e8] sm:$0xff]  ;;  %v4751_v18 = vld [vmem:[%s18019_s3 + $0x160] sm:$0xff]  ;;  %v3625_v25 = vshrl.u32 %v3624_v13, 7  ;;  %v4738_v13 = vld [vmem:[%s18019_s3 + $0xf8] sm:$0xff] }
 0x17d   :  { %v12862_v45 = vpop.f32.mrb[79].mxu1  ;;  %v12864_v36 = vpop.f32.mrb[79].mxu0  ;;  %9695 = vmatpush3.bf16.msra.mxu0 %v9694_v19  ;;  %v9728_v19 = vpack.c.bf16 %v4768_v27, %v4767_v44  ;;  %v4720_v59 = vld [vmem:[%s18019_s3 + $0x68] sm:$0xff] }
 0x17e   :  { %9697 = vmatprep.subr.bf16.mxu0 %v9696_v6  ;;  %v3623_v44 = vunpack.c.0.s8 %v3622_v31  ;;  %v4752_v6 = vld [vmem:[%s18019_s3 + $0x168] sm:$0xff]  ;;  %v4737_v31 = vld [vmem:[%s18019_s3 + $0xf0] sm:$0xff]  ;;  %v12969_v10 = vsub.s32 %v3687_v17, %v3625_v25  ;;  %v13036_v17 = vadd.f32 %v12778_v57, %v12046_v22  ;;  %v4787_v57 = vld [vmem:[%s18019_s3 + $0x280] sm:$0xff] }
 0x17f   :  { %9727 = vmatpush3.bf16.msra.mxu1 %v9726_v23  ;;  %v4719_v23 = vld [vmem:[%s18019_s3 + $0x60] sm:$0xff]  ;;  %v9730_v27 = vpack.c.bf16 %v4752_v6, %v4751_v18  ;;  %v9700_v18 = vpack.c.bf16 %v4738_v13, %v4737_v31  ;;  %v4721_v6 = vld [vmem:[%s18019_s3 + $0x70] sm:$0xff] }
 0x180   :  { %v12878_v24 = vpop.f32.mrb[80].mxu1  ;;  %v12880_v38 = vpop.f32.mrb[80].mxu0  ;;  %9729 = vmatprep.subr.bf16.mxu1 %v9728_v19  ;;  %v9698_v29 = vpack.c.bf16 %v4720_v59, %v4719_v23  ;;  %v12900_v19 = vadd.f32 %v12614_v41, %v12059_v4  ;;  %v12914_v23 = vadd.f32 %v12621_v39, %v12059_v4  ;;  %v12931_v39 = vadd.f32 %v12632_v51, %v12084_v49  ;;  %v4754_v51 = vld [vmem:[%s18019_s3 + $0x178] sm:$0xff] }
 0x181   :  { %v12882_v21 = vpop.f32.mrb[81].mxu1  ;;  %v12884_v16 = vpop.f32.mrb[81].mxu0  ;;  %v12937_v31 = vsub.s32 %v3623_v44, %v3625_v25  ;;  %v9702_v44 = vpack.c.bf16 %v4722_v53, %v4721_v6  ;;  %18295 = vst [vmem:[#allocation64_spill] sm:$0xff] %v12969_v10  ;;  %v4819_v25 = vld [vmem:[%s18019_s3 + $0x380] sm:$0xff]  ;;  %v13065_v53 = vadd.f32 %v12798_v46, %v12072_v14  ;;  %v13082_v46 = vadd.f32 %v12800_v55, %v12072_v14 }
 0x182   :  { %9699 = vmatpush3.bf16.msra.mxu0 %v9698_v29  ;;  %v4770_v29 = vld [vmem:[%s18019_s3 + $0x1f8] sm:$0xff] }
 0x183   :  { %9731 = vmatpush3.bf16.msra.mxu1 %v9730_v27  ;;  %v12935_v27 = vadd.f32 %v12637_v40, %v12084_v49  ;;  %18294 = vst [vmem:[#allocation63_spill] sm:$0xff] %v12937_v31  ;;  %v9732_v13 = vpack.c.bf16 %v4770_v29, %v4769_v20  ;;  %v12954_v40 = vadd.f32 %v12675_v60, %v12046_v22 }
 0x184   :  { %v12902_v61 = vpop.f32.mrb[82].mxu1  ;;  %v12904_v37 = vpop.f32.mrb[82].mxu0  ;;  %9701 = vmatprep.subr.bf16.mxu0 %v9700_v18  ;;  %v9734_v20 = vpack.c.bf16 %v4754_v51, %v4753_v0  ;;  %v12959_v31 = vadd.f32 %v12684_v2, %v12072_v14  ;;  %v12973_v0 = vadd.f32 %v12715_v50, %v12059_v4  ;;  %v12978_v60 = vadd.f32 %v12724_v47, %v12059_v4 }
 0x185   :  { %v12916_v41 = vpop.f32.mrb[83].mxu1  ;;  %v12918_v59 = vpop.f32.mrb[83].mxu0  ;;  %9733 = vmatprep.subr.bf16.mxu1 %v9732_v13  ;;  %v12982_v2 = vadd.f32 %v12717_v33, %v12059_v4  ;;  %v12991_v50 = vadd.f32 %v12748_v1, %v12084_v49  ;;  %v12996_v47 = vadd.f32 %v12726_v54, %v12059_v4  ;;  %v13000_v33 = vadd.f32 %v12758_v42, %v12084_v49 }
 0x186   :  { %9703 = vmatpush3.bf16.msra.mxu0 %v9702_v44  ;;  %v13006_v51 = vadd.f32 %v12750_v62, %v12084_v49  ;;  %v13010_v1 = vadd.f32 %v12771_v52, %v12046_v22  ;;  %v13016_v42 = vadd.f32 %v12760_v34, %v12084_v49  ;;  %v13027_v52 = vadd.f32 %v12773_v58, %v12046_v22 }
 0x187   :  { %9735 = vmatpush3.bf16.msra.mxu1 %v9734_v20  ;;  %18296 = vst [vmem:[#allocation65_spill] sm:$0xff] %v13000_v33  ;;  %v13041_v62 = vadd.f32 %v12780_v56, %v12046_v22  ;;  %v13046_v58 = vadd.f32 %v12794_v8, %v12072_v14  ;;  %v13051_v34 = vadd.f32 %v12796_v7, %v12072_v14  ;;  %v4788_v56 = vld [vmem:[%s18019_s3 + $0x288] sm:$0xff] }
 0x188   :  { %v12965_v12 = vpop.f32.mrb[84].mxu1  ;;  %v12967_v28 = vpop.f32.mrb[84].mxu0  ;;  %18297 = vst [vmem:[#allocation66_spill] sm:$0xff] %v13006_v51  ;;  %18298 = vst [vmem:[#allocation67_spill] sm:$0xff] %v13010_v1  ;;  %v9736_v10 = vpack.c.bf16 %v4788_v56, %v4787_v57  ;;  %v4820_v33 = vld [vmem:[%s18019_s3 + $0x388] sm:$0xff]  ;;  %v13077_v51 = vadd.f32 %v12826_v48, %v12059_v4  ;;  %v13091_v56 = vadd.f32 %v12830_v9, %v12059_v4 }
 0x189   :  { %v12984_v11 = vpop.f32.mrb[85].mxu1  ;;  %v12986_v18 = vpop.f32.mrb[85].mxu0  ;;  %18299 = vst [vmem:[#allocation68_spill] sm:$0xff] %v13016_v42  ;;  %18300 = vst [vmem:[#allocation69_spill] sm:$0xff] %v13027_v52  ;;  %v9768_v42 = vpack.c.bf16 %v4820_v33, %v4819_v25  ;;  %v13096_v8 = vadd.f32 %v12828_v30, %v12059_v4  ;;  %v13101_v52 = vadd.f32 %v12858_v35, %v12084_v49 }
 0x18a   :  { %18301 = vst [vmem:[#allocation70_spill] sm:$0xff] %v13077_v51  ;;  %18302 = vst [vmem:[#allocation71_spill] sm:$0xff] %v13091_v56  ;;  %9737 = vmatprep.subr.bf16.mxu0 %v9736_v10  ;;  %v13106_v33 = vadd.f32 %v12832_v3, %v12059_v4  ;;  %v13111_v30 = vadd.f32 %v12862_v45, %v12084_v49  ;;  %v13115_v10 = vadd.f32 %v12860_v32, %v12084_v49 }
 0x18b   :  { %18303 = vst [vmem:[#allocation72_spill] sm:$0xff] %v13101_v52  ;;  %9769 = vmatprep.subr.bf16.mxu1 %v9768_v42  ;;  %v13119_v35 = vadd.f32 %v12864_v36, %v12084_v49  ;;  %v13128_v42 = vadd.f32 %v12878_v24, %v12046_v22  ;;  %v13133_v32 = vadd.f32 %v12880_v38, %v12046_v22 }
 0x18c   :  { %v13018_v20 = vpop.f32.mrb[86].mxu1  ;;  %v13020_v6 = vpop.f32.mrb[86].mxu0  ;;  %18304 = vst [vmem:[#allocation73_spill] sm:$0xff] %v13111_v30  ;;  %v13142_v57 = vadd.f32 %v12882_v21, %v12046_v22  ;;  %v13147_v24 = vadd.f32 %v12884_v16, %v12046_v22  ;;  %v13152_v38 = vadd.f32 %v12902_v61, %v12072_v14  ;;  %v13157_v48 = vadd.f32 %v12904_v37, %v12072_v14 }
 0x18d   :  { %v13029_v44 = vpop.f32.mrb[87].mxu1  ;;  %v13031_v54 = vpop.f32.mrb[87].mxu0  ;;  %18305 = vst [vmem:[#allocation74_spill] sm:$0xff] %v13119_v35  ;;  %18306 = vst [vmem:[#allocation75_spill] sm:$0xff] %v13128_v42  ;;  %v13162_v3 = vadd.f32 %v12916_v41, %v12072_v14  ;;  %v13172_v37 = vadd.f32 %v12918_v59, %v12072_v14  ;;  %v13180_v45 = vadd.f32 %v12965_v12, %v12059_v4 }
 0x18e   :  { %18307 = vst [vmem:[#allocation76_spill] sm:$0xff] %v13133_v32  ;;  %18308 = vst [vmem:[#allocation77_spill] sm:$0xff] %v13142_v57  ;;  %v13193_v16 = vadd.f32 %v12984_v11, %v12059_v4  ;;  %v13197_v12 = vadd.f32 %v12986_v18, %v12059_v4  ;;  %v13203_v59 = vadd.f32 %v13018_v20, %v12084_v49 }
 0x18f   :  { %18309 = vst [vmem:[#allocation78_spill] sm:$0xff] %v13147_v24  ;;  %18310 = vst [vmem:[#allocation79_spill] sm:$0xff] %v13152_v38  ;;  %v18321_v38 = vmax.f32 %v12914_v23, 0.0 }
 0x190   :  { %v13068_v13 = vpop.f32.mrb[88].mxu1  ;;  %v13070_v29 = vpop.f32.mrb[88].mxu0  ;;  %18311 = vst [vmem:[#allocation80_spill] sm:$0xff] %v13157_v48  ;;  %18312 = vst [vmem:[#allocation81_spill] sm:$0xff] %v13162_v3 }
 0x191   :  { %v13084_v7 = vpop.f32.mrb[89].mxu1  ;;  %v13086_v1 = vpop.f32.mrb[89].mxu0  ;;  %18313 = vst [vmem:[#allocation82_spill] sm:$0xff] %v13172_v37  ;;  %18314 = vst [vmem:[#allocation83_spill] sm:$0xff] %v13180_v45  ;;  %v18324_v45 = vld [vmem:[#allocation14_spill] sm:$0xff] }
 0x192   :  { %18316 = vst [vmem:[#allocation85_spill] sm:$0xff] %v13193_v16  ;;  %18317 = vst [vmem:[#allocation86_spill] sm:$0xff] %v13197_v12  ;;  %v18341_v16 = vmax.f32 %v12954_v40, 0.0 }
 0x193   :  { %18318 = vst [vmem:[#allocation87_spill] sm:$0xff] %v13203_v59 }
 0x194   :  { %v13121_v25 = vpop.f32.mrb[90].mxu1  ;;  %v13123_v55 = vpop.f32.mrb[90].mxu0 }
 0x195   :  { %v13135_v9 = vpop.f32.mrb[91].mxu1  ;;  %v13137_v36 = vpop.f32.mrb[91].mxu0 }
 0x198   :  { %v13166_v52 = vpop.f32.mrb[92].mxu1  ;;  %v2525_v61 = vpop.f32.mrb[92].mxu0 }
 0x199   :  { %v2526_v21 = vadd.f32 %v2525_v61, %v12059_v4  ;;  %v13175_v30 = vpop.f32.mrb[93].mxu1  ;;  %v2527_v41 = vpop.f32.mrb[93].mxu0  ;;  %v13188_v61 = vadd.f32 %v12967_v28, %v12059_v4 }
 0x19a   :  { %v2528_v56 = vadd.f32 %v2527_v41, %v12059_v4 }
 0x19b   :  { %18315 = vst [vmem:[#allocation84_spill] sm:$0xff] %v13188_v61  ;;  %v3219_v32 = vmax.f32 %v2526_v21, 0.0  ;;  %v18319_v21 = vmax.f32 %v12900_v19, 0.0  ;;  %v13221_v19 = vadd.f32 %v13029_v44, %v12084_v49 }
 0x19c   :  { %v3220_v41 = vmax.f32 %v2528_v56, 0.0  ;;  %v13199_v35 = vpop.f32.mrb[94].mxu1  ;;  %v2531_v51 = vpop.f32.mrb[94].mxu0  ;;  %v13214_v56 = vadd.f32 %v13020_v6, %v12084_v49 }
 0x19d   :  { %v3491_v42 = vmax.f32 %v18319_v21, %v3219_v32  ;;  %v2532_v11 = vadd.f32 %v2531_v51, %v12084_v49  ;;  %v13209_v3 = vpop.f32.mrb[95].mxu1  ;;  %v2533_v48 = vpop.f32.mrb[95].mxu0  ;;  %18322 = vst [vmem:[#allocation89_spill] sm:$0xff] %v13221_v19  ;;  %v18323_v32 = vld [vmem:[#allocation13_spill] sm:$0xff]  ;;  %v13296_v19 = vld [vmem:[%s18019_s3 + $0x290] sm:$0xff] }
 0x19e   :  { %18320 = vst [vmem:[#allocation88_spill] sm:$0xff] %v13214_v56  ;;  %v3492_v20 = vmax.f32 %v18321_v38, %v3220_v41  ;;  %v2534_v24 = vadd.f32 %v2533_v48, %v12084_v49  ;;  %v13237_v41 = vadd.f32 %v13031_v54, %v12084_v49  ;;  %18338 = vst [vmem:[#allocation95_spill] sm:$0xff] %v13296_v19  ;;  %v18340_v56 = vmax.f32 %v12950_v26, 0.0  ;;  %v13320_v26 = vld [vmem:[%s18019_s3 + $0x390] sm:$0xff] }
 0x19f   :  { %v13225_v21 = vmax.f32 %v18323_v32, %v3491_v42  ;;  %v3283_v28 = vmax.f32 %v2532_v11, 0.0  ;;  %v18325_v42 = vmax.f32 %v12931_v39, 0.0  ;;  %v13255_v39 = vld [vmem:[%s18019_s3 + $0x200] sm:$0xff]  ;;  %18342 = vst [vmem:[#allocation97_spill] sm:$0xff] %v13320_v26  ;;  %v18349_v19 = vmax.f32 %v12959_v31, 0.0 }
 0x1a0   :  { %v13230_v37 = vmax.f32 %v18324_v45, %v3492_v20  ;;  %v3284_v23 = vmax.f32 %v2534_v24, 0.0  ;;  %v13232_v38 = vpop.f32.mrb[96].mxu1  ;;  %v2537_v48 = vpop.f32.mrb[96].mxu0  ;;  %v13246_v45 = vadd.f32 %v13068_v13, %v12046_v22  ;;  %v18326_v20 = vmax.f32 %v12935_v27, 0.0  ;;  %18327 = vst [vmem:[#allocation13_spill] sm:$0xff] %v13255_v39  ;;  %v18330_v27 = vld [vmem:[#allocation15_spill] sm:$0xff] }
 0x1a1   :  { %v3507_v11 = vmax.f32 %v18325_v42, %v3283_v28  ;;  %v2538_v32 = vadd.f32 %v2537_v48, %v12046_v22  ;;  %v13242_v18 = vpop.f32.mrb[97].mxu1  ;;  %v2539_v6 = vpop.f32.mrb[97].mxu0  ;;  %v13260_v28 = vld [vmem:[%s18019_s3 + $0x208] sm:$0xff]  ;;  %v13265_v48 = vadd.f32 %v13070_v29, %v12046_v22  ;;  %v13273_v42 = vld [vmem:[%s18019_s3 + $0x300] sm:$0xff]  ;;  %v13282_v13 = vadd.f32 %v13084_v7, %v12046_v22  ;;  %v13301_v7 = vld [vmem:[%s18019_s3 + $0x298] sm:$0xff] }
 0x1a2   :  { %v3508_v44 = vmax.f32 %v18326_v20, %v3284_v23  ;;  %v2540_v54 = vadd.f32 %v2539_v6, %v12046_v22  ;;  %18328 = vst [vmem:[#allocation14_spill] sm:$0xff] %v13260_v28  ;;  %18331 = vst [vmem:[#allocation15_spill] sm:$0xff] %v13273_v42  ;;  %v13278_v20 = vld [vmem:[%s18019_s3 + $0x308] sm:$0xff]  ;;  %v13286_v29 = vadd.f32 %v13086_v1, %v12046_v22  ;;  %v13341_v1 = vld [vmem:[%s18019_s3 + $0x218] sm:$0xff]  ;;  %v18358_v26 = vmax.f32 %v12978_v60, 0.0 }
 0x1a3   :  { %18329 = vst [vmem:[#allocation90_spill] sm:$0xff] %v13265_v48  ;;  %v13268_v23 = vmax.f32 %v18330_v27, %v3507_v11  ;;  %v3347_v6 = vmax.f32 %v2538_v32, 0.0  ;;  %18332 = vst [vmem:[#allocation91_spill] sm:$0xff] %v13278_v20  ;;  %v18335_v11 = vld [vmem:[#allocation17_spill] sm:$0xff]  ;;  %v18361_v60 = vld [vmem:[#allocation24_spill] sm:$0xff] }
 0x1a4   :  { %18333 = vst [vmem:[#allocation92_spill] sm:$0xff] %v13282_v13  ;;  %18334 = vst [vmem:[#allocation93_spill] sm:$0xff] %v13286_v29  ;;  %v13289_v32 = vmax.f32 %v18335_v11, %v3508_v44  ;;  %v3348_v27 = vmax.f32 %v2540_v54, 0.0  ;;  %v13291_v24 = vpop.f32.mrb[98].mxu1  ;;  %v2543_v51 = vpop.f32.mrb[98].mxu0 }
 0x1a5   :  { %18337 = vst [vmem:[#allocation94_spill] sm:$0xff] %v13291_v24  ;;  %18339 = vst [vmem:[#allocation96_spill] sm:$0xff] %v13301_v7  ;;  %v3523_v44 = vmax.f32 %v18340_v56, %v3347_v6  ;;  %v2544_v54 = vadd.f32 %v2543_v51, %v12072_v14  ;;  %v13307_v11 = vpop.f32.mrb[99].mxu1  ;;  %v2545_v24 = vpop.f32.mrb[99].mxu0  ;;  %v13325_v56 = vld [vmem:[%s18019_s3 + $0x398] sm:$0xff]  ;;  %v18344_v6 = vld [vmem:[#allocation19_spill] sm:$0xff] }
 0x1a6   :  { %18336 = vst [vmem:[#allocation17_spill] sm:$0xff] %v13289_v32  ;;  %v3524_v61 = vmax.f32 %v18341_v16, %v3348_v27  ;;  %v2546_v57 = vadd.f32 %v2545_v24, %v12072_v14  ;;  %18343 = vst [vmem:[#allocation98_spill] sm:$0xff] %v13325_v56  ;;  %v13336_v27 = vld [vmem:[%s18019_s3 + $0x210] sm:$0xff]  ;;  %v18350_v51 = vmax.f32 %v12963_v15, 0.0  ;;  %v13369_v15 = vadd.f32 %v13123_v55, %v12072_v14  ;;  %v18375_v56 = vld [vmem:[#allocation26_spill] sm:$0xff] }
 0x1a7   :  { %v13329_v40 = vmax.f32 %v18344_v6, %v3523_v44  ;;  %v3411_v16 = vmax.f32 %v2544_v54, 0.0  ;;  %18345 = vst [vmem:[#allocation19_spill] sm:$0xff] %v13336_v27  ;;  %18346 = vst [vmem:[#allocation99_spill] sm:$0xff] %v13341_v1  ;;  %v18347_v44 = vld [vmem:[#allocation21_spill] sm:$0xff]  ;;  %v18356_v27 = vmax.f32 %v12973_v0, 0.0  ;;  %v18357_v1 = vmax.f32 %v12982_v2, 0.0 }
 0x1a8   :  { %v13346_v6 = vmax.f32 %v18347_v44, %v3524_v61  ;;  %v3412_v54 = vmax.f32 %v2546_v57, 0.0  ;;  %v2614_v12 = vpop.f32.mrb[100].mxu1  ;;  %v2703_v24 = vpop.f32.mrb[100].mxu0  ;;  %v18383_v32 = vld [vmem:[#allocation67_spill] sm:$0xff] }
 0x1a9   :  { %v3539_v7 = vmax.f32 %v18349_v19, %v3411_v16  ;;  %v2615_v42 = vadd.f32 %v2614_v12, %v12059_v4  ;;  %v2704_v20 = vadd.f32 %v2703_v24, %v12059_v4  ;;  %v2616_v39 = vpop.f32.mrb[101].mxu1  ;;  %v2705_v28 = vpop.f32.mrb[101].mxu0  ;;  %v13362_v12 = vadd.f32 %v13121_v25, %v12072_v14  ;;  %v18352_v19 = vld [vmem:[#allocation22_spill] sm:$0xff] }
 0x1aa   :  { %18348 = vst [vmem:[#allocation21_spill] sm:$0xff] %v13346_v6  ;;  %v3540_v29 = vmax.f32 %v18350_v51, %v3412_v54  ;;  %v2617_v61 = vadd.f32 %v2616_v39, %v12059_v4  ;;  %v2706_v57 = vadd.f32 %v2705_v28, %v12059_v4  ;;  %18353 = vst [vmem:[#allocation22_spill] sm:$0xff] %v13369_v15  ;;  %v18354_v51 = vld [vmem:[#allocation23_spill] sm:$0xff]  ;;  %v18387_v15 = vmax.f32 %v13036_v17, 0.0  ;;  %v18392_v17 = vld [vmem:[#allocation32_spill] sm:$0xff] }
 0x1ab   :  { %18351 = vst [vmem:[#allocation100_spill] sm:$0xff] %v13362_v12  ;;  %v13365_v16 = vmax.f32 %v18352_v19, %v3539_v7  ;;  %v3221_v24 = vmax.f32 %v2615_v42, 0.0  ;;  %v3223_v44 = vmax.f32 %v2704_v20, 0.0 }
 0x1ac   :  { %v13372_v39 = vmax.f32 %v18354_v51, %v3540_v29  ;;  %v3222_v28 = vmax.f32 %v2617_v61, 0.0  ;;  %v3224_v54 = vmax.f32 %v2706_v57, 0.0  ;;  %v2620_v59 = vpop.f32.mrb[102].mxu1  ;;  %v2709_v31 = vpop.f32.mrb[102].mxu0  ;;  %v18359_v61 = vmax.f32 %v12996_v47, 0.0 }
 0x1ad   :  { %v3493_v25 = vmax.f32 %v18356_v27, %v3221_v24  ;;  %v3495_v7 = vmax.f32 %v18357_v1, %v3223_v44  ;;  %v2621_v42 = vadd.f32 %v2620_v59, %v12084_v49  ;;  %v2710_v20 = vadd.f32 %v2709_v31, %v12084_v49  ;;  %v2622_v19 = vpop.f32.mrb[103].mxu1  ;;  %v2711_v55 = vpop.f32.mrb[103].mxu0 }
 0x1ae   :  { %18355 = vst [vmem:[#allocation23_spill] sm:$0xff] %v13372_v39  ;;  %v3494_v29 = vmax.f32 %v18358_v26, %v3222_v28  ;;  %v3496_v57 = vmax.f32 %v18359_v61, %v3224_v54  ;;  %v2623_v51 = vadd.f32 %v2622_v19, %v12084_v49  ;;  %v2712_v0 = vadd.f32 %v2711_v55, %v12084_v49  ;;  %v13419_v61 = vld [vmem:[%s18019_s3 + $0x2a0] sm:$0xff]  ;;  %v18374_v54 = vld [vmem:[#allocation25_spill] sm:$0xff] }
 0x1af   :  { %v13387_v27 = vmax.f32 %v12320_v43, %v3493_v25  ;;  %v13390_v2 = vmax.f32 %v12324_v63, %v3495_v7  ;;  %v3285_v59 = vmax.f32 %v2621_v42, 0.0  ;;  %v3287_v1 = vmax.f32 %v2710_v20, 0.0  ;;  %v13401_v43 = vld [vmem:[%s18019_s3 + $0x310] sm:$0xff]  ;;  %v13406_v63 = vld [vmem:[%s18019_s3 + $0x318] sm:$0xff]  ;;  %v18365_v42 = vld [vmem:[#allocation66_spill] sm:$0xff] }
 0x1b0   :  { %v13393_v31 = vmax.f32 %v12330_v5, %v3494_v29  ;;  %v13396_v26 = vmax.f32 %v18361_v60, %v3496_v57  ;;  %v3286_v47 = vmax.f32 %v2623_v51, 0.0  ;;  %v3288_v24 = vmax.f32 %v2712_v0, 0.0  ;;  %v2626_v44 = vpop.f32.mrb[104].mxu1  ;;  %v2715_v28 = vpop.f32.mrb[104].mxu0  ;;  %18362 = vst [vmem:[#allocation24_spill] sm:$0xff] %v13401_v43  ;;  %18363 = vst [vmem:[#allocation102_spill] sm:$0xff] %v13406_v63 }
 0x1b1   :  { %v18364_v25 = vmax.f32 %v12991_v50, 0.0  ;;  %v18366_v20 = vmax.f32 %v18365_v42, 0.0  ;;  %v2628_v55 = vpop.f32.mrb[105].mxu1  ;;  %v2717_v29 = vpop.f32.mrb[105].mxu0  ;;  %18367 = vst [vmem:[#allocation66_spill] sm:$0xff] %v13419_v61  ;;  %v13424_v57 = vld [vmem:[%s18019_s3 + $0x2a8] sm:$0xff] }
 0x1b2   :  { %18360 = vst [vmem:[#allocation101_spill] sm:$0xff] %v13393_v31  ;;  %18368 = vst [vmem:[#allocation103_spill] sm:$0xff] %v13424_v57  ;;  %v18369_v0 = vld [vmem:[#allocation65_spill] sm:$0xff]  ;;  %v18371_v60 = vld [vmem:[#allocation68_spill] sm:$0xff]  ;;  %v2718_v51 = vadd.f32 %v2717_v29, %v12046_v22  ;;  %v18384_v29 = vmax.f32 %v18383_v32, 0.0 }
 0x1b3   :  { %v3509_v7 = vmax.f32 %v18364_v25, %v3285_v59  ;;  %v3511_v19 = vmax.f32 %v18366_v20, %v3287_v1  ;;  %v18370_v59 = vmax.f32 %v18369_v0, 0.0  ;;  %v18372_v25 = vmax.f32 %v18371_v60, 0.0  ;;  %v18385_v50 = vld [vmem:[#allocation69_spill] sm:$0xff] }
 0x1b4   :  { %v13436_v20 = vadd.f32 %v13135_v9, %v12072_v14  ;;  %v13448_v0 = vadd.f32 %v13137_v36, %v12072_v14  ;;  %v2632_v9 = vpop.f32.mrb[106].mxu1  ;;  %v2627_v36 = vadd.f32 %v2626_v44, %v12046_v22  ;;  %v18386_v43 = vmax.f32 %v18385_v50, 0.0 }
 0x1b5   :  { %v3510_v1 = vmax.f32 %v18370_v59, %v3286_v47  ;;  %v3512_v42 = vmax.f32 %v18372_v25, %v3288_v24  ;;  %v13439_v5 = vmax.f32 %v18374_v54, %v3509_v7  ;;  %v13442_v13 = vmax.f32 %v18375_v56, %v3511_v19  ;;  %v18377_v47 = vld [vmem:[#allocation27_spill] sm:$0xff]  ;;  %v18379_v24 = vld [vmem:[#allocation28_spill] sm:$0xff]  ;;  %v2721_v25 = vpop.f32.mrb[106].mxu0 }
 0x1b6   :  { %18373 = vst [vmem:[#allocation65_spill] sm:$0xff] %v13436_v20  ;;  %18376 = vst [vmem:[#allocation68_spill] sm:$0xff] %v13448_v0  ;;  %v2716_v19 = vadd.f32 %v2715_v28, %v12046_v22  ;;  %v2629_v54 = vadd.f32 %v2628_v55, %v12046_v22  ;;  %v3349_v56 = vmax.f32 %v2627_v36, 0.0  ;;  %v13474_v28 = vadd.f32 %v13166_v52, %v12059_v4  ;;  %v18420_v20 = vld [vmem:[#allocation40_spill] sm:$0xff] }
 0x1b7   :  { %v13451_v59 = vmax.f32 %v18377_v47, %v3510_v1  ;;  %v13454_v60 = vmax.f32 %v18379_v24, %v3512_v42  ;;  %v2634_v1 = vpop.f32.mrb[107].mxu1  ;;  %v2723_v47 = vpop.f32.mrb[107].mxu0  ;;  %v13478_v42 = vadd.f32 %v13175_v30, %v12059_v4  ;;  %v3352_v24 = vmax.f32 %v2718_v51, 0.0 }
 0x1b8   :  { %v3351_v44 = vmax.f32 %v2716_v19, 0.0  ;;  %18381 = vst [vmem:[#allocation27_spill] sm:$0xff] %v13474_v28  ;;  %v3350_v61 = vmax.f32 %v2629_v54, 0.0  ;;  %v2881_v55 = vpop.f32.mrb[108].mxu0  ;;  %v3525_v57 = vmax.f32 %v18384_v29, %v3349_v56  ;;  %v2633_v36 = vadd.f32 %v2632_v9, %v12072_v14  ;;  %v18389_v56 = vld [vmem:[#allocation29_spill] sm:$0xff]  ;;  %v18418_v28 = vld [vmem:[#allocation39_spill] sm:$0xff] }
 0x1b9   :  { %18378 = vst [vmem:[#allocation25_spill] sm:$0xff] %v13451_v59  ;;  %18380 = vst [vmem:[#allocation26_spill] sm:$0xff] %v13454_v60  ;;  %v2792_v60 = vpop.f32.mrb[108].mxu1  ;;  %v2722_v19 = vadd.f32 %v2721_v25, %v12072_v14  ;;  %v2883_v63 = vpop.f32.mrb[109].mxu0  ;;  %v18388_v54 = vmax.f32 %v13041_v62, 0.0  ;;  %v2635_v12 = vadd.f32 %v2634_v1, %v12072_v14  ;;  %v2724_v32 = vadd.f32 %v2723_v47, %v12072_v14 }
 0x1ba   :  { %18382 = vst [vmem:[#allocation28_spill] sm:$0xff] %v13478_v42  ;;  %v3527_v7 = vmax.f32 %v18386_v43, %v3351_v44  ;;  %v2794_v52 = vpop.f32.mrb[109].mxu1  ;;  %v3526_v30 = vmax.f32 %v18387_v15, %v3350_v61  ;;  %v13493_v29 = vmax.f32 %v18389_v56, %v3525_v57  ;;  %v18390_v43 = vld [vmem:[#allocation30_spill] sm:$0xff]  ;;  %v3413_v9 = vmax.f32 %v2633_v36, 0.0  ;;  %v18391_v44 = vld [vmem:[#allocation31_spill] sm:$0xff] }
 0x1bb   :  { %v3528_v51 = vmax.f32 %v18388_v54, %v3352_v24  ;;  %v3415_v25 = vmax.f32 %v2722_v19, 0.0  ;;  %v3414_v62 = vmax.f32 %v2635_v12, 0.0  ;;  %v3416_v61 = vmax.f32 %v2724_v32, 0.0  ;;  %v18400_v57 = vld [vmem:[#allocation35_spill] sm:$0xff] }
 0x1bc   :  { %v13496_v50 = vmax.f32 %v18390_v43, %v3527_v7  ;;  %v13499_v48 = vmax.f32 %v18391_v44, %v3526_v30  ;;  %v2798_v24 = vpop.f32.mrb[110].mxu1  ;;  %v2887_v1 = vpop.f32.mrb[110].mxu0  ;;  %v18394_v7 = vmax.f32 %v13046_v58, 0.0  ;;  %v18395_v19 = vmax.f32 %v13051_v34, 0.0  ;;  %v18398_v34 = vld [vmem:[#allocation33_spill] sm:$0xff]  ;;  %v18405_v58 = vld [vmem:[#allocation63_spill] sm:$0xff] }
 0x1bd   :  { %v13502_v15 = vmax.f32 %v18392_v17, %v3528_v51  ;;  %v2800_v54 = vpop.f32.mrb[111].mxu1  ;;  %v2889_v56 = vpop.f32.mrb[111].mxu0  ;;  %v18396_v32 = vmax.f32 %v13065_v53, 0.0  ;;  %v18397_v44 = vmax.f32 %v13082_v46, 0.0  ;;  %v2884_v51 = vadd.f32 %v2883_v63, %v12059_v4 }
 0x1be   :  { %v3541_v36 = vmax.f32 %v18394_v7, %v3413_v9  ;;  %v3543_v30 = vmax.f32 %v18395_v19, %v3415_v25  ;;  %v18399_v7 = vld [vmem:[#allocation34_spill] sm:$0xff]  ;;  %v13558_v12 = vadd.f32 %v13199_v35, %v12084_v49  ;;  %v18408_v63 = vcombine.high %v13225_v21, %v13390_v2 }
 0x1bf   :  { %18393 = vst [vmem:[#allocation67_spill] sm:$0xff] %v13502_v15  ;;  %v3542_v43 = vmax.f32 %v18396_v32, %v3414_v62  ;;  %v3544_v17 = vmax.f32 %v18397_v44, %v3416_v61  ;;  %v18402_v62 = vld [vmem:[#allocation36_spill] sm:$0xff]  ;;  %v2793_v44 = vadd.f32 %v2792_v60, %v12059_v4  ;;  %v13562_v60 = vadd.f32 %v13209_v3, %v12084_v49 }
 0x1c0   :  { %v13523_v25 = vmax.f32 %v18398_v34, %v3541_v36  ;;  %v13526_v19 = vmax.f32 %v18399_v7, %v3543_v30  ;;  %v13536_v61 = vpop.f32.mrb[112].mxu1  ;;  %v13538_v32 = vpop.f32.mrb[112].mxu0  ;;  %v2882_v34 = vadd.f32 %v2881_v55, %v12059_v4  ;;  %18404 = vst [vmem:[#allocation30_spill] sm:$0xff] %v13558_v12  ;;  %v2888_v15 = vadd.f32 %v2887_v1, %v12084_v49  ;;  %v18445_v12 = vld [vmem:[#allocation77_spill] sm:$0xff] }
 0x1c1   :  { %v13531_v53 = vmax.f32 %v18400_v57, %v3542_v43  ;;  %v13534_v46 = vmax.f32 %v18402_v62, %v3544_v17  ;;  %v13546_v7 = vpop.f32.mrb[113].mxu1  ;;  %v13548_v57 = vpop.f32.mrb[113].mxu0  ;;  %v2795_v62 = vadd.f32 %v2794_v52, %v12059_v4  ;;  %v3225_v55 = vmax.f32 %v2793_v44, 0.0  ;;  %v18410_v44 = vld [vmem:[#allocation70_spill] sm:$0xff] }
 0x1c2   :  { %v3227_v9 = vmax.f32 %v2882_v34, 0.0  ;;  %v18406_v43 = vcombine.low %v13225_v21, %v13390_v2  ;;  %v13574_v52 = vrot.slane %v18408_v63, %v18405_v58  ;;  %v3228_v17 = vmax.f32 %v2884_v51, 0.0  ;;  %v18413_v2 = vld [vmem:[#allocation71_spill] sm:$0xff] }
 0x1c3   :  { %18401 = vst [vmem:[#allocation69_spill] sm:$0xff] %v13531_v53  ;;  %18403 = vst [vmem:[#allocation29_spill] sm:$0xff] %v13534_v46  ;;  %v3226_v35 = vmax.f32 %v2795_v62, 0.0  ;;  %v18411_v34 = vmax.f32 %v18410_v44, 0.0  ;;  %v18412_v46 = vmax.f32 %v13096_v8, 0.0  ;;  %v18414_v51 = vmax.f32 %v18413_v2, 0.0 }
 0x1c4   :  { %v13568_v30 = vrot.slane %v18406_v43, %v18405_v58  ;;  %18409 = vst [vmem:[#allocation32_spill] sm:$0xff] %v13574_v52  ;;  %v13576_v36 = vpop.f32.mrb[114].mxu1  ;;  %v13578_v3 = vpop.f32.mrb[114].mxu0  ;;  %v2799_v43 = vadd.f32 %v2798_v24, %v12084_v49  ;;  %v18415_v63 = vmax.f32 %v13106_v33, 0.0  ;;  %v2801_v44 = vadd.f32 %v2800_v54, %v12084_v49  ;;  %v18416_v8 = vld [vmem:[#allocation37_spill] sm:$0xff] }
 0x1c5   :  { %v3497_v47 = vmax.f32 %v18411_v34, %v3225_v55  ;;  %v3499_v39 = vmax.f32 %v18412_v46, %v3227_v9  ;;  %v13586_v6 = vpop.f32.mrb[115].mxu1  ;;  %v13588_v21 = vpop.f32.mrb[115].mxu0  ;;  %v3498_v62 = vmax.f32 %v18414_v51, %v3226_v35  ;;  %v2890_v55 = vadd.f32 %v2889_v56, %v12084_v49  ;;  %v18417_v46 = vld [vmem:[#allocation38_spill] sm:$0xff] }
 0x1c6   :  { %18407 = vst [vmem:[#allocation31_spill] sm:$0xff] %v13568_v30  ;;  %v3500_v42 = vmax.f32 %v18415_v63, %v3228_v17  ;;  %v3289_v1 = vmax.f32 %v2799_v43, 0.0  ;;  %v3291_v34 = vmax.f32 %v2888_v15, 0.0  ;;  %v3290_v35 = vmax.f32 %v2801_v44, 0.0  ;;  %v18424_v44 = vld [vmem:[#allocation73_spill] sm:$0xff] }
 0x1c7   :  { %v3561_v9 = vmax.f32 %v18416_v8, %v3497_v47  ;;  %v13598_v24 = vmax.f32 %v18417_v46, %v3499_v39  ;;  %v13601_v0 = vmax.f32 %v18418_v28, %v3498_v62  ;;  %v3292_v33 = vmax.f32 %v2890_v55, 0.0  ;;  %v18421_v39 = vld [vmem:[#allocation72_spill] sm:$0xff] }
 0x1c8   :  { %v13604_v2 = vmax.f32 %v18420_v20, %v3500_v42  ;;  %v13606_v17 = vpop.f32.mrb[116].mxu1  ;;  %v13608_v54 = vpop.f32.mrb[116].mxu0  ;;  %v18422_v51 = vmax.f32 %v18421_v39, 0.0  ;;  %v18423_v15 = vmax.f32 %v13115_v10, 0.0  ;;  %v18425_v55 = vmax.f32 %v18424_v44, 0.0 }
 0x1c9   :  { %18419 = vst [vmem:[#allocation33_spill] sm:$0xff] %v13601_v0  ;;  %v3635_v56 = vcombine.low %v13387_v27, %v3561_v9  ;;  %v3636_v47 = vcombine.high %v13387_v27, %v3561_v9  ;;  %v13616_v62 = vpop.f32.mrb[117].mxu1  ;;  %v13618_v20 = vpop.f32.mrb[117].mxu0  ;;  %v18426_v27 = vld [vmem:[#allocation74_spill] sm:$0xff]  ;;  %v13641_v44 = vadd.f32 %v13232_v38, %v12046_v22  ;;  %v13673_v38 = vadd.f32 %v13242_v18, %v12046_v22 }
 0x1ca   :  { %v3513_v43 = vmax.f32 %v18422_v51, %v3289_v1  ;;  %v3515_v28 = vmax.f32 %v18423_v15, %v3291_v34  ;;  %v3514_v8 = vmax.f32 %v18425_v55, %v3290_v35  ;;  %v18427_v9 = vmax.f32 %v18426_v27, 0.0  ;;  %v18430_v34 = vld [vmem:[#allocation41_spill] sm:$0xff]  ;;  %v18431_v51 = vld [vmem:[#allocation42_spill] sm:$0xff]  ;;  %v18432_v35 = vld [vmem:[#allocation43_spill] sm:$0xff] }
 0x1cb   :  { %v13629_v1 = vrot.slane %v3635_v56, %v18405_v58  ;;  %v13632_v10 = vrot.slane %v3636_v47, %v18405_v58  ;;  %v2807_v42 = vadd.f32 %v13546_v7, %v12046_v22  ;;  %v18437_v18 = vcombine.high %v13268_v23, %v13442_v13 }
 0x1cc   :  { %v3516_v46 = vmax.f32 %v18427_v9, %v3292_v33  ;;  %v3577_v39 = vmax.f32 %v18430_v34, %v3513_v43  ;;  %v13636_v15 = vmax.f32 %v18431_v51, %v3515_v28  ;;  %v13644_v55 = vmax.f32 %v18432_v35, %v3514_v8  ;;  %v18434_v33 = vld [vmem:[#allocation44_spill] sm:$0xff]  ;;  %v13649_v27 = vpop.f32.mrb[118].mxu1  ;;  %v13651_v47 = vpop.f32.mrb[118].mxu0 }
 0x1cd   :  { %18428 = vst [vmem:[#allocation34_spill] sm:$0xff] %v13629_v1  ;;  %18429 = vst [vmem:[#allocation35_spill] sm:$0xff] %v13632_v10  ;;  %v13661_v9 = vpop.f32.mrb[119].mxu1  ;;  %v2805_v8 = vadd.f32 %v13536_v61, %v12046_v22  ;;  %v2894_v28 = vadd.f32 %v13538_v32, %v12046_v22  ;;  %v18446_v1 = vmax.f32 %v18445_v12, 0.0 }
 0x1ce   :  { %18433 = vst [vmem:[#allocation36_spill] sm:$0xff] %v13644_v55  ;;  %v13647_v56 = vmax.f32 %v18434_v33, %v3516_v46  ;;  %v13663_v46 = vpop.f32.mrb[119].mxu0  ;;  %v3771_v34 = vcombine.low %v13439_v5, %v3577_v39  ;;  %v3772_v51 = vcombine.high %v13439_v5, %v3577_v39  ;;  %v18435_v5 = vcombine.low %v13268_v23, %v13442_v13 }
 0x1cf   :  { %v13691_v33 = vrot.slane %v18437_v18, %v18405_v58  ;;  %v3353_v43 = vmax.f32 %v2805_v8, 0.0  ;;  %v3355_v63 = vmax.f32 %v2894_v28, 0.0  ;;  %v2896_v55 = vadd.f32 %v13548_v57, %v12046_v22  ;;  %v18443_v57 = vld [vmem:[#allocation76_spill] sm:$0xff] }
 0x1d0   :  { %v13685_v39 = vrot.slane %v18435_v5, %v18405_v58  ;;  %v13694_v61 = vrot.slane %v3771_v34, %v18405_v58  ;;  %v13697_v32 = vrot.slane %v3772_v51, %v18405_v58  ;;  %v13699_v35 = vpop.f32.mrb[120].mxu1  ;;  %v13701_v7 = vpop.f32.mrb[120].mxu0  ;;  %v3354_v5 = vmax.f32 %v2807_v42, 0.0  ;;  %v18441_v42 = vld [vmem:[#allocation75_spill] sm:$0xff] }
 0x1d1   :  { %18438 = vst [vmem:[#allocation70_spill] sm:$0xff] %v13691_v33  ;;  %v13705_v59 = vpop.f32.mrb[121].mxu1  ;;  %v13707_v13 = vpop.f32.mrb[121].mxu0  ;;  %v18442_v8 = vmax.f32 %v18441_v42, 0.0  ;;  %v18444_v10 = vmax.f32 %v18443_v57, 0.0  ;;  %v3356_v0 = vmax.f32 %v2896_v55, 0.0  ;;  %v2811_v23 = vadd.f32 %v13576_v36, %v12072_v14 }
 0x1d2   :  { %18436 = vst [vmem:[#allocation63_spill] sm:$0xff] %v13685_v39  ;;  %18439 = vst [vmem:[#allocation71_spill] sm:$0xff] %v13694_v61  ;;  %v3530_v30 = vmax.f32 %v18446_v1, %v3354_v5  ;;  %v2900_v34 = vadd.f32 %v13578_v3, %v12072_v14  ;;  %v2813_v51 = vadd.f32 %v13586_v6, %v12072_v14  ;;  %v18448_v1 = vld [vmem:[#allocation46_spill] sm:$0xff]  ;;  %v18450_v55 = vld [vmem:[#allocation47_spill] sm:$0xff] }
 0x1d3   :  { %18440 = vst [vmem:[#allocation37_spill] sm:$0xff] %v13697_v32  ;;  %v3529_v18 = vmax.f32 %v18442_v8, %v3353_v43  ;;  %v3531_v52 = vmax.f32 %v18444_v10, %v3355_v63  ;;  %v2902_v42 = vadd.f32 %v13588_v21, %v12072_v14  ;;  %v18447_v63 = vld [vmem:[#allocation45_spill] sm:$0xff]  ;;  %v18452_v5 = vld [vmem:[#allocation78_spill] sm:$0xff]  ;;  %v3417_v21 = vmax.f32 %v2811_v23, 0.0  ;;  %v18457_v23 = vld [vmem:[#allocation80_spill] sm:$0xff] }
 0x1d4   :  { %v13731_v43 = vpop.f32.mrb[122].mxu1  ;;  %v13733_v8 = vpop.f32.mrb[122].mxu0  ;;  %v13740_v36 = vmax.f32 %v18450_v55, %v3530_v30  ;;  %v18453_v3 = vmax.f32 %v18452_v5, 0.0  ;;  %v3419_v32 = vmax.f32 %v2900_v34, 0.0  ;;  %v3418_v33 = vmax.f32 %v2813_v51, 0.0 }
 0x1d5   :  { %v3593_v12 = vmax.f32 %v18447_v63, %v3529_v18  ;;  %v13737_v10 = vmax.f32 %v18448_v1, %v3531_v52  ;;  %v13744_v28 = vpop.f32.mrb[123].mxu1  ;;  %v13746_v6 = vpop.f32.mrb[123].mxu0  ;;  %v3420_v61 = vmax.f32 %v2902_v42, 0.0  ;;  %v18454_v63 = vld [vmem:[#allocation48_spill] sm:$0xff]  ;;  %v18455_v1 = vld [vmem:[#allocation79_spill] sm:$0xff]  ;;  %v18458_v34 = vmax.f32 %v18457_v23, 0.0 }
 0x1d6   :  { %18451 = vst [vmem:[#allocation39_spill] sm:$0xff] %v13740_v36  ;;  %v3532_v57 = vmax.f32 %v18453_v3, %v3356_v0  ;;  %v18456_v55 = vmax.f32 %v18455_v1, 0.0  ;;  %v18459_v42 = vld [vmem:[#allocation81_spill] sm:$0xff]  ;;  %v18467_v1 = vld [vmem:[#allocation2_spill] sm:$0xff]  ;;  %v18468_v23 = vld [vmem:[#allocation3_spill] sm:$0xff] }
 0x1d7   :  { %18449 = vst [vmem:[#allocation38_spill] sm:$0xff] %v13737_v10  ;;  %v3907_v39 = vcombine.low %v13493_v29, %v3593_v12  ;;  %v3908_v18 = vcombine.high %v13493_v29, %v3593_v12  ;;  %v3547_v51 = vmax.f32 %v18458_v34, %v3419_v32  ;;  %v18460_v3 = vmax.f32 %v18459_v42, 0.0  ;;  %v18469_v42 = vld [vmem:[#allocation49_spill] sm:$0xff] }
 0x1d8   :  { %v13755_v0 = vmax.f32 %v18454_v63, %v3532_v57  ;;  %v3545_v5 = vmax.f32 %v18456_v55, %v3417_v21  ;;  %v13763_v10 = vpop.f32.mrb[124].mxu1  ;;  %v18461_v29 = vcombine.low %v13329_v40, %v13496_v50  ;;  %v18463_v57 = vcombine.high %v13329_v40, %v13496_v50  ;;  %v18485_v52 = vld [vmem:[#allocation85_spill] sm:$0xff] }
 0x1d9   :  { %v3546_v31 = vmax.f32 %v18460_v3, %v3418_v33  ;;  %v13778_v21 = vrot.slane %v3907_v39, %v18405_v58  ;;  %v13781_v32 = vrot.slane %v3908_v18, %v18405_v58  ;;  %v13783_v33 = vpop.f32.mrb[125].mxu1  ;;  %v13787_v34 = vmax.f32 %v18468_v23, %v3547_v51 }
 0x1da   :  { %v13769_v12 = vrot.slane %v18461_v29, %v18405_v58  ;;  %v13775_v63 = vrot.slane %v18463_v57, %v18405_v58  ;;  %v3609_v55 = vmax.f32 %v18467_v1, %v3545_v5  ;;  %v18471_v29 = vld [vmem:[#allocation82_spill] sm:$0xff]  ;;  %v3060_v5 = vadd.f32 %v13608_v54, %v12059_v4 }
 0x1db   :  { %18465 = vst [vmem:[#allocation73_spill] sm:$0xff] %v13778_v21  ;;  %18466 = vst [vmem:[#allocation74_spill] sm:$0xff] %v13781_v32  ;;  %v13790_v3 = vmax.f32 %v18469_v42, %v3546_v31  ;;  %v18472_v40 = vmax.f32 %v18471_v29, 0.0  ;;  %v18473_v42 = vld [vmem:[#allocation50_spill] sm:$0xff]  ;;  %v18475_v57 = vcombine.low %v13365_v16, %v13526_v19  ;;  %v3062_v1 = vadd.f32 %v13618_v20, %v12059_v4 }
 0x1dc   :  { %18462 = vst [vmem:[#allocation40_spill] sm:$0xff] %v13769_v12  ;;  %18464 = vst [vmem:[#allocation72_spill] sm:$0xff] %v13775_v63  ;;  %v4043_v51 = vcombine.low %v13523_v25, %v3609_v55  ;;  %v4044_v31 = vcombine.high %v13523_v25, %v3609_v55  ;;  %v13808_v23 = vpop.f32.mrb[126].mxu1  ;;  %v2973_v25 = vadd.f32 %v13616_v62, %v12059_v4  ;;  %v3231_v39 = vmax.f32 %v3060_v5, 0.0 }
 0x1dd   :  { %18470 = vst [vmem:[#allocation41_spill] sm:$0xff] %v13790_v3  ;;  %v3548_v50 = vmax.f32 %v18472_v40, %v3420_v61  ;;  %v2971_v40 = vadd.f32 %v13606_v17, %v12059_v4  ;;  %v13819_v55 = vpop.f32.mrb[127].mxu1  ;;  %v13825_v18 = vrot.slane %v18475_v57, %v18405_v58  ;;  %v18486_v32 = vmax.f32 %v18485_v52, 0.0  ;;  %v18488_v52 = vld [vmem:[#allocation5_spill] sm:$0xff]  ;;  %v18524_v3 = vld [vmem:[#allocation68_spill] sm:$0xff] }
 0x1de   :  { %v13834_v17 = vrot.slane %v4043_v51, %v18405_v58  ;;  %v13837_v54 = vrot.slane %v4044_v31, %v18405_v58  ;;  %v3230_v61 = vmax.f32 %v2973_v25, 0.0  ;;  %v3232_v63 = vmax.f32 %v3062_v1, 0.0 }
 0x1df   :  { %v13811_v29 = vmax.f32 %v18473_v42, %v3548_v50  ;;  %18476 = vst [vmem:[#allocation43_spill] sm:$0xff] %v13825_v18  ;;  %v18477_v50 = vcombine.high %v13365_v16, %v13526_v19  ;;  %v3229_v62 = vmax.f32 %v2971_v40, 0.0  ;;  %v18481_v40 = vld [vmem:[#allocation83_spill] sm:$0xff]  ;;  %v2977_v19 = vadd.f32 %v13649_v27, %v12084_v49 }
 0x1e0   :  { %18479 = vst [vmem:[#allocation75_spill] sm:$0xff] %v13834_v17  ;;  %18480 = vst [vmem:[#allocation76_spill] sm:$0xff] %v13837_v54  ;;  %v13849_v31 = vpop.f32.mrb[128].mxu1  ;;  %v18482_v5 = vmax.f32 %v18481_v40, 0.0  ;;  %v3502_v57 = vmax.f32 %v18486_v32, %v3230_v61  ;;  %v3066_v51 = vadd.f32 %v13651_v47, %v12084_v49  ;;  %v2979_v16 = vadd.f32 %v13661_v9, %v12084_v49  ;;  %v18487_v40 = vld [vmem:[#allocation4_spill] sm:$0xff]  ;;  %v18490_v61 = vld [vmem:[#allocation86_spill] sm:$0xff] }
 0x1e1   :  { %18474 = vst [vmem:[#allocation42_spill] sm:$0xff] %v13811_v29  ;;  %v13831_v42 = vrot.slane %v18477_v50, %v18405_v58  ;;  %v18483_v50 = vld [vmem:[#allocation84_spill] sm:$0xff]  ;;  %v13857_v21 = vpop.f32.mrb[129].mxu1  ;;  %v18491_v27 = vmax.f32 %v18490_v61, 0.0  ;;  %v18497_v61 = vld [vmem:[#allocation89_spill] sm:$0xff]  ;;  %v18499_v17 = vmax.f32 %v13237_v41, 0.0 }
 0x1e2   :  { %v3501_v25 = vmax.f32 %v18482_v5, %v3229_v62  ;;  %v18484_v30 = vmax.f32 %v18483_v50, 0.0  ;;  %v3068_v62 = vadd.f32 %v13663_v46, %v12084_v49  ;;  %v3293_v50 = vmax.f32 %v2977_v19, 0.0 }
 0x1e3   :  { %18478 = vst [vmem:[#allocation44_spill] sm:$0xff] %v13831_v42  ;;  %v3504_v5 = vmax.f32 %v18491_v27, %v3232_v63  ;;  %v3295_v47 = vmax.f32 %v3066_v51, 0.0  ;;  %v3294_v54 = vmax.f32 %v2979_v16, 0.0  ;;  %v18493_v63 = vld [vmem:[#allocation87_spill] sm:$0xff]  ;;  %v18495_v51 = vld [vmem:[#allocation88_spill] sm:$0xff]  ;;  %v18498_v27 = vmax.f32 %v18497_v61, 0.0 }
 0x1e4   :  { %v3503_v20 = vmax.f32 %v18484_v30, %v3231_v39  ;;  %v13868_v30 = vmax.f32 %v18487_v40, %v3501_v25  ;;  %v18489_v39 = vld [vmem:[#allocation51_spill] sm:$0xff]  ;;  %v3296_v42 = vmax.f32 %v3068_v62, 0.0  ;;  %v13878_v9 = vpop.f32.mrb[130].mxu1  ;;  %v18494_v19 = vmax.f32 %v18493_v63, 0.0  ;;  %v18501_v63 = vld [vmem:[#allocation6_spill] sm:$0xff]  ;;  %v18510_v61 = vld [vmem:[#allocation9_spill] sm:$0xff] }
 0x1e5   :  { %v13874_v1 = vmax.f32 %v18489_v39, %v3502_v57  ;;  %v2983_v57 = vadd.f32 %v13699_v35, %v12046_v22  ;;  %v18496_v62 = vmax.f32 %v18495_v51, 0.0  ;;  %v3518_v46 = vmax.f32 %v18498_v27, %v3294_v54  ;;  %v18502_v54 = vld [vmem:[#allocation7_spill] sm:$0xff]  ;;  %v18504_v51 = vld [vmem:[#allocation54_spill] sm:$0xff] }
 0x1e6   :  { %v13871_v32 = vmax.f32 %v18488_v52, %v3503_v20  ;;  %v18492_v20 = vld [vmem:[#allocation52_spill] sm:$0xff]  ;;  %v13889_v52 = vpop.f32.mrb[131].mxu1  ;;  %v3517_v16 = vmax.f32 %v18494_v19, %v3293_v50  ;;  %v3520_v25 = vmax.f32 %v18499_v17, %v3296_v42  ;;  %v13905_v35 = vadd.f32 %v13307_v11, %v12072_v14  ;;  %v18503_v42 = vld [vmem:[#allocation53_spill] sm:$0xff] }
 0x1e7   :  { %v13885_v40 = vmax.f32 %v18492_v20, %v3504_v5  ;;  %v3519_v39 = vmax.f32 %v18496_v62, %v3295_v47  ;;  %v18500_v5 = vld [vmem:[#allocation94_spill] sm:$0xff]  ;;  %v13918_v17 = vmax.f32 %v18503_v42, %v3518_v46  ;;  %v3357_v27 = vmax.f32 %v2983_v57, 0.0 }
 0x1e8   :  { %v13901_v20 = vadd.f32 %v18500_v5, %v12072_v14  ;;  %v13912_v19 = vmax.f32 %v18501_v63, %v3517_v16  ;;  %v13921_v62 = vmax.f32 %v18504_v51, %v3520_v25  ;;  %v3072_v5 = vadd.f32 %v13701_v7, %v12046_v22 }
 0x1e9   :  { %v13915_v41 = vmax.f32 %v18502_v54, %v3519_v39  ;;  %v18505_v63 = vmax.f32 %v13246_v45, 0.0  ;;  %v2985_v57 = vadd.f32 %v13705_v59, %v12046_v22  ;;  %v3074_v7 = vadd.f32 %v13707_v13, %v12046_v22  ;;  %v18507_v45 = vld [vmem:[#allocation8_spill] sm:$0xff] }
 0x1ea   :  { %v3359_v42 = vmax.f32 %v3072_v5, 0.0  ;;  %v18506_v25 = vcombine.low %v13230_v37, %v13396_v26  ;;  %v18508_v5 = vld [vmem:[#allocation90_spill] sm:$0xff]  ;;  %v2989_v51 = vadd.f32 %v13731_v43, %v12072_v14  ;;  %v3149_v43 = vadd.f32 %v13763_v10, %v12059_v4 }
 0x1eb   :  { %v3787_v16 = vcombine.low %v13636_v15, %v13915_v41  ;;  %v3788_v39 = vcombine.high %v13636_v15, %v13915_v41  ;;  %v3533_v54 = vmax.f32 %v18505_v63, %v3357_v27  ;;  %v18509_v59 = vmax.f32 %v18508_v5, 0.0  ;;  %v18520_v10 = vld [vmem:[#allocation22_spill] sm:$0xff] }
 0x1ec   :  { %v13948_v46 = vrot.slane %v18506_v25, %v18405_v58  ;;  %v3358_v47 = vmax.f32 %v2985_v57, 0.0  ;;  %v3360_v13 = vmax.f32 %v3074_v7, 0.0  ;;  %v3078_v41 = vadd.f32 %v13733_v8, %v12072_v14  ;;  %v18513_v57 = vld [vmem:[#allocation93_spill] sm:$0xff] }
 0x1ed   :  { %v13951_v27 = vmax.f32 %v18507_v45, %v3533_v54  ;;  %v3535_v63 = vmax.f32 %v18509_v59, %v3359_v42  ;;  %v2991_v15 = vadd.f32 %v13744_v28, %v12072_v14  ;;  %v3080_v25 = vadd.f32 %v13746_v6, %v12072_v14  ;;  %v18511_v45 = vld [vmem:[#allocation92_spill] sm:$0xff]  ;;  %v18515_v28 = vld [vmem:[#allocation38_spill] sm:$0xff] }
 0x1ee   :  { %v18512_v5 = vmax.f32 %v18511_v45, 0.0  ;;  %v18514_v7 = vmax.f32 %v18513_v57, 0.0  ;;  %v3421_v11 = vmax.f32 %v2989_v51, 0.0  ;;  %v3423_v8 = vmax.f32 %v3078_v41, 0.0 }
 0x1ef   :  { %v13964_v54 = vmax.f32 %v18510_v61, %v3535_v63  ;;  %v3422_v50 = vmax.f32 %v2991_v15, 0.0  ;;  %v3424_v18 = vmax.f32 %v3080_v25, 0.0  ;;  %v18516_v61 = vld [vmem:[#allocation55_spill] sm:$0xff]  ;;  %v18521_v51 = vmax.f32 %v18520_v10, 0.0  ;;  %v18522_v15 = vld [vmem:[#allocation65_spill] sm:$0xff] }
 0x1f0   :  { %v3534_v42 = vmax.f32 %v18512_v5, %v3358_v47  ;;  %v3536_v59 = vmax.f32 %v18514_v7, %v3360_v13  ;;  %v18517_v47 = vld [vmem:[#allocation56_spill] sm:$0xff]  ;;  %v18523_v25 = vmax.f32 %v18522_v15, 0.0  ;;  %v18525_v53 = vmax.f32 %v18524_v3, 0.0  ;;  %v18530_v3 = vld [vmem:[#allocation10_spill] sm:$0xff]  ;;  %v18533_v10 = vld [vmem:[#allocation57_spill] sm:$0xff] }
 0x1f1   :  { %v3923_v12 = vcombine.low %v18515_v28, %v13964_v54  ;;  %v3924_v6 = vcombine.high %v18515_v28, %v13964_v54  ;;  %v18518_v13 = vld [vmem:[#allocation100_spill] sm:$0xff]  ;;  %v3551_v41 = vmax.f32 %v18521_v51, %v3423_v8  ;;  %v18526_v54 = vld [vmem:[#allocation101_spill] sm:$0xff] }
 0x1f2   :  { %v13977_v63 = vmax.f32 %v18516_v61, %v3534_v42  ;;  %v13980_v45 = vmax.f32 %v18517_v47, %v3536_v59  ;;  %v18519_v5 = vmax.f32 %v18518_v13, 0.0  ;;  %v3550_v7 = vmax.f32 %v18523_v25, %v3422_v50  ;;  %v18527_v28 = vld [vmem:[#allocation33_spill] sm:$0xff]  ;;  %v18532_v13 = vld [vmem:[#allocation12_spill] sm:$0xff]  ;;  %v18536_v25 = vld [vmem:[#allocation31_spill] sm:$0xff] }
 0x1f3   :  { %v3552_v36 = vmax.f32 %v18525_v53, %v3424_v18  ;;  %v18528_v42 = vcombine.low %v18526_v54, %v18527_v28  ;;  %v18529_v59 = vcombine.high %v18526_v54, %v18527_v28  ;;  %v18531_v18 = vld [vmem:[#allocation11_spill] sm:$0xff]  ;;  %v18535_v15 = vld [vmem:[#allocation64_spill] sm:$0xff]  ;;  %v18537_v54 = vld [vmem:[#allocation34_spill] sm:$0xff] }
 0x1f4   :  { %v3549_v57 = vmax.f32 %v18519_v5, %v3421_v11  ;;  %v14010_v47 = vmax.f32 %v18531_v18, %v3551_v41  ;;  %v14013_v5 = vmax.f32 %v18532_v13, %v3550_v7  ;;  %v18538_v28 = vcombine.low %v18536_v25, %v18537_v54 }
 0x1f5   :  { %v13994_v61 = vrot.slane %v18528_v42, %v18405_v58  ;;  %v14000_v11 = vrot.slane %v18529_v59, %v18405_v58  ;;  %v14016_v51 = vmax.f32 %v18533_v10, %v3552_v36  ;;  %v3233_v41 = vmax.f32 %v3149_v43, 0.0  ;;  %v18540_v10 = vld [vmem:[#allocation27_spill] sm:$0xff] }
 0x1f6   :  { %v14007_v53 = vmax.f32 %v18530_v3, %v3549_v57  ;;  %v14022_v42 = vrot.slane %v18538_v28, %v18535_v15  ;;  %v18539_v57 = vcombine.low %v13598_v24, %v13871_v32  ;;  %v3151_v7 = vadd.f32 %v13783_v33, %v12059_v4 }
 0x1f7   :  { %18534 = vst [vmem:[#allocation77_spill] sm:$0xff] %v14016_v51  ;;  %v4059_v36 = vcombine.low %v13787_v34, %v14010_v47  ;;  %v18541_v28 = vmax.f32 %v18540_v10, 0.0  ;;  %v3155_v43 = vadd.f32 %v13808_v23, %v12084_v49  ;;  %v3157_v4 = vadd.f32 %v13819_v55, %v12084_v49  ;;  %v18545_v55 = vld [vmem:[#allocation28_spill] sm:$0xff] }
 0x1f8   :  { %v14028_v59 = vrot.slane %v18539_v57, %v18405_v58  ;;  %v3234_v50 = vmax.f32 %v3151_v7, 0.0  ;;  %v18542_v33 = vcombine.high %v13598_v24, %v13871_v32  ;;  %v18543_v13 = vcombine.low %v13604_v2, %v13885_v40  ;;  %v18544_v7 = vld [vmem:[#allocation58_spill] sm:$0xff] }
 0x1f9   :  { %v3505_v57 = vmax.f32 %v18541_v28, %v3233_v41  ;;  %v14059_v41 = vrot.slane %v3787_v16, %v18405_v58  ;;  %v14062_v23 = vrot.slane %v3788_v39, %v18405_v58  ;;  %v18546_v10 = vmax.f32 %v18545_v55, 0.0 }
 0x1fa   :  { %v14050_v8 = vrot.slane %v18542_v33, %v18405_v58  ;;  %v14056_v18 = vrot.slane %v18543_v13, %v18405_v58  ;;  %v3297_v24 = vmax.f32 %v3155_v43, 0.0  ;;  %v3298_v32 = vmax.f32 %v3157_v4, 0.0  ;;  %v18548_v43 = vld [vmem:[#allocation30_spill] sm:$0xff] }
 0x1fb   :  { %v3569_v49 = vmax.f32 %v18544_v7, %v3505_v57  ;;  %v3506_v28 = vmax.f32 %v18546_v10, %v3234_v50  ;;  %v14068_v33 = vrot.slane %v3923_v12, %v18405_v58  ;;  %v3161_v13 = vadd.f32 %v13849_v31, %v12046_v22  ;;  %v18547_v7 = vld [vmem:[#allocation59_spill] sm:$0xff] }
 0x1fc   :  { %v3163_v16 = vadd.f32 %v13857_v21, %v12046_v22  ;;  %v3167_v39 = vadd.f32 %v13878_v9, %v12072_v14  ;;  %v18549_v4 = vmax.f32 %v18548_v43, 0.0  ;;  %v18550_v12 = vmax.f32 %v13562_v60, 0.0 }
 0x1fd   :  { %v3667_v3 = vcombine.low %v13868_v30, %v3569_v49  ;;  %v3668_v57 = vcombine.high %v13868_v30, %v3569_v49  ;;  %v3570_v50 = vmax.f32 %v18547_v7, %v3506_v28  ;;  %v3361_v51 = vmax.f32 %v3161_v13, 0.0  ;;  %v18551_v49 = vld [vmem:[#allocation16_spill] sm:$0xff] }
 0x1fe   :  { %v3521_v55 = vmax.f32 %v18549_v4, %v3297_v24  ;;  %v3522_v10 = vmax.f32 %v18550_v12, %v3298_v32  ;;  %v3362_v31 = vmax.f32 %v3163_v16, 0.0  ;;  %v3425_v29 = vmax.f32 %v3167_v39, 0.0  ;;  %v18552_v7 = vld [vmem:[#allocation60_spill] sm:$0xff]  ;;  %v18555_v12 = vld [vmem:[#allocation18_spill] sm:$0xff] }
 0x1ff   :  { %v14084_v22 = vrot.slane %v3667_v3, %v18405_v58  ;;  %v14087_v21 = vrot.slane %v3668_v57, %v18405_v58  ;;  %v4211_v9 = vcombine.low %v13874_v1, %v3570_v50  ;;  %v4212_v30 = vcombine.high %v13874_v1, %v3570_v50 }
 0x200   :  { %v3585_v28 = vmax.f32 %v18551_v49, %v3521_v55  ;;  %v14093_v24 = vmax.f32 %v18552_v7, %v3522_v10  ;;  %v18553_v60 = vmax.f32 %v13641_v44, 0.0  ;;  %v18554_v13 = vmax.f32 %v13673_v38, 0.0 }
 0x201   :  { %v3715_v3 = vcombine.low %v14028_v59, %v14084_v22  ;;  %v3716_v39 = vcombine.high %v14028_v59, %v14084_v22  ;;  %v3731_v1 = vcombine.low %v14050_v8, %v14087_v21  ;;  %v3732_v57 = vcombine.high %v14050_v8, %v14087_v21  ;;  %v18569_v59 = vld [vmem:[#allocation15_spill] sm:$0xff]  ;;  %v4854_v21 = vld [vmem:[%s18019_s3 + $0x498] sm:$0xff] }
 0x202   :  { %v3537_v32 = vmax.f32 %v18553_v60, %v3361_v51  ;;  %v3538_v16 = vmax.f32 %v18554_v13, %v3362_v31  ;;  %v14108_v50 = vrot.slane %v3924_v6, %v18405_v58  ;;  %v3803_v44 = vcombine.low %v13912_v19, %v3585_v28  ;;  %v18584_v13 = vld [vmem:[#allocation66_spill] sm:$0xff] }
 0x203   :  { %v3804_v38 = vcombine.high %v13912_v19, %v3585_v28  ;;  %v3169_v51 = vadd.f32 %v13889_v52, %v12072_v14  ;;  %v4219_v43 = vrot.slane %v4211_v9, %v18405_v58  ;;  %v4347_v4 = vcombine.low %v13918_v17, %v14093_v24  ;;  %v18556_v19 = vld [vmem:[#allocation20_spill] sm:$0xff] }
 0x204   :  { %v3601_v10 = vmax.f32 %v18555_v12, %v3537_v32  ;;  %v14121_v6 = vrot.slane %v3803_v44, %v18405_v58  ;;  %v14127_v49 = vmax.f32 %v18556_v19, %v3538_v16  ;;  %v18557_v14 = vmax.f32 %v13901_v20, 0.0  ;;  %v18558_v44 = vld [vmem:[#allocation61_spill] sm:$0xff]  ;;  %v4783_v32 = vld [vmem:[%s18019_s3 + $0x260] sm:$0xff] }
 0x205   :  { %v14124_v31 = vrot.slane %v3804_v38, %v18405_v58  ;;  %v14132_v9 = vrot.slane %v4059_v36, %v18405_v58  ;;  %v3723_v28 = vrot.slane %v3715_v3, %v18535_v15  ;;  %v3426_v12 = vmax.f32 %v3169_v51, 0.0 }
 0x206   :  { %v3553_v52 = vmax.f32 %v18557_v14, %v3425_v29  ;;  %v3939_v7 = vcombine.low %v13951_v27, %v3601_v10  ;;  %v3940_v60 = vcombine.high %v13951_v27, %v3601_v10  ;;  %v4227_v10 = vcombine.low %v13948_v46, %v13994_v61 }
 0x207   :  { %v4259_v19 = vcombine.low %v14056_v18, %v4219_v43  ;;  %v18559_v51 = vcombine.high %v13787_v34, %v14010_v47  ;;  %v3747_v27 = vcombine.low %v14022_v42, %v3723_v28 }
 0x208   :  { %v14146_v20 = vrot.slane %v3939_v7, %v18405_v58  ;;  %v14149_v36 = vrot.slane %v3940_v60, %v18405_v58  ;;  %v3617_v38 = vmax.f32 %v18558_v44, %v3553_v52  ;;  %v14174_v44 = vrot.slane %v4212_v30, %v18405_v58 }
 0x209   :  { %v14171_v52 = vrot.slane %v18559_v51, %v18405_v58  ;;  %v18560_v7 = vmax.f32 %v13905_v35, 0.0  ;;  %v4235_v60 = vrot.slane %v4227_v10, %v18535_v15  ;;  %v4267_v29 = vrot.slane %v4259_v19, %v18535_v15 }
 0x20a   :  { %v4075_v14 = vcombine.low %v14007_v53, %v3617_v38  ;;  %v4076_v16 = vcombine.high %v14007_v53, %v3617_v38  ;;  %v3748_v30 = vcombine.high %v14022_v42, %v3723_v28  ;;  %v4228_v53 = vcombine.high %v13948_v46, %v13994_v61  ;;  %v18561_v38 = vld [vmem:[#allocation62_spill] sm:$0xff]  ;;  %v4824_v61 = vld [vmem:[%s18019_s3 + $0x3a8] sm:$0xff]  ;;  %v18581_v42 = vld [vmem:[#allocation24_spill] sm:$0xff] }
 0x20b   :  { %v3554_v3 = vmax.f32 %v18560_v7, %v3426_v12  ;;  %v4291_v12 = vcombine.low %v4235_v60, %v4267_v29  ;;  %v4292_v10 = vcombine.high %v4235_v60, %v4267_v29  ;;  %v4260_v19 = vcombine.high %v14056_v18, %v4219_v43  ;;  %v4823_v46 = vld [vmem:[%s18019_s3 + $0x3a0] sm:$0xff]  ;;  %v4777_v18 = vld [vmem:[%s18019_s3 + $0x230] sm:$0xff] }
 0x20c   :  { %v14184_v34 = vrot.slane %v4075_v14, %v18405_v58  ;;  %v14187_v47 = vrot.slane %v4076_v16, %v18405_v58  ;;  %v4242_v28 = vrot.slane %v4228_v53, %v18535_v15  ;;  %v14226_v51 = vrot.slane %v3716_v39, %v18535_v15 }
 0x20d   :  { %v14193_v35 = vmax.f32 %v18561_v38, %v3554_v3  ;;  %5795 = vmatprep.mubr.f32.mxu0 %v4291_v12  ;;  %5865 = vmatprep.mubr.f32.mxu1 %v4292_v10  ;;  %v4274_v29 = vrot.slane %v4260_v19, %v18535_v15  ;;  %v18562_v3 = vcombine.high %v18536_v25, %v18537_v54  ;;  %v18565_v25 = vld [vmem:[#allocation14_spill] sm:$0xff]  ;;  %v18566_v54 = vld [vmem:[#allocation13_spill] sm:$0xff]  ;;  %v18568_v10 = vld [vmem:[#allocation91_spill] sm:$0xff] }
 0x20e   :  { %5796 = vmatmul.mubr.f32.vlgmr.msra.gmra.mrb[124].mxu0 %v3747_v27  ;;  %5866 = vmatmul.mubr.f32.vlgmr.msra.gmra.mrb[132].mxu1 %v3748_v30  ;;  %v18563_v53 = vcombine.high %v13230_v37, %v13396_v26  ;;  %v18564_v30 = vcombine.high %v13604_v2, %v13885_v40  ;;  %v18567_v12 = vpack.c.bf16 %v18565_v25, %v18566_v54  ;;  %v4775_v37 = vld [vmem:[%s18019_s3 + $0x220] sm:$0xff]  ;;  %v4776_v26 = vld [vmem:[%s18019_s3 + $0x228] sm:$0xff] }
 0x20f   :  { %v14220_v60 = vrot.slane %v18562_v3, %v18535_v15  ;;  %v18570_v22 = vpack.c.bf16 %v18568_v10, %v18569_v59  ;;  %v9776_v39 = vpack.c.bf16 %v4824_v61, %v4823_v46  ;;  %v4807_v2 = vld [vmem:[%s18019_s3 + $0x320] sm:$0xff]  ;;  %v4293_v40 = vcombine.low %v4242_v28, %v4274_v29  ;;  %v18571_v3 = vld [vmem:[#allocation96_spill] sm:$0xff]  ;;  %v18575_v46 = vld [vmem:[#allocation97_spill] sm:$0xff] }
 0x210   :  { %v14232_v27 = vrot.slane %v18563_v53, %v18405_v58  ;;  %v14238_v38 = vrot.slane %v18564_v30, %v18405_v58  ;;  %9739 = vmatpush3.bf16.msra.mxu0 %v18567_v12  ;;  %v4294_v19 = vcombine.high %v4242_v28, %v4274_v29  ;;  %v18572_v53 = vld [vmem:[#allocation95_spill] sm:$0xff]  ;;  %v18574_v25 = vld [vmem:[#allocation98_spill] sm:$0xff]  ;;  %v4793_v12 = vld [vmem:[%s18019_s3 + $0x2b0] sm:$0xff]  ;;  %v9746_v14 = vpack.c.bf16 %v4776_v26, %v4775_v37 }
 0x211   :  { %9771 = vmatpush3.bf16.msra.mxu1 %v18570_v22  ;;  %v18573_v30 = vpack.c.bf16 %v18571_v3, %v18572_v53  ;;  %v18576_v61 = vpack.c.bf16 %v18574_v25, %v18575_v46  ;;  %v4808_v54 = vld [vmem:[%s18019_s3 + $0x328] sm:$0xff]  ;;  %v4794_v28 = vld [vmem:[%s18019_s3 + $0x2b8] sm:$0xff]  ;;  %v4825_v10 = vld [vmem:[%s18019_s3 + $0x3b0] sm:$0xff]  ;;  %5935 = vmatprep.mubr.f32.mxu0 %v4293_v40 }
 0x212   :  { %v4826_v59 = vld [vmem:[%s18019_s3 + $0x3b8] sm:$0xff]  ;;  %v4243_v3 = vcombine.low %v14232_v27, %v14000_v11  ;;  %6005 = vmatprep.mubr.f32.mxu1 %v4294_v19  ;;  %v4275_v53 = vcombine.low %v14238_v38, %v14174_v44  ;;  %v18578_v25 = vld [vmem:[#allocation19_spill] sm:$0xff]  ;;  %v9778_v7 = vpack.c.bf16 %v4808_v54, %v4807_v2  ;;  %v9748_v43 = vpack.c.bf16 %v4794_v28, %v4793_v12  ;;  %v4795_v37 = vld [vmem:[%s18019_s3 + $0x2c0] sm:$0xff] }
 0x213   :  { %9741 = vmatprep.subr.bf16.mxu0 %v18573_v30  ;;  %9773 = vmatprep.subr.bf16.mxu1 %v18576_v61  ;;  %v18577_v30 = vld [vmem:[#allocation99_spill] sm:$0xff]  ;;  %v18580_v61 = vld [vmem:[#allocation102_spill] sm:$0xff]  ;;  %v4778_v40 = vld [vmem:[%s18019_s3 + $0x238] sm:$0xff] }
 0x214   :  { %v18579_v46 = vpack.c.bf16 %v18577_v30, %v18578_v25  ;;  %v18582_v16 = vpack.c.bf16 %v18580_v61, %v18581_v42  ;;  %v18583_v19 = vld [vmem:[#allocation103_spill] sm:$0xff]  ;;  %v9780_v30 = vpack.c.bf16 %v4826_v59, %v4825_v10  ;;  %v4810_v42 = vld [vmem:[%s18019_s3 + $0x338] sm:$0xff]  ;;  %v14309_v26 = vrot.slane %v4243_v3, %v18535_v15  ;;  %v4779_v59 = vld [vmem:[%s18019_s3 + $0x240] sm:$0xff] }
 0x215   :  { %v18585_v55 = vpack.c.bf16 %v18583_v19, %v18584_v13  ;;  %v14312_v13 = vrot.slane %v4275_v53, %v18535_v15  ;;  %v4828_v2 = vld [vmem:[%s18019_s3 + $0x3c8] sm:$0xff]  ;;  %v9750_v28 = vpack.c.bf16 %v4778_v40, %v4777_v18  ;;  %v4811_v53 = vld [vmem:[%s18019_s3 + $0x340] sm:$0xff]  ;;  %v4798_v18 = vld [vmem:[%s18019_s3 + $0x2d8] sm:$0xff] }
 0x216   :  { %9743 = vmatpush3.bf16.msra.mxu0 %v18579_v46  ;;  %9775 = vmatpush3.bf16.msra.mxu1 %v18582_v16  ;;  %v4809_v16 = vld [vmem:[%s18019_s3 + $0x330] sm:$0xff]  ;;  %v4780_v3 = vld [vmem:[%s18019_s3 + $0x248] sm:$0xff] }
 0x217   :  { %9745 = vmatprep.subr.bf16.mxu0 %v18585_v55  ;;  %9777 = vmatprep.subr.bf16.mxu1 %v9776_v39  ;;  %v4796_v55 = vld [vmem:[%s18019_s3 + $0x2c8] sm:$0xff]  ;;  %v4827_v39 = vld [vmem:[%s18019_s3 + $0x3c0] sm:$0xff]  ;;  %v9782_v10 = vpack.c.bf16 %v4810_v42, %v4809_v16  ;;  %v4829_v61 = vld [vmem:[%s18019_s3 + $0x3d0] sm:$0xff]  ;;  %v9754_v40 = vpack.c.bf16 %v4780_v3, %v4779_v59 }
 0x218   :  { %v9752_v25 = vpack.c.bf16 %v4796_v55, %v4795_v37  ;;  %v9784_v46 = vpack.c.bf16 %v4828_v2, %v4827_v39  ;;  %v4781_v16 = vld [vmem:[%s18019_s3 + $0x250] sm:$0xff]  ;;  %v4782_v42 = vld [vmem:[%s18019_s3 + $0x258] sm:$0xff]  ;;  %v4799_v2 = vld [vmem:[%s18019_s3 + $0x2e0] sm:$0xff] }
 0x219   :  { %v4813_v55 = vld [vmem:[%s18019_s3 + $0x350] sm:$0xff]  ;;  %v4814_v39 = vld [vmem:[%s18019_s3 + $0x358] sm:$0xff] }
 0x21a   :  { %9747 = vmatpush3.bf16.msra.mxu0 %v9746_v14  ;;  %9779 = vmatpush3.bf16.msra.mxu1 %v9778_v7  ;;  %v4812_v7 = vld [vmem:[%s18019_s3 + $0x348] sm:$0xff]  ;;  %v4797_v14 = vld [vmem:[%s18019_s3 + $0x2d0] sm:$0xff] }
 0x21b   :  { %9749 = vmatprep.subr.bf16.mxu0 %v9748_v43  ;;  %9781 = vmatprep.subr.bf16.mxu1 %v9780_v30  ;;  %v4830_v43 = vld [vmem:[%s18019_s3 + $0x3d8] sm:$0xff]  ;;  %v9786_v19 = vpack.c.bf16 %v4812_v7, %v4811_v53  ;;  %v9756_v30 = vpack.c.bf16 %v4798_v18, %v4797_v14  ;;  %v14376_v53 = vrot.slane %v3731_v1, %v18535_v15  ;;  %v4832_v7 = vld [vmem:[%s18019_s3 + $0x3e8] sm:$0xff] }
 0x21c   :  { %v9788_v37 = vpack.c.bf16 %v4830_v43, %v4829_v61  ;;  %v4244_v14 = vcombine.high %v14232_v27, %v14000_v11  ;;  %v4276_v18 = vcombine.high %v14238_v38, %v14174_v44  ;;  %v9758_v1 = vpack.c.bf16 %v4782_v42, %v4781_v16  ;;  %v4784_v11 = vld [vmem:[%s18019_s3 + $0x268] sm:$0xff]  ;;  %v4801_v42 = vld [vmem:[%s18019_s3 + $0x2f0] sm:$0xff] }
 0x21d   :  { %v4816_v16 = vld [vmem:[%s18019_s3 + $0x368] sm:$0xff] }
 0x21e   :  { %9751 = vmatpush3.bf16.msra.mxu0 %v9750_v28  ;;  %9783 = vmatpush3.bf16.msra.mxu1 %v9782_v10  ;;  %v18586_v28 = vld [vmem:[#allocation32_spill] sm:$0xff]  ;;  %v18587_v10 = vld [vmem:[#allocation35_spill] sm:$0xff]  ;;  %v14402_v44 = vrot.slane %v4244_v14, %v18535_v15  ;;  %v14405_v27 = vrot.slane %v4276_v18, %v18535_v15  ;;  %v4786_v14 = vld [vmem:[%s18019_s3 + $0x278] sm:$0xff] }
 0x21f   :  { %9753 = vmatprep.subr.bf16.mxu0 %v9752_v25  ;;  %9785 = vmatprep.subr.bf16.mxu1 %v9784_v46  ;;  %v18588_v59 = vcombine.low %v18586_v28, %v18587_v10  ;;  %v4800_v25 = vld [vmem:[%s18019_s3 + $0x2e8] sm:$0xff]  ;;  %v4831_v46 = vld [vmem:[%s18019_s3 + $0x3e0] sm:$0xff]  ;;  %v4817_v18 = vld [vmem:[%s18019_s3 + $0x370] sm:$0xff] }
 0x220   :  { %v9760_v38 = vpack.c.bf16 %v4800_v25, %v4799_v2  ;;  %v4785_v25 = vld [vmem:[%s18019_s3 + $0x270] sm:$0xff]  ;;  %v4818_v2 = vld [vmem:[%s18019_s3 + $0x378] sm:$0xff] }
 0x221   :  { %v14370_v3 = vrot.slane %v18588_v59, %v18535_v15  ;;  %v9790_v59 = vpack.c.bf16 %v4814_v39, %v4813_v55  ;;  %v4802_v55 = vld [vmem:[%s18019_s3 + $0x2f8] sm:$0xff] }
 0x222   :  { %9755 = vmatpush3.bf16.msra.mxu0 %v9754_v40  ;;  %9787 = vmatpush3.bf16.msra.mxu1 %v9786_v19  ;;  %v9792_v40 = vpack.c.bf16 %v4832_v7, %v4831_v46  ;;  %v4815_v19 = vld [vmem:[%s18019_s3 + $0x360] sm:$0xff]  ;;  %v9762_v46 = vpack.c.bf16 %v4784_v11, %v4783_v32  ;;  %v9764_v39 = vpack.c.bf16 %v4802_v55, %v4801_v42  ;;  %v18590_v11 = vld [vmem:[#allocation36_spill] sm:$0xff]  ;;  %v4884_v42 = vld [vmem:[%s18019_s3 + $0x588] sm:$0xff] }
 0x223   :  { %9757 = vmatprep.subr.bf16.mxu0 %v9756_v30  ;;  %9789 = vmatprep.subr.bf16.mxu1 %v9788_v37  ;;  %v4833_v30 = vld [vmem:[%s18019_s3 + $0x3f0] sm:$0xff]  ;;  %v4834_v37 = vld [vmem:[%s18019_s3 + $0x3f8] sm:$0xff]  ;;  %v9794_v7 = vpack.c.bf16 %v4816_v16, %v4815_v19  ;;  %v4851_v32 = vld [vmem:[%s18019_s3 + $0x480] sm:$0xff]  ;;  %v9766_v55 = vpack.c.bf16 %v4786_v14, %v4785_v25  ;;  %v18596_v25 = vcombine.high %v18586_v28, %v18587_v10 }
 0x224   :  { %v9796_v43 = vpack.c.bf16 %v4834_v37, %v4833_v30  ;;  %v9798_v30 = vpack.c.bf16 %v4818_v2, %v4817_v18  ;;  %v18592_v37 = vld [vmem:[#allocation17_spill] sm:$0xff]  ;;  %v4835_v2 = vld [vmem:[%s18019_s3 + $0x400] sm:$0xff]  ;;  %v4853_v28 = vld [vmem:[%s18019_s3 + $0x490] sm:$0xff] }
 0x225   :  { %v14487_v14 = vrot.slane %v18596_v25, %v18535_v15  ;;  %v4837_v25 = vld [vmem:[%s18019_s3 + $0x410] sm:$0xff]  ;;  %v4915_v18 = vld [vmem:[%s18019_s3 + $0x680] sm:$0xff] }
 0x226   :  { %9759 = vmatpush3.bf16.msra.mxu0 %v9758_v1  ;;  %9791 = vmatpush3.bf16.msra.mxu1 %v9790_v59  ;;  %v4852_v1 = vld [vmem:[%s18019_s3 + $0x488] sm:$0xff]  ;;  %v18589_v59 = vld [vmem:[#allocation25_spill] sm:$0xff] }
 0x227   :  { %9761 = vmatprep.subr.bf16.mxu0 %v9760_v38  ;;  %9793 = vmatprep.subr.bf16.mxu1 %v9792_v40  ;;  %v18591_v19 = vcombine.low %v18589_v59, %v18590_v11  ;;  %v14457_v38 = vrot.slane %v4347_v4, %v18405_v58  ;;  %v4883_v40 = vld [vmem:[%s18019_s3 + $0x580] sm:$0xff]  ;;  %v18595_v4 = vcombine.low %v13647_v56, %v13921_v62 }
 0x228   :  { %v9800_v22 = vpack.c.bf16 %v4852_v1, %v4851_v32  ;;  %v9832_v29 = vpack.c.bf16 %v4884_v42, %v4883_v40  ;;  %18597 = vst [vmem:[#allocation45_spill] sm:$0xff] %v14487_v14  ;;  %v4838_v32 = vld [vmem:[%s18019_s3 + $0x418] sm:$0xff] }
 0x229   :  { %v14451_v16 = vrot.slane %v18591_v19, %v18405_v58  ;;  %v18593_v19 = vld [vmem:[#allocation26_spill] sm:$0xff]  ;;  %v14475_v54 = vrot.slane %v18595_v4, %v18405_v58 }
 0x22a   :  { %v18594_v61 = vcombine.low %v18592_v37, %v18593_v19  ;;  %9763 = vmatpush3.bf16.msra.mxu0 %v9762_v46  ;;  %9795 = vmatpush3.bf16.msra.mxu1 %v9794_v7  ;;  %v4868_v46 = vld [vmem:[%s18019_s3 + $0x508] sm:$0xff]  ;;  %v4886_v7 = vld [vmem:[%s18019_s3 + $0x598] sm:$0xff] }
 0x22b   :  { %9765 = vmatprep.subr.bf16.mxu0 %v9764_v39  ;;  %9797 = vmatprep.subr.bf16.mxu1 %v9796_v43  ;;  %v14493_v43 = vrot.slane %v3732_v57, %v18535_v15  ;;  %v4867_v39 = vld [vmem:[%s18019_s3 + $0x500] sm:$0xff]  ;;  %v4395_v8 = vcombine.low %v14475_v54, %v14457_v38  ;;  %v4885_v57 = vld [vmem:[%s18019_s3 + $0x590] sm:$0xff] }
 0x22c   :  { %v14469_v12 = vrot.slane %v18594_v61, %v18405_v58  ;;  %v4836_v61 = vld [vmem:[%s18019_s3 + $0x408] sm:$0xff]  ;;  %v9834_v4 = vpack.c.bf16 %v4868_v46, %v4867_v39  ;;  %v4843_v39 = vld [vmem:[%s18019_s3 + $0x440] sm:$0xff] }
 0x22d   :  { %18598 = vst [vmem:[#allocation46_spill] sm:$0xff] %v14493_v43  ;;  %v9802_v1 = vpack.c.bf16 %v4836_v61, %v4835_v2  ;;  %v14525_v42 = vrot.slane %v4395_v8, %v18535_v15  ;;  %v9836_v2 = vpack.c.bf16 %v4886_v7, %v4885_v57  ;;  %v4856_v61 = vld [vmem:[%s18019_s3 + $0x4a8] sm:$0xff]  ;;  %v4887_v8 = vld [vmem:[%s18019_s3 + $0x5a0] sm:$0xff]  ;;  %v18603_v57 = vcombine.low %v14309_v26, %v14312_v13 }
 0x22e   :  { %v4363_v10 = vcombine.low %v14469_v12, %v14451_v16  ;;  %9767 = vmatpush3.bf16.msra.mxu0 %v9766_v55  ;;  %9799 = vmatpush3.bf16.msra.mxu1 %v9798_v30  ;;  %v4869_v55 = vld [vmem:[%s18019_s3 + $0x510] sm:$0xff]  ;;  %v9804_v30 = vpack.c.bf16 %v4854_v21, %v4853_v28  ;;  %v18601_v28 = vcombine.low %v14220_v60, %v14226_v51  ;;  %v4888_v21 = vld [vmem:[%s18019_s3 + $0x5a8] sm:$0xff] }
 0x22f   :  { %18600 = vst [vmem:[#allocation78_spill] sm:$0xff] %v14525_v42  ;;  %9801 = vmatprep.subr.bf16.mxu0 %v9800_v22  ;;  %9833 = vmatprep.subr.bf16.mxu1 %v9832_v29  ;;  %v4870_v22 = vld [vmem:[%s18019_s3 + $0x518] sm:$0xff]  ;;  %v4855_v29 = vld [vmem:[%s18019_s3 + $0x4a0] sm:$0xff]  ;;  %v9806_v7 = vpack.c.bf16 %v4838_v32, %v4837_v25  ;;  %v4872_v32 = vld [vmem:[%s18019_s3 + $0x528] sm:$0xff] }
 0x230   :  { %v14522_v40 = vrot.slane %v4363_v10, %v18535_v15  ;;  %v18602_v10 = vcombine.high %v14220_v60, %v14226_v51  ;;  %v18604_v60 = vcombine.high %v14309_v26, %v14312_v13  ;;  %v9838_v51 = vpack.c.bf16 %v4870_v22, %v4869_v55  ;;  %v4857_v26 = vld [vmem:[%s18019_s3 + $0x4b0] sm:$0xff]  ;;  %v4858_v13 = vld [vmem:[%s18019_s3 + $0x4b8] sm:$0xff] }
 0x231   :  { %5936 = vmatmul.mubr.f32.vlgmr.msra.gmra.mrb[126].mxu0 %v18601_v28  ;;  %v4839_v28 = vld [vmem:[%s18019_s3 + $0x420] sm:$0xff]  ;;  %v4889_v25 = vld [vmem:[%s18019_s3 + $0x5b0] sm:$0xff]  ;;  %v4890_v55 = vld [vmem:[%s18019_s3 + $0x5b8] sm:$0xff] }
 0x232   :  { %18599 = vst [vmem:[#allocation47_spill] sm:$0xff] %v14522_v40  ;;  %6006 = vmatmul.mubr.f32.vlgmr.msra.gmra.mrb[134].mxu1 %v18602_v10  ;;  %9803 = vmatpush3.bf16.msra.mxu0 %v9802_v1  ;;  %v9808_v10 = vpack.c.bf16 %v4856_v61, %v4855_v29  ;;  %v4840_v1 = vld [vmem:[%s18019_s3 + $0x428] sm:$0xff]  ;;  %v4841_v22 = vld [vmem:[%s18019_s3 + $0x430] sm:$0xff]  ;;  %v9812_v29 = vpack.c.bf16 %v4858_v13, %v4857_v26  ;;  %v4842_v61 = vld [vmem:[%s18019_s3 + $0x438] sm:$0xff] }
 0x233   :  { %6075 = vmatprep.mubr.f32.mxu0 %v18603_v57  ;;  %9835 = vmatpush3.bf16.msra.mxu1 %v9834_v4  ;;  %v4871_v57 = vld [vmem:[%s18019_s3 + $0x520] sm:$0xff]  ;;  %v9840_v4 = vpack.c.bf16 %v4888_v21, %v4887_v8  ;;  %v4873_v8 = vld [vmem:[%s18019_s3 + $0x530] sm:$0xff]  ;;  %v4874_v21 = vld [vmem:[%s18019_s3 + $0x538] sm:$0xff]  ;;  %v4364_v13 = vcombine.high %v14469_v12, %v14451_v16  ;;  %v9814_v46 = vpack.c.bf16 %v4842_v61, %v4841_v22 }
 0x234   :  { %6145 = vmatprep.mubr.f32.mxu1 %v18604_v60  ;;  %9805 = vmatprep.subr.bf16.mxu0 %v9804_v30  ;;  %v9810_v30 = vpack.c.bf16 %v4840_v1, %v4839_v28  ;;  %v18606_v28 = vld [vmem:[#allocation71_spill] sm:$0xff]  ;;  %v9846_v12 = vpack.c.bf16 %v4874_v21, %v4873_v8  ;;  %v4861_v22 = vld [vmem:[%s18019_s3 + $0x4d0] sm:$0xff]  ;;  %v4894_v8 = vld [vmem:[%s18019_s3 + $0x5d8] sm:$0xff] }
 0x235   :  { %9837 = vmatprep.subr.bf16.mxu1 %v9836_v2  ;;  %v9842_v2 = vpack.c.bf16 %v4872_v32, %v4871_v57  ;;  %v9844_v57 = vpack.c.bf16 %v4890_v55, %v4889_v25  ;;  %v4859_v32 = vld [vmem:[%s18019_s3 + $0x4c0] sm:$0xff]  ;;  %v4860_v26 = vld [vmem:[%s18019_s3 + $0x4c8] sm:$0xff]  ;;  %v4893_v61 = vld [vmem:[%s18019_s3 + $0x5d0] sm:$0xff] }
 0x236   :  { %9807 = vmatpush3.bf16.msra.mxu0 %v9806_v7  ;;  %v18605_v7 = vld [vmem:[#allocation63_spill] sm:$0xff]  ;;  %v9816_v16 = vpack.c.bf16 %v4860_v26, %v4859_v32  ;;  %v4875_v55 = vld [vmem:[%s18019_s3 + $0x540] sm:$0xff]  ;;  %v4845_v26 = vld [vmem:[%s18019_s3 + $0x450] sm:$0xff] }
 0x237   :  { %9839 = vmatpush3.bf16.msra.mxu1 %v9838_v51  ;;  %9809 = vmatprep.subr.bf16.mxu0 %v9808_v10  ;;  %v18607_v60 = vcombine.low %v18605_v7, %v18606_v28  ;;  %v18609_v51 = vcombine.low %v14059_v41, %v14121_v6  ;;  %v4844_v25 = vld [vmem:[%s18019_s3 + $0x448] sm:$0xff] }
 0x238   :  { %9841 = vmatprep.subr.bf16.mxu1 %v9840_v4  ;;  %v4892_v4 = vld [vmem:[%s18019_s3 + $0x5c8] sm:$0xff]  ;;  %v9818_v32 = vpack.c.bf16 %v4844_v25, %v4843_v39  ;;  %v4878_v39 = vld [vmem:[%s18019_s3 + $0x558] sm:$0xff]  ;;  %v18613_v25 = vcombine.high %v18589_v59, %v18590_v11  ;;  %v18616_v11 = vcombine.high %v13647_v56, %v13921_v62 }
 0x239   :  { %v14607_v1 = vrot.slane %v18607_v60, %v18535_v15  ;;  %v14613_v10 = vrot.slane %v18609_v51, %v18535_v15  ;;  %v4891_v60 = vld [vmem:[%s18019_s3 + $0x5c0] sm:$0xff]  ;;  %v4396_v51 = vcombine.high %v14475_v54, %v14457_v38  ;;  %v14645_v54 = vrot.slane %v4364_v13, %v18535_v15  ;;  %v4846_v13 = vld [vmem:[%s18019_s3 + $0x458] sm:$0xff]  ;;  %v4896_v59 = vld [vmem:[%s18019_s3 + $0x5e8] sm:$0xff] }
 0x23a   :  { %9811 = vmatpush3.bf16.msra.mxu0 %v9810_v30  ;;  %v9848_v30 = vpack.c.bf16 %v4892_v4, %v4891_v60 }
 0x23b   :  { %18608 = vst [vmem:[#allocation48_spill] sm:$0xff] %v14607_v1  ;;  %18610 = vst [vmem:[#allocation79_spill] sm:$0xff] %v14613_v10  ;;  %9843 = vmatpush3.bf16.msra.mxu1 %v9842_v2  ;;  %9813 = vmatprep.subr.bf16.mxu0 %v9812_v29  ;;  %v14648_v38 = vrot.slane %v4396_v51, %v18535_v15  ;;  %v4876_v2 = vld [vmem:[%s18019_s3 + $0x548] sm:$0xff]  ;;  %v4862_v29 = vld [vmem:[%s18019_s3 + $0x4d8] sm:$0xff]  ;;  %v18639_v1 = vcombine.high %v13755_v0, %v13980_v45 }
 0x23c   :  { %18611 = vst [vmem:[#allocation80_spill] sm:$0xff] %v14645_v54  ;;  %9845 = vmatprep.subr.bf16.mxu1 %v9844_v57  ;;  %v9850_v60 = vpack.c.bf16 %v4876_v2, %v4875_v55  ;;  %v9820_v4 = vpack.c.bf16 %v4862_v29, %v4861_v22  ;;  %v4877_v51 = vld [vmem:[%s18019_s3 + $0x550] sm:$0xff]  ;;  %v18614_v55 = vcombine.high %v13918_v17, %v14093_v24  ;;  %v4864_v22 = vld [vmem:[%s18019_s3 + $0x4e8] sm:$0xff]  ;;  %v4895_v29 = vld [vmem:[%s18019_s3 + $0x5e0] sm:$0xff] }
 0x23d   :  { %18612 = vst [vmem:[#allocation81_spill] sm:$0xff] %v14648_v38  ;;  %v9852_v2 = vpack.c.bf16 %v4894_v8, %v4893_v61  ;;  %v18615_v17 = vcombine.high %v18592_v37, %v18593_v19  ;;  %v9822_v61 = vpack.c.bf16 %v4846_v13, %v4845_v26  ;;  %v4847_v8 = vld [vmem:[%s18019_s3 + $0x460] sm:$0xff]  ;;  %v18619_v37 = vcombine.high %v14059_v41, %v14121_v6  ;;  %v4848_v26 = vld [vmem:[%s18019_s3 + $0x468] sm:$0xff]  ;;  %v4865_v41 = vld [vmem:[%s18019_s3 + $0x4f0] sm:$0xff] }
 0x23e   :  { %9815 = vmatpush3.bf16.msra.mxu0 %v9814_v46  ;;  %v4863_v46 = vld [vmem:[%s18019_s3 + $0x4e0] sm:$0xff]  ;;  %v9854_v56 = vpack.c.bf16 %v4878_v39, %v4877_v51  ;;  %v4866_v6 = vld [vmem:[%s18019_s3 + $0x4f8] sm:$0xff]  ;;  %v4897_v13 = vld [vmem:[%s18019_s3 + $0x5f0] sm:$0xff] }
 0x23f   :  { %9847 = vmatpush3.bf16.msra.mxu1 %v9846_v12  ;;  %9817 = vmatprep.subr.bf16.mxu0 %v9816_v16  ;;  %v14688_v12 = vrot.slane %v18613_v25, %v18405_v58  ;;  %v14694_v16 = vrot.slane %v18614_v55, %v18405_v58  ;;  %v14709_v24 = vrot.slane %v18615_v17, %v18405_v58  ;;  %v4947_v54 = vld [vmem:[%s18019_s3 + $0x780] sm:$0xff] }
 0x240   :  { %9849 = vmatprep.subr.bf16.mxu1 %v9848_v30  ;;  %v14715_v30 = vrot.slane %v18616_v11, %v18405_v58  ;;  %v18617_v25 = vcombine.high %v18605_v7, %v18606_v28  ;;  %v14730_v19 = vrot.slane %v18619_v37, %v18535_v15  ;;  %v9824_v62 = vpack.c.bf16 %v4864_v22, %v4863_v46  ;;  %v4879_v7 = vld [vmem:[%s18019_s3 + $0x560] sm:$0xff]  ;;  %v4880_v28 = vld [vmem:[%s18019_s3 + $0x568] sm:$0xff]  ;;  %v18621_v46 = vld [vmem:[#allocation21_spill] sm:$0xff] }
 0x241   :  { %v4379_v51 = vcombine.low %v14709_v24, %v14688_v12  ;;  %v18625_v11 = vld [vmem:[#allocation23_spill] sm:$0xff]  ;;  %v9828_v38 = vpack.c.bf16 %v4866_v6, %v4865_v41  ;;  %v14846_v41 = vld [vmem:[%s18019_s3 + $0x700] sm:$0xff] }
 0x242   :  { %9819 = vmatpush3.bf16.msra.mxu0 %v9818_v32  ;;  %v14724_v55 = vrot.slane %v18617_v25, %v18535_v15  ;;  %18620 = vst [vmem:[#allocation3_spill] sm:$0xff] %v14730_v19  ;;  %v9856_v32 = vpack.c.bf16 %v4896_v59, %v4895_v29  ;;  %v4411_v39 = vcombine.low %v14715_v30, %v14694_v16  ;;  %v18626_v25 = vld [vmem:[#allocation29_spill] sm:$0xff]  ;;  %v4916_v19 = vld [vmem:[%s18019_s3 + $0x688] sm:$0xff] }
 0x243   :  { %9851 = vmatpush3.bf16.msra.mxu1 %v9850_v60  ;;  %9821 = vmatprep.subr.bf16.mxu0 %v9820_v4  ;;  %v18627_v37 = vcombine.low %v18625_v11, %v18626_v25  ;;  %v18628_v60 = vcombine.high %v18625_v11, %v18626_v25  ;;  %v4881_v11 = vld [vmem:[%s18019_s3 + $0x570] sm:$0xff]  ;;  %v4882_v25 = vld [vmem:[%s18019_s3 + $0x578] sm:$0xff]  ;;  %v14851_v6 = vld [vmem:[%s18019_s3 + $0x708] sm:$0xff] }
 0x244   :  { %18618 = vst [vmem:[#allocation2_spill] sm:$0xff] %v14724_v55  ;;  %9853 = vmatprep.subr.bf16.mxu1 %v9852_v2  ;;  %v18622_v2 = vld [vmem:[#allocation67_spill] sm:$0xff]  ;;  %v9858_v55 = vpack.c.bf16 %v4880_v28, %v4879_v7 }
 0x245   :  { %v18623_v22 = vcombine.low %v18621_v46, %v18622_v2  ;;  %v18624_v59 = vcombine.high %v18621_v46, %v18622_v2  ;;  %v14774_v4 = vrot.slane %v18627_v37, %v18405_v58  ;;  %v14780_v57 = vrot.slane %v18628_v60, %v18405_v58  ;;  %v4849_v46 = vld [vmem:[%s18019_s3 + $0x470] sm:$0xff]  ;;  %v4850_v2 = vld [vmem:[%s18019_s3 + $0x478] sm:$0xff]  ;;  %v14841_v28 = vld [vmem:[%s18019_s3 + $0x608] sm:$0xff] }
 0x246   :  { %9823 = vmatpush3.bf16.msra.mxu0 %v9822_v61  ;;  %v9826_v60 = vpack.c.bf16 %v4848_v26, %v4847_v8  ;;  %v14813_v61 = vrot.slane %v4411_v39, %v18535_v15  ;;  %v14830_v39 = vld [vmem:[%s18019_s3 + $0x600] sm:$0xff]  ;;  %v9830_v43 = vpack.c.bf16 %v4850_v2, %v4849_v46  ;;  %v9862_v46 = vpack.c.bf16 %v4882_v25, %v4881_v11 }
 0x247   :  { %v14762_v29 = vrot.slane %v18623_v22, %v18405_v58  ;;  %v14768_v17 = vrot.slane %v18624_v59, %v18405_v58  ;;  %v4898_v22 = vld [vmem:[%s18019_s3 + $0x5f8] sm:$0xff]  ;;  %v18629_v59 = vld [vmem:[#allocation39_spill] sm:$0xff]  ;;  %9855 = vmatpush3.bf16.msra.mxu1 %v9854_v56  ;;  %9825 = vmatprep.subr.bf16.mxu0 %v9824_v62  ;;  %v9864_v2 = vpack.c.bf16 %v4916_v19, %v4915_v18 }
 0x248   :  { %v18630_v37 = vcombine.low %v13499_v48, %v18629_v59  ;;  %18632 = vst [vmem:[#allocation82_spill] sm:$0xff] %v14813_v61  ;;  %v18633_v8 = vcombine.high %v13499_v48, %v18629_v59  ;;  %v18634_v48 = vld [vmem:[#allocation69_spill] sm:$0xff]  ;;  %9857 = vmatprep.subr.bf16.mxu1 %v9856_v32  ;;  %v9860_v7 = vpack.c.bf16 %v4898_v22, %v4897_v13  ;;  %v18640_v32 = vld [vmem:[#allocation42_spill] sm:$0xff] }
 0x249   :  { %v18635_v59 = vld [vmem:[#allocation41_spill] sm:$0xff] }
 0x24a   :  { %v14795_v21 = vrot.slane %v18630_v37, %v18405_v58  ;;  %v14810_v37 = vrot.slane %v4379_v51, %v18535_v15  ;;  %v14819_v26 = vrot.slane %v18633_v8, %v18405_v58  ;;  %v4948_v51 = vld [vmem:[%s18019_s3 + $0x788] sm:$0xff]  ;;  %v18636_v56 = vcombine.low %v18634_v48, %v18635_v59  ;;  %v18641_v61 = vld [vmem:[#allocation77_spill] sm:$0xff]  ;;  %9827 = vmatpush3.bf16.msra.mxu0 %v9826_v60 }
 0x24b   :  { %v18637_v13 = vcombine.high %v18634_v48, %v18635_v59  ;;  %v14873_v8 = vrot.slane %v18639_v1, %v18405_v58  ;;  %v14884_v48 = vld [vmem:[%s18019_s3 + $0x690] sm:$0xff]  ;;  %v14889_v59 = vld [vmem:[%s18019_s3 + $0x698] sm:$0xff]  ;;  %9859 = vmatpush3.bf16.msra.mxu1 %v9858_v55  ;;  %9829 = vmatprep.subr.bf16.mxu0 %v9828_v38  ;;  %v9896_v60 = vpack.c.bf16 %v4948_v51, %v4947_v54  ;;  %v18647_v55 = vld [vmem:[#allocation70_spill] sm:$0xff] }
 0x24c   :  { %18631 = vst [vmem:[#allocation49_spill] sm:$0xff] %v14810_v37  ;;  %v14836_v62 = vrot.slane %v18636_v56, %v18405_v58  ;;  %v18638_v56 = vcombine.low %v13755_v0, %v13980_v45  ;;  %v18642_v37 = vcombine.low %v18640_v32, %v18641_v61  ;;  %v14894_v0 = vld [vmem:[%s18019_s3 + $0x790] sm:$0xff]  ;;  %v18643_v45 = vcombine.high %v18640_v32, %v18641_v61  ;;  %v14917_v61 = vld [vmem:[%s18019_s3 + $0x798] sm:$0xff] }
 0x24d   :  { %v14861_v22 = vrot.slane %v18637_v13, %v18405_v58  ;;  %v14922_v32 = vld [vmem:[%s18019_s3 + $0x610] sm:$0xff]  ;;  %9861 = vmatprep.subr.bf16.mxu1 %v9860_v7  ;;  %v9868_v14 = vpack.c.bf16 %v14889_v59, %v14884_v48  ;;  %v14949_v18 = vld [vmem:[%s18019_s3 + $0x718] sm:$0xff]  ;;  %v9900_v54 = vpack.c.bf16 %v14917_v61, %v14894_v0  ;;  %v18650_v51 = vcombine.low %v14062_v23, %v14124_v31 }
 0x24e   :  { %v14867_v10 = vrot.slane %v18638_v56, %v18405_v58  ;;  %v14879_v42 = vrot.slane %v18642_v37, %v18405_v58  ;;  %v14900_v1 = vrot.slane %v18643_v45, %v18405_v58  ;;  %v18644_v37 = vcombine.low %v13977_v63, %v14127_v49  ;;  %v14927_v45 = vld [vmem:[%s18019_s3 + $0x618] sm:$0xff]  ;;  %9831 = vmatpush3.bf16.msra.mxu0 %v9830_v43  ;;  %v4953_v61 = vld [vmem:[%s18019_s3 + $0x7b0] sm:$0xff] }
 0x24f   :  { %v18645_v56 = vcombine.high %v13977_v63, %v14127_v49  ;;  %v18646_v63 = vcombine.low %v14013_v5, %v14193_v35  ;;  %v9870_v38 = vpack.c.bf16 %v14927_v45, %v14922_v32  ;;  %v18648_v19 = vld [vmem:[#allocation37_spill] sm:$0xff]  ;;  %v4380_v7 = vcombine.high %v14709_v24, %v14688_v12  ;;  %9863 = vmatpush3.bf16.msra.mxu1 %v9862_v46  ;;  %v4919_v24 = vld [vmem:[%s18019_s3 + $0x6a0] sm:$0xff]  ;;  %v4952_v46 = vld [vmem:[%s18019_s3 + $0x7a8] sm:$0xff] }
 0x250   :  { %v14906_v13 = vrot.slane %v18644_v37, %v18405_v58  ;;  %v9866_v37 = vpack.c.bf16 %v14841_v28, %v14830_v39  ;;  %v18649_v11 = vcombine.low %v18647_v55, %v18648_v19  ;;  %v14965_v39 = vrot.slane %v18650_v51, %v18535_v15  ;;  %9865 = vmatprep.subr.bf16.mxu0 %v9864_v2  ;;  %v15017_v2 = vld [vmem:[%s18019_s3 + $0x620] sm:$0xff]  ;;  %v4922_v32 = vld [vmem:[%s18019_s3 + $0x6b8] sm:$0xff] }
 0x251   :  { %v14912_v40 = vrot.slane %v18645_v56, %v18405_v58  ;;  %v14933_v49 = vrot.slane %v18646_v63, %v18405_v58  ;;  %v9898_v56 = vpack.c.bf16 %v14851_v6, %v14846_v41  ;;  %v14944_v63 = vld [vmem:[%s18019_s3 + $0x710] sm:$0xff]  ;;  %v4412_v28 = vcombine.high %v14715_v30, %v14694_v16  ;;  %9897 = vmatprep.subr.bf16.mxu1 %v9896_v60  ;;  %v15022_v60 = vld [vmem:[%s18019_s3 + $0x628] sm:$0xff] }
 0x252   :  { %v14959_v25 = vrot.slane %v18649_v11, %v18535_v15  ;;  %v18651_v41 = vcombine.high %v18647_v55, %v18648_v19  ;;  %v18652_v48 = vcombine.high %v14062_v23, %v14124_v31  ;;  %v9902_v43 = vpack.c.bf16 %v14949_v18, %v14944_v63  ;;  %v4920_v23 = vld [vmem:[%s18019_s3 + $0x6a8] sm:$0xff]  ;;  %v4951_v31 = vld [vmem:[%s18019_s3 + $0x7a0] sm:$0xff]  ;;  %v18654_v55 = vld [vmem:[#allocation40_spill] sm:$0xff] }
 0x253   :  { %v14999_v30 = vrot.slane %v4380_v7, %v18535_v15  ;;  %v15002_v0 = vrot.slane %v4412_v28, %v18535_v15  ;;  %v18653_v45 = vcombine.low %v14370_v3, %v14376_v53  ;;  %v4499_v63 = vcombine.low %v14762_v29, %v14795_v21  ;;  %v18655_v19 = vld [vmem:[#allocation73_spill] sm:$0xff] }
 0x254   :  { %v14975_v6 = vrot.slane %v18651_v41, %v18535_v15  ;;  %v14981_v59 = vrot.slane %v18652_v48, %v18535_v15  ;;  %v3887_v12 = vcombine.low %v14959_v25, %v14965_v39  ;;  %v3888_v16 = vcombine.high %v14959_v25, %v14965_v39  ;;  %v15046_v48 = vld [vmem:[%s18019_s3 + $0x720] sm:$0xff] }
 0x255   :  { %6076 = vmatmul.mubr.f32.vlgmr.msra.gmra.mrb[128].mxu0 %v18653_v45  ;;  %v4531_v18 = vcombine.low %v14867_v10, %v14906_v13  ;;  %v18656_v11 = vcombine.low %v18654_v55, %v18655_v19  ;;  %v18657_v7 = vcombine.low %v14068_v33, %v14146_v20  ;;  %v18658_v41 = vcombine.high %v14370_v3, %v14376_v53  ;;  %v15051_v45 = vld [vmem:[%s18019_s3 + $0x728] sm:$0xff]  ;;  %v4954_v53 = vld [vmem:[%s18019_s3 + $0x7b8] sm:$0xff]  ;;  %v5191_v25 = vld [vmem:[%s18019_s3 + $0xf20] sm:$0xff] }
 0x256   :  { %9867 = vmatpush3.bf16.msra.mxu0 %v9866_v37  ;;  %v4433_v3 = vcombine.low %v14999_v30, %v15002_v0  ;;  %v4500_v37 = vcombine.high %v14762_v29, %v14795_v21  ;;  %v15077_v21 = vrot.slane %v4499_v63, %v18535_v15  ;;  %v15094_v63 = vld [vmem:[%s18019_s3 + $0x630] sm:$0xff]  ;;  %v18706_v39 = vcombine.high %v14999_v30, %v15002_v0  ;;  %v5210_v0 = vld [vmem:[%s18019_s3 + $0xfb8] sm:$0xff] }
 0x257   :  { %v15032_v51 = vrot.slane %v18656_v11, %v18535_v15  ;;  %v15038_v28 = vrot.slane %v18657_v7, %v18535_v15  ;;  %6146 = vmatmul.mubr.f32.vlgmr.msra.gmra.mrb[136].mxu1 %v18658_v41  ;;  %v15056_v11 = vld [vmem:[%s18019_s3 + $0x6b0] sm:$0xff]  ;;  %v18659_v7 = vcombine.low %v14402_v44, %v14405_v27  ;;  %v9872_v41 = vpack.c.bf16 %v4920_v23, %v4919_v24 }
 0x258   :  { %9899 = vmatpush3.bf16.msra.mxu1 %v9898_v56  ;;  %v15080_v29 = vrot.slane %v4531_v18, %v18535_v15  ;;  %v18660_v56 = vcombine.high %v14013_v5, %v14193_v35  ;;  %v18661_v23 = vcombine.high %v14402_v44, %v14405_v27  ;;  %9869 = vmatprep.subr.bf16.mxu0 %v9868_v14  ;;  %v15099_v18 = vld [vmem:[%s18019_s3 + $0x638] sm:$0xff]  ;;  %v15108_v35 = vld [vmem:[%s18019_s3 + $0x730] sm:$0xff] }
 0x259   :  { %6215 = vmatprep.mubr.f32.mxu0 %v18659_v7  ;;  %v9904_v7 = vpack.c.bf16 %v4952_v46, %v4951_v31  ;;  %9901 = vmatprep.subr.bf16.mxu1 %v9900_v54  ;;  %v9874_v5 = vpack.c.bf16 %v15022_v60, %v15017_v2  ;;  %v15113_v44 = vld [vmem:[%s18019_s3 + $0x738] sm:$0xff]  ;;  %v9906_v31 = vpack.c.bf16 %v15051_v45, %v15046_v48  ;;  %v4923_v60 = vld [vmem:[%s18019_s3 + $0x6c0] sm:$0xff]  ;;  %v15150_v45 = vld [vmem:[%s18019_s3 + $0x648] sm:$0xff] }
 0x25a   :  { %v15086_v24 = vrot.slane %v18660_v56, %v18405_v58  ;;  %6285 = vmatprep.mubr.f32.mxu1 %v18661_v23  ;;  %9871 = vmatpush3.bf16.msra.mxu0 %v9870_v38  ;;  %v9876_v46 = vpack.c.bf16 %v4922_v32, %v15056_v11  ;;  %v9908_v2 = vpack.c.bf16 %v4954_v53, %v4953_v61  ;;  %v4924_v56 = vld [vmem:[%s18019_s3 + $0x6c8] sm:$0xff]  ;;  %v15133_v23 = vld [vmem:[%s18019_s3 + $0x7c0] sm:$0xff]  ;;  %v4942_v54 = vld [vmem:[%s18019_s3 + $0x758] sm:$0xff] }
 0x25b   :  { %v4532_v38 = vcombine.high %v14867_v10, %v14906_v13  ;;  %9873 = vmatprep.subr.bf16.mxu0 %v9872_v41  ;;  %v9878_v61 = vpack.c.bf16 %v15099_v18, %v15094_v63  ;;  %v4956_v32 = vld [vmem:[%s18019_s3 + $0x7c8] sm:$0xff]  ;;  %v15145_v48 = vld [vmem:[%s18019_s3 + $0x640] sm:$0xff]  ;;  %v18662_v10 = vcombine.high %v18654_v55, %v18655_v19  ;;  %v9910_v53 = vpack.c.bf16 %v15113_v44, %v15108_v35  ;;  %v15187_v63 = vld [vmem:[%s18019_s3 + $0x6d0] sm:$0xff] }
 0x25c   :  { %9903 = vmatpush3.bf16.msra.mxu1 %v9902_v43  ;;  %v18663_v43 = vcombine.high %v14068_v33, %v14146_v20  ;;  %v15169_v41 = vld [vmem:[%s18019_s3 + $0x740] sm:$0xff]  ;;  %v15174_v55 = vld [vmem:[%s18019_s3 + $0x748] sm:$0xff]  ;;  %v15177_v19 = vrot.slane %v4500_v37, %v18535_v15  ;;  %v4515_v20 = vcombine.low %v14768_v17, %v14819_v26  ;;  %v4547_v37 = vcombine.low %v14873_v8, %v14912_v40  ;;  %v5209_v30 = vld [vmem:[%s18019_s3 + $0xfb0] sm:$0xff] }
 0x25d   :  { %v15156_v13 = vrot.slane %v18662_v10, %v18535_v15  ;;  %9905 = vmatprep.subr.bf16.mxu1 %v9904_v7  ;;  %v15180_v33 = vrot.slane %v4532_v38, %v18535_v15  ;;  %v9880_v7 = vpack.c.bf16 %v4924_v56, %v4923_v60  ;;  %v9912_v44 = vpack.c.bf16 %v4956_v32, %v15133_v23  ;;  %v4926_v56 = vld [vmem:[%s18019_s3 + $0x6d8] sm:$0xff]  ;;  %v15204_v38 = vld [vmem:[%s18019_s3 + $0x7d0] sm:$0xff] }
 0x25e   :  { %v15162_v11 = vrot.slane %v18663_v43, %v18535_v15  ;;  %9875 = vmatpush3.bf16.msra.mxu0 %v9874_v5  ;;  %v9882_v60 = vpack.c.bf16 %v15150_v45, %v15145_v48  ;;  %v4958_v10 = vld [vmem:[%s18019_s3 + $0x7d8] sm:$0xff]  ;;  %v9914_v32 = vpack.c.bf16 %v15174_v55, %v15169_v41  ;;  %v15216_v48 = vrot.slane %v4515_v20, %v18535_v15  ;;  %v15224_v43 = vld [vmem:[%s18019_s3 + $0x650] sm:$0xff]  ;;  %v18665_v41 = vld [vmem:[#allocation74_spill] sm:$0xff] }
 0x25f   :  { %9877 = vmatprep.subr.bf16.mxu0 %v9876_v46  ;;  %v15219_v45 = vrot.slane %v4547_v37, %v18535_v15  ;;  %v18664_v46 = vld [vmem:[#allocation72_spill] sm:$0xff]  ;;  %v4516_v35 = vcombine.high %v14768_v17, %v14819_v26  ;;  %v4548_v18 = vcombine.high %v14873_v8, %v14912_v40  ;;  %v9884_v23 = vpack.c.bf16 %v4926_v56, %v15187_v63  ;;  %v4928_v26 = vld [vmem:[%s18019_s3 + $0x6e8] sm:$0xff]  ;;  %v4959_v8 = vld [vmem:[%s18019_s3 + $0x7e0] sm:$0xff] }
 0x260   :  { %9907 = vmatpush3.bf16.msra.mxu1 %v9906_v31  ;;  %v15229_v31 = vld [vmem:[%s18019_s3 + $0x658] sm:$0xff]  ;;  %v18666_v55 = vcombine.low %v18664_v46, %v18665_v41  ;;  %v9916_v5 = vpack.c.bf16 %v4958_v10, %v15204_v38  ;;  %v4960_v63 = vld [vmem:[%s18019_s3 + $0x7e8] sm:$0xff]  ;;  %v15286_v17 = vld [vmem:[%s18019_s3 + $0x660] sm:$0xff]  ;;  %v18680_v27 = vcombine.high %v14171_v52, %v14187_v47 }
 0x261   :  { %9909 = vmatprep.subr.bf16.mxu1 %v9908_v2  ;;  %v18667_v2 = vcombine.low %v14108_v50, %v14149_v36  ;;  %v15279_v10 = vrot.slane %v4548_v18, %v18535_v15  ;;  %v9886_v40 = vpack.c.bf16 %v15229_v31, %v15224_v43  ;;  %v15291_v38 = vld [vmem:[%s18019_s3 + $0x668] sm:$0xff]  ;;  %v18668_v18 = vcombine.high %v18664_v46, %v18665_v41  ;;  %v15308_v31 = vld [vmem:[%s18019_s3 + $0x760] sm:$0xff]  ;;  %v4962_v41 = vld [vmem:[%s18019_s3 + $0x7f8] sm:$0xff] }
 0x262   :  { %v15235_v20 = vrot.slane %v18666_v55, %v18535_v15  ;;  %v4941_v55 = vld [vmem:[%s18019_s3 + $0x750] sm:$0xff]  ;;  %9879 = vmatpush3.bf16.msra.mxu0 %v9878_v61  ;;  %v15276_v61 = vrot.slane %v4516_v35, %v18535_v15  ;;  %v15313_v56 = vld [vmem:[%s18019_s3 + $0x768] sm:$0xff] }
 0x263   :  { %v15241_v37 = vrot.slane %v18667_v2, %v18535_v15  ;;  %v4927_v2 = vld [vmem:[%s18019_s3 + $0x6e0] sm:$0xff]  ;;  %9881 = vmatprep.subr.bf16.mxu0 %v9880_v7  ;;  %v15297_v35 = vrot.slane %v18668_v18, %v18535_v15  ;;  %v9918_v43 = vpack.c.bf16 %v4942_v54, %v4941_v55  ;;  %v9890_v18 = vpack.c.bf16 %v15291_v38, %v15286_v17  ;;  %v4930_v38 = vld [vmem:[%s18019_s3 + $0x6f8] sm:$0xff] }
 0x264   :  { %9911 = vmatpush3.bf16.msra.mxu1 %v9910_v53  ;;  %v18669_v53 = vcombine.high %v14108_v50, %v14149_v36  ;;  %v4635_v36 = vcombine.low %v14774_v4, %v14836_v62  ;;  %v9888_v54 = vpack.c.bf16 %v4928_v26, %v4927_v2  ;;  %v4667_v50 = vcombine.low %v14879_v42, %v14933_v49  ;;  %v18670_v2 = vld [vmem:[#allocation43_spill] sm:$0xff] }
 0x265   :  { %9913 = vmatprep.subr.bf16.mxu1 %v9912_v44  ;;  %v9920_v44 = vpack.c.bf16 %v4960_v63, %v4959_v8  ;;  %v18671_v26 = vld [vmem:[#allocation75_spill] sm:$0xff]  ;;  %v9922_v17 = vpack.c.bf16 %v15313_v56, %v15308_v31 }
 0x266   :  { %v15303_v7 = vrot.slane %v18669_v53, %v18535_v15  ;;  %9883 = vmatpush3.bf16.msra.mxu0 %v9882_v60  ;;  %v4929_v53 = vld [vmem:[%s18019_s3 + $0x6f0] sm:$0xff]  ;;  %v18672_v8 = vcombine.low %v18670_v2, %v18671_v26  ;;  %v18673_v60 = vcombine.low %v14132_v9, %v14184_v34  ;;  %v15363_v56 = vrot.slane %v4667_v50, %v18535_v15 }
 0x267   :  { %9885 = vmatprep.subr.bf16.mxu0 %v9884_v23  ;;  %v4668_v23 = vcombine.high %v14879_v42, %v14933_v49  ;;  %v4914_v42 = vld [vmem:[%s18019_s3 + $0x678] sm:$0xff]  ;;  %v9892_v31 = vpack.c.bf16 %v4930_v38, %v4929_v53  ;;  %v4980_v53 = vld [vmem:[%s18019_s3 + $0x888] sm:$0xff] }
 0x268   :  { %v15336_v63 = vrot.slane %v18672_v8, %v18535_v15  ;;  %v15342_v55 = vrot.slane %v18673_v60, %v18535_v15  ;;  %9915 = vmatpush3.bf16.msra.mxu1 %v9914_v32  ;;  %v4961_v8 = vld [vmem:[%s18019_s3 + $0x7f0] sm:$0xff]  ;;  %v4636_v60 = vcombine.high %v14774_v4, %v14836_v62  ;;  %v15360_v32 = vrot.slane %v4635_v36, %v18535_v15  ;;  %v5012_v38 = vld [vmem:[%s18019_s3 + $0x988] sm:$0xff] }
 0x269   :  { %9917 = vmatprep.subr.bf16.mxu1 %v9916_v5  ;;  %v4913_v4 = vld [vmem:[%s18019_s3 + $0x670] sm:$0xff]  ;;  %v15379_v49 = vrot.slane %v4668_v23, %v18535_v15  ;;  %v18674_v5 = vcombine.high %v18670_v2, %v18671_v26  ;;  %v18675_v36 = vcombine.high %v14132_v9, %v14184_v34  ;;  %v9924_v58 = vpack.c.bf16 %v4962_v41, %v4961_v8  ;;  %v4946_v9 = vld [vmem:[%s18019_s3 + $0x778] sm:$0xff]  ;;  %v4979_v34 = vld [vmem:[%s18019_s3 + $0x880] sm:$0xff] }
 0x26a   :  { %v15376_v62 = vrot.slane %v4636_v60, %v18535_v15  ;;  %9887 = vmatpush3.bf16.msra.mxu0 %v9886_v40  ;;  %v4945_v2 = vld [vmem:[%s18019_s3 + $0x770] sm:$0xff]  ;;  %v5011_v26 = vld [vmem:[%s18019_s3 + $0x980] sm:$0xff]  ;;  %v18679_v41 = vcombine.low %v14171_v52, %v14187_v47  ;;  %v4652_v8 = vcombine.high %v14780_v57, %v14861_v22  ;;  %v4684_v23 = vcombine.high %v14900_v1, %v15086_v24  ;;  %v4996_v47 = vld [vmem:[%s18019_s3 + $0x908] sm:$0xff] }
 0x26b   :  { %v15385_v50 = vrot.slane %v18674_v5, %v18535_v15  ;;  %v15391_v46 = vrot.slane %v18675_v36, %v18535_v15  ;;  %9889 = vmatprep.subr.bf16.mxu0 %v9888_v54  ;;  %v9894_v54 = vpack.c.bf16 %v4914_v42, %v4913_v4  ;;  %v4651_v5 = vcombine.low %v14780_v57, %v14861_v22  ;;  %v18676_v4 = vld [vmem:[#allocation44_spill] sm:$0xff]  ;;  %v4995_v52 = vld [vmem:[%s18019_s3 + $0x900] sm:$0xff] }
 0x26c   :  { %9919 = vmatpush3.bf16.msra.mxu1 %v9918_v43  ;;  %v18677_v42 = vld [vmem:[#allocation76_spill] sm:$0xff]  ;;  %v15437_v40 = vrot.slane %v18679_v41, %v18535_v15  ;;  %v9926_v60 = vpack.c.bf16 %v4946_v9, %v4945_v2  ;;  %v15453_v41 = vrot.slane %v18680_v27, %v18535_v15  ;;  %v9928_v57 = vpack.c.bf16 %v4980_v53, %v4979_v34  ;;  %v4982_v34 = vld [vmem:[%s18019_s3 + $0x898] sm:$0xff]  ;;  %v4968_v27 = vld [vmem:[%s18019_s3 + $0x828] sm:$0xff] }
 0x26d   :  { %9921 = vmatprep.subr.bf16.mxu1 %v9920_v44  ;;  %v4683_v44 = vcombine.low %v14900_v1, %v15086_v24  ;;  %v18678_v36 = vcombine.low %v18676_v4, %v18677_v42  ;;  %v15444_v14 = vrot.slane %v4651_v5, %v18535_v15  ;;  %v9960_v22 = vpack.c.bf16 %v5012_v38, %v5011_v26  ;;  %v4963_v1 = vld [vmem:[%s18019_s3 + $0x800] sm:$0xff]  ;;  %v4964_v24 = vld [vmem:[%s18019_s3 + $0x808] sm:$0xff]  ;;  %v4981_v9 = vld [vmem:[%s18019_s3 + $0x890] sm:$0xff] }
 0x26e   :  { %9891 = vmatpush3.bf16.msra.mxu0 %v9890_v18  ;;  %v15488_v53 = vrot.slane %v4652_v8, %v18535_v15  ;;  %v15491_v26 = vrot.slane %v4684_v23, %v18535_v15  ;;  %v9930_v38 = vpack.c.bf16 %v4964_v24, %v4963_v1  ;;  %v5013_v5 = vld [vmem:[%s18019_s3 + $0x990] sm:$0xff]  ;;  %v9932_v24 = vpack.c.bf16 %v4982_v34, %v4981_v9  ;;  %v18683_v8 = vld [vmem:[#allocation46_spill] sm:$0xff]  ;;  %v5016_v34 = vld [vmem:[%s18019_s3 + $0x9a8] sm:$0xff] }
 0x26f   :  { %v15431_v43 = vrot.slane %v18678_v36, %v18535_v15  ;;  %v15447_v36 = vrot.slane %v4683_v44, %v18535_v15  ;;  %9893 = vmatprep.subr.bf16.mxu0 %v9892_v31  ;;  %v5014_v44 = vld [vmem:[%s18019_s3 + $0x998] sm:$0xff]  ;;  %v4965_v23 = vld [vmem:[%s18019_s3 + $0x810] sm:$0xff]  ;;  %v5015_v9 = vld [vmem:[%s18019_s3 + $0x9a0] sm:$0xff] }
 0x270   :  { %9923 = vmatpush3.bf16.msra.mxu1 %v9922_v17  ;;  %v18687_v18 = vld [vmem:[#allocation78_spill] sm:$0xff] }
 0x271   :  { %9925 = vmatprep.subr.bf16.mxu1 %v9924_v58  ;;  %v18681_v58 = vcombine.high %v18676_v4, %v18677_v42  ;;  %v4997_v42 = vld [vmem:[%s18019_s3 + $0x910] sm:$0xff] }
 0x272   :  { %9895 = vmatpush3.bf16.msra.mxu0 %v9894_v54  ;;  %v4966_v54 = vld [vmem:[%s18019_s3 + $0x818] sm:$0xff] }
 0x273   :  { %v15479_v2 = vrot.slane %v18681_v58, %v18535_v15  ;;  %9929 = vmatprep.subr.bf16.mxu0 %v9928_v57  ;;  %v9962_v15 = vpack.c.bf16 %v4996_v47, %v4995_v52  ;;  %v4983_v57 = vld [vmem:[%s18019_s3 + $0x8a0] sm:$0xff]  ;;  %v4984_v52 = vld [vmem:[%s18019_s3 + $0x8a8] sm:$0xff]  ;;  %v18682_v58 = vld [vmem:[#allocation45_spill] sm:$0xff]  ;;  %v9934_v31 = vpack.c.bf16 %v4966_v54, %v4965_v23 }
 0x274   :  { %9927 = vmatpush3.bf16.msra.mxu1 %v9926_v60  ;;  %v4998_v60 = vld [vmem:[%s18019_s3 + $0x918] sm:$0xff]  ;;  %v18684_v4 = vcombine.low %v18682_v58, %v18683_v8  ;;  %v18685_v1 = vcombine.high %v18682_v58, %v18683_v8  ;;  %v18686_v47 = vld [vmem:[#allocation47_spill] sm:$0xff]  ;;  %v4985_v23 = vld [vmem:[%s18019_s3 + $0x8b0] sm:$0xff] }
 0x275   :  { %9961 = vmatprep.subr.bf16.mxu1 %v9960_v22  ;;  %v9964_v22 = vpack.c.bf16 %v5014_v44, %v5013_v5  ;;  %v18688_v17 = vcombine.low %v18686_v47, %v18687_v18  ;;  %v9966_v5 = vpack.c.bf16 %v4998_v60, %v4997_v42  ;;  %v9936_v44 = vpack.c.bf16 %v4984_v52, %v4983_v57  ;;  %v4986_v54 = vld [vmem:[%s18019_s3 + $0x8b8] sm:$0xff]  ;;  %v4969_v57 = vld [vmem:[%s18019_s3 + $0x830] sm:$0xff] }
 0x276   :  { %6216 = vmatmul.mubr.f32.vlgmr.msra.gmra.mrb[130].mxu0 %v18684_v4  ;;  %v4967_v4 = vld [vmem:[%s18019_s3 + $0x820] sm:$0xff]  ;;  %v18689_v8 = vcombine.high %v18686_v47, %v18687_v18  ;;  %v5017_v18 = vld [vmem:[%s18019_s3 + $0x9b0] sm:$0xff]  ;;  %v5018_v42 = vld [vmem:[%s18019_s3 + $0x9b8] sm:$0xff]  ;;  %v9940_v60 = vpack.c.bf16 %v4986_v54, %v4985_v23 }
 0x277   :  { %6286 = vmatmul.mubr.f32.vlgmr.msra.gmra.mrb[138].mxu1 %v18685_v1  ;;  %9931 = vmatpush3.bf16.msra.mxu0 %v9930_v38  ;;  %v4999_v38 = vld [vmem:[%s18019_s3 + $0x920] sm:$0xff]  ;;  %v9938_v1 = vpack.c.bf16 %v4968_v27, %v4967_v4  ;;  %v4970_v52 = vld [vmem:[%s18019_s3 + $0x838] sm:$0xff]  ;;  %v5001_v47 = vld [vmem:[%s18019_s3 + $0x930] sm:$0xff]  ;;  %v9972_v58 = vpack.c.bf16 %v5018_v42, %v5017_v18 }
 0x278   :  { %6355 = vmatprep.mubr.f32.mxu0 %v18688_v17  ;;  %9963 = vmatpush3.bf16.msra.mxu1 %v9962_v15  ;;  %v9968_v17 = vpack.c.bf16 %v5016_v34, %v5015_v9  ;;  %v5000_v15 = vld [vmem:[%s18019_s3 + $0x928] sm:$0xff]  ;;  %v5002_v27 = vld [vmem:[%s18019_s3 + $0x938] sm:$0xff]  ;;  %v5019_v9 = vld [vmem:[%s18019_s3 + $0x9c0] sm:$0xff] }
 0x279   :  { %6425 = vmatprep.mubr.f32.mxu1 %v18689_v8  ;;  %9933 = vmatprep.subr.bf16.mxu0 %v9932_v24  ;;  %v9970_v24 = vpack.c.bf16 %v5000_v15, %v4999_v38  ;;  %v5020_v34 = vld [vmem:[%s18019_s3 + $0x9c8] sm:$0xff]  ;;  %v4971_v38 = vld [vmem:[%s18019_s3 + $0x840] sm:$0xff]  ;;  %v4989_v54 = vld [vmem:[%s18019_s3 + $0x8d0] sm:$0xff] }
 0x27a   :  { %9965 = vmatprep.subr.bf16.mxu1 %v9964_v22  ;;  %v4988_v22 = vld [vmem:[%s18019_s3 + $0x8c8] sm:$0xff]  ;;  %v9976_v15 = vpack.c.bf16 %v5020_v34, %v5019_v9  ;;  %v4990_v18 = vld [vmem:[%s18019_s3 + $0x8d8] sm:$0xff]  ;;  %v5021_v42 = vld [vmem:[%s18019_s3 + $0x9d0] sm:$0xff] }
 0x27b   :  { %9935 = vmatpush3.bf16.msra.mxu0 %v9934_v31  ;;  %v4987_v31 = vld [vmem:[%s18019_s3 + $0x8c0] sm:$0xff]  ;;  %v4972_v8 = vld [vmem:[%s18019_s3 + $0x848] sm:$0xff] }
 0x27c   :  { %9967 = vmatpush3.bf16.msra.mxu1 %v9966_v5  ;;  %9937 = vmatprep.subr.bf16.mxu0 %v9936_v44  ;;  %v9942_v5 = vpack.c.bf16 %v4970_v52, %v4969_v57  ;;  %v9974_v44 = vpack.c.bf16 %v5002_v27, %v5001_v47  ;;  %v9944_v4 = vpack.c.bf16 %v4988_v22, %v4987_v31  ;;  %v5004_v23 = vld [vmem:[%s18019_s3 + $0x948] sm:$0xff]  ;;  %v4973_v52 = vld [vmem:[%s18019_s3 + $0x850] sm:$0xff]  ;;  %v4974_v47 = vld [vmem:[%s18019_s3 + $0x858] sm:$0xff] }
 0x27d   :  { %9969 = vmatprep.subr.bf16.mxu1 %v9968_v17  ;;  %v5003_v17 = vld [vmem:[%s18019_s3 + $0x940] sm:$0xff]  ;;  %v9948_v57 = vpack.c.bf16 %v4990_v18, %v4989_v54  ;;  %v5006_v31 = vld [vmem:[%s18019_s3 + $0x958] sm:$0xff]  ;;  %v4992_v9 = vld [vmem:[%s18019_s3 + $0x8e8] sm:$0xff] }
 0x27e   :  { %v4991_v22 = vld [vmem:[%s18019_s3 + $0x8e0] sm:$0xff]  ;;  %v5008_v54 = vld [vmem:[%s18019_s3 + $0x968] sm:$0xff]  ;;  %v4993_v18 = vld [vmem:[%s18019_s3 + $0x8f0] sm:$0xff] }
 0x27f   :  { %9939 = vmatpush3.bf16.msra.mxu0 %v9938_v1  ;;  %v5022_v1 = vld [vmem:[%s18019_s3 + $0x9d8] sm:$0xff]  ;;  %v5023_v34 = vld [vmem:[%s18019_s3 + $0x9e0] sm:$0xff] }
 0x280   :  { %9971 = vmatpush3.bf16.msra.mxu1 %v9970_v24  ;;  %9941 = vmatprep.subr.bf16.mxu0 %v9940_v60  ;;  %v9946_v24 = vpack.c.bf16 %v4972_v8, %v4971_v38  ;;  %v9978_v60 = vpack.c.bf16 %v5004_v23, %v5003_v17  ;;  %v9980_v27 = vpack.c.bf16 %v5022_v1, %v5021_v42  ;;  %v4975_v8 = vld [vmem:[%s18019_s3 + $0x860] sm:$0xff]  ;;  %v4976_v17 = vld [vmem:[%s18019_s3 + $0x868] sm:$0xff]  ;;  %v4994_v42 = vld [vmem:[%s18019_s3 + $0x8f8] sm:$0xff] }
 0x281   :  { %9973 = vmatprep.subr.bf16.mxu1 %v9972_v58  ;;  %v5005_v58 = vld [vmem:[%s18019_s3 + $0x950] sm:$0xff]  ;;  %v9952_v38 = vpack.c.bf16 %v4992_v9, %v4991_v22  ;;  %v5010_v22 = vld [vmem:[%s18019_s3 + $0x978] sm:$0xff]  ;;  %v5043_v9 = vld [vmem:[%s18019_s3 + $0xa80] sm:$0xff] }
 0x282   :  { %v5025_v1 = vld [vmem:[%s18019_s3 + $0x9f0] sm:$0xff] }
 0x283   :  { %9943 = vmatpush3.bf16.msra.mxu0 %v9942_v5  ;;  %v5024_v5 = vld [vmem:[%s18019_s3 + $0x9e8] sm:$0xff] }
 0x284   :  { %9975 = vmatpush3.bf16.msra.mxu1 %v9974_v44  ;;  %9945 = vmatprep.subr.bf16.mxu0 %v9944_v4  ;;  %v9950_v44 = vpack.c.bf16 %v4974_v47, %v4973_v52  ;;  %v9982_v4 = vpack.c.bf16 %v5006_v31, %v5005_v58  ;;  %v9984_v23 = vpack.c.bf16 %v5024_v5, %v5023_v34  ;;  %v4977_v47 = vld [vmem:[%s18019_s3 + $0x870] sm:$0xff]  ;;  %v4978_v58 = vld [vmem:[%s18019_s3 + $0x878] sm:$0xff]  ;;  %v5044_v34 = vld [vmem:[%s18019_s3 + $0xa88] sm:$0xff] }
 0x285   :  { %9977 = vmatprep.subr.bf16.mxu1 %v9976_v15  ;;  %v5007_v15 = vld [vmem:[%s18019_s3 + $0x960] sm:$0xff]  ;;  %v9956_v52 = vpack.c.bf16 %v4994_v42, %v4993_v18  ;;  %v5060_v18 = vld [vmem:[%s18019_s3 + $0xb08] sm:$0xff]  ;;  %v5045_v42 = vld [vmem:[%s18019_s3 + $0xa90] sm:$0xff] }
 0x286   :  { %v5075_v5 = vld [vmem:[%s18019_s3 + $0xb80] sm:$0xff] }
 0x287   :  { %9947 = vmatpush3.bf16.msra.mxu0 %v9946_v24  ;;  %v5026_v24 = vld [vmem:[%s18019_s3 + $0x9f8] sm:$0xff] }
 0x288   :  { %9979 = vmatpush3.bf16.msra.mxu1 %v9978_v60  ;;  %9949 = vmatprep.subr.bf16.mxu0 %v9948_v57  ;;  %v9954_v60 = vpack.c.bf16 %v4976_v17, %v4975_v8  ;;  %v9986_v57 = vpack.c.bf16 %v5008_v54, %v5007_v15  ;;  %v9988_v31 = vpack.c.bf16 %v5026_v24, %v5025_v1  ;;  %v5027_v17 = vld [vmem:[%s18019_s3 + $0xa00] sm:$0xff]  ;;  %v5028_v15 = vld [vmem:[%s18019_s3 + $0xa08] sm:$0xff]  ;;  %v5046_v1 = vld [vmem:[%s18019_s3 + $0xa98] sm:$0xff] }
 0x289   :  { %9981 = vmatprep.subr.bf16.mxu1 %v9980_v27  ;;  %v5009_v27 = vld [vmem:[%s18019_s3 + $0x970] sm:$0xff]  ;;  %v9992_v8 = vpack.c.bf16 %v5044_v34, %v5043_v9  ;;  %v5059_v54 = vld [vmem:[%s18019_s3 + $0xb00] sm:$0xff]  ;;  %v9994_v24 = vpack.c.bf16 %v5028_v15, %v5027_v17  ;;  %v5048_v34 = vld [vmem:[%s18019_s3 + $0xaa8] sm:$0xff] }
 0x28a   :  { %v5047_v9 = vld [vmem:[%s18019_s3 + $0xaa0] sm:$0xff]  ;;  %v5080_v17 = vld [vmem:[%s18019_s3 + $0xba8] sm:$0xff] }
 0x28b   :  { %9951 = vmatpush3.bf16.msra.mxu0 %v9950_v44  ;;  %v5076_v44 = vld [vmem:[%s18019_s3 + $0xb88] sm:$0xff] }
 0x28c   :  { %9983 = vmatpush3.bf16.msra.mxu1 %v9982_v4  ;;  %9953 = vmatprep.subr.bf16.mxu0 %v9952_v38  ;;  %v9958_v4 = vpack.c.bf16 %v4978_v58, %v4977_v47  ;;  %v9990_v38 = vpack.c.bf16 %v5010_v22, %v5009_v27  ;;  %v5029_v47 = vld [vmem:[%s18019_s3 + $0xa10] sm:$0xff]  ;;  %v5030_v58 = vld [vmem:[%s18019_s3 + $0xa18] sm:$0xff] }
 0x28d   :  { %9985 = vmatprep.subr.bf16.mxu1 %v9984_v23  ;;  %v10024_v23 = vpack.c.bf16 %v5076_v44, %v5075_v5  ;;  %v5061_v27 = vld [vmem:[%s18019_s3 + $0xb10] sm:$0xff]  ;;  %v5062_v22 = vld [vmem:[%s18019_s3 + $0xb18] sm:$0xff]  ;;  %v18691_v44 = vld [vmem:[#allocation79_spill] sm:$0xff] }
 0x28e   :  { %v18690_v5 = vld [vmem:[#allocation48_spill] sm:$0xff] }
 0x28f   :  { %9955 = vmatpush3.bf16.msra.mxu0 %v9954_v60  ;;  %v5077_v60 = vld [vmem:[%s18019_s3 + $0xb90] sm:$0xff]  ;;  %v18693_v15 = vcombine.high %v18690_v5, %v18691_v44 }
 0x290   :  { %9987 = vmatpush3.bf16.msra.mxu1 %v9986_v57  ;;  %9957 = vmatprep.subr.bf16.mxu0 %v9956_v52  ;;  %v5078_v57 = vld [vmem:[%s18019_s3 + $0xb98] sm:$0xff]  ;;  %v10026_v52 = vpack.c.bf16 %v5060_v18, %v5059_v54  ;;  %v18694_v54 = vld [vmem:[#allocation80_spill] sm:$0xff] }
 0x291   :  { %9989 = vmatprep.subr.bf16.mxu1 %v9988_v31  ;;  %v9996_v31 = vpack.c.bf16 %v5046_v1, %v5045_v42  ;;  %v18695_v18 = vld [vmem:[#allocation81_spill] sm:$0xff]  ;;  %v10030_v1 = vpack.c.bf16 %v5062_v22, %v5061_v27  ;;  %v5049_v27 = vld [vmem:[%s18019_s3 + $0xab0] sm:$0xff] }
 0x292   :  { %v18696_v42 = vcombine.low %v18694_v54, %v18695_v18  ;;  %v5050_v22 = vld [vmem:[%s18019_s3 + $0xab8] sm:$0xff] }
 0x293   :  { %9959 = vmatpush3.bf16.msra.mxu0 %v9958_v4  ;;  %v18692_v4 = vcombine.low %v18690_v5, %v18691_v44  ;;  %v10004_v44 = vpack.c.bf16 %v5050_v22, %v5049_v27  ;;  %v5068_v27 = vld [vmem:[%s18019_s3 + $0xb48] sm:$0xff]  ;;  %v5053_v22 = vld [vmem:[%s18019_s3 + $0xad0] sm:$0xff] }
 0x294   :  { %9991 = vmatpush3.bf16.msra.mxu1 %v9990_v38  ;;  %9993 = vmatprep.subr.bf16.mxu0 %v9992_v8  ;;  %v10028_v38 = vpack.c.bf16 %v5078_v57, %v5077_v60  ;;  %v5079_v8 = vld [vmem:[%s18019_s3 + $0xba0] sm:$0xff]  ;;  %v10000_v60 = vpack.c.bf16 %v5048_v34, %v5047_v9  ;;  %v5081_v9 = vld [vmem:[%s18019_s3 + $0xbb0] sm:$0xff] }
 0x295   :  { %10025 = vmatprep.subr.bf16.mxu1 %v10024_v23  ;;  %v9998_v23 = vpack.c.bf16 %v5030_v58, %v5029_v47  ;;  %v5031_v57 = vld [vmem:[%s18019_s3 + $0xa20] sm:$0xff]  ;;  %v18697_v47 = vcombine.high %v18694_v54, %v18695_v18  ;;  %v5064_v58 = vld [vmem:[%s18019_s3 + $0xb28] sm:$0xff] }
 0x296   :  { %6356 = vmatmul.mubr.f32.vlgmr.msra.gmra.mrb[132].mxu0 %v18692_v4  ;;  %v5032_v4 = vld [vmem:[%s18019_s3 + $0xa28] sm:$0xff]  ;;  %v5051_v54 = vld [vmem:[%s18019_s3 + $0xac0] sm:$0xff] }
 0x297   :  { %6426 = vmatmul.mubr.f32.vlgmr.msra.gmra.mrb[140].mxu1 %v18693_v15  ;;  %9995 = vmatpush3.bf16.msra.mxu0 %v9994_v24  ;;  %v5063_v24 = vld [vmem:[%s18019_s3 + $0xb20] sm:$0xff]  ;;  %v10002_v34 = vpack.c.bf16 %v5032_v4, %v5031_v57  ;;  %v5052_v18 = vld [vmem:[%s18019_s3 + $0xac8] sm:$0xff] }
 0x298   :  { %6495 = vmatprep.mubr.f32.mxu0 %v18696_v42  ;;  %10027 = vmatpush3.bf16.msra.mxu1 %v10026_v52  ;;  %v10032_v52 = vpack.c.bf16 %v5080_v17, %v5079_v8  ;;  %v10034_v5 = vpack.c.bf16 %v5064_v58, %v5063_v24  ;;  %v5033_v8 = vld [vmem:[%s18019_s3 + $0xa30] sm:$0xff]  ;;  %v5083_v42 = vld [vmem:[%s18019_s3 + $0xbc0] sm:$0xff]  ;;  %v10008_v4 = vpack.c.bf16 %v5052_v18, %v5051_v54  ;;  %v5070_v54 = vld [vmem:[%s18019_s3 + $0xb58] sm:$0xff] }
 0x299   :  { %6565 = vmatprep.mubr.f32.mxu1 %v18697_v47  ;;  %9997 = vmatprep.subr.bf16.mxu0 %v9996_v31  ;;  %v5082_v31 = vld [vmem:[%s18019_s3 + $0xbb8] sm:$0xff]  ;;  %v5065_v17 = vld [vmem:[%s18019_s3 + $0xb30] sm:$0xff]  ;;  %v5035_v24 = vld [vmem:[%s18019_s3 + $0xa40] sm:$0xff] }
 0x29a   :  { %10029 = vmatprep.subr.bf16.mxu1 %v10028_v38  ;;  %v5034_v38 = vld [vmem:[%s18019_s3 + $0xa38] sm:$0xff]  ;;  %v10036_v15 = vpack.c.bf16 %v5082_v31, %v5081_v9  ;;  %v5036_v47 = vld [vmem:[%s18019_s3 + $0xa48] sm:$0xff]  ;;  %v5085_v31 = vld [vmem:[%s18019_s3 + $0xbd0] sm:$0xff] }
 0x29b   :  { %9999 = vmatpush3.bf16.msra.mxu0 %v9998_v23  ;;  %v5066_v23 = vld [vmem:[%s18019_s3 + $0xb38] sm:$0xff]  ;;  %v5055_v18 = vld [vmem:[%s18019_s3 + $0xae0] sm:$0xff] }
 0x29c   :  { %10031 = vmatpush3.bf16.msra.mxu1 %v10030_v1  ;;  %10001 = vmatprep.subr.bf16.mxu0 %v10000_v60  ;;  %v5084_v1 = vld [vmem:[%s18019_s3 + $0xbc8] sm:$0xff]  ;;  %v10006_v60 = vpack.c.bf16 %v5034_v38, %v5033_v8  ;;  %v10038_v57 = vpack.c.bf16 %v5066_v23, %v5065_v17  ;;  %v5054_v9 = vld [vmem:[%s18019_s3 + $0xad8] sm:$0xff]  ;;  %v5037_v38 = vld [vmem:[%s18019_s3 + $0xa50] sm:$0xff] }
 0x29d   :  { %10033 = vmatprep.subr.bf16.mxu1 %v10032_v52  ;;  %v5067_v52 = vld [vmem:[%s18019_s3 + $0xb40] sm:$0xff]  ;;  %v10040_v58 = vpack.c.bf16 %v5084_v1, %v5083_v42  ;;  %v10012_v8 = vpack.c.bf16 %v5054_v9, %v5053_v22  ;;  %v5038_v17 = vld [vmem:[%s18019_s3 + $0xa58] sm:$0xff]  ;;  %v5056_v42 = vld [vmem:[%s18019_s3 + $0xae8] sm:$0xff] }
 0x29e   :  { %v5087_v1 = vld [vmem:[%s18019_s3 + $0xbe0] sm:$0xff]  ;;  %v5072_v22 = vld [vmem:[%s18019_s3 + $0xb68] sm:$0xff]  ;;  %v5057_v9 = vld [vmem:[%s18019_s3 + $0xaf0] sm:$0xff] }
 0x29f   :  { %10003 = vmatpush3.bf16.msra.mxu0 %v10002_v34  ;;  %v5086_v34 = vld [vmem:[%s18019_s3 + $0xbd8] sm:$0xff] }
 0x2a0   :  { %10035 = vmatpush3.bf16.msra.mxu1 %v10034_v5  ;;  %10005 = vmatprep.subr.bf16.mxu0 %v10004_v44  ;;  %v10010_v5 = vpack.c.bf16 %v5036_v47, %v5035_v24  ;;  %v10042_v44 = vpack.c.bf16 %v5068_v27, %v5067_v52  ;;  %v10044_v23 = vpack.c.bf16 %v5086_v34, %v5085_v31  ;;  %v5039_v47 = vld [vmem:[%s18019_s3 + $0xa60] sm:$0xff]  ;;  %v5040_v52 = vld [vmem:[%s18019_s3 + $0xa68] sm:$0xff]  ;;  %v5058_v31 = vld [vmem:[%s18019_s3 + $0xaf8] sm:$0xff] }
 0x2a1   :  { %10037 = vmatprep.subr.bf16.mxu1 %v10036_v15  ;;  %v5069_v15 = vld [vmem:[%s18019_s3 + $0xb50] sm:$0xff]  ;;  %v10016_v24 = vpack.c.bf16 %v5056_v42, %v5055_v18  ;;  %v5074_v18 = vld [vmem:[%s18019_s3 + $0xb78] sm:$0xff]  ;;  %v5107_v42 = vld [vmem:[%s18019_s3 + $0xc80] sm:$0xff] }
 0x2a2   :  { %v5089_v34 = vld [vmem:[%s18019_s3 + $0xbf0] sm:$0xff] }
 0x2a3   :  { %10007 = vmatpush3.bf16.msra.mxu0 %v10006_v60  ;;  %v5088_v60 = vld [vmem:[%s18019_s3 + $0xbe8] sm:$0xff] }
 0x2a4   :  { %10039 = vmatpush3.bf16.msra.mxu1 %v10038_v57  ;;  %10009 = vmatprep.subr.bf16.mxu0 %v10008_v4  ;;  %v10014_v57 = vpack.c.bf16 %v5038_v17, %v5037_v38  ;;  %v10046_v4 = vpack.c.bf16 %v5070_v54, %v5069_v15  ;;  %v10048_v27 = vpack.c.bf16 %v5088_v60, %v5087_v1  ;;  %v5041_v17 = vld [vmem:[%s18019_s3 + $0xa70] sm:$0xff]  ;;  %v5042_v15 = vld [vmem:[%s18019_s3 + $0xa78] sm:$0xff]  ;;  %v5108_v1 = vld [vmem:[%s18019_s3 + $0xc88] sm:$0xff] }
 0x2a5   :  { %10041 = vmatprep.subr.bf16.mxu1 %v10040_v58  ;;  %v5071_v58 = vld [vmem:[%s18019_s3 + $0xb60] sm:$0xff]  ;;  %v10020_v38 = vpack.c.bf16 %v5058_v31, %v5057_v9  ;;  %v5124_v9 = vld [vmem:[%s18019_s3 + $0xd08] sm:$0xff]  ;;  %v5109_v31 = vld [vmem:[%s18019_s3 + $0xc90] sm:$0xff] }
 0x2a6   :  { %v5139_v60 = vld [vmem:[%s18019_s3 + $0xd80] sm:$0xff] }
 0x2a7   :  { %10011 = vmatpush3.bf16.msra.mxu0 %v10010_v5  ;;  %v5090_v5 = vld [vmem:[%s18019_s3 + $0xbf8] sm:$0xff] }
 0x2a8   :  { %10043 = vmatpush3.bf16.msra.mxu1 %v10042_v44  ;;  %10013 = vmatprep.subr.bf16.mxu0 %v10012_v8  ;;  %v10018_v44 = vpack.c.bf16 %v5040_v52, %v5039_v47  ;;  %v10050_v8 = vpack.c.bf16 %v5072_v22, %v5071_v58  ;;  %v10052_v54 = vpack.c.bf16 %v5090_v5, %v5089_v34  ;;  %v5091_v52 = vld [vmem:[%s18019_s3 + $0xc00] sm:$0xff]  ;;  %v5092_v58 = vld [vmem:[%s18019_s3 + $0xc08] sm:$0xff]  ;;  %v5110_v34 = vld [vmem:[%s18019_s3 + $0xc98] sm:$0xff] }
 0x2a9   :  { %10045 = vmatprep.subr.bf16.mxu1 %v10044_v23  ;;  %v5073_v23 = vld [vmem:[%s18019_s3 + $0xb70] sm:$0xff]  ;;  %v10056_v47 = vpack.c.bf16 %v5108_v1, %v5107_v42  ;;  %v5123_v22 = vld [vmem:[%s18019_s3 + $0xd00] sm:$0xff]  ;;  %v10058_v5 = vpack.c.bf16 %v5092_v58, %v5091_v52  ;;  %v5112_v1 = vld [vmem:[%s18019_s3 + $0xca8] sm:$0xff] }
 0x2aa   :  { %v5111_v42 = vld [vmem:[%s18019_s3 + $0xca0] sm:$0xff]  ;;  %v5144_v52 = vld [vmem:[%s18019_s3 + $0xda8] sm:$0xff] }
 0x2ab   :  { %10015 = vmatpush3.bf16.msra.mxu0 %v10014_v57  ;;  %v5140_v57 = vld [vmem:[%s18019_s3 + $0xd88] sm:$0xff] }
 0x2ac   :  { %10047 = vmatpush3.bf16.msra.mxu1 %v10046_v4  ;;  %10017 = vmatprep.subr.bf16.mxu0 %v10016_v24  ;;  %v10022_v4 = vpack.c.bf16 %v5042_v15, %v5041_v17  ;;  %v10054_v24 = vpack.c.bf16 %v5074_v18, %v5073_v23  ;;  %v5093_v17 = vld [vmem:[%s18019_s3 + $0xc10] sm:$0xff]  ;;  %v5094_v15 = vld [vmem:[%s18019_s3 + $0xc18] sm:$0xff] }
 0x2ad   :  { %10049 = vmatprep.subr.bf16.mxu1 %v10048_v27  ;;  %v10088_v27 = vpack.c.bf16 %v5140_v57, %v5139_v60  ;;  %v5125_v23 = vld [vmem:[%s18019_s3 + $0xd10] sm:$0xff]  ;;  %v5126_v18 = vld [vmem:[%s18019_s3 + $0xd18] sm:$0xff]  ;;  %v18698_v60 = vld [vmem:[#allocation2_spill] sm:$0xff] }
 0x2ae   :  { %v18699_v57 = vld [vmem:[#allocation3_spill] sm:$0xff] }
 0x2af   :  { %10019 = vmatpush3.bf16.msra.mxu0 %v10018_v44  ;;  %v5141_v44 = vld [vmem:[%s18019_s3 + $0xd90] sm:$0xff]  ;;  %v18701_v58 = vcombine.high %v18698_v60, %v18699_v57 }
 0x2b0   :  { %10051 = vmatpush3.bf16.msra.mxu1 %v10050_v8  ;;  %10021 = vmatprep.subr.bf16.mxu0 %v10020_v38  ;;  %v5142_v8 = vld [vmem:[%s18019_s3 + $0xd98] sm:$0xff]  ;;  %v10090_v38 = vpack.c.bf16 %v5124_v9, %v5123_v22  ;;  %v18703_v9 = vld [vmem:[#allocation82_spill] sm:$0xff] }
 0x2b1   :  { %10053 = vmatprep.subr.bf16.mxu1 %v10052_v54  ;;  %v10060_v54 = vpack.c.bf16 %v5110_v34, %v5109_v31  ;;  %v18702_v22 = vld [vmem:[#allocation49_spill] sm:$0xff]  ;;  %v10094_v34 = vpack.c.bf16 %v5126_v18, %v5125_v23  ;;  %v5113_v23 = vld [vmem:[%s18019_s3 + $0xcb0] sm:$0xff] }
 0x2b2   :  { %v18704_v31 = vcombine.low %v18702_v22, %v18703_v9  ;;  %v5114_v18 = vld [vmem:[%s18019_s3 + $0xcb8] sm:$0xff] }
 0x2b3   :  { %10023 = vmatpush3.bf16.msra.mxu0 %v10022_v4  ;;  %v18700_v4 = vcombine.low %v18698_v60, %v18699_v57  ;;  %v10068_v57 = vpack.c.bf16 %v5114_v18, %v5113_v23  ;;  %v5132_v23 = vld [vmem:[%s18019_s3 + $0xd48] sm:$0xff]  ;;  %v5117_v18 = vld [vmem:[%s18019_s3 + $0xcd0] sm:$0xff] }
 0x2b4   :  { %10055 = vmatpush3.bf16.msra.mxu1 %v10054_v24  ;;  %10057 = vmatprep.subr.bf16.mxu0 %v10056_v47  ;;  %v10092_v24 = vpack.c.bf16 %v5142_v8, %v5141_v44  ;;  %v5143_v47 = vld [vmem:[%s18019_s3 + $0xda0] sm:$0xff]  ;;  %v10064_v44 = vpack.c.bf16 %v5112_v1, %v5111_v42  ;;  %v5145_v42 = vld [vmem:[%s18019_s3 + $0xdb0] sm:$0xff] }
 0x2b5   :  { %10089 = vmatprep.subr.bf16.mxu1 %v10088_v27  ;;  %v10062_v27 = vpack.c.bf16 %v5094_v15, %v5093_v17  ;;  %v5095_v8 = vld [vmem:[%s18019_s3 + $0xc20] sm:$0xff]  ;;  %v18705_v17 = vcombine.high %v18702_v22, %v18703_v9  ;;  %v5128_v15 = vld [vmem:[%s18019_s3 + $0xd28] sm:$0xff] }
 0x2b6   :  { %6496 = vmatmul.mubr.f32.vlgmr.msra.gmra.mrb[134].mxu0 %v18700_v4  ;;  %v5096_v4 = vld [vmem:[%s18019_s3 + $0xc28] sm:$0xff]  ;;  %v5115_v22 = vld [vmem:[%s18019_s3 + $0xcc0] sm:$0xff] }
 0x2b7   :  { %6566 = vmatmul.mubr.f32.vlgmr.msra.gmra.mrb[142].mxu1 %v18701_v58  ;;  %10059 = vmatpush3.bf16.msra.mxu0 %v10058_v5  ;;  %v5127_v5 = vld [vmem:[%s18019_s3 + $0xd20] sm:$0xff]  ;;  %v10066_v1 = vpack.c.bf16 %v5096_v4, %v5095_v8  ;;  %v5116_v9 = vld [vmem:[%s18019_s3 + $0xcc8] sm:$0xff] }
 0x2b8   :  { %6635 = vmatprep.mubr.f32.mxu0 %v18704_v31  ;;  %10091 = vmatpush3.bf16.msra.mxu1 %v10090_v38  ;;  %v10096_v38 = vpack.c.bf16 %v5144_v52, %v5143_v47  ;;  %v10098_v60 = vpack.c.bf16 %v5128_v15, %v5127_v5  ;;  %v5097_v47 = vld [vmem:[%s18019_s3 + $0xc30] sm:$0xff]  ;;  %v5147_v31 = vld [vmem:[%s18019_s3 + $0xdc0] sm:$0xff]  ;;  %v10072_v4 = vpack.c.bf16 %v5116_v9, %v5115_v22  ;;  %v5134_v22 = vld [vmem:[%s18019_s3 + $0xd58] sm:$0xff] }
 0x2b9   :  { %6705 = vmatprep.mubr.f32.mxu1 %v18705_v17  ;;  %10061 = vmatprep.subr.bf16.mxu0 %v10060_v54  ;;  %v5146_v54 = vld [vmem:[%s18019_s3 + $0xdb8] sm:$0xff]  ;;  %v5129_v52 = vld [vmem:[%s18019_s3 + $0xd30] sm:$0xff]  ;;  %v5099_v5 = vld [vmem:[%s18019_s3 + $0xc40] sm:$0xff] }
 0x2ba   :  { %10093 = vmatprep.subr.bf16.mxu1 %v10092_v24  ;;  %v5098_v24 = vld [vmem:[%s18019_s3 + $0xc38] sm:$0xff]  ;;  %v10100_v58 = vpack.c.bf16 %v5146_v54, %v5145_v42  ;;  %v5100_v17 = vld [vmem:[%s18019_s3 + $0xc48] sm:$0xff]  ;;  %v5149_v54 = vld [vmem:[%s18019_s3 + $0xdd0] sm:$0xff] }
 0x2bb   :  { %10063 = vmatpush3.bf16.msra.mxu0 %v10062_v27  ;;  %v5130_v27 = vld [vmem:[%s18019_s3 + $0xd38] sm:$0xff]  ;;  %v5119_v9 = vld [vmem:[%s18019_s3 + $0xce0] sm:$0xff] }
 0x2bc   :  { %10095 = vmatpush3.bf16.msra.mxu1 %v10094_v34  ;;  %10065 = vmatprep.subr.bf16.mxu0 %v10064_v44  ;;  %v5148_v34 = vld [vmem:[%s18019_s3 + $0xdc8] sm:$0xff]  ;;  %v10070_v44 = vpack.c.bf16 %v5098_v24, %v5097_v47  ;;  %v10102_v8 = vpack.c.bf16 %v5130_v27, %v5129_v52  ;;  %v5118_v42 = vld [vmem:[%s18019_s3 + $0xcd8] sm:$0xff]  ;;  %v5101_v24 = vld [vmem:[%s18019_s3 + $0xc50] sm:$0xff] }
 0x2bd   :  { %10097 = vmatprep.subr.bf16.mxu1 %v10096_v38  ;;  %v5131_v38 = vld [vmem:[%s18019_s3 + $0xd40] sm:$0xff]  ;;  %v10104_v15 = vpack.c.bf16 %v5148_v34, %v5147_v31  ;;  %v10076_v47 = vpack.c.bf16 %v5118_v42, %v5117_v18  ;;  %v5102_v52 = vld [vmem:[%s18019_s3 + $0xc58] sm:$0xff]  ;;  %v5120_v31 = vld [vmem:[%s18019_s3 + $0xce8] sm:$0xff] }
 0x2be   :  { %v5151_v34 = vld [vmem:[%s18019_s3 + $0xde0] sm:$0xff]  ;;  %v5136_v18 = vld [vmem:[%s18019_s3 + $0xd68] sm:$0xff]  ;;  %v5121_v42 = vld [vmem:[%s18019_s3 + $0xcf0] sm:$0xff] }
 0x2bf   :  { %10067 = vmatpush3.bf16.msra.mxu0 %v10066_v1  ;;  %v5150_v1 = vld [vmem:[%s18019_s3 + $0xdd8] sm:$0xff] }
 0x2c0   :  { %10099 = vmatpush3.bf16.msra.mxu1 %v10098_v60  ;;  %10069 = vmatprep.subr.bf16.mxu0 %v10068_v57  ;;  %v10074_v60 = vpack.c.bf16 %v5100_v17, %v5099_v5  ;;  %v10106_v57 = vpack.c.bf16 %v5132_v23, %v5131_v38  ;;  %v10108_v27 = vpack.c.bf16 %v5150_v1, %v5149_v54  ;;  %v5103_v17 = vld [vmem:[%s18019_s3 + $0xc60] sm:$0xff]  ;;  %v5104_v38 = vld [vmem:[%s18019_s3 + $0xc68] sm:$0xff]  ;;  %v5122_v54 = vld [vmem:[%s18019_s3 + $0xcf8] sm:$0xff] }
 0x2c1   :  { %10101 = vmatprep.subr.bf16.mxu1 %v10100_v58  ;;  %v5133_v58 = vld [vmem:[%s18019_s3 + $0xd50] sm:$0xff]  ;;  %v10080_v5 = vpack.c.bf16 %v5120_v31, %v5119_v9  ;;  %v5138_v9 = vld [vmem:[%s18019_s3 + $0xd78] sm:$0xff]  ;;  %v5171_v31 = vld [vmem:[%s18019_s3 + $0xe80] sm:$0xff] }
 0x2c2   :  { %v5153_v1 = vld [vmem:[%s18019_s3 + $0xdf0] sm:$0xff] }
 0x2c3   :  { %10071 = vmatpush3.bf16.msra.mxu0 %v10070_v44  ;;  %v5152_v44 = vld [vmem:[%s18019_s3 + $0xde8] sm:$0xff] }
 0x2c4   :  { %10103 = vmatpush3.bf16.msra.mxu1 %v10102_v8  ;;  %10073 = vmatprep.subr.bf16.mxu0 %v10072_v4  ;;  %v10078_v8 = vpack.c.bf16 %v5102_v52, %v5101_v24  ;;  %v10110_v4 = vpack.c.bf16 %v5134_v22, %v5133_v58  ;;  %v10112_v23 = vpack.c.bf16 %v5152_v44, %v5151_v34  ;;  %v5105_v52 = vld [vmem:[%s18019_s3 + $0xc70] sm:$0xff]  ;;  %v5106_v58 = vld [vmem:[%s18019_s3 + $0xc78] sm:$0xff]  ;;  %v5172_v34 = vld [vmem:[%s18019_s3 + $0xe88] sm:$0xff] }
 0x2c5   :  { %10105 = vmatprep.subr.bf16.mxu1 %v10104_v15  ;;  %v5135_v15 = vld [vmem:[%s18019_s3 + $0xd60] sm:$0xff]  ;;  %v10084_v24 = vpack.c.bf16 %v5122_v54, %v5121_v42  ;;  %v5188_v42 = vld [vmem:[%s18019_s3 + $0xf08] sm:$0xff]  ;;  %v5173_v54 = vld [vmem:[%s18019_s3 + $0xe90] sm:$0xff] }
 0x2c6   :  { %v5203_v44 = vld [vmem:[%s18019_s3 + $0xf80] sm:$0xff] }
 0x2c7   :  { %10075 = vmatpush3.bf16.msra.mxu0 %v10074_v60  ;;  %v5154_v60 = vld [vmem:[%s18019_s3 + $0xdf8] sm:$0xff] }
 0x2c8   :  { %10107 = vmatpush3.bf16.msra.mxu1 %v10106_v57  ;;  %10077 = vmatprep.subr.bf16.mxu0 %v10076_v47  ;;  %v10082_v57 = vpack.c.bf16 %v5104_v38, %v5103_v17  ;;  %v10114_v47 = vpack.c.bf16 %v5136_v18, %v5135_v15  ;;  %v10116_v22 = vpack.c.bf16 %v5154_v60, %v5153_v1  ;;  %v5155_v38 = vld [vmem:[%s18019_s3 + $0xe00] sm:$0xff]  ;;  %v5156_v15 = vld [vmem:[%s18019_s3 + $0xe08] sm:$0xff]  ;;  %v5174_v1 = vld [vmem:[%s18019_s3 + $0xe98] sm:$0xff] }
 0x2c9   :  { %10109 = vmatprep.subr.bf16.mxu1 %v10108_v27  ;;  %v5137_v27 = vld [vmem:[%s18019_s3 + $0xd70] sm:$0xff]  ;;  %v10120_v17 = vpack.c.bf16 %v5172_v34, %v5171_v31  ;;  %v5187_v18 = vld [vmem:[%s18019_s3 + $0xf00] sm:$0xff]  ;;  %v10122_v60 = vpack.c.bf16 %v5156_v15, %v5155_v38  ;;  %v5176_v34 = vld [vmem:[%s18019_s3 + $0xea8] sm:$0xff] }
 0x2ca   :  { %v5175_v31 = vld [vmem:[%s18019_s3 + $0xea0] sm:$0xff]  ;;  %v5160_v15 = vld [vmem:[%s18019_s3 + $0xe28] sm:$0xff] }
 0x2cb   :  { %10079 = vmatpush3.bf16.msra.mxu0 %v10078_v8  ;;  %v5204_v8 = vld [vmem:[%s18019_s3 + $0xf88] sm:$0xff]  ;;  %v5159_v38 = vld [vmem:[%s18019_s3 + $0xe20] sm:$0xff] }
 0x2cc   :  { %10111 = vmatpush3.bf16.msra.mxu1 %v10110_v4  ;;  %10081 = vmatprep.subr.bf16.mxu0 %v10080_v5  ;;  %v10086_v4 = vpack.c.bf16 %v5106_v58, %v5105_v52  ;;  %v10118_v5 = vpack.c.bf16 %v5138_v9, %v5137_v27  ;;  %v5157_v52 = vld [vmem:[%s18019_s3 + $0xe10] sm:$0xff]  ;;  %v5158_v58 = vld [vmem:[%s18019_s3 + $0xe18] sm:$0xff] }
 0x2cd   :  { %10113 = vmatprep.subr.bf16.mxu1 %v10112_v23  ;;  %v10152_v23 = vpack.c.bf16 %v5204_v8, %v5203_v44  ;;  %v5189_v27 = vld [vmem:[%s18019_s3 + $0xf10] sm:$0xff]  ;;  %v5190_v9 = vld [vmem:[%s18019_s3 + $0xf18] sm:$0xff]  ;;  %v5207_v8 = vld [vmem:[%s18019_s3 + $0xfa0] sm:$0xff] }
 0x2cf   :  { %10083 = vmatpush3.bf16.msra.mxu0 %v10082_v57  ;;  %v5205_v57 = vld [vmem:[%s18019_s3 + $0xf90] sm:$0xff] }
 0x2d0   :  { %10115 = vmatpush3.bf16.msra.mxu1 %v10114_v47  ;;  %10085 = vmatprep.subr.bf16.mxu0 %v10084_v24  ;;  %v5206_v47 = vld [vmem:[%s18019_s3 + $0xf98] sm:$0xff]  ;;  %v10154_v24 = vpack.c.bf16 %v5188_v42, %v5187_v18  ;;  %v10130_v42 = vpack.c.bf16 %v5160_v15, %v5159_v38  ;;  %v5181_v38 = vld [vmem:[%s18019_s3 + $0xed0] sm:$0xff] }
 0x2d1   :  { %10117 = vmatprep.subr.bf16.mxu1 %v10116_v22  ;;  %v10124_v22 = vpack.c.bf16 %v5174_v1, %v5173_v54  ;;  %v10156_v44 = vpack.c.bf16 %v5206_v47, %v5205_v57  ;;  %v5178_v18 = vld [vmem:[%s18019_s3 + $0xeb8] sm:$0xff]  ;;  %v5193_v47 = vld [vmem:[%s18019_s3 + $0xf30] sm:$0xff] }
 0x2d2   :  { %v5162_v57 = vld [vmem:[%s18019_s3 + $0xe38] sm:$0xff] }
 0x2d3   :  { %10087 = vmatpush3.bf16.msra.mxu0 %v10086_v4  ;;  %v5208_v4 = vld [vmem:[%s18019_s3 + $0xfa8] sm:$0xff]  ;;  %v5182_v15 = vld [vmem:[%s18019_s3 + $0xed8] sm:$0xff] }
 0x2d4   :  { %10119 = vmatpush3.bf16.msra.mxu1 %v10118_v5  ;;  %10121 = vmatprep.subr.bf16.mxu0 %v10120_v17  ;;  %v10126_v5 = vpack.c.bf16 %v5158_v58, %v5157_v52  ;;  %v10128_v17 = vpack.c.bf16 %v5176_v34, %v5175_v31  ;;  %v5194_v52 = vld [vmem:[%s18019_s3 + $0xf38] sm:$0xff]  ;;  %v5179_v58 = vld [vmem:[%s18019_s3 + $0xec0] sm:$0xff] }
 0x2d5   :  { %10153 = vmatprep.subr.bf16.mxu1 %v10152_v23  ;;  %v5177_v23 = vld [vmem:[%s18019_s3 + $0xeb0] sm:$0xff]  ;;  %v10166_v34 = vpack.c.bf16 %v5194_v52, %v5193_v47  ;;  %v5216_v47 = vld [vmem:[%s18019_s3 + $0xfe8] sm:$0xff] }
 0x2d6   :  { %6636 = vmatmul.mubr.f32.vlgmr.msra.gmra.mrb[136].mxu0 %v3887_v12  ;;  %v10158_v12 = vpack.c.bf16 %v5190_v9, %v5189_v27  ;;  %v10132_v1 = vpack.c.bf16 %v5178_v18, %v5177_v23  ;;  %v5180_v27 = vld [vmem:[%s18019_s3 + $0xec8] sm:$0xff]  ;;  %v10140_v23 = vpack.c.bf16 %v5182_v15, %v5181_v38  ;;  %v5165_v18 = vld [vmem:[%s18019_s3 + $0xe50] sm:$0xff]  ;;  %v5218_v15 = vld [vmem:[%s18019_s3 + $0xff8] sm:$0xff] }
 0x2d7   :  { %6706 = vmatmul.mubr.f32.vlgmr.msra.gmra.mrb[144].mxu1 %v3888_v16  ;;  %10123 = vmatpush3.bf16.msra.mxu0 %v10122_v60  ;;  %v10160_v16 = vpack.c.bf16 %v5208_v4, %v5207_v8  ;;  %v5161_v60 = vld [vmem:[%s18019_s3 + $0xe30] sm:$0xff]  ;;  %v5212_v9 = vld [vmem:[%s18019_s3 + $0xfc8] sm:$0xff]  ;;  %v5163_v8 = vld [vmem:[%s18019_s3 + $0xe40] sm:$0xff] }
 0x2d8   :  { %6775 = vmatprep.mubr.f32.mxu0 %v4433_v3  ;;  %10155 = vmatpush3.bf16.msra.mxu1 %v10154_v24  ;;  %v5192_v3 = vld [vmem:[%s18019_s3 + $0xf28] sm:$0xff]  ;;  %v10164_v24 = vpack.c.bf16 %v5210_v0, %v5209_v30  ;;  %v10134_v31 = vpack.c.bf16 %v5162_v57, %v5161_v60  ;;  %v5166_v30 = vld [vmem:[%s18019_s3 + $0xe58] sm:$0xff]  ;;  %v5197_v0 = vld [vmem:[%s18019_s3 + $0xf50] sm:$0xff] }
 0x2d9   :  { %6845 = vmatprep.mubr.f32.mxu1 %v18706_v39  ;;  %10125 = vmatprep.subr.bf16.mxu0 %v10124_v22  ;;  %v10162_v54 = vpack.c.bf16 %v5192_v3, %v5191_v25  ;;  %v5211_v22 = vld [vmem:[%s18019_s3 + $0xfc0] sm:$0xff]  ;;  %v5164_v4 = vld [vmem:[%s18019_s3 + $0xe48] sm:$0xff]  ;;  %v5213_v25 = vld [vmem:[%s18019_s3 + $0xfd0] sm:$0xff] }
 0x2da   :  { %10157 = vmatprep.subr.bf16.mxu1 %v10156_v44  ;;  %v10136_v44 = vpack.c.bf16 %v5180_v27, %v5179_v58  ;;  %v5214_v39 = vld [vmem:[%s18019_s3 + $0xfd8] sm:$0xff]  ;;  %v5184_v60 = vld [vmem:[%s18019_s3 + $0xee8] sm:$0xff]  ;;  %v5215_v57 = vld [vmem:[%s18019_s3 + $0xfe0] sm:$0xff] }
 0x2db   :  { %10127 = vmatpush3.bf16.msra.mxu0 %v10126_v5  ;;  %v5195_v5 = vld [vmem:[%s18019_s3 + $0xf40] sm:$0xff]  ;;  %v5217_v38 = vld [vmem:[%s18019_s3 + $0xff0] sm:$0xff] }
 0x2dc   :  { %10159 = vmatpush3.bf16.msra.mxu1 %v10158_v12  ;;  %10129 = vmatprep.subr.bf16.mxu0 %v10128_v17  ;;  %v10168_v12 = vpack.c.bf16 %v5212_v9, %v5211_v22  ;;  %v5196_v17 = vld [vmem:[%s18019_s3 + $0xf48] sm:$0xff]  ;;  %v5167_v27 = vld [vmem:[%s18019_s3 + $0xe60] sm:$0xff] }
 0x2dd   :  { %10161 = vmatprep.subr.bf16.mxu1 %v10160_v16  ;;  %v10138_v16 = vpack.c.bf16 %v5164_v4, %v5163_v8  ;;  %v10170_v3 = vpack.c.bf16 %v5196_v17, %v5195_v5  ;;  %v5168_v22 = vld [vmem:[%s18019_s3 + $0xe68] sm:$0xff]  ;;  %v5199_v9 = vld [vmem:[%s18019_s3 + $0xf60] sm:$0xff]  ;;  %v5185_v4 = vld [vmem:[%s18019_s3 + $0xef0] sm:$0xff] }
 0x2de   :  { %v5200_v8 = vld [vmem:[%s18019_s3 + $0xf68] sm:$0xff]  ;;  %v5186_v5 = vld [vmem:[%s18019_s3 + $0xef8] sm:$0xff] }
 0x2df   :  { %10131 = vmatpush3.bf16.msra.mxu0 %v10130_v42  ;;  %v10172_v42 = vpack.c.bf16 %v5214_v39, %v5213_v25 }
 0x2e0   :  { %10163 = vmatpush3.bf16.msra.mxu1 %v10162_v54  ;;  %10133 = vmatprep.subr.bf16.mxu0 %v10132_v1  ;;  %v5198_v54 = vld [vmem:[%s18019_s3 + $0xf58] sm:$0xff]  ;;  %v5183_v1 = vld [vmem:[%s18019_s3 + $0xee0] sm:$0xff] }
 0x2e1   :  { %10165 = vmatprep.subr.bf16.mxu1 %v10164_v24  ;;  %v10142_v24 = vpack.c.bf16 %v5166_v30, %v5165_v18  ;;  %v10174_v52 = vpack.c.bf16 %v5198_v54, %v5197_v0  ;;  %v10144_v58 = vpack.c.bf16 %v5184_v60, %v5183_v1  ;;  %v5169_v18 = vld [vmem:[%s18019_s3 + $0xe70] sm:$0xff]  ;;  %v5170_v30 = vld [vmem:[%s18019_s3 + $0xe78] sm:$0xff]  ;;  %v10180_v1 = vpack.c.bf16 %v5218_v15, %v5217_v38 }
 0x2e2   :  { %v5201_v0 = vld [vmem:[%s18019_s3 + $0xf70] sm:$0xff]  ;;  %v5202_v60 = vld [vmem:[%s18019_s3 + $0xf78] sm:$0xff] }
 0x2e3   :  { %10135 = vmatpush3.bf16.msra.mxu0 %v10134_v31  ;;  %v8300_v31 = vpop.f32.mrb[124].mxu0  ;;  %v5269_v38 = vld [vmem:[%s18019_s3 + $0x1190] sm:$0xff]  ;;  %v5270_v15 = vld [vmem:[%s18019_s3 + $0x1198] sm:$0xff] }
 0x2e4   :  { %10167 = vmatpush3.bf16.msra.mxu1 %v10166_v34  ;;  %10137 = vmatprep.subr.bf16.mxu0 %v10136_v44  ;;  %v8335_v34 = vpop.f32.mrb[132].mxu1  ;;  %v10176_v44 = vpack.c.bf16 %v5216_v47, %v5215_v57  ;;  %v5235_v57 = vld [vmem:[%s18019_s3 + $0x1080] sm:$0xff]  ;;  %v5236_v47 = vld [vmem:[%s18019_s3 + $0x1088] sm:$0xff] }
 0x2e5   :  { %10169 = vmatprep.subr.bf16.mxu1 %v10168_v12  ;;  %v8301_v12 = vpop.f32.mrb[125].mxu0  ;;  %v8336_v17 = vpop.f32.mrb[133].mxu1 }
 0x2e6   :  { %v8302_v25 = vadd.f32 %v8301_v12, %v8300_v31  ;;  %v8337_v39 = vadd.f32 %v8336_v17, %v8335_v34  ;;  %v5219_v31 = vld [vmem:[%s18019_s3 + $0x1000] sm:$0xff]  ;;  %v5220_v34 = vld [vmem:[%s18019_s3 + $0x1008] sm:$0xff]  ;;  %v5238_v12 = vld [vmem:[%s18019_s3 + $0x1098] sm:$0xff] }
 0x2e7   :  { %10139 = vmatpush3.bf16.msra.mxu0 %v10138_v16  ;;  %v10146_v16 = vpack.c.bf16 %v5168_v22, %v5167_v27  ;;  %v10150_v27 = vpack.c.bf16 %v5170_v30, %v5169_v18  ;;  %v10182_v22 = vpack.c.bf16 %v5202_v60, %v5201_v0  ;;  %v10186_v17 = vpack.c.bf16 %v5220_v34, %v5219_v31  ;;  %v5254_v18 = vld [vmem:[%s18019_s3 + $0x1118] sm:$0xff]  ;;  %v5239_v30 = vld [vmem:[%s18019_s3 + $0x10a0] sm:$0xff]  ;;  %v5240_v0 = vld [vmem:[%s18019_s3 + $0x10a8] sm:$0xff] }
 0x2e8   :  { %10171 = vmatpush3.bf16.msra.mxu1 %v10170_v3  ;;  %10141 = vmatprep.subr.bf16.mxu0 %v10140_v23  ;;  %v10178_v3 = vpack.c.bf16 %v5200_v8, %v5199_v9  ;;  %v10148_v23 = vpack.c.bf16 %v5186_v5, %v5185_v4  ;;  %v7973_v54 = vsel %vm7971_vm1, %v8337_v39, 0.0  ;;  %v10184_v9 = vpack.c.bf16 %v5236_v47, %v5235_v57  ;;  %v5251_v8 = vld [vmem:[%s18019_s3 + $0x1100] sm:$0xff]  ;;  %v5252_v4 = vld [vmem:[%s18019_s3 + $0x1108] sm:$0xff]  ;;  %v5237_v5 = vld [vmem:[%s18019_s3 + $0x1090] sm:$0xff] }
 0x2e9   :  { %10173 = vmatprep.subr.bf16.mxu1 %v10172_v42  ;;  %v7972_v42 = vsel %vm7971_vm1, %v8302_v25, 0.0  ;;  %v10218_v25 = vpack.c.bf16 %v5252_v4, %v5251_v8  ;;  %v5221_v39 = vld [vmem:[%s18019_s3 + $0x1010] sm:$0xff]  ;;  %v5272_v60 = vld [vmem:[%s18019_s3 + $0x11a8] sm:$0xff]  ;;  %v18708_v57 = vcombine.high %v14975_v6, %v14981_v59  ;;  %v5242_v8 = vld [vmem:[%s18019_s3 + $0x10b8] sm:$0xff] }
 0x2ea   :  { %v5256_v34 = vld [vmem:[%s18019_s3 + $0x1128] sm:$0xff] }
 0x2eb   :  { %10143 = vmatpush3.bf16.msra.mxu0 %v10142_v24  ;;  %v16295_v24 = vadd.f32 %v7973_v54, %v7972_v42  ;;  %v18707_v42 = vcombine.low %v14975_v6, %v14981_v59  ;;  %v10220_v54 = vpack.c.bf16 %v5270_v15, %v5269_v38  ;;  %v5255_v6 = vld [vmem:[%s18019_s3 + $0x1120] sm:$0xff]  ;;  %v18710_v59 = vcombine.high %v15077_v21, %v15080_v29  ;;  %v5226_v38 = vld [vmem:[%s18019_s3 + $0x1038] sm:$0xff]  ;;  %v5257_v15 = vld [vmem:[%s18019_s3 + $0x1130] sm:$0xff] }
 0x2ec   :  { %10175 = vmatpush3.bf16.msra.mxu1 %v10174_v52  ;;  %10145 = vmatprep.subr.bf16.mxu0 %v10144_v58  ;;  %v5267_v52 = vld [vmem:[%s18019_s3 + $0x1180] sm:$0xff]  ;;  %v5268_v58 = vld [vmem:[%s18019_s3 + $0x1188] sm:$0xff] }
 0x2ed   :  { %10177 = vmatprep.subr.bf16.mxu1 %v10176_v44  ;;  %v10216_v44 = vpack.c.bf16 %v5268_v58, %v5267_v52  ;;  %v18709_v52 = vcombine.low %v15077_v21, %v15080_v29  ;;  %v5273_v21 = vld [vmem:[%s18019_s3 + $0x11b0] sm:$0xff]  ;;  %v5274_v29 = vld [vmem:[%s18019_s3 + $0x11b8] sm:$0xff] }
 0x2ef   :  { %10147 = vmatpush3.bf16.msra.mxu0 %v10146_v16  ;;  %v5222_v16 = vld [vmem:[%s18019_s3 + $0x1018] sm:$0xff] }
 0x2f0   :  { %10179 = vmatpush3.bf16.msra.mxu1 %v10178_v3  ;;  %10149 = vmatprep.subr.bf16.mxu0 %v10148_v23  ;;  %v5253_v3 = vld [vmem:[%s18019_s3 + $0x1110] sm:$0xff]  ;;  %v10188_v23 = vpack.c.bf16 %v5238_v12, %v5237_v5  ;;  %v10190_v47 = vpack.c.bf16 %v5222_v16, %v5221_v39  ;;  %v10226_v5 = vpack.c.bf16 %v5256_v34, %v5255_v6  ;;  %v5258_v39 = vld [vmem:[%s18019_s3 + $0x1138] sm:$0xff]  ;;  %v5243_v16 = vld [vmem:[%s18019_s3 + $0x10c0] sm:$0xff] }
 0x2f1   :  { %10181 = vmatprep.subr.bf16.mxu1 %v10180_v1  ;;  %v5271_v1 = vld [vmem:[%s18019_s3 + $0x11a0] sm:$0xff]  ;;  %v10222_v58 = vpack.c.bf16 %v5254_v18, %v5253_v3  ;;  %v5244_v3 = vld [vmem:[%s18019_s3 + $0x10c8] sm:$0xff]  ;;  %v5230_v34 = vld [vmem:[%s18019_s3 + $0x1058] sm:$0xff] }
 0x2f2   :  { %v10224_v31 = vpack.c.bf16 %v5272_v60, %v5271_v1  ;;  %v5276_v18 = vld [vmem:[%s18019_s3 + $0x11c8] sm:$0xff]  ;;  %v5259_v60 = vld [vmem:[%s18019_s3 + $0x1140] sm:$0xff] }
 0x2f3   :  { %10151 = vmatpush3.bf16.msra.mxu0 %v10150_v27  ;;  %v10192_v27 = vpack.c.bf16 %v5240_v0, %v5239_v30  ;;  %v10230_v0 = vpack.c.bf16 %v5258_v39, %v5257_v15  ;;  %v5228_v1 = vld [vmem:[%s18019_s3 + $0x1048] sm:$0xff] }
 0x2f4   :  { %10183 = vmatpush3.bf16.msra.mxu1 %v10182_v22  ;;  %10185 = vmatprep.subr.bf16.mxu0 %v10184_v9  ;;  %v5223_v22 = vld [vmem:[%s18019_s3 + $0x1020] sm:$0xff]  ;;  %v5224_v9 = vld [vmem:[%s18019_s3 + $0x1028] sm:$0xff] }
 0x2f5   :  { %10217 = vmatprep.subr.bf16.mxu1 %v10216_v44  ;;  %v5241_v44 = vld [vmem:[%s18019_s3 + $0x10b0] sm:$0xff]  ;;  %v10194_v4 = vpack.c.bf16 %v5224_v9, %v5223_v22  ;;  %v5278_v22 = vld [vmem:[%s18019_s3 + $0x11d8] sm:$0xff]  ;;  %v5232_v39 = vld [vmem:[%s18019_s3 + $0x1068] sm:$0xff] }
 0x2f6   :  { %6776 = vmatmul.mubr.f32.vlgmr.msra.gmra.mrb[138].mxu0 %v18707_v42  ;;  %v10196_v12 = vpack.c.bf16 %v5242_v8, %v5241_v44  ;;  %v10200_v42 = vpack.c.bf16 %v5244_v3, %v5243_v16  ;;  %v5261_v44 = vld [vmem:[%s18019_s3 + $0x1150] sm:$0xff]  ;;  %v5263_v16 = vld [vmem:[%s18019_s3 + $0x1160] sm:$0xff] }
 0x2f7   :  { %6846 = vmatmul.mubr.f32.vlgmr.msra.gmra.mrb[146].mxu1 %v18708_v57  ;;  %10187 = vmatpush3.bf16.msra.mxu0 %v10186_v17  ;;  %v5225_v17 = vld [vmem:[%s18019_s3 + $0x1030] sm:$0xff] }
 0x2f8   :  { %6915 = vmatprep.mubr.f32.mxu0 %v18709_v52  ;;  %10219 = vmatpush3.bf16.msra.mxu1 %v10218_v25  ;;  %v10228_v25 = vpack.c.bf16 %v5274_v29, %v5273_v21  ;;  %v10198_v30 = vpack.c.bf16 %v5226_v38, %v5225_v17  ;;  %v5245_v52 = vld [vmem:[%s18019_s3 + $0x10d0] sm:$0xff]  ;;  %v5262_v21 = vld [vmem:[%s18019_s3 + $0x1158] sm:$0xff]  ;;  %v5247_v29 = vld [vmem:[%s18019_s3 + $0x10e0] sm:$0xff] }
 0x2f9   :  { %6985 = vmatprep.mubr.f32.mxu1 %v18710_v59  ;;  %10189 = vmatprep.subr.bf16.mxu0 %v10188_v23  ;;  %v5275_v23 = vld [vmem:[%s18019_s3 + $0x11c0] sm:$0xff]  ;;  %v10238_v38 = vpack.c.bf16 %v5262_v21, %v5261_v44  ;;  %v5266_v44 = vld [vmem:[%s18019_s3 + $0x1178] sm:$0xff]  ;;  %v5300_v21 = vld [vmem:[%s18019_s3 + $0x1288] sm:$0xff] }
 0x2fa   :  { %10221 = vmatprep.subr.bf16.mxu1 %v10220_v54  ;;  %v5227_v54 = vld [vmem:[%s18019_s3 + $0x1040] sm:$0xff]  ;;  %v10232_v57 = vpack.c.bf16 %v5276_v18, %v5275_v23 }
 0x2fb   :  { %10191 = vmatpush3.bf16.msra.mxu0 %v10190_v47  ;;  %v5260_v47 = vld [vmem:[%s18019_s3 + $0x1148] sm:$0xff]  ;;  %v10202_v9 = vpack.c.bf16 %v5228_v1, %v5227_v54 }
 0x2fc   :  { %10223 = vmatpush3.bf16.msra.mxu1 %v10222_v58  ;;  %10193 = vmatprep.subr.bf16.mxu0 %v10192_v27  ;;  %v5246_v58 = vld [vmem:[%s18019_s3 + $0x10d8] sm:$0xff]  ;;  %v5277_v27 = vld [vmem:[%s18019_s3 + $0x11d0] sm:$0xff]  ;;  %v10234_v6 = vpack.c.bf16 %v5260_v47, %v5259_v60 }
 0x2fd   :  { %10225 = vmatprep.subr.bf16.mxu1 %v10224_v31  ;;  %v10204_v59 = vpack.c.bf16 %v5246_v58, %v5245_v52  ;;  %v5229_v31 = vld [vmem:[%s18019_s3 + $0x1050] sm:$0xff]  ;;  %v10236_v8 = vpack.c.bf16 %v5278_v22, %v5277_v27 }
 0x2fe   :  { %v10206_v17 = vpack.c.bf16 %v5230_v34, %v5229_v31  ;;  %v5281_v60 = vld [vmem:[%s18019_s3 + $0x11f0] sm:$0xff] }
 0x2ff   :  { %10195 = vmatpush3.bf16.msra.mxu0 %v10194_v4  ;;  %v5248_v4 = vld [vmem:[%s18019_s3 + $0x10e8] sm:$0xff] }
 0x300   :  { %10227 = vmatpush3.bf16.msra.mxu1 %v10226_v5  ;;  %10197 = vmatprep.subr.bf16.mxu0 %v10196_v12  ;;  %v5279_v5 = vld [vmem:[%s18019_s3 + $0x11e0] sm:$0xff]  ;;  %v5280_v12 = vld [vmem:[%s18019_s3 + $0x11e8] sm:$0xff]  ;;  %v10208_v15 = vpack.c.bf16 %v5248_v4, %v5247_v29 }
 0x301   :  { %10229 = vmatprep.subr.bf16.mxu1 %v10228_v25  ;;  %v5231_v25 = vld [vmem:[%s18019_s3 + $0x1060] sm:$0xff]  ;;  %v10240_v18 = vpack.c.bf16 %v5280_v12, %v5279_v5  ;;  %v5332_v5 = vld [vmem:[%s18019_s3 + $0x1388] sm:$0xff] }
 0x302   :  { %v10210_v58 = vpack.c.bf16 %v5232_v39, %v5231_v25  ;;  %v5331_v4 = vld [vmem:[%s18019_s3 + $0x1380] sm:$0xff]  ;;  %v5284_v39 = vld [vmem:[%s18019_s3 + $0x1208] sm:$0xff] }
 0x303   :  { %10199 = vmatpush3.bf16.msra.mxu0 %v10198_v30  ;;  %v5264_v30 = vld [vmem:[%s18019_s3 + $0x1168] sm:$0xff] }
 0x304   :  { %10231 = vmatpush3.bf16.msra.mxu1 %v10230_v0  ;;  %10201 = vmatprep.subr.bf16.mxu0 %v10200_v42  ;;  %v8370_v3 = vpop.f32.mrb[126].mxu0  ;;  %v5249_v0 = vld [vmem:[%s18019_s3 + $0x10f0] sm:$0xff]  ;;  %v5250_v42 = vld [vmem:[%s18019_s3 + $0x10f8] sm:$0xff]  ;;  %v10242_v27 = vpack.c.bf16 %v5264_v30, %v5263_v16  ;;  %v10280_v16 = vpack.c.bf16 %v5332_v5, %v5331_v4  ;;  %v5287_v4 = vld [vmem:[%s18019_s3 + $0x1220] sm:$0xff] }
 0x305   :  { %10233 = vmatprep.subr.bf16.mxu1 %v10232_v57  ;;  %v8405_v23 = vpop.f32.mrb[134].mxu1  ;;  %v8371_v54 = vpop.f32.mrb[127].mxu0  ;;  %v5282_v57 = vld [vmem:[%s18019_s3 + $0x11f8] sm:$0xff]  ;;  %v10212_v22 = vpack.c.bf16 %v5250_v42, %v5249_v0  ;;  %v5333_v42 = vld [vmem:[%s18019_s3 + $0x1390] sm:$0xff]  ;;  %v5288_v5 = vld [vmem:[%s18019_s3 + $0x1228] sm:$0xff] }
 0x306   :  { %v8406_v1 = vpop.f32.mrb[135].mxu1  ;;  %v8372_v47 = vadd.f32 %v8371_v54, %v8370_v3  ;;  %v10244_v34 = vpack.c.bf16 %v5282_v57, %v5281_v60  ;;  %v5315_v3 = vld [vmem:[%s18019_s3 + $0x1300] sm:$0xff]  ;;  %v5302_v30 = vld [vmem:[%s18019_s3 + $0x1298] sm:$0xff]  ;;  %v5285_v60 = vld [vmem:[%s18019_s3 + $0x1210] sm:$0xff] }
 0x307   :  { %10203 = vmatpush3.bf16.msra.mxu0 %v10202_v9  ;;  %v8407_v52 = vadd.f32 %v8406_v1, %v8405_v23  ;;  %v5233_v9 = vld [vmem:[%s18019_s3 + $0x1070] sm:$0xff]  ;;  %v5316_v23 = vld [vmem:[%s18019_s3 + $0x1308] sm:$0xff]  ;;  %v5334_v54 = vld [vmem:[%s18019_s3 + $0x1398] sm:$0xff] }
 0x308   :  { %10235 = vmatpush3.bf16.msra.mxu1 %v10234_v6  ;;  %10205 = vmatprep.subr.bf16.mxu0 %v10204_v59  ;;  %v5234_v6 = vld [vmem:[%s18019_s3 + $0x1078] sm:$0xff]  ;;  %v5265_v59 = vld [vmem:[%s18019_s3 + $0x1170] sm:$0xff]  ;;  %v7975_v31 = vsel %vm7971_vm1, %v8372_v47, 0.0  ;;  %v10282_v1 = vpack.c.bf16 %v5316_v23, %v5315_v3 }
 0x309   :  { %10237 = vmatprep.subr.bf16.mxu1 %v10236_v8  ;;  %v5299_v8 = vld [vmem:[%s18019_s3 + $0x1280] sm:$0xff]  ;;  %v7976_v29 = vadd.f32 %v7975_v31, %v16295_v24  ;;  %v7977_v12 = vsel %vm7971_vm1, %v8407_v52, 0.0  ;;  %v5286_v57 = vld [vmem:[%s18019_s3 + $0x1218] sm:$0xff]  ;;  %v5317_v47 = vld [vmem:[%s18019_s3 + $0x1310] sm:$0xff] }
 0x30a   :  { %v10248_v25 = vpack.c.bf16 %v5300_v21, %v5299_v8  ;;  %v5283_v24 = vld [vmem:[%s18019_s3 + $0x1200] sm:$0xff]  ;;  %v5336_v31 = vld [vmem:[%s18019_s3 + $0x13a8] sm:$0xff]  ;;  %v18713_v8 = vcombine.low %v15177_v19, %v15180_v33  ;;  %v5289_v3 = vld [vmem:[%s18019_s3 + $0x1230] sm:$0xff] }
 0x30b   :  { %10207 = vmatpush3.bf16.msra.mxu0 %v10206_v17  ;;  %v10214_v17 = vpack.c.bf16 %v5234_v6, %v5233_v9  ;;  %v10250_v0 = vpack.c.bf16 %v5284_v39, %v5283_v24  ;;  %v18711_v9 = vcombine.low %v15032_v51, %v15038_v28  ;;  %v10284_v6 = vpack.c.bf16 %v5334_v54, %v5333_v42  ;;  %v5290_v23 = vld [vmem:[%s18019_s3 + $0x1238] sm:$0xff]  ;;  %v5307_v42 = vld [vmem:[%s18019_s3 + $0x12c0] sm:$0xff]  ;;  %v5308_v54 = vld [vmem:[%s18019_s3 + $0x12c8] sm:$0xff] }
 0x30c   :  { %10239 = vmatpush3.bf16.msra.mxu1 %v10238_v38  ;;  %10209 = vmatprep.subr.bf16.mxu0 %v10208_v15  ;;  %v16510_v38 = vadd.f32 %v7977_v12, %v7976_v29  ;;  %v10246_v15 = vpack.c.bf16 %v5266_v44, %v5265_v59  ;;  %v5335_v59 = vld [vmem:[%s18019_s3 + $0x13a0] sm:$0xff]  ;;  %v10254_v44 = vpack.c.bf16 %v5286_v57, %v5285_v60  ;;  %v5340_v60 = vld [vmem:[%s18019_s3 + $0x13c8] sm:$0xff] }
 0x30d   :  { %10241 = vmatprep.subr.bf16.mxu1 %v10240_v18  ;;  %v5301_v18 = vld [vmem:[%s18019_s3 + $0x1290] sm:$0xff]  ;;  %v10288_v12 = vpack.c.bf16 %v5336_v31, %v5335_v59  ;;  %v10258_v24 = vpack.c.bf16 %v5288_v5, %v5287_v4  ;;  %v10262_v57 = vpack.c.bf16 %v5290_v23, %v5289_v3  ;;  %v5310_v31 = vld [vmem:[%s18019_s3 + $0x12d8] sm:$0xff]  ;;  %v5296_v3 = vld [vmem:[%s18019_s3 + $0x1268] sm:$0xff] }
 0x30e   :  { %v10252_v52 = vpack.c.bf16 %v5302_v30, %v5301_v18  ;;  %v5321_v18 = vld [vmem:[%s18019_s3 + $0x1330] sm:$0xff]  ;;  %v5294_v5 = vld [vmem:[%s18019_s3 + $0x1258] sm:$0xff]  ;;  %v5327_v23 = vld [vmem:[%s18019_s3 + $0x1360] sm:$0xff] }
 0x30f   :  { %10211 = vmatpush3.bf16.msra.mxu0 %v10210_v58  ;;  %v5318_v58 = vld [vmem:[%s18019_s3 + $0x1318] sm:$0xff]  ;;  %v5309_v59 = vld [vmem:[%s18019_s3 + $0x12d0] sm:$0xff] }
 0x310   :  { %10243 = vmatpush3.bf16.msra.mxu1 %v10242_v27  ;;  %10213 = vmatprep.subr.bf16.mxu0 %v10212_v22  ;;  %v5303_v27 = vld [vmem:[%s18019_s3 + $0x12a0] sm:$0xff]  ;;  %v5304_v22 = vld [vmem:[%s18019_s3 + $0x12a8] sm:$0xff]  ;;  %v10286_v21 = vpack.c.bf16 %v5318_v58, %v5317_v47  ;;  %v5293_v4 = vld [vmem:[%s18019_s3 + $0x1250] sm:$0xff] }
 0x311   :  { %10245 = vmatprep.subr.bf16.mxu1 %v10244_v34  ;;  %v18712_v34 = vcombine.high %v15032_v51, %v15038_v28  ;;  %v10256_v29 = vpack.c.bf16 %v5304_v22, %v5303_v27  ;;  %v5319_v51 = vld [vmem:[%s18019_s3 + $0x1320] sm:$0xff]  ;;  %v18714_v28 = vcombine.high %v15177_v19, %v15180_v33  ;;  %v5337_v19 = vld [vmem:[%s18019_s3 + $0x13b0] sm:$0xff]  ;;  %v5338_v33 = vld [vmem:[%s18019_s3 + $0x13b8] sm:$0xff] }
 0x312   :  { %v10292_v30 = vpack.c.bf16 %v5338_v33, %v5337_v19  ;;  %v5291_v58 = vld [vmem:[%s18019_s3 + $0x1240] sm:$0xff]  ;;  %v5292_v27 = vld [vmem:[%s18019_s3 + $0x1248] sm:$0xff]  ;;  %v10270_v33 = vpack.c.bf16 %v5294_v5, %v5293_v4 }
 0x313   :  { %10215 = vmatpush3.bf16.msra.mxu0 %v10214_v17  ;;  %v5320_v17 = vld [vmem:[%s18019_s3 + $0x1328] sm:$0xff]  ;;  %v5323_v22 = vld [vmem:[%s18019_s3 + $0x1340] sm:$0xff] }
 0x314   :  { %10247 = vmatpush3.bf16.msra.mxu1 %v10246_v15  ;;  %10249 = vmatprep.subr.bf16.mxu0 %v10248_v25  ;;  %v5305_v15 = vld [vmem:[%s18019_s3 + $0x12b0] sm:$0xff]  ;;  %v5306_v25 = vld [vmem:[%s18019_s3 + $0x12b8] sm:$0xff]  ;;  %v10290_v39 = vpack.c.bf16 %v5320_v17, %v5319_v51  ;;  %v5311_v17 = vld [vmem:[%s18019_s3 + $0x12e0] sm:$0xff] }
 0x315   :  { %10281 = vmatprep.subr.bf16.mxu1 %v10280_v16  ;;  %v10260_v16 = vpack.c.bf16 %v5306_v25, %v5305_v15  ;;  %v5325_v51 = vld [vmem:[%s18019_s3 + $0x1350] sm:$0xff]  ;;  %v5312_v15 = vld [vmem:[%s18019_s3 + $0x12e8] sm:$0xff]  ;;  %v5343_v25 = vld [vmem:[%s18019_s3 + $0x13e0] sm:$0xff] }
 0x316   :  { %6916 = vmatmul.mubr.f32.vlgmr.msra.gmra.mrb[140].mxu0 %v18711_v9  ;;  %v5344_v19 = vld [vmem:[%s18019_s3 + $0x13e8] sm:$0xff] }
 0x317   :  { %6986 = vmatmul.mubr.f32.vlgmr.msra.gmra.mrb[148].mxu1 %v18712_v34  ;;  %10251 = vmatpush3.bf16.msra.mxu0 %v10250_v0  ;;  %v5322_v0 = vld [vmem:[%s18019_s3 + $0x1338] sm:$0xff]  ;;  %v5341_v34 = vld [vmem:[%s18019_s3 + $0x13d0] sm:$0xff]  ;;  %v5364_v4 = vld [vmem:[%s18019_s3 + $0x1488] sm:$0xff] }
 0x318   :  { %7055 = vmatprep.mubr.f32.mxu0 %v18713_v8  ;;  %10283 = vmatpush3.bf16.msra.mxu1 %v10282_v1  ;;  %v5339_v1 = vld [vmem:[%s18019_s3 + $0x13c0] sm:$0xff]  ;;  %v10294_v47 = vpack.c.bf16 %v5322_v0, %v5321_v18  ;;  %v10266_v8 = vpack.c.bf16 %v5292_v27, %v5291_v58  ;;  %v5328_v0 = vld [vmem:[%s18019_s3 + $0x1368] sm:$0xff] }
 0x319   :  { %7125 = vmatprep.mubr.f32.mxu1 %v18714_v28  ;;  %10253 = vmatprep.subr.bf16.mxu0 %v10252_v52  ;;  %v10264_v52 = vpack.c.bf16 %v5308_v54, %v5307_v42  ;;  %v10296_v9 = vpack.c.bf16 %v5340_v60, %v5339_v1  ;;  %v5313_v42 = vld [vmem:[%s18019_s3 + $0x12f0] sm:$0xff]  ;;  %v5314_v54 = vld [vmem:[%s18019_s3 + $0x12f8] sm:$0xff] }
 0x31a   :  { %10285 = vmatprep.subr.bf16.mxu1 %v10284_v6  ;;  %v5324_v6 = vld [vmem:[%s18019_s3 + $0x1348] sm:$0xff] }
 0x31b   :  { %10255 = vmatpush3.bf16.msra.mxu0 %v10254_v44  ;;  %v5342_v44 = vld [vmem:[%s18019_s3 + $0x13d8] sm:$0xff] }
 0x31c   :  { %10287 = vmatpush3.bf16.msra.mxu1 %v10286_v21  ;;  %10257 = vmatprep.subr.bf16.mxu0 %v10256_v29  ;;  %v10298_v21 = vpack.c.bf16 %v5324_v6, %v5323_v22  ;;  %v10268_v29 = vpack.c.bf16 %v5310_v31, %v5309_v59  ;;  %v10300_v28 = vpack.c.bf16 %v5342_v44, %v5341_v34  ;;  %v5297_v59 = vld [vmem:[%s18019_s3 + $0x1270] sm:$0xff]  ;;  %v5298_v31 = vld [vmem:[%s18019_s3 + $0x1278] sm:$0xff] }
 0x31d   :  { %10289 = vmatprep.subr.bf16.mxu1 %v10288_v12  ;;  %v5326_v12 = vld [vmem:[%s18019_s3 + $0x1358] sm:$0xff]  ;;  %v10276_v6 = vpack.c.bf16 %v5314_v54, %v5313_v42  ;;  %v5329_v34 = vld [vmem:[%s18019_s3 + $0x1370] sm:$0xff] }
 0x31e   :  { %v5349_v54 = vld [vmem:[%s18019_s3 + $0x1410] sm:$0xff] }
 0x31f   :  { %10259 = vmatpush3.bf16.msra.mxu0 %v10258_v24  ;;  %v10302_v24 = vpack.c.bf16 %v5326_v12, %v5325_v51  ;;  %v5395_v51 = vld [vmem:[%s18019_s3 + $0x1580] sm:$0xff] }
 0x320   :  { %10291 = vmatpush3.bf16.msra.mxu1 %v10290_v39  ;;  %10261 = vmatprep.subr.bf16.mxu0 %v10260_v16  ;;  %v10272_v39 = vpack.c.bf16 %v5312_v15, %v5311_v17  ;;  %v5295_v16 = vld [vmem:[%s18019_s3 + $0x1260] sm:$0xff]  ;;  %v10278_v17 = vpack.c.bf16 %v5298_v31, %v5297_v59  ;;  %v18716_v59 = vcombine.high %v15156_v13, %v15162_v11 }
 0x321   :  { %10293 = vmatprep.subr.bf16.mxu1 %v10292_v30  ;;  %v10304_v30 = vpack.c.bf16 %v5344_v19, %v5343_v25  ;;  %v10274_v27 = vpack.c.bf16 %v5296_v3, %v5295_v16  ;;  %v5380_v16 = vld [vmem:[%s18019_s3 + $0x1508] sm:$0xff]  ;;  %v5365_v3 = vld [vmem:[%s18019_s3 + $0x1490] sm:$0xff] }
 0x323   :  { %10263 = vmatpush3.bf16.msra.mxu0 %v10262_v57  ;;  %v5345_v57 = vld [vmem:[%s18019_s3 + $0x13f0] sm:$0xff] }
 0x324   :  { %10295 = vmatpush3.bf16.msra.mxu1 %v10294_v47  ;;  %10265 = vmatprep.subr.bf16.mxu0 %v10264_v52  ;;  %v5346_v47 = vld [vmem:[%s18019_s3 + $0x13f8] sm:$0xff] }
 0x325   :  { %10297 = vmatprep.subr.bf16.mxu1 %v10296_v9  ;;  %v10306_v9 = vpack.c.bf16 %v5328_v0, %v5327_v23  ;;  %v5366_v23 = vld [vmem:[%s18019_s3 + $0x1498] sm:$0xff] }
 0x326   :  { %v5398_v0 = vld [vmem:[%s18019_s3 + $0x1598] sm:$0xff] }
 0x327   :  { %10267 = vmatpush3.bf16.msra.mxu0 %v10266_v8  ;;  %v10308_v8 = vpack.c.bf16 %v5346_v47, %v5345_v57  ;;  %v10316_v57 = vpack.c.bf16 %v5366_v23, %v5365_v3  ;;  %v5382_v47 = vld [vmem:[%s18019_s3 + $0x1518] sm:$0xff]  ;;  %v5372_v3 = vld [vmem:[%s18019_s3 + $0x14c8] sm:$0xff]  ;;  %v5403_v23 = vld [vmem:[%s18019_s3 + $0x15c0] sm:$0xff] }
 0x328   :  { %10299 = vmatpush3.bf16.msra.mxu1 %v10298_v21  ;;  %10269 = vmatprep.subr.bf16.mxu0 %v10268_v29  ;;  %v8440_v18 = vpop.f32.mrb[128].mxu0  ;;  %v5330_v21 = vld [vmem:[%s18019_s3 + $0x1378] sm:$0xff]  ;;  %v5363_v29 = vld [vmem:[%s18019_s3 + $0x1480] sm:$0xff] }
 0x329   :  { %10301 = vmatprep.subr.bf16.mxu1 %v10300_v28  ;;  %v8441_v60 = vpop.f32.mrb[129].mxu0  ;;  %v5396_v28 = vld [vmem:[%s18019_s3 + $0x1588] sm:$0xff]  ;;  %v10310_v25 = vpack.c.bf16 %v5330_v21, %v5329_v34  ;;  %v10312_v19 = vpack.c.bf16 %v5364_v4, %v5363_v29  ;;  %v18717_v34 = vcombine.low %v15216_v48, %v15219_v45  ;;  %v5351_v21 = vld [vmem:[%s18019_s3 + $0x1420] sm:$0xff] }
 0x32a   :  { %v8475_v1 = vpop.f32.mrb[136].mxu1  ;;  %v8442_v52 = vadd.f32 %v8441_v60, %v8440_v18  ;;  %v5381_v60 = vld [vmem:[%s18019_s3 + $0x1510] sm:$0xff]  ;;  %v5352_v29 = vld [vmem:[%s18019_s3 + $0x1428] sm:$0xff] }
 0x32b   :  { %v8476_v58 = vpop.f32.mrb[137].mxu1  ;;  %10271 = vmatpush3.bf16.msra.mxu0 %v10270_v33  ;;  %v5348_v33 = vld [vmem:[%s18019_s3 + $0x1408] sm:$0xff] }
 0x32c   :  { %v8477_v22 = vadd.f32 %v8476_v58, %v8475_v1  ;;  %10303 = vmatpush3.bf16.msra.mxu1 %v10302_v24  ;;  %10273 = vmatprep.subr.bf16.mxu0 %v10272_v39  ;;  %v7979_v44 = vsel %vm7971_vm1, %v8442_v52, 0.0  ;;  %v10344_v24 = vpack.c.bf16 %v5396_v28, %v5395_v51  ;;  %v5379_v39 = vld [vmem:[%s18019_s3 + $0x1500] sm:$0xff]  ;;  %v5350_v1 = vld [vmem:[%s18019_s3 + $0x1418] sm:$0xff]  ;;  %v5368_v58 = vld [vmem:[%s18019_s3 + $0x14a8] sm:$0xff] }
 0x32d   :  { %10305 = vmatprep.subr.bf16.mxu1 %v10304_v30  ;;  %v7980_v5 = vadd.f32 %v7979_v44, %v16510_v38  ;;  %v5347_v38 = vld [vmem:[%s18019_s3 + $0x1400] sm:$0xff]  ;;  %v5397_v30 = vld [vmem:[%s18019_s3 + $0x1590] sm:$0xff]  ;;  %v10346_v42 = vpack.c.bf16 %v5380_v16, %v5379_v39  ;;  %v10318_v31 = vpack.c.bf16 %v5350_v1, %v5349_v54  ;;  %v10350_v44 = vpack.c.bf16 %v5382_v47, %v5381_v60  ;;  %v5370_v28 = vld [vmem:[%s18019_s3 + $0x14b8] sm:$0xff] }
 0x32e   :  { %v7981_v12 = vsel %vm7971_vm1, %v8477_v22, 0.0  ;;  %v10314_v18 = vpack.c.bf16 %v5348_v33, %v5347_v38  ;;  %v5367_v52 = vld [vmem:[%s18019_s3 + $0x14a0] sm:$0xff]  ;;  %v10348_v22 = vpack.c.bf16 %v5398_v0, %v5397_v30  ;;  %v5369_v51 = vld [vmem:[%s18019_s3 + $0x14b0] sm:$0xff]  ;;  %v5354_v38 = vld [vmem:[%s18019_s3 + $0x1438] sm:$0xff] }
 0x32f   :  { %10275 = vmatpush3.bf16.msra.mxu0 %v10274_v27  ;;  %v16719_v15 = vadd.f32 %v7981_v12, %v7980_v5  ;;  %v18715_v27 = vcombine.low %v15156_v13, %v15162_v11  ;;  %v5383_v13 = vld [vmem:[%s18019_s3 + $0x1520] sm:$0xff]  ;;  %v18718_v11 = vcombine.high %v15216_v48, %v15219_v45  ;;  %v5384_v5 = vld [vmem:[%s18019_s3 + $0x1528] sm:$0xff]  ;;  %v5401_v48 = vld [vmem:[%s18019_s3 + $0x15b0] sm:$0xff]  ;;  %v10322_v12 = vpack.c.bf16 %v5352_v29, %v5351_v21 }
 0x330   :  { %10307 = vmatpush3.bf16.msra.mxu1 %v10306_v9  ;;  %10277 = vmatprep.subr.bf16.mxu0 %v10276_v6  ;;  %v5399_v9 = vld [vmem:[%s18019_s3 + $0x15a0] sm:$0xff]  ;;  %v5400_v6 = vld [vmem:[%s18019_s3 + $0x15a8] sm:$0xff]  ;;  %v5402_v45 = vld [vmem:[%s18019_s3 + $0x15b8] sm:$0xff] }
 0x331   :  { %10309 = vmatprep.subr.bf16.mxu1 %v10308_v8  ;;  %v10320_v8 = vpack.c.bf16 %v5368_v58, %v5367_v52  ;;  %v10352_v4 = vpack.c.bf16 %v5400_v6, %v5399_v9  ;;  %v5385_v33 = vld [vmem:[%s18019_s3 + $0x1530] sm:$0xff]  ;;  %v5386_v39 = vld [vmem:[%s18019_s3 + $0x1538] sm:$0xff]  ;;  %v5371_v16 = vld [vmem:[%s18019_s3 + $0x14c0] sm:$0xff] }
 0x332   :  { %v10358_v0 = vpack.c.bf16 %v5386_v39, %v5385_v33  ;;  %v5355_v54 = vld [vmem:[%s18019_s3 + $0x1440] sm:$0xff]  ;;  %v5356_v1 = vld [vmem:[%s18019_s3 + $0x1448] sm:$0xff]  ;;  %v5373_v52 = vld [vmem:[%s18019_s3 + $0x14d0] sm:$0xff] }
 0x333   :  { %10279 = vmatpush3.bf16.msra.mxu0 %v10278_v17  ;;  %v10354_v17 = vpack.c.bf16 %v5384_v5, %v5383_v13  ;;  %v5387_v60 = vld [vmem:[%s18019_s3 + $0x1540] sm:$0xff]  ;;  %v5388_v47 = vld [vmem:[%s18019_s3 + $0x1548] sm:$0xff]  ;;  %v5374_v58 = vld [vmem:[%s18019_s3 + $0x14d8] sm:$0xff]  ;;  %v10330_v9 = vpack.c.bf16 %v5356_v1, %v5355_v54 }
 0x334   :  { %10311 = vmatpush3.bf16.msra.mxu1 %v10310_v25  ;;  %10313 = vmatprep.subr.bf16.mxu0 %v10312_v19  ;;  %v10324_v25 = vpack.c.bf16 %v5370_v28, %v5369_v51  ;;  %v5353_v19 = vld [vmem:[%s18019_s3 + $0x1430] sm:$0xff]  ;;  %v10362_v6 = vpack.c.bf16 %v5388_v47, %v5387_v60  ;;  %v5390_v21 = vld [vmem:[%s18019_s3 + $0x1558] sm:$0xff]  ;;  %v5375_v29 = vld [vmem:[%s18019_s3 + $0x14e0] sm:$0xff] }
 0x335   :  { %10345 = vmatprep.subr.bf16.mxu1 %v10344_v24  ;;  %v10356_v24 = vpack.c.bf16 %v5402_v45, %v5401_v48  ;;  %v10326_v30 = vpack.c.bf16 %v5354_v38, %v5353_v19  ;;  %v5376_v13 = vld [vmem:[%s18019_s3 + $0x14e8] sm:$0xff]  ;;  %v5359_v48 = vld [vmem:[%s18019_s3 + $0x1460] sm:$0xff]  ;;  %v5377_v38 = vld [vmem:[%s18019_s3 + $0x14f0] sm:$0xff] }
 0x336   :  { %7056 = vmatmul.mubr.f32.vlgmr.msra.gmra.mrb[142].mxu0 %v18715_v27  ;;  %v5405_v27 = vld [vmem:[%s18019_s3 + $0x15d0] sm:$0xff]  ;;  %v10336_v28 = vpack.c.bf16 %v5376_v13, %v5375_v29  ;;  %v5360_v45 = vld [vmem:[%s18019_s3 + $0x1468] sm:$0xff]  ;;  %v5378_v33 = vld [vmem:[%s18019_s3 + $0x14f8] sm:$0xff] }
 0x337   :  { %7126 = vmatmul.mubr.f32.vlgmr.msra.gmra.mrb[150].mxu1 %v18716_v59  ;;  %10315 = vmatpush3.bf16.msra.mxu0 %v10314_v18  ;;  %v5404_v18 = vld [vmem:[%s18019_s3 + $0x15c8] sm:$0xff]  ;;  %v10332_v59 = vpack.c.bf16 %v5374_v58, %v5373_v52  ;;  %v10340_v54 = vpack.c.bf16 %v5378_v33, %v5377_v38  ;;  %v5361_v1 = vld [vmem:[%s18019_s3 + $0x1470] sm:$0xff]  ;;  %v5362_v60 = vld [vmem:[%s18019_s3 + $0x1478] sm:$0xff] }
 0x338   :  { %7195 = vmatprep.mubr.f32.mxu0 %v18717_v34  ;;  %10347 = vmatpush3.bf16.msra.mxu1 %v10346_v42  ;;  %v10328_v42 = vpack.c.bf16 %v5372_v3, %v5371_v16  ;;  %v5358_v34 = vld [vmem:[%s18019_s3 + $0x1458] sm:$0xff]  ;;  %v5392_v19 = vld [vmem:[%s18019_s3 + $0x1568] sm:$0xff]  ;;  %v5409_v16 = vld [vmem:[%s18019_s3 + $0x15f0] sm:$0xff] }
 0x339   :  { %7265 = vmatprep.mubr.f32.mxu1 %v18718_v11  ;;  %10317 = vmatprep.subr.bf16.mxu0 %v10316_v57  ;;  %v10360_v57 = vpack.c.bf16 %v5404_v18, %v5403_v23  ;;  %v5407_v11 = vld [vmem:[%s18019_s3 + $0x15e0] sm:$0xff]  ;;  %v5410_v3 = vld [vmem:[%s18019_s3 + $0x15f8] sm:$0xff]  ;;  %v5412_v29 = vld [vmem:[%s18019_s3 + $0x1608] sm:$0xff] }
 0x33a   :  { %10349 = vmatprep.subr.bf16.mxu1 %v10348_v22  ;;  %v5406_v22 = vld [vmem:[%s18019_s3 + $0x15d8] sm:$0xff]  ;;  %v10372_v52 = vpack.c.bf16 %v5410_v3, %v5409_v16  ;;  %v18719_v16 = vcombine.low %v15235_v20, %v15241_v37 }
 0x33b   :  { %10319 = vmatpush3.bf16.msra.mxu0 %v10318_v31  ;;  %v5357_v31 = vld [vmem:[%s18019_s3 + $0x1450] sm:$0xff]  ;;  %v5394_v58 = vld [vmem:[%s18019_s3 + $0x1578] sm:$0xff] }
 0x33c   :  { %10351 = vmatpush3.bf16.msra.mxu1 %v10350_v44  ;;  %10321 = vmatprep.subr.bf16.mxu0 %v10320_v8  ;;  %v5389_v44 = vld [vmem:[%s18019_s3 + $0x1550] sm:$0xff]  ;;  %v10364_v8 = vpack.c.bf16 %v5406_v22, %v5405_v27  ;;  %v10334_v5 = vpack.c.bf16 %v5358_v34, %v5357_v31  ;;  %v5427_v27 = vld [vmem:[%s18019_s3 + $0x1680] sm:$0xff]  ;;  %v5428_v22 = vld [vmem:[%s18019_s3 + $0x1688] sm:$0xff]  ;;  %v10342_v34 = vpack.c.bf16 %v5362_v60, %v5361_v1 }
 0x33d   :  { %10353 = vmatprep.subr.bf16.mxu1 %v10352_v4  ;;  %v5408_v4 = vld [vmem:[%s18019_s3 + $0x15e8] sm:$0xff]  ;;  %v10366_v51 = vpack.c.bf16 %v5390_v21, %v5389_v44  ;;  %v10376_v21 = vpack.c.bf16 %v5428_v22, %v5427_v27  ;;  %v5446_v33 = vld [vmem:[%s18019_s3 + $0x1718] sm:$0xff]  ;;  %v5415_v60 = vld [vmem:[%s18019_s3 + $0x1620] sm:$0xff] }
 0x33e   :  { %v5434_v27 = vld [vmem:[%s18019_s3 + $0x16b8] sm:$0xff] }
 0x33f   :  { %10323 = vmatpush3.bf16.msra.mxu0 %v10322_v12  ;;  %v5391_v12 = vld [vmem:[%s18019_s3 + $0x1560] sm:$0xff] }
 0x340   :  { %10355 = vmatpush3.bf16.msra.mxu1 %v10354_v17  ;;  %10325 = vmatprep.subr.bf16.mxu0 %v10324_v25  ;;  %v10368_v25 = vpack.c.bf16 %v5408_v4, %v5407_v11  ;;  %v5443_v11 = vld [vmem:[%s18019_s3 + $0x1700] sm:$0xff]  ;;  %v5444_v4 = vld [vmem:[%s18019_s3 + $0x1708] sm:$0xff] }
 0x341   :  { %10357 = vmatprep.subr.bf16.mxu1 %v10356_v24 }
 0x343   :  { %10327 = vmatpush3.bf16.msra.mxu0 %v10326_v30  ;;  %v10338_v30 = vpack.c.bf16 %v5360_v45, %v5359_v48  ;;  %v5461_v48 = vld [vmem:[%s18019_s3 + $0x1790] sm:$0xff]  ;;  %v5462_v45 = vld [vmem:[%s18019_s3 + $0x1798] sm:$0xff] }
 0x344   :  { %10359 = vmatpush3.bf16.msra.mxu1 %v10358_v0  ;;  %10329 = vmatprep.subr.bf16.mxu0 %v10328_v42  ;;  %v10370_v42 = vpack.c.bf16 %v5392_v19, %v5391_v12  ;;  %v10410_v12 = vpack.c.bf16 %v5444_v4, %v5443_v11  ;;  %v5445_v19 = vld [vmem:[%s18019_s3 + $0x1710] sm:$0xff]  ;;  %v10412_v3 = vpack.c.bf16 %v5462_v45, %v5461_v48  ;;  %v5468_v11 = vld [vmem:[%s18019_s3 + $0x17c8] sm:$0xff]  ;;  %v5451_v45 = vld [vmem:[%s18019_s3 + $0x1740] sm:$0xff] }
 0x345   :  { %10361 = vmatprep.subr.bf16.mxu1 %v10360_v57  ;;  %v5393_v57 = vld [vmem:[%s18019_s3 + $0x1570] sm:$0xff]  ;;  %v5420_v48 = vld [vmem:[%s18019_s3 + $0x1648] sm:$0xff] }
 0x347   :  { %10331 = vmatpush3.bf16.msra.mxu0 %v10330_v9 }
 0x348   :  { %10363 = vmatpush3.bf16.msra.mxu1 %v10362_v6  ;;  %10333 = vmatprep.subr.bf16.mxu0 %v10332_v59  ;;  %v5459_v6 = vld [vmem:[%s18019_s3 + $0x1780] sm:$0xff]  ;;  %v5460_v59 = vld [vmem:[%s18019_s3 + $0x1788] sm:$0xff] }
 0x349   :  { %v8510_v17 = vpop.f32.mrb[130].mxu0  ;;  %10365 = vmatprep.subr.bf16.mxu1 %v10364_v8  ;;  %v10374_v8 = vpack.c.bf16 %v5394_v58, %v5393_v57  ;;  %v10408_v13 = vpack.c.bf16 %v5460_v59, %v5459_v6  ;;  %v5416_v57 = vld [vmem:[%s18019_s3 + $0x1628] sm:$0xff]  ;;  %v5433_v58 = vld [vmem:[%s18019_s3 + $0x16b0] sm:$0xff] }
 0x34a   :  { %v8545_v24 = vpop.f32.mrb[138].mxu1  ;;  %v8511_v39 = vpop.f32.mrb[131].mxu0  ;;  %v10386_v22 = vpack.c.bf16 %v5416_v57, %v5415_v60  ;;  %v10388_v6 = vpack.c.bf16 %v5434_v27, %v5433_v58  ;;  %v5417_v59 = vld [vmem:[%s18019_s3 + $0x1630] sm:$0xff]  ;;  %v5472_v60 = vld [vmem:[%s18019_s3 + $0x17e8] sm:$0xff]  ;;  %v5455_v58 = vld [vmem:[%s18019_s3 + $0x1760] sm:$0xff] }
 0x34b   :  { %v8512_v23 = vadd.f32 %v8511_v39, %v8510_v17  ;;  %v8546_v18 = vpop.f32.mrb[139].mxu1  ;;  %10335 = vmatpush3.bf16.msra.mxu0 %v10334_v5  ;;  %v5429_v5 = vld [vmem:[%s18019_s3 + $0x1690] sm:$0xff]  ;;  %v5432_v39 = vld [vmem:[%s18019_s3 + $0x16a8] sm:$0xff] }
 0x34c   :  { %v8547_v0 = vadd.f32 %v8546_v18, %v8545_v24  ;;  %10367 = vmatpush3.bf16.msra.mxu1 %v10366_v51  ;;  %10337 = vmatprep.subr.bf16.mxu0 %v10336_v28  ;;  %v5430_v51 = vld [vmem:[%s18019_s3 + $0x1698] sm:$0xff]  ;;  %v5413_v17 = vld [vmem:[%s18019_s3 + $0x1610] sm:$0xff]  ;;  %v5431_v24 = vld [vmem:[%s18019_s3 + $0x16a0] sm:$0xff] }
 0x34d   :  { %v7983_v47 = vsel %vm7971_vm1, %v8512_v23, 0.0  ;;  %10369 = vmatprep.subr.bf16.mxu1 %v10368_v25  ;;  %v5414_v25 = vld [vmem:[%s18019_s3 + $0x1618] sm:$0xff]  ;;  %v10380_v38 = vpack.c.bf16 %v5430_v51, %v5429_v5  ;;  %v5463_v23 = vld [vmem:[%s18019_s3 + $0x17a0] sm:$0xff]  ;;  %v5464_v18 = vld [vmem:[%s18019_s3 + $0x17a8] sm:$0xff]  ;;  %v10384_v1 = vpack.c.bf16 %v5432_v39, %v5431_v24 }
 0x34e   :  { %v7984_v9 = vadd.f32 %v7983_v47, %v16719_v15  ;;  %v7985_v31 = vsel %vm7971_vm1, %v8547_v0, 0.0  ;;  %v5411_v15 = vld [vmem:[%s18019_s3 + $0x1600] sm:$0xff]  ;;  %v10382_v0 = vpack.c.bf16 %v5414_v25, %v5413_v17  ;;  %v10416_v47 = vpack.c.bf16 %v5464_v18, %v5463_v23  ;;  %v5452_v17 = vld [vmem:[%s18019_s3 + $0x1748] sm:$0xff]  ;;  %v5437_v25 = vld [vmem:[%s18019_s3 + $0x16d0] sm:$0xff] }
 0x34f   :  { %10339 = vmatpush3.bf16.msra.mxu0 %v10338_v30  ;;  %v10378_v28 = vpack.c.bf16 %v5412_v29, %v5411_v15  ;;  %v18720_v30 = vcombine.high %v15235_v20, %v15241_v37  ;;  %v5447_v20 = vld [vmem:[%s18019_s3 + $0x1720] sm:$0xff]  ;;  %v18722_v37 = vcombine.high %v15276_v61, %v15279_v10  ;;  %v5436_v29 = vld [vmem:[%s18019_s3 + $0x16c8] sm:$0xff]  ;;  %v10426_v39 = vpack.c.bf16 %v5452_v17, %v5451_v45  ;;  %v5422_v23 = vld [vmem:[%s18019_s3 + $0x1658] sm:$0xff] }
 0x350   :  { %v16928_v44 = vadd.f32 %v7985_v31, %v7984_v9  ;;  %10371 = vmatpush3.bf16.msra.mxu1 %v10370_v42  ;;  %10341 = vmatprep.subr.bf16.mxu0 %v10340_v54  ;;  %v18721_v42 = vcombine.low %v15276_v61, %v15279_v10  ;;  %v10414_v54 = vpack.c.bf16 %v5446_v33, %v5445_v19  ;;  %v5465_v61 = vld [vmem:[%s18019_s3 + $0x17b0] sm:$0xff]  ;;  %v5466_v10 = vld [vmem:[%s18019_s3 + $0x17b8] sm:$0xff]  ;;  %v5435_v15 = vld [vmem:[%s18019_s3 + $0x16c0] sm:$0xff] }
 0x351   :  { %10373 = vmatprep.subr.bf16.mxu1 %v10372_v52  ;;  %v5448_v52 = vld [vmem:[%s18019_s3 + $0x1728] sm:$0xff]  ;;  %v5418_v31 = vld [vmem:[%s18019_s3 + $0x1638] sm:$0xff]  ;;  %v10392_v51 = vpack.c.bf16 %v5436_v29, %v5435_v15  ;;  %v5453_v18 = vld [vmem:[%s18019_s3 + $0x1750] sm:$0xff] }
 0x352   :  { %v10418_v9 = vpack.c.bf16 %v5448_v52, %v5447_v20  ;;  %v10390_v4 = vpack.c.bf16 %v5418_v31, %v5417_v59  ;;  %v5438_v19 = vld [vmem:[%s18019_s3 + $0x16d8] sm:$0xff]  ;;  %v5424_v52 = vld [vmem:[%s18019_s3 + $0x1668] sm:$0xff]  ;;  %v5473_v31 = vld [vmem:[%s18019_s3 + $0x17f0] sm:$0xff] }
 0x353   :  { %10343 = vmatpush3.bf16.msra.mxu0 %v10342_v34  ;;  %v5449_v34 = vld [vmem:[%s18019_s3 + $0x1730] sm:$0xff]  ;;  %v5470_v33 = vld [vmem:[%s18019_s3 + $0x17d8] sm:$0xff]  ;;  %v5492_v17 = vld [vmem:[%s18019_s3 + $0x1888] sm:$0xff] }
 0x354   :  { %10375 = vmatpush3.bf16.msra.mxu1 %v10374_v8  ;;  %10377 = vmatprep.subr.bf16.mxu0 %v10376_v21  ;;  %v10420_v8 = vpack.c.bf16 %v5466_v10, %v5465_v61  ;;  %v5450_v21 = vld [vmem:[%s18019_s3 + $0x1738] sm:$0xff]  ;;  %v5456_v10 = vld [vmem:[%s18019_s3 + $0x1768] sm:$0xff] }
 0x355   :  { %10409 = vmatprep.subr.bf16.mxu1 %v10408_v13  ;;  %v5467_v13 = vld [vmem:[%s18019_s3 + $0x17c0] sm:$0xff]  ;;  %v10422_v5 = vpack.c.bf16 %v5450_v21, %v5449_v34  ;;  %v5474_v34 = vld [vmem:[%s18019_s3 + $0x17f8] sm:$0xff] }
 0x356   :  { %7196 = vmatmul.mubr.f32.vlgmr.msra.gmra.mrb[144].mxu0 %v18719_v16  ;;  %v10396_v16 = vpack.c.bf16 %v5438_v19, %v5437_v25  ;;  %v5458_v45 = vld [vmem:[%s18019_s3 + $0x1778] sm:$0xff]  ;;  %v5523_v19 = vld [vmem:[%s18019_s3 + $0x1980] sm:$0xff] }
 0x357   :  { %7266 = vmatmul.mubr.f32.vlgmr.msra.gmra.mrb[152].mxu1 %v18720_v30  ;;  %10379 = vmatpush3.bf16.msra.mxu0 %v10378_v28  ;;  %v5419_v28 = vld [vmem:[%s18019_s3 + $0x1640] sm:$0xff] }
 0x358   :  { %7335 = vmatprep.mubr.f32.mxu0 %v18721_v42  ;;  %10411 = vmatpush3.bf16.msra.mxu1 %v10410_v12  ;;  %v10424_v12 = vpack.c.bf16 %v5468_v11, %v5467_v13  ;;  %v10394_v24 = vpack.c.bf16 %v5420_v48, %v5419_v28  ;;  %v5439_v42 = vld [vmem:[%s18019_s3 + $0x16e0] sm:$0xff]  ;;  %v10434_v13 = vpack.c.bf16 %v5456_v10, %v5455_v58  ;;  %v5496_v10 = vld [vmem:[%s18019_s3 + $0x18a8] sm:$0xff] }
 0x359   :  { %7405 = vmatprep.mubr.f32.mxu1 %v18722_v37  ;;  %10381 = vmatprep.subr.bf16.mxu0 %v10380_v38  ;;  %v5469_v38 = vld [vmem:[%s18019_s3 + $0x17d0] sm:$0xff]  ;;  %v10436_v48 = vpack.c.bf16 %v5474_v34, %v5473_v31  ;;  %v18724_v31 = vcombine.high %v15297_v35, %v15303_v7 }
 0x35a   :  { %10413 = vmatprep.subr.bf16.mxu1 %v10412_v3  ;;  %v5421_v3 = vld [vmem:[%s18019_s3 + $0x1650] sm:$0xff]  ;;  %v10428_v30 = vpack.c.bf16 %v5470_v33, %v5469_v38  ;;  %v5524_v38 = vld [vmem:[%s18019_s3 + $0x1988] sm:$0xff] }
 0x35b   :  { %10383 = vmatpush3.bf16.msra.mxu0 %v10382_v0  ;;  %v5454_v0 = vld [vmem:[%s18019_s3 + $0x1758] sm:$0xff]  ;;  %v10398_v57 = vpack.c.bf16 %v5422_v23, %v5421_v3  ;;  %v5476_v23 = vld [vmem:[%s18019_s3 + $0x1808] sm:$0xff] }
 0x35c   :  { %10415 = vmatpush3.bf16.msra.mxu1 %v10414_v54  ;;  %10385 = vmatprep.subr.bf16.mxu0 %v10384_v1  ;;  %v5440_v54 = vld [vmem:[%s18019_s3 + $0x16e8] sm:$0xff]  ;;  %v5471_v1 = vld [vmem:[%s18019_s3 + $0x17e0] sm:$0xff]  ;;  %v10430_v20 = vpack.c.bf16 %v5454_v0, %v5453_v18  ;;  %v10472_v18 = vpack.c.bf16 %v5524_v38, %v5523_v19  ;;  %v5514_v38 = vld [vmem:[%s18019_s3 + $0x1938] sm:$0xff] }
 0x35d   :  { %10417 = vmatprep.subr.bf16.mxu1 %v10416_v47  ;;  %v10400_v37 = vpack.c.bf16 %v5440_v54, %v5439_v42  ;;  %v5423_v47 = vld [vmem:[%s18019_s3 + $0x1660] sm:$0xff]  ;;  %v10432_v61 = vpack.c.bf16 %v5472_v60, %v5471_v1  ;;  %v5508_v0 = vld [vmem:[%s18019_s3 + $0x1908] sm:$0xff]  ;;  %v5493_v42 = vld [vmem:[%s18019_s3 + $0x1890] sm:$0xff] }
 0x35e   :  { %v10402_v15 = vpack.c.bf16 %v5424_v52, %v5423_v47  ;;  %v5494_v54 = vld [vmem:[%s18019_s3 + $0x1898] sm:$0xff]  ;;  %v5525_v60 = vld [vmem:[%s18019_s3 + $0x1990] sm:$0xff] }
 0x35f   :  { %10387 = vmatpush3.bf16.msra.mxu0 %v10386_v22  ;;  %v5441_v22 = vld [vmem:[%s18019_s3 + $0x16f0] sm:$0xff]  ;;  %v5478_v47 = vld [vmem:[%s18019_s3 + $0x1818] sm:$0xff]  ;;  %v10444_v58 = vpack.c.bf16 %v5494_v54, %v5493_v42  ;;  %v5515_v42 = vld [vmem:[%s18019_s3 + $0x1940] sm:$0xff] }
 0x360   :  { %10419 = vmatpush3.bf16.msra.mxu1 %v10418_v9  ;;  %10389 = vmatprep.subr.bf16.mxu0 %v10388_v6  ;;  %v5442_v9 = vld [vmem:[%s18019_s3 + $0x16f8] sm:$0xff]  ;;  %v5509_v52 = vld [vmem:[%s18019_s3 + $0x1910] sm:$0xff] }
 0x361   :  { %10421 = vmatprep.subr.bf16.mxu1 %v10420_v8  ;;  %v10404_v11 = vpack.c.bf16 %v5442_v9, %v5441_v22  ;;  %v18723_v22 = vcombine.low %v15297_v35, %v15303_v7  ;;  %v5511_v35 = vld [vmem:[%s18019_s3 + $0x1920] sm:$0xff]  ;;  %v18726_v7 = vcombine.high %v15360_v32, %v15363_v56 }
 0x363   :  { %10391 = vmatpush3.bf16.msra.mxu0 %v10390_v4  ;;  %v5425_v4 = vld [vmem:[%s18019_s3 + $0x1670] sm:$0xff] }
 0x364   :  { %10423 = vmatpush3.bf16.msra.mxu1 %v10422_v5  ;;  %10393 = vmatprep.subr.bf16.mxu0 %v10392_v51  ;;  %v5426_v5 = vld [vmem:[%s18019_s3 + $0x1678] sm:$0xff]  ;;  %v5457_v51 = vld [vmem:[%s18019_s3 + $0x1770] sm:$0xff] }
 0x365   :  { %10425 = vmatprep.subr.bf16.mxu1 %v10424_v12  ;;  %v5491_v12 = vld [vmem:[%s18019_s3 + $0x1880] sm:$0xff] }
 0x366   :  { %v10440_v3 = vpack.c.bf16 %v5492_v17, %v5491_v12  ;;  %v5481_v12 = vld [vmem:[%s18019_s3 + $0x1830] sm:$0xff]  ;;  %v5482_v17 = vld [vmem:[%s18019_s3 + $0x1838] sm:$0xff] }
 0x367   :  { %10395 = vmatpush3.bf16.msra.mxu0 %v10394_v24  ;;  %v10406_v24 = vpack.c.bf16 %v5426_v5, %v5425_v4  ;;  %v5512_v4 = vld [vmem:[%s18019_s3 + $0x1928] sm:$0xff]  ;;  %v5497_v5 = vld [vmem:[%s18019_s3 + $0x18b0] sm:$0xff] }
 0x368   :  { %10427 = vmatpush3.bf16.msra.mxu1 %v10426_v39  ;;  %10397 = vmatprep.subr.bf16.mxu0 %v10396_v16  ;;  %v10438_v16 = vpack.c.bf16 %v5458_v45, %v5457_v51  ;;  %v5498_v51 = vld [vmem:[%s18019_s3 + $0x18b8] sm:$0xff] }
 0x369   :  { %v8580_v27 = vpop.f32.mrb[132].mxu0  ;;  %10429 = vmatprep.subr.bf16.mxu1 %v10428_v30  ;;  %v5507_v30 = vld [vmem:[%s18019_s3 + $0x1900] sm:$0xff]  ;;  %v10452_v45 = vpack.c.bf16 %v5498_v51, %v5497_v5  ;;  %v5505_v5 = vld [vmem:[%s18019_s3 + $0x18f0] sm:$0xff]  ;;  %v5506_v51 = vld [vmem:[%s18019_s3 + $0x18f8] sm:$0xff] }
 0x36a   :  { %v8615_v6 = vpop.f32.mrb[140].mxu1  ;;  %v8581_v59 = vpop.f32.mrb[133].mxu0 }
 0x36b   :  { %v8582_v8 = vadd.f32 %v8581_v59, %v8580_v27  ;;  %v8616_v21 = vpop.f32.mrb[141].mxu1  ;;  %10399 = vmatpush3.bf16.msra.mxu0 %v10398_v57  ;;  %v5526_v57 = vld [vmem:[%s18019_s3 + $0x1998] sm:$0xff]  ;;  %v5528_v59 = vld [vmem:[%s18019_s3 + $0x19a8] sm:$0xff] }
 0x36c   :  { %v8617_v29 = vadd.f32 %v8616_v21, %v8615_v6  ;;  %10431 = vmatpush3.bf16.msra.mxu1 %v10430_v20  ;;  %10401 = vmatprep.subr.bf16.mxu0 %v10400_v37  ;;  %v10474_v20 = vpack.c.bf16 %v5508_v0, %v5507_v30  ;;  %v5477_v37 = vld [vmem:[%s18019_s3 + $0x1810] sm:$0xff]  ;;  %v5510_v27 = vld [vmem:[%s18019_s3 + $0x1918] sm:$0xff]  ;;  %v10476_v9 = vpack.c.bf16 %v5526_v57, %v5525_v60  ;;  %v5527_v6 = vld [vmem:[%s18019_s3 + $0x19a0] sm:$0xff] }
 0x36d   :  { %v7987_v28 = vsel %vm7971_vm1, %v8582_v8, 0.0  ;;  %10433 = vmatprep.subr.bf16.mxu1 %v10432_v61  ;;  %v5495_v61 = vld [vmem:[%s18019_s3 + $0x18a0] sm:$0xff]  ;;  %v10446_v34 = vpack.c.bf16 %v5478_v47, %v5477_v37  ;;  %v18725_v8 = vcombine.low %v15360_v32, %v15363_v56  ;;  %v10478_v21 = vpack.c.bf16 %v5510_v27, %v5509_v52  ;;  %v5529_v32 = vld [vmem:[%s18019_s3 + $0x19b0] sm:$0xff]  ;;  %v5530_v56 = vld [vmem:[%s18019_s3 + $0x19b8] sm:$0xff] }
 0x36e   :  { %v7988_v25 = vadd.f32 %v7987_v28, %v16928_v44  ;;  %v7989_v33 = vsel %vm7971_vm1, %v8617_v29, 0.0  ;;  %v5475_v44 = vld [vmem:[%s18019_s3 + $0x1800] sm:$0xff]  ;;  %v10484_v19 = vpack.c.bf16 %v5530_v56, %v5529_v32  ;;  %v5484_v0 = vld [vmem:[%s18019_s3 + $0x1848] sm:$0xff]  ;;  %v5501_v60 = vld [vmem:[%s18019_s3 + $0x18d0] sm:$0xff] }
 0x36f   :  { %10403 = vmatpush3.bf16.msra.mxu0 %v10402_v15  ;;  %v10442_v1 = vpack.c.bf16 %v5476_v23, %v5475_v44  ;;  %v10448_v15 = vpack.c.bf16 %v5496_v10, %v5495_v61  ;;  %v5479_v29 = vld [vmem:[%s18019_s3 + $0x1820] sm:$0xff]  ;;  %v10454_v44 = vpack.c.bf16 %v5482_v17, %v5481_v12  ;;  %v5502_v57 = vld [vmem:[%s18019_s3 + $0x18d8] sm:$0xff]  ;;  %v5485_v27 = vld [vmem:[%s18019_s3 + $0x1850] sm:$0xff] }
 0x370   :  { %v17137_v39 = vadd.f32 %v7989_v33, %v7988_v25  ;;  %10435 = vmatpush3.bf16.msra.mxu1 %v10434_v13  ;;  %10405 = vmatprep.subr.bf16.mxu0 %v10404_v11  ;;  %v5480_v13 = vld [vmem:[%s18019_s3 + $0x1828] sm:$0xff]  ;;  %v10480_v11 = vpack.c.bf16 %v5528_v59, %v5527_v6  ;;  %v5513_v25 = vld [vmem:[%s18019_s3 + $0x1930] sm:$0xff]  ;;  %v5499_v33 = vld [vmem:[%s18019_s3 + $0x18c0] sm:$0xff] }
 0x371   :  { %10437 = vmatprep.subr.bf16.mxu1 %v10436_v48  ;;  %v10450_v28 = vpack.c.bf16 %v5480_v13, %v5479_v29  ;;  %v10482_v48 = vpack.c.bf16 %v5512_v4, %v5511_v35  ;;  %v10486_v23 = vpack.c.bf16 %v5514_v38, %v5513_v25  ;;  %v5483_v30 = vld [vmem:[%s18019_s3 + $0x1840] sm:$0xff]  ;;  %v5534_v37 = vld [vmem:[%s18019_s3 + $0x19d8] sm:$0xff]  ;;  %v5517_v10 = vld [vmem:[%s18019_s3 + $0x1950] sm:$0xff]  ;;  %v10468_v38 = vpack.c.bf16 %v5506_v51, %v5505_v5 }
 0x372   :  { %v10458_v47 = vpack.c.bf16 %v5484_v0, %v5483_v30  ;;  %v5486_v61 = vld [vmem:[%s18019_s3 + $0x1858] sm:$0xff]  ;;  %v5503_v6 = vld [vmem:[%s18019_s3 + $0x18e0] sm:$0xff]  ;;  %v5504_v59 = vld [vmem:[%s18019_s3 + $0x18e8] sm:$0xff]  ;;  %v18728_v5 = vcombine.high %v15336_v63, %v15342_v55 }
 0x373   :  { %10407 = vmatpush3.bf16.msra.mxu0 %v10406_v24  ;;  %v5500_v24 = vld [vmem:[%s18019_s3 + $0x18c8] sm:$0xff]  ;;  %v5487_v29 = vld [vmem:[%s18019_s3 + $0x1860] sm:$0xff] }
 0x374   :  { %10439 = vmatpush3.bf16.msra.mxu1 %v10438_v16  ;;  %10441 = vmatprep.subr.bf16.mxu0 %v10440_v3  ;;  %v5531_v16 = vld [vmem:[%s18019_s3 + $0x19c0] sm:$0xff]  ;;  %v5532_v3 = vld [vmem:[%s18019_s3 + $0x19c8] sm:$0xff] }
 0x375   :  { %10473 = vmatprep.subr.bf16.mxu1 %v10472_v18  ;;  %v10456_v18 = vpack.c.bf16 %v5500_v24, %v5499_v33  ;;  %v10488_v54 = vpack.c.bf16 %v5532_v3, %v5531_v16  ;;  %v5488_v13 = vld [vmem:[%s18019_s3 + $0x1868] sm:$0xff]  ;;  %v5519_v35 = vld [vmem:[%s18019_s3 + $0x1960] sm:$0xff]  ;;  %v5489_v33 = vld [vmem:[%s18019_s3 + $0x1870] sm:$0xff] }
 0x376   :  { %7336 = vmatmul.mubr.f32.vlgmr.msra.gmra.mrb[146].mxu0 %v18723_v22  ;;  %v5520_v4 = vld [vmem:[%s18019_s3 + $0x1968] sm:$0xff]  ;;  %v10466_v17 = vpack.c.bf16 %v5488_v13, %v5487_v29  ;;  %v5490_v24 = vld [vmem:[%s18019_s3 + $0x1878] sm:$0xff]  ;;  %v5521_v16 = vld [vmem:[%s18019_s3 + $0x1970] sm:$0xff] }
 0x377   :  { %7406 = vmatmul.mubr.f32.vlgmr.msra.gmra.mrb[154].mxu1 %v18724_v31  ;;  %10443 = vmatpush3.bf16.msra.mxu0 %v10442_v1  ;;  %v5516_v1 = vld [vmem:[%s18019_s3 + $0x1948] sm:$0xff]  ;;  %v5535_v31 = vld [vmem:[%s18019_s3 + $0x19e0] sm:$0xff] }
 0x378   :  { %7475 = vmatprep.mubr.f32.mxu0 %v18725_v8  ;;  %10475 = vmatpush3.bf16.msra.mxu1 %v10474_v20  ;;  %v5533_v20 = vld [vmem:[%s18019_s3 + $0x19d0] sm:$0xff]  ;;  %v10490_v52 = vpack.c.bf16 %v5516_v1, %v5515_v42  ;;  %v10462_v8 = vpack.c.bf16 %v5486_v61, %v5485_v27  ;;  %v5556_v30 = vld [vmem:[%s18019_s3 + $0x1a88] sm:$0xff]  ;;  %v5587_v42 = vld [vmem:[%s18019_s3 + $0x1b80] sm:$0xff] }
 0x379   :  { %7545 = vmatprep.mubr.f32.mxu1 %v18726_v7  ;;  %10445 = vmatprep.subr.bf16.mxu0 %v10444_v58  ;;  %v10460_v58 = vpack.c.bf16 %v5502_v57, %v5501_v60  ;;  %v10492_v22 = vpack.c.bf16 %v5534_v37, %v5533_v20  ;;  %v10470_v60 = vpack.c.bf16 %v5490_v24, %v5489_v33  ;;  %v5572_v27 = vld [vmem:[%s18019_s3 + $0x1b08] sm:$0xff]  ;;  %v5557_v61 = vld [vmem:[%s18019_s3 + $0x1a90] sm:$0xff]  ;;  %v5559_v29 = vld [vmem:[%s18019_s3 + $0x1aa0] sm:$0xff] }
 0x37a   :  { %10477 = vmatprep.subr.bf16.mxu1 %v10476_v9  ;;  %v5518_v9 = vld [vmem:[%s18019_s3 + $0x1958] sm:$0xff]  ;;  %v5560_v13 = vld [vmem:[%s18019_s3 + $0x1aa8] sm:$0xff] }
 0x37b   :  { %10447 = vmatpush3.bf16.msra.mxu0 %v10446_v34  ;;  %v5536_v34 = vld [vmem:[%s18019_s3 + $0x19e8] sm:$0xff] }
 0x37c   :  { %10479 = vmatpush3.bf16.msra.mxu1 %v10478_v21  ;;  %10449 = vmatprep.subr.bf16.mxu0 %v10448_v15  ;;  %v10494_v21 = vpack.c.bf16 %v5518_v9, %v5517_v10  ;;  %v10464_v15 = vpack.c.bf16 %v5504_v59, %v5503_v6  ;;  %v5558_v10 = vld [vmem:[%s18019_s3 + $0x1a98] sm:$0xff]  ;;  %v5589_v9 = vld [vmem:[%s18019_s3 + $0x1b90] sm:$0xff] }
 0x37d   :  { %10481 = vmatprep.subr.bf16.mxu1 %v10480_v11  ;;  %v10496_v11 = vpack.c.bf16 %v5536_v34, %v5535_v31  ;;  %v5590_v6 = vld [vmem:[%s18019_s3 + $0x1b98] sm:$0xff]  ;;  %v5541_v31 = vld [vmem:[%s18019_s3 + $0x1a10] sm:$0xff] }
 0x37e   :  { %v5542_v34 = vld [vmem:[%s18019_s3 + $0x1a18] sm:$0xff] }
 0x37f   :  { %10451 = vmatpush3.bf16.msra.mxu0 %v10450_v28  ;;  %v5537_v28 = vld [vmem:[%s18019_s3 + $0x19f0] sm:$0xff]  ;;  %v10510_v51 = vpack.c.bf16 %v5542_v34, %v5541_v31  ;;  %v5550_v34 = vld [vmem:[%s18019_s3 + $0x1a58] sm:$0xff] }
 0x380   :  { %10483 = vmatpush3.bf16.msra.mxu1 %v10482_v48  ;;  %10453 = vmatprep.subr.bf16.mxu0 %v10452_v45  ;;  %v5538_v48 = vld [vmem:[%s18019_s3 + $0x19f8] sm:$0xff]  ;;  %v5549_v31 = vld [vmem:[%s18019_s3 + $0x1a50] sm:$0xff] }
 0x381   :  { %10485 = vmatprep.subr.bf16.mxu1 %v10484_v19  ;;  %v10498_v19 = vpack.c.bf16 %v5520_v4, %v5519_v35  ;;  %v18727_v35 = vcombine.low %v15336_v63, %v15342_v55  ;;  %v5592_v4 = vld [vmem:[%s18019_s3 + $0x1ba8] sm:$0xff]  ;;  %v5575_v55 = vld [vmem:[%s18019_s3 + $0x1b20] sm:$0xff]  ;;  %v18730_v63 = vcombine.high %v15376_v62, %v15379_v49 }
 0x383   :  { %10455 = vmatpush3.bf16.msra.mxu0 %v10454_v44  ;;  %v10500_v44 = vpack.c.bf16 %v5538_v48, %v5537_v28  ;;  %v10512_v28 = vpack.c.bf16 %v5560_v13, %v5559_v29  ;;  %v5543_v48 = vld [vmem:[%s18019_s3 + $0x1a20] sm:$0xff]  ;;  %v5568_v13 = vld [vmem:[%s18019_s3 + $0x1ae8] sm:$0xff] }
 0x384   :  { %10487 = vmatpush3.bf16.msra.mxu1 %v10486_v23  ;;  %10457 = vmatprep.subr.bf16.mxu0 %v10456_v18  ;;  %v5522_v23 = vld [vmem:[%s18019_s3 + $0x1978] sm:$0xff]  ;;  %v5555_v18 = vld [vmem:[%s18019_s3 + $0x1a80] sm:$0xff] }
 0x385   :  { %10489 = vmatprep.subr.bf16.mxu1 %v10488_v54  ;;  %v5588_v54 = vld [vmem:[%s18019_s3 + $0x1b88] sm:$0xff]  ;;  %v10502_v20 = vpack.c.bf16 %v5522_v23, %v5521_v16  ;;  %v10504_v37 = vpack.c.bf16 %v5556_v30, %v5555_v18  ;;  %v5545_v16 = vld [vmem:[%s18019_s3 + $0x1a30] sm:$0xff]  ;;  %v5578_v18 = vld [vmem:[%s18019_s3 + $0x1b38] sm:$0xff] }
 0x386   :  { %v5563_v30 = vld [vmem:[%s18019_s3 + $0x1ac0] sm:$0xff] }
 0x387   :  { %10459 = vmatpush3.bf16.msra.mxu0 %v10458_v47  ;;  %v5540_v47 = vld [vmem:[%s18019_s3 + $0x1a08] sm:$0xff]  ;;  %v5567_v29 = vld [vmem:[%s18019_s3 + $0x1ae0] sm:$0xff] }
 0x388   :  { %10491 = vmatpush3.bf16.msra.mxu1 %v10490_v52  ;;  %10461 = vmatprep.subr.bf16.mxu0 %v10460_v58  ;;  %v10536_v52 = vpack.c.bf16 %v5588_v54, %v5587_v42  ;;  %v5571_v58 = vld [vmem:[%s18019_s3 + $0x1b00] sm:$0xff]  ;;  %v5596_v54 = vld [vmem:[%s18019_s3 + $0x1bc8] sm:$0xff] }
 0x389   :  { %v8650_v7 = vpop.f32.mrb[134].mxu0  ;;  %10493 = vmatprep.subr.bf16.mxu1 %v10492_v22  ;;  %v10538_v59 = vpack.c.bf16 %v5572_v27, %v5571_v58  ;;  %v5595_v42 = vld [vmem:[%s18019_s3 + $0x1bc0] sm:$0xff]  ;;  %v5580_v58 = vld [vmem:[%s18019_s3 + $0x1b48] sm:$0xff]  ;;  %v5565_v27 = vld [vmem:[%s18019_s3 + $0x1ad0] sm:$0xff] }
 0x38a   :  { %v8685_v32 = vpop.f32.mrb[142].mxu1  ;;  %v8651_v56 = vpop.f32.mrb[135].mxu0 }
 0x38b   :  { %v8652_v45 = vadd.f32 %v8651_v56, %v8650_v7  ;;  %v8686_v12 = vpop.f32.mrb[143].mxu1  ;;  %10463 = vmatpush3.bf16.msra.mxu0 %v10462_v8  ;;  %v5573_v8 = vld [vmem:[%s18019_s3 + $0x1b10] sm:$0xff]  ;;  %v10540_v7 = vpack.c.bf16 %v5590_v6, %v5589_v9 }
 0x38c   :  { %v8687_v25 = vadd.f32 %v8686_v12, %v8685_v32  ;;  %10495 = vmatpush3.bf16.msra.mxu1 %v10494_v21  ;;  %10465 = vmatprep.subr.bf16.mxu0 %v10464_v15  ;;  %v10508_v21 = vpack.c.bf16 %v5558_v10, %v5557_v61  ;;  %v5574_v15 = vld [vmem:[%s18019_s3 + $0x1b18] sm:$0xff]  ;;  %v18729_v32 = vcombine.low %v15376_v62, %v15379_v49  ;;  %v5593_v62 = vld [vmem:[%s18019_s3 + $0x1bb0] sm:$0xff] }
 0x38d   :  { %v7991_v3 = vsel %vm7971_vm1, %v8652_v45, 0.0  ;;  %10497 = vmatprep.subr.bf16.mxu1 %v10496_v11  ;;  %v5591_v11 = vld [vmem:[%s18019_s3 + $0x1ba0] sm:$0xff]  ;;  %v10542_v56 = vpack.c.bf16 %v5574_v15, %v5573_v8  ;;  %v5544_v45 = vld [vmem:[%s18019_s3 + $0x1a28] sm:$0xff]  ;;  %v5594_v49 = vld [vmem:[%s18019_s3 + $0x1bb8] sm:$0xff] }
 0x38e   :  { %v7992_v0 = vadd.f32 %v7991_v3, %v17137_v39  ;;  %v7993_v1 = vsel %vm7971_vm1, %v8687_v25, 0.0  ;;  %v5539_v39 = vld [vmem:[%s18019_s3 + $0x1a00] sm:$0xff]  ;;  %v10544_v12 = vpack.c.bf16 %v5592_v4, %v5591_v11  ;;  %v5561_v25 = vld [vmem:[%s18019_s3 + $0x1ab0] sm:$0xff]  ;;  %v5546_v3 = vld [vmem:[%s18019_s3 + $0x1a38] sm:$0xff]  ;;  %v10548_v23 = vpack.c.bf16 %v5594_v49, %v5593_v62 }
 0x38f   :  { %10467 = vmatpush3.bf16.msra.mxu0 %v10466_v17  ;;  %v10506_v22 = vpack.c.bf16 %v5540_v47, %v5539_v39  ;;  %v5576_v17 = vld [vmem:[%s18019_s3 + $0x1b28] sm:$0xff]  ;;  %v5579_v47 = vld [vmem:[%s18019_s3 + $0x1b40] sm:$0xff]  ;;  %v5566_v61 = vld [vmem:[%s18019_s3 + $0x1ad8] sm:$0xff]  ;;  %v10526_v11 = vpack.c.bf16 %v5550_v34, %v5549_v31 }
 0x390   :  { %v17346_v57 = vadd.f32 %v7993_v1, %v7992_v0  ;;  %10499 = vmatpush3.bf16.msra.mxu1 %v10498_v19  ;;  %10469 = vmatprep.subr.bf16.mxu0 %v10468_v38  ;;  %v5562_v19 = vld [vmem:[%s18019_s3 + $0x1ab8] sm:$0xff]  ;;  %v10514_v38 = vpack.c.bf16 %v5544_v45, %v5543_v48  ;;  %v10546_v33 = vpack.c.bf16 %v5576_v17, %v5575_v55  ;;  %v5564_v0 = vld [vmem:[%s18019_s3 + $0x1ac8] sm:$0xff]  ;;  %v5597_v10 = vld [vmem:[%s18019_s3 + $0x1bd0] sm:$0xff] }
 0x391   :  { %10501 = vmatprep.subr.bf16.mxu1 %v10500_v44  ;;  %v10516_v24 = vpack.c.bf16 %v5562_v19, %v5561_v25  ;;  %v5577_v44 = vld [vmem:[%s18019_s3 + $0x1b30] sm:$0xff]  ;;  %v10518_v1 = vpack.c.bf16 %v5546_v3, %v5545_v16  ;;  %v5548_v39 = vld [vmem:[%s18019_s3 + $0x1a48] sm:$0xff]  ;;  %v10554_v6 = vpack.c.bf16 %v5580_v58, %v5579_v47  ;;  %v5582_v15 = vld [vmem:[%s18019_s3 + $0x1b58] sm:$0xff] }
 0x392   :  { %v5581_v8 = vld [vmem:[%s18019_s3 + $0x1b50] sm:$0xff]  ;;  %v5584_v45 = vld [vmem:[%s18019_s3 + $0x1b68] sm:$0xff]  ;;  %v5602_v19 = vld [vmem:[%s18019_s3 + $0x1bf8] sm:$0xff] }
 0x393   :  { %10471 = vmatpush3.bf16.msra.mxu0 %v10470_v60  ;;  %v10550_v60 = vpack.c.bf16 %v5578_v18, %v5577_v44  ;;  %v10558_v4 = vpack.c.bf16 %v5582_v15, %v5581_v8  ;;  %v5569_v55 = vld [vmem:[%s18019_s3 + $0x1af0] sm:$0xff]  ;;  %v5554_v44 = vld [vmem:[%s18019_s3 + $0x1a78] sm:$0xff] }
 0x394   :  { %10503 = vmatpush3.bf16.msra.mxu1 %v10502_v20  ;;  %10505 = vmatprep.subr.bf16.mxu0 %v10504_v37  ;;  %v10520_v20 = vpack.c.bf16 %v5564_v0, %v5563_v30  ;;  %v5547_v37 = vld [vmem:[%s18019_s3 + $0x1a40] sm:$0xff]  ;;  %v5601_v25 = vld [vmem:[%s18019_s3 + $0x1bf0] sm:$0xff]  ;;  %v5586_v0 = vld [vmem:[%s18019_s3 + $0x1b78] sm:$0xff] }
 0x395   :  { %10537 = vmatprep.subr.bf16.mxu1 %v10536_v52  ;;  %v10552_v52 = vpack.c.bf16 %v5596_v54, %v5595_v42  ;;  %v10522_v9 = vpack.c.bf16 %v5548_v39, %v5547_v37  ;;  %v5553_v3 = vld [vmem:[%s18019_s3 + $0x1a70] sm:$0xff]  ;;  %v10564_v30 = vpack.c.bf16 %v5602_v19, %v5601_v25  ;;  %v5619_v42 = vld [vmem:[%s18019_s3 + $0x1c80] sm:$0xff]  ;;  %v5620_v54 = vld [vmem:[%s18019_s3 + $0x1c88] sm:$0xff] }
 0x396   :  { %7476 = vmatmul.mubr.f32.vlgmr.msra.gmra.mrb[148].mxu0 %v18727_v35  ;;  %v5599_v35 = vld [vmem:[%s18019_s3 + $0x1be0] sm:$0xff]  ;;  %v10534_v39 = vpack.c.bf16 %v5554_v44, %v5553_v3  ;;  %v10568_v58 = vpack.c.bf16 %v5620_v54, %v5619_v42  ;;  %v5653_v31 = vld [vmem:[%s18019_s3 + $0x1d90] sm:$0xff]  ;;  %v5654_v34 = vld [vmem:[%s18019_s3 + $0x1d98] sm:$0xff] }
 0x397   :  { %7546 = vmatmul.mubr.f32.vlgmr.msra.gmra.mrb[156].mxu1 %v18728_v5  ;;  %10507 = vmatpush3.bf16.msra.mxu0 %v10506_v22  ;;  %v5598_v22 = vld [vmem:[%s18019_s3 + $0x1bd8] sm:$0xff]  ;;  %v10528_v5 = vpack.c.bf16 %v5568_v13, %v5567_v29  ;;  %v5637_v29 = vld [vmem:[%s18019_s3 + $0x1d10] sm:$0xff]  ;;  %v5640_v25 = vld [vmem:[%s18019_s3 + $0x1d28] sm:$0xff] }
 0x398   :  { %7615 = vmatprep.mubr.f32.mxu0 %v18729_v32  ;;  %10539 = vmatpush3.bf16.msra.mxu1 %v10538_v59  ;;  %v10524_v59 = vpack.c.bf16 %v5566_v61, %v5565_v27  ;;  %v5552_v32 = vld [vmem:[%s18019_s3 + $0x1a68] sm:$0xff]  ;;  %v5606_v15 = vld [vmem:[%s18019_s3 + $0x1c18] sm:$0xff]  ;;  %v5625_v19 = vld [vmem:[%s18019_s3 + $0x1cb0] sm:$0xff] }
 0x399   :  { %7685 = vmatprep.mubr.f32.mxu1 %v18730_v63  ;;  %10509 = vmatprep.subr.bf16.mxu0 %v10508_v21  ;;  %v10556_v21 = vpack.c.bf16 %v5598_v22, %v5597_v10  ;;  %v5570_v63 = vld [vmem:[%s18019_s3 + $0x1af8] sm:$0xff]  ;;  %v5604_v27 = vld [vmem:[%s18019_s3 + $0x1c08] sm:$0xff]  ;;  %v5635_v10 = vld [vmem:[%s18019_s3 + $0x1d00] sm:$0xff] }
 0x39a   :  { %10541 = vmatprep.subr.bf16.mxu1 %v10540_v7  ;;  %v5600_v7 = vld [vmem:[%s18019_s3 + $0x1be8] sm:$0xff]  ;;  %v10532_v16 = vpack.c.bf16 %v5570_v63, %v5569_v55  ;;  %v5607_v63 = vld [vmem:[%s18019_s3 + $0x1c20] sm:$0xff]  ;;  %v5641_v3 = vld [vmem:[%s18019_s3 + $0x1d30] sm:$0xff] }
 0x39b   :  { %10511 = vmatpush3.bf16.msra.mxu0 %v10510_v51  ;;  %v5551_v51 = vld [vmem:[%s18019_s3 + $0x1a60] sm:$0xff]  ;;  %v10560_v48 = vpack.c.bf16 %v5600_v7, %v5599_v35  ;;  %v5636_v22 = vld [vmem:[%s18019_s3 + $0x1d08] sm:$0xff]  ;;  %v5638_v35 = vld [vmem:[%s18019_s3 + $0x1d18] sm:$0xff] }
 0x39c   :  { %10543 = vmatpush3.bf16.msra.mxu1 %v10542_v56  ;;  %10513 = vmatprep.subr.bf16.mxu0 %v10512_v28  ;;  %v5583_v56 = vld [vmem:[%s18019_s3 + $0x1b60] sm:$0xff]  ;;  %v10602_v8 = vpack.c.bf16 %v5636_v22, %v5635_v10  ;;  %v5660_v42 = vld [vmem:[%s18019_s3 + $0x1dc8] sm:$0xff]  ;;  %v5662_v10 = vld [vmem:[%s18019_s3 + $0x1dd8] sm:$0xff] }
 0x39d   :  { %10545 = vmatprep.subr.bf16.mxu1 %v10544_v12  ;;  %v5623_v7 = vld [vmem:[%s18019_s3 + $0x1ca0] sm:$0xff] }
 0x39f   :  { %10515 = vmatpush3.bf16.msra.mxu0 %v10514_v38  ;;  %v10530_v38 = vpack.c.bf16 %v5552_v32, %v5551_v51  ;;  %v5655_v51 = vld [vmem:[%s18019_s3 + $0x1da0] sm:$0xff]  ;;  %v5656_v32 = vld [vmem:[%s18019_s3 + $0x1da8] sm:$0xff] }
 0x3a0   :  { %10547 = vmatpush3.bf16.msra.mxu1 %v10546_v33  ;;  %10517 = vmatprep.subr.bf16.mxu0 %v10516_v24  ;;  %v10562_v24 = vpack.c.bf16 %v5584_v45, %v5583_v56  ;;  %v18732_v56 = vcombine.high %v15385_v50, %v15391_v46  ;;  %v10606_v45 = vpack.c.bf16 %v5638_v35, %v5637_v29  ;;  %v5632_v29 = vld [vmem:[%s18019_s3 + $0x1ce8] sm:$0xff] }
 0x3a1   :  { %10549 = vmatprep.subr.bf16.mxu1 %v10548_v23  ;;  %v5585_v23 = vld [vmem:[%s18019_s3 + $0x1b70] sm:$0xff]  ;;  %v5664_v35 = vld [vmem:[%s18019_s3 + $0x1de8] sm:$0xff] }
 0x3a3   :  { %10519 = vmatpush3.bf16.msra.mxu0 %v10518_v1 }
 0x3a4   :  { %10551 = vmatpush3.bf16.msra.mxu1 %v10550_v60  ;;  %10521 = vmatprep.subr.bf16.mxu0 %v10520_v20  ;;  %v5651_v60 = vld [vmem:[%s18019_s3 + $0x1d80] sm:$0xff]  ;;  %v5652_v20 = vld [vmem:[%s18019_s3 + $0x1d88] sm:$0xff] }
 0x3a5   :  { %10553 = vmatprep.subr.bf16.mxu1 %v10552_v52  ;;  %v10566_v52 = vpack.c.bf16 %v5586_v0, %v5585_v23  ;;  %v10600_v61 = vpack.c.bf16 %v5652_v20, %v5651_v60  ;;  %v5642_v23 = vld [vmem:[%s18019_s3 + $0x1d38] sm:$0xff]  ;;  %v5659_v0 = vld [vmem:[%s18019_s3 + $0x1dc0] sm:$0xff] }
 0x3a6   :  { %v5611_v20 = vld [vmem:[%s18019_s3 + $0x1c40] sm:$0xff] }
 0x3a7   :  { %10523 = vmatpush3.bf16.msra.mxu0 %v10522_v9  ;;  %v5621_v9 = vld [vmem:[%s18019_s3 + $0x1c90] sm:$0xff] }
 0x3a8   :  { %10555 = vmatpush3.bf16.msra.mxu1 %v10554_v6  ;;  %10525 = vmatprep.subr.bf16.mxu0 %v10524_v59  ;;  %v5622_v6 = vld [vmem:[%s18019_s3 + $0x1c98] sm:$0xff] }
 0x3a9   :  { %v8720_v28 = vpop.f32.mrb[136].mxu0  ;;  %10557 = vmatprep.subr.bf16.mxu1 %v10556_v21  ;;  %v5605_v21 = vld [vmem:[%s18019_s3 + $0x1c10] sm:$0xff]  ;;  %v10572_v13 = vpack.c.bf16 %v5622_v6, %v5621_v9 }
 0x3aa   :  { %v8755_v12 = vpop.f32.mrb[144].mxu1  ;;  %v8721_v17 = vpop.f32.mrb[137].mxu0 }
 0x3ab   :  { %v8722_v62 = vadd.f32 %v8721_v17, %v8720_v28  ;;  %v8756_v49 = vpop.f32.mrb[145].mxu1  ;;  %10527 = vmatpush3.bf16.msra.mxu0 %v10526_v11  ;;  %v5624_v11 = vld [vmem:[%s18019_s3 + $0x1ca8] sm:$0xff]  ;;  %v10574_v28 = vpack.c.bf16 %v5606_v15, %v5605_v21  ;;  %v10608_v17 = vpack.c.bf16 %v5656_v32, %v5655_v51  ;;  %v5646_v21 = vld [vmem:[%s18019_s3 + $0x1d58] sm:$0xff]  ;;  %v5631_v15 = vld [vmem:[%s18019_s3 + $0x1ce0] sm:$0xff] }
 0x3ac   :  { %v8757_v33 = vadd.f32 %v8756_v49, %v8755_v12  ;;  %10559 = vmatpush3.bf16.msra.mxu1 %v10558_v4  ;;  %10529 = vmatprep.subr.bf16.mxu0 %v10528_v5  ;;  %v18731_v4 = vcombine.low %v15385_v50, %v15391_v46  ;;  %v10604_v5 = vpack.c.bf16 %v5654_v34, %v5653_v31  ;;  %v5608_v12 = vld [vmem:[%s18019_s3 + $0x1c28] sm:$0xff]  ;;  %v5639_v46 = vld [vmem:[%s18019_s3 + $0x1d20] sm:$0xff]  ;;  %v5614_v31 = vld [vmem:[%s18019_s3 + $0x1c58] sm:$0xff] }
 0x3ad   :  { %v7995_v18 = vsel %vm7971_vm1, %v8722_v62, 0.0  ;;  %10561 = vmatprep.subr.bf16.mxu1 %v10560_v48  ;;  %v18733_v48 = vcombine.low %v15444_v14, %v15447_v36  ;;  %v10576_v55 = vpack.c.bf16 %v5624_v11, %v5623_v7  ;;  %v18734_v50 = vcombine.high %v15444_v14, %v15447_v36  ;;  %v5626_v62 = vld [vmem:[%s18019_s3 + $0x1cb8] sm:$0xff]  ;;  %v5657_v14 = vld [vmem:[%s18019_s3 + $0x1db0] sm:$0xff]  ;;  %v5616_v51 = vld [vmem:[%s18019_s3 + $0x1c68] sm:$0xff] }
 0x3ae   :  { %v7996_v1 = vadd.f32 %v7995_v18, %v17346_v57  ;;  %v7997_v37 = vsel %vm7971_vm1, %v8757_v33, 0.0  ;;  %v5603_v57 = vld [vmem:[%s18019_s3 + $0x1c00] sm:$0xff]  ;;  %v5658_v36 = vld [vmem:[%s18019_s3 + $0x1db8] sm:$0xff]  ;;  %v10578_v49 = vpack.c.bf16 %v5608_v12, %v5607_v63  ;;  %v10580_v33 = vpack.c.bf16 %v5626_v62, %v5625_v19  ;;  %v5645_v34 = vld [vmem:[%s18019_s3 + $0x1d50] sm:$0xff] }
 0x3af   :  { %10531 = vmatpush3.bf16.msra.mxu0 %v10530_v38  ;;  %v10570_v59 = vpack.c.bf16 %v5604_v27, %v5603_v57  ;;  %v10610_v38 = vpack.c.bf16 %v5640_v25, %v5639_v46  ;;  %v10612_v44 = vpack.c.bf16 %v5658_v36, %v5657_v14  ;;  %v5627_v18 = vld [vmem:[%s18019_s3 + $0x1cc0] sm:$0xff]  ;;  %v5629_v57 = vld [vmem:[%s18019_s3 + $0x1cd0] sm:$0xff]  ;;  %v5630_v27 = vld [vmem:[%s18019_s3 + $0x1cd8] sm:$0xff]  ;;  %v10622_v11 = vpack.c.bf16 %v5646_v21, %v5645_v34 }
 0x3b0   :  { %v17555_v47 = vadd.f32 %v7997_v37, %v7996_v1  ;;  %10563 = vmatpush3.bf16.msra.mxu1 %v10562_v24  ;;  %10533 = vmatprep.subr.bf16.mxu0 %v10532_v16  ;;  %v5609_v24 = vld [vmem:[%s18019_s3 + $0x1c30] sm:$0xff]  ;;  %v5610_v16 = vld [vmem:[%s18019_s3 + $0x1c38] sm:$0xff]  ;;  %v10614_v1 = vpack.c.bf16 %v5642_v23, %v5641_v3  ;;  %v5612_v37 = vld [vmem:[%s18019_s3 + $0x1c48] sm:$0xff]  ;;  %v10588_v6 = vpack.c.bf16 %v5630_v27, %v5629_v57 }
 0x3b1   :  { %10565 = vmatprep.subr.bf16.mxu1 %v10564_v30  ;;  %v5628_v30 = vld [vmem:[%s18019_s3 + $0x1cc8] sm:$0xff]  ;;  %v10582_v54 = vpack.c.bf16 %v5610_v16, %v5609_v24  ;;  %v10586_v22 = vpack.c.bf16 %v5612_v37, %v5611_v20  ;;  %v5647_v32 = vld [vmem:[%s18019_s3 + $0x1d60] sm:$0xff]  ;;  %v5665_v46 = vld [vmem:[%s18019_s3 + $0x1df0] sm:$0xff] }
 0x3b2   :  { %v10584_v60 = vpack.c.bf16 %v5628_v30, %v5627_v18  ;;  %v5650_v3 = vld [vmem:[%s18019_s3 + $0x1d78] sm:$0xff]  ;;  %v5684_v23 = vld [vmem:[%s18019_s3 + $0x1e88] sm:$0xff]  ;;  %v5715_v30 = vld [vmem:[%s18019_s3 + $0x1f80] sm:$0xff] }
 0x3b3   :  { %10535 = vmatpush3.bf16.msra.mxu0 %v10534_v39  ;;  %v5643_v39 = vld [vmem:[%s18019_s3 + $0x1d40] sm:$0xff]  ;;  %v5668_v37 = vld [vmem:[%s18019_s3 + $0x1e08] sm:$0xff]  ;;  %v5685_v57 = vld [vmem:[%s18019_s3 + $0x1e90] sm:$0xff] }
 0x3b4   :  { %10567 = vmatpush3.bf16.msra.mxu1 %v10566_v52  ;;  %10569 = vmatprep.subr.bf16.mxu0 %v10568_v58  ;;  %v10616_v52 = vpack.c.bf16 %v5660_v42, %v5659_v0  ;;  %v5644_v58 = vld [vmem:[%s18019_s3 + $0x1d48] sm:$0xff]  ;;  %v5686_v27 = vld [vmem:[%s18019_s3 + $0x1e98] sm:$0xff]  ;;  %v5687_v21 = vld [vmem:[%s18019_s3 + $0x1ea0] sm:$0xff] }
 0x3b5   :  { %10601 = vmatprep.subr.bf16.mxu1 %v10600_v61  ;;  %v5661_v61 = vld [vmem:[%s18019_s3 + $0x1dd0] sm:$0xff]  ;;  %v10618_v9 = vpack.c.bf16 %v5644_v58, %v5643_v39  ;;  %v5716_v0 = vld [vmem:[%s18019_s3 + $0x1f88] sm:$0xff]  ;;  %v10636_v34 = vpack.c.bf16 %v5686_v27, %v5685_v57 }
 0x3b6   :  { %7616 = vmatmul.mubr.f32.vlgmr.msra.gmra.mrb[150].mxu0 %v18731_v4  ;;  %v10592_v4 = vpack.c.bf16 %v5632_v29, %v5631_v15  ;;  %v10664_v39 = vpack.c.bf16 %v5716_v0, %v5715_v30  ;;  %v5700_v58 = vld [vmem:[%s18019_s3 + $0x1f08] sm:$0xff]  ;;  %v18735_v29 = vcombine.low %v15431_v43, %v15437_v40  ;;  %v5709_v57 = vld [vmem:[%s18019_s3 + $0x1f50] sm:$0xff] }
 0x3b7   :  { %7686 = vmatmul.mubr.f32.vlgmr.msra.gmra.mrb[158].mxu1 %v18732_v56  ;;  %10571 = vmatpush3.bf16.msra.mxu0 %v10570_v59  ;;  %v5613_v59 = vld [vmem:[%s18019_s3 + $0x1c50] sm:$0xff]  ;;  %v5688_v15 = vld [vmem:[%s18019_s3 + $0x1ea8] sm:$0xff] }
 0x3b8   :  { %7755 = vmatprep.mubr.f32.mxu0 %v18733_v48  ;;  %10603 = vmatpush3.bf16.msra.mxu1 %v10602_v8  ;;  %v10620_v8 = vpack.c.bf16 %v5662_v10, %v5661_v61  ;;  %v10590_v7 = vpack.c.bf16 %v5614_v31, %v5613_v59  ;;  %v5648_v48 = vld [vmem:[%s18019_s3 + $0x1d68] sm:$0xff]  ;;  %v5717_v10 = vld [vmem:[%s18019_s3 + $0x1f90] sm:$0xff]  ;;  %v5670_v59 = vld [vmem:[%s18019_s3 + $0x1e18] sm:$0xff] }
 0x3b9   :  { %7825 = vmatprep.mubr.f32.mxu1 %v18734_v50  ;;  %10573 = vmatprep.subr.bf16.mxu0 %v10572_v13  ;;  %v5663_v13 = vld [vmem:[%s18019_s3 + $0x1de0] sm:$0xff]  ;;  %v5666_v50 = vld [vmem:[%s18019_s3 + $0x1df8] sm:$0xff]  ;;  %v10626_v14 = vpack.c.bf16 %v5648_v48, %v5647_v32  ;;  %v5701_v31 = vld [vmem:[%s18019_s3 + $0x1f10] sm:$0xff]  ;;  %v10640_v32 = vpack.c.bf16 %v5688_v15, %v5687_v21 }
 0x3ba   :  { %10605 = vmatprep.subr.bf16.mxu1 %v10604_v5  ;;  %v5615_v5 = vld [vmem:[%s18019_s3 + $0x1c60] sm:$0xff]  ;;  %v10628_v16 = vpack.c.bf16 %v5666_v50, %v5665_v46  ;;  %v5708_v0 = vld [vmem:[%s18019_s3 + $0x1f48] sm:$0xff] }
 0x3bb   :  { %10575 = vmatpush3.bf16.msra.mxu0 %v10574_v28  ;;  %v10624_v28 = vpack.c.bf16 %v5664_v35, %v5663_v13  ;;  %v10594_v19 = vpack.c.bf16 %v5616_v51, %v5615_v5  ;;  %v5719_v35 = vld [vmem:[%s18019_s3 + $0x1fa0] sm:$0xff]  ;;  %v18737_v5 = vcombine.low %v15488_v53, %v15491_v26  ;;  %v5680_v21 = vld [vmem:[%s18019_s3 + $0x1e68] sm:$0xff] }
 0x3bc   :  { %10607 = vmatpush3.bf16.msra.mxu1 %v10606_v45  ;;  %10577 = vmatprep.subr.bf16.mxu0 %v10576_v55  ;;  %v5633_v45 = vld [vmem:[%s18019_s3 + $0x1cf0] sm:$0xff]  ;;  %v5634_v55 = vld [vmem:[%s18019_s3 + $0x1cf8] sm:$0xff]  ;;  %v5711_v15 = vld [vmem:[%s18019_s3 + $0x1f60] sm:$0xff] }
 0x3bd   :  { %10609 = vmatprep.subr.bf16.mxu1 %v10608_v17  ;;  %v10596_v36 = vpack.c.bf16 %v5634_v55, %v5633_v45  ;;  %v5704_v45 = vld [vmem:[%s18019_s3 + $0x1f28] sm:$0xff]  ;;  %v5689_v55 = vld [vmem:[%s18019_s3 + $0x1eb0] sm:$0xff] }
 0x3bf   :  { %10579 = vmatpush3.bf16.msra.mxu0 %v10578_v49  ;;  %v5617_v49 = vld [vmem:[%s18019_s3 + $0x1c70] sm:$0xff] }
 0x3c0   :  { %10611 = vmatpush3.bf16.msra.mxu1 %v10610_v38  ;;  %10581 = vmatprep.subr.bf16.mxu0 %v10580_v33  ;;  %v5618_v38 = vld [vmem:[%s18019_s3 + $0x1c78] sm:$0xff]  ;;  %v5649_v33 = vld [vmem:[%s18019_s3 + $0x1d70] sm:$0xff] }
 0x3c1   :  { %10613 = vmatprep.subr.bf16.mxu1 %v10612_v44  ;;  %v5683_v44 = vld [vmem:[%s18019_s3 + $0x1e80] sm:$0xff] }
 0x3c2   :  { %v10632_v20 = vpack.c.bf16 %v5684_v23, %v5683_v44  ;;  %v5675_v44 = vld [vmem:[%s18019_s3 + $0x1e40] sm:$0xff]  ;;  %v5676_v23 = vld [vmem:[%s18019_s3 + $0x1e48] sm:$0xff] }
 0x3c3   :  { %10583 = vmatpush3.bf16.msra.mxu0 %v10582_v54  ;;  %v10598_v54 = vpack.c.bf16 %v5618_v38, %v5617_v49  ;;  %v5692_v49 = vld [vmem:[%s18019_s3 + $0x1ec8] sm:$0xff]  ;;  %v5723_v38 = vld [vmem:[%s18019_s3 + $0x1fc0] sm:$0xff] }
 0x3c4   :  { %10615 = vmatpush3.bf16.msra.mxu1 %v10614_v1  ;;  %10585 = vmatprep.subr.bf16.mxu0 %v10584_v60  ;;  %v10630_v60 = vpack.c.bf16 %v5650_v3, %v5649_v33  ;;  %v5724_v33 = vld [vmem:[%s18019_s3 + $0x1fc8] sm:$0xff] }
 0x3c5   :  { %10617 = vmatprep.subr.bf16.mxu1 %v10616_v52  ;;  %v5699_v52 = vld [vmem:[%s18019_s3 + $0x1f00] sm:$0xff]  ;;  %v10680_v30 = vpack.c.bf16 %v5724_v33, %v5723_v38 }
 0x3c7   :  { %10587 = vmatpush3.bf16.msra.mxu0 %v10586_v22  ;;  %v5718_v22 = vld [vmem:[%s18019_s3 + $0x1f98] sm:$0xff] }
 0x3c8   :  { %10619 = vmatpush3.bf16.msra.mxu1 %v10618_v9  ;;  %10589 = vmatprep.subr.bf16.mxu0 %v10588_v6  ;;  %v10666_v9 = vpack.c.bf16 %v5700_v58, %v5699_v52  ;;  %v5669_v6 = vld [vmem:[%s18019_s3 + $0x1e10] sm:$0xff]  ;;  %v10668_v13 = vpack.c.bf16 %v5718_v22, %v5717_v10  ;;  %v5678_v58 = vld [vmem:[%s18019_s3 + $0x1e58] sm:$0xff]  ;;  %v5695_v10 = vld [vmem:[%s18019_s3 + $0x1ee0] sm:$0xff] }
 0x3c9   :  { %v8790_v56 = vpop.f32.mrb[138].mxu0  ;;  %10621 = vmatprep.subr.bf16.mxu1 %v10620_v8  ;;  %v5702_v8 = vld [vmem:[%s18019_s3 + $0x1f18] sm:$0xff]  ;;  %v5677_v52 = vld [vmem:[%s18019_s3 + $0x1e50] sm:$0xff]  ;;  %v5696_v22 = vld [vmem:[%s18019_s3 + $0x1ee8] sm:$0xff] }
 0x3ca   :  { %v8825_v63 = vpop.f32.mrb[146].mxu1  ;;  %v8791_v12 = vpop.f32.mrb[139].mxu0  ;;  %v10670_v51 = vpack.c.bf16 %v5702_v8, %v5701_v31  ;;  %v5679_v8 = vld [vmem:[%s18019_s3 + $0x1e60] sm:$0xff] }
 0x3cb   :  { %v8792_v17 = vadd.f32 %v8791_v12, %v8790_v56  ;;  %v8826_v25 = vpop.f32.mrb[147].mxu1  ;;  %10591 = vmatpush3.bf16.msra.mxu0 %v10590_v7  ;;  %v5720_v7 = vld [vmem:[%s18019_s3 + $0x1fa8] sm:$0xff]  ;;  %v5671_v56 = vld [vmem:[%s18019_s3 + $0x1e20] sm:$0xff] }
 0x3cc   :  { %v8827_v62 = vadd.f32 %v8826_v25, %v8825_v63  ;;  %10623 = vmatpush3.bf16.msra.mxu1 %v10622_v11  ;;  %10593 = vmatprep.subr.bf16.mxu0 %v10592_v4  ;;  %v18736_v11 = vcombine.high %v15431_v43, %v15437_v40  ;;  %v10638_v4 = vpack.c.bf16 %v5670_v59, %v5669_v6  ;;  %v5703_v40 = vld [vmem:[%s18019_s3 + $0x1f20] sm:$0xff]  ;;  %v5690_v63 = vld [vmem:[%s18019_s3 + $0x1eb8] sm:$0xff]  ;;  %v5728_v6 = vld [vmem:[%s18019_s3 + $0x1fe8] sm:$0xff] }
 0x3cd   :  { %v7999_v24 = vsel %vm7971_vm1, %v8792_v17, 0.0  ;;  %10625 = vmatprep.subr.bf16.mxu1 %v10624_v28  ;;  %v5672_v28 = vld [vmem:[%s18019_s3 + $0x1e28] sm:$0xff]  ;;  %v18738_v43 = vcombine.high %v15488_v53, %v15491_v26  ;;  %v10672_v48 = vpack.c.bf16 %v5720_v7, %v5719_v35  ;;  %v5721_v53 = vld [vmem:[%s18019_s3 + $0x1fb0] sm:$0xff]  ;;  %v5722_v26 = vld [vmem:[%s18019_s3 + $0x1fb8] sm:$0xff]  ;;  %v10674_v46 = vpack.c.bf16 %v5704_v45, %v5703_v40 }
 0x3ce   :  { %v8000_v18 = vadd.f32 %v7999_v24, %v17555_v47  ;;  %v8001_v42 = vsel %vm7971_vm1, %v8827_v62, 0.0  ;;  %v5667_v47 = vld [vmem:[%s18019_s3 + $0x1e00] sm:$0xff]  ;;  %v10642_v12 = vpack.c.bf16 %v5672_v28, %v5671_v56  ;;  %v10644_v50 = vpack.c.bf16 %v5690_v63, %v5689_v55  ;;  %v5673_v17 = vld [vmem:[%s18019_s3 + $0x1e30] sm:$0xff]  ;;  %v5674_v25 = vld [vmem:[%s18019_s3 + $0x1e38] sm:$0xff] }
 0x3cf   :  { %10595 = vmatpush3.bf16.msra.mxu0 %v10594_v19  ;;  %v10634_v61 = vpack.c.bf16 %v5668_v37, %v5667_v47  ;;  %v5705_v19 = vld [vmem:[%s18019_s3 + $0x1f30] sm:$0xff]  ;;  %v10676_v62 = vpack.c.bf16 %v5722_v26, %v5721_v53  ;;  %v10646_v24 = vpack.c.bf16 %v5674_v25, %v5673_v17  ;;  %v10650_v47 = vpack.c.bf16 %v5676_v23, %v5675_v44  ;;  %v5712_v35 = vld [vmem:[%s18019_s3 + $0x1f68] sm:$0xff]  ;;  %v5682_v63 = vld [vmem:[%s18019_s3 + $0x1e78] sm:$0xff] }
 0x3d0   :  { %v17764_v1 = vadd.f32 %v8001_v42, %v8000_v18  ;;  %10627 = vmatpush3.bf16.msra.mxu1 %v10626_v14  ;;  %10597 = vmatprep.subr.bf16.mxu0 %v10596_v36  ;;  %v5706_v14 = vld [vmem:[%s18019_s3 + $0x1f38] sm:$0xff]  ;;  %v5691_v36 = vld [vmem:[%s18019_s3 + $0x1ec0] sm:$0xff]  ;;  %v5693_v42 = vld [vmem:[%s18019_s3 + $0x1ed0] sm:$0xff]  ;;  %v10654_v59 = vpack.c.bf16 %v5678_v58, %v5677_v52  ;;  %v10658_v40 = vpack.c.bf16 %v5680_v21, %v5679_v8 }
 0x3d1   :  { %10629 = vmatprep.subr.bf16.mxu1 %v10628_v16  ;;  %v10678_v16 = vpack.c.bf16 %v5706_v14, %v5705_v19  ;;  %v10648_v3 = vpack.c.bf16 %v5692_v49, %v5691_v36  ;;  %v5707_v18 = vld [vmem:[%s18019_s3 + $0x1f40] sm:$0xff]  ;;  %v5697_v7 = vld [vmem:[%s18019_s3 + $0x1ef0] sm:$0xff]  ;;  %v18739_v14 = vcombine.low %v15479_v2, %v15453_v41  ;;  %v18740_v36 = vcombine.high %v15479_v2, %v15453_v41  ;;  %v8045_v58 = vld [vmem:[%s18020_s5 + $0x8] sm:$0xff] }
 0x3d2   :  { %v10682_v37 = vpack.c.bf16 %v5708_v0, %v5707_v18  ;;  %v5681_v55 = vld [vmem:[%s18019_s3 + $0x1e70] sm:$0xff]  ;;  %v8044_v52 = vld [vmem:[%s18020_s5] sm:$0xff] }
 0x3d3   :  { %10599 = vmatpush3.bf16.msra.mxu0 %v10598_v54  ;;  %v5694_v54 = vld [vmem:[%s18019_s3 + $0x1ed8] sm:$0xff]  ;;  %v10662_v25 = vpack.c.bf16 %v5682_v63, %v5681_v55  ;;  %v8046_v21 = vld [vmem:[%s18020_s5 + $0x10] sm:$0xff] }
 0x3d4   :  { %10631 = vmatpush3.bf16.msra.mxu1 %v10630_v60  ;;  %10633 = vmatprep.subr.bf16.mxu0 %v10632_v20  ;;  %v5725_v60 = vld [vmem:[%s18019_s3 + $0x1fd0] sm:$0xff]  ;;  %v5726_v20 = vld [vmem:[%s18019_s3 + $0x1fd8] sm:$0xff] }
 0x3d5   :  { %10665 = vmatprep.subr.bf16.mxu1 %v10664_v39  ;;  %v10652_v39 = vpack.c.bf16 %v5694_v54, %v5693_v42  ;;  %v10684_v27 = vpack.c.bf16 %v5726_v20, %v5725_v60 }
 0x3d6   :  { %7756 = vmatmul.mubr.f32.vlgmr.msra.gmra.mrb[152].mxu0 %v18735_v29 }
 0x3d7   :  { %7826 = vmatmul.mubr.f32.vlgmr.msra.gmra.mrb[160].mxu1 %v18736_v11  ;;  %10635 = vmatpush3.bf16.msra.mxu0 %v10634_v61  ;;  %v5710_v61 = vld [vmem:[%s18019_s3 + $0x1f58] sm:$0xff] }
 0x3d8   :  { %7895 = vmatprep.mubr.f32.mxu0 %v18737_v5  ;;  %10667 = vmatpush3.bf16.msra.mxu1 %v10666_v9  ;;  %v5727_v9 = vld [vmem:[%s18019_s3 + $0x1fe0] sm:$0xff]  ;;  %v10686_v31 = vpack.c.bf16 %v5710_v61, %v5709_v57  ;;  %v5698_v11 = vld [vmem:[%s18019_s3 + $0x1ef8] sm:$0xff]  ;;  %v10697_v57 = vpack.c.bf16 %v8045_v58, %v8044_v52 }
 0x3d9   :  { %7965 = vmatprep.mubr.f32.mxu1 %v18738_v43  ;;  %10637 = vmatprep.subr.bf16.mxu0 %v10636_v34  ;;  %v10656_v34 = vpack.c.bf16 %v5696_v22, %v5695_v10  ;;  %v10660_v45 = vpack.c.bf16 %v5698_v11, %v5697_v7  ;;  %v18741_v7 = vmov 0.0  }
 0x3da   :  { %10669 = vmatprep.subr.bf16.mxu1 %v10668_v13  ;;  %v10688_v13 = vpack.c.bf16 %v5728_v6, %v5727_v9 }
 0x3db   :  { %10639 = vmatpush3.bf16.msra.mxu0 %v10638_v4 }
 0x3dc   :  { %10671 = vmatpush3.bf16.msra.mxu1 %v10670_v51  ;;  %10641 = vmatprep.subr.bf16.mxu0 %v10640_v32  ;;  %v5729_v51 = vld [vmem:[%s18019_s3 + $0x1ff0] sm:$0xff]  ;;  %v5730_v32 = vld [vmem:[%s18019_s3 + $0x1ff8] sm:$0xff] }
 0x3dd   :  { %10673 = vmatprep.subr.bf16.mxu1 %v10672_v48  ;;  %v10690_v48 = vpack.c.bf16 %v5712_v35, %v5711_v15  ;;  %v10692_v26 = vpack.c.bf16 %v5730_v32, %v5729_v51  ;;  %v8047_v15 = vld [vmem:[%s18020_s5 + $0x18] sm:$0xff]  ;;  %v8049_v35 = vld [vmem:[%s18020_s5 + $0x28] sm:$0xff] }
 0x3df   :  { %10643 = vmatpush3.bf16.msra.mxu0 %v10642_v12  ;;  %v5713_v12 = vld [vmem:[%s18019_s3 + $0x1f70] sm:$0xff] }
 0x3e0   :  { %10675 = vmatpush3.bf16.msra.mxu1 %v10674_v46  ;;  %10645 = vmatprep.subr.bf16.mxu0 %v10644_v50  ;;  %v5714_v46 = vld [vmem:[%s18019_s3 + $0x1f78] sm:$0xff] }
 0x3e1   :  { %10677 = vmatprep.subr.bf16.mxu1 %v10676_v62  ;;  %v10694_v62 = vpack.c.bf16 %v5714_v46, %v5713_v12 }
 0x3e3   :  { %10647 = vmatpush3.bf16.msra.mxu0 %v10646_v24 }
 0x3e4   :  { %10679 = vmatpush3.bf16.msra.mxu1 %v10678_v16  ;;  %10649 = vmatprep.subr.bf16.mxu0 %v10648_v3 }
 0x3e5   :  { %10681 = vmatprep.subr.bf16.mxu1 %v10680_v30 }
 0x3e7   :  { %10651 = vmatpush3.bf16.msra.mxu0 %v10650_v47 }
 0x3e8   :  { %10683 = vmatpush3.bf16.msra.mxu1 %v10682_v37  ;;  %10653 = vmatprep.subr.bf16.mxu0 %v10652_v39  ;;  %v10728_v39 = vmov 0.0|0.0  }
 0x3e9   :  { %v8860_v29 = vpop.f32.mrb[140].mxu0  ;;  %10685 = vmatprep.subr.bf16.mxu1 %v10684_v27 }
 0x3ea   :  { %v8895_v4 = vpop.f32.mrb[148].mxu1  ;;  %v8861_v5 = vpop.f32.mrb[141].mxu0 }
 0x3eb   :  { %v8862_v56 = vadd.f32 %v8861_v5, %v8860_v29  ;;  %v8896_v28 = vpop.f32.mrb[149].mxu1  ;;  %10655 = vmatpush3.bf16.msra.mxu0 %v10654_v59  ;;  %v8048_v29 = vld [vmem:[%s18020_s5 + $0x20] sm:$0xff]  ;;  %v8051_v5 = vld [vmem:[%s18020_s5 + $0x38] sm:$0xff] }
 0x3ec   :  { %v8897_v43 = vadd.f32 %v8896_v28, %v8895_v4  ;;  %10687 = vmatpush3.bf16.msra.mxu1 %v10686_v31  ;;  %10657 = vmatprep.subr.bf16.mxu0 %v10656_v34  ;;  %v10703_v11 = vpack.c.bf16 %v8049_v35, %v8048_v29  ;;  %v8050_v4 = vld [vmem:[%s18020_s5 + $0x30] sm:$0xff] }
 0x3ed   :  { %v8003_v53 = vsel %vm7971_vm1, %v8862_v56, 0.0  ;;  %10689 = vmatprep.subr.bf16.mxu1 %v10688_v13  ;;  %v10700_v13 = vpack.c.bf16 %v8047_v15, %v8046_v21  ;;  %v10706_v51 = vpack.c.bf16 %v8051_v5, %v8050_v4 }
 0x3ee   :  { %v8004_v50 = vadd.f32 %v8003_v53, %v17764_v1  ;;  %v8005_v17 = vsel %vm7971_vm1, %v8897_v43, 0.0 }
 0x3ef   :  { %10659 = vmatpush3.bf16.msra.mxu0 %v10658_v40 }
 0x3f0   :  { %v8006_v19 = vadd.f32 %v8005_v17, %v8004_v50  ;;  %10691 = vmatpush3.bf16.msra.mxu1 %v10690_v48  ;;  %10661 = vmatprep.subr.bf16.mxu0 %v10660_v45 }
 0x3f1   :  { %10693 = vmatprep.subr.bf16.mxu1 %v10692_v26 }
 0x3f3   :  { %10663 = vmatpush3.bf16.msra.mxu0 %v10662_v25 }
 0x3f4   :  { %10695 = vmatpush3.bf16.msra.mxu1 %v10694_v62  ;;  %10696 = vmatprep.subr.bf16.mxu0 %v10728_v39 }
 0x3f6   :  { %7896 = vmatmul.mubr.f32.vlgmr.msra.gmra.mrb[154].mxu0 %v18739_v14 }
 0x3f7   :  { %7966 = vmatmul.mubr.f32.vlgmr.msra.gmra.mrb[162].mxu1 %v18740_v36  ;;  %10698 = vmatpush3.bf16.msra.mxu0 %v10697_v57  ;;  %v8266_v57 = vld [vmem:[%s18022_s6] ss:$0 sm:$0xff] }
 0x3f8   :  { %10699 = vmatprep.subr.bf16.mxu0 %v10728_v39  ;;  %9413 = vmatprep.mubr.msk.f32.mxu0 %vm10729_vm2, %v18741_v7 }
 0x3fb   :  { %10701 = vmatpush3.bf16.msra.mxu0 %v10700_v13 }
 0x3fc   :  { %10702 = vmatprep.subr.bf16.mxu0 %v10728_v39 }
 0x3ff   :  { %10704 = vmatpush3.bf16.msra.mxu0 %v10703_v11 }
 0x400   :  { %10705 = vmatprep.subr.bf16.mxu0 %v10728_v39 }
 0x403   :  { %10707 = vmatpush3.bf16.msra.mxu0 %v10706_v51 }
 0x409   :  { %v8930_v1 = vpop.f32.mrb[142].mxu0 }
 0x40a   :  { %v8965_v49 = vpop.f32.mrb[150].mxu1  ;;  %v8931_v38 = vpop.f32.mrb[143].mxu0 }
 0x40b   :  { %v8932_v33 = vadd.f32 %v8931_v38, %v8930_v1  ;;  %v8966_v24 = vpop.f32.mrb[151].mxu1 }
 0x40c   :  { %v8967_v16 = vadd.f32 %v8966_v24, %v8965_v49 }
 0x40d   :  { %v8007_v3 = vsel %vm7971_vm1, %v8932_v33, 0.0 }
 0x40e   :  { %v8008_v44 = vadd.f32 %v8007_v3, %v8006_v19  ;;  %v8009_v23 = vsel %vm7971_vm1, %v8967_v16, 0.0 }
 0x410   :  { %v8010_v18 = vadd.f32 %v8009_v23, %v8008_v44 }
 0x429   :  { %v9000_v30 = vpop.f32.mrb[144].mxu0 }
 0x42a   :  { %v9035_v0 = vpop.f32.mrb[152].mxu1  ;;  %v9001_v42 = vpop.f32.mrb[145].mxu0 }
 0x42b   :  { %v9002_v54 = vadd.f32 %v9001_v42, %v9000_v30  ;;  %v9036_v60 = vpop.f32.mrb[153].mxu1 }
 0x42c   :  { %v9037_v20 = vadd.f32 %v9036_v60, %v9035_v0 }
 0x42d   :  { %v8011_v41 = vsel %vm7971_vm1, %v9002_v54, 0.0 }
 0x42e   :  { %v8012_v2 = vadd.f32 %v8011_v41, %v8010_v18  ;;  %v8013_v47 = vsel %vm7971_vm1, %v9037_v20, 0.0 }
 0x430   :  { %v8014_v37 = vadd.f32 %v8013_v47, %v8012_v2 }
 0x449   :  { %v9070_v27 = vpop.f32.mrb[146].mxu0 }
 0x44a   :  { %v9105_v61 = vpop.f32.mrb[154].mxu1  ;;  %v9071_v10 = vpop.f32.mrb[147].mxu0 }
 0x44b   :  { %v9072_v22 = vadd.f32 %v9071_v10, %v9070_v27  ;;  %v9106_v9 = vpop.f32.mrb[155].mxu1 }
 0x44c   :  { %v9107_v6 = vadd.f32 %v9106_v9, %v9105_v61 }
 0x44d   :  { %v8015_v59 = vsel %vm7971_vm1, %v9072_v22, 0.0 }
 0x44e   :  { %v8016_v31 = vadd.f32 %v8015_v59, %v8014_v37  ;;  %v8017_v34 = vsel %vm7971_vm1, %v9107_v6, 0.0  ;;  %v8265_v37 = vld [vmem:[%s18021_s4] ss:$0 sm:$0xff] }
 0x450   :  { %v8018_v8 = vadd.f32 %v8017_v34, %v8016_v31 }
 0x469   :  { %v9140_v32 = vpop.f32.mrb[148].mxu0 }
 0x46a   :  { %v9175_v56 = vpop.f32.mrb[156].mxu1  ;;  %v9141_v28 = vpop.f32.mrb[149].mxu0 }
 0x46b   :  { %v9142_v40 = vadd.f32 %v9141_v28, %v9140_v32  ;;  %v9176_v43 = vpop.f32.mrb[157].mxu1 }
 0x46c   :  { %v9177_v48 = vadd.f32 %v9176_v43, %v9175_v56 }
 0x46d   :  { %v8019_v45 = vsel %vm7971_vm1, %v9142_v40, 0.0 }
 0x46e   :  { %v8020_v55 = vadd.f32 %v8019_v45, %v8018_v8  ;;  %v8021_v63 = vsel %vm7971_vm1, %v9177_v48, 0.0 }
 0x470   :  { %v8022_v53 = vadd.f32 %v8021_v63, %v8020_v55 }
 0x489   :  { %v9210_v26 = vpop.f32.mrb[150].mxu0 }
 0x48a   :  { %v9245_v12 = vpop.f32.mrb[158].mxu1  ;;  %v9211_v46 = vpop.f32.mrb[151].mxu0 }
 0x48b   :  { %v9212_v50 = vadd.f32 %v9211_v46, %v9210_v26  ;;  %v9246_v17 = vpop.f32.mrb[159].mxu1 }
 0x48c   :  { %v9247_v25 = vadd.f32 %v9246_v17, %v9245_v12 }
 0x48d   :  { %v8023_v19 = vsel %vm7971_vm1, %v9212_v50, 0.0 }
 0x48e   :  { %v8024_v62 = vadd.f32 %v8023_v19, %v8022_v53  ;;  %v8025_v14 = vsel %vm7971_vm1, %v9247_v25, 0.0 }
 0x490   :  { %v8026_v36 = vadd.f32 %v8025_v14, %v8024_v62 }
 0x4a9   :  { %v9280_v1 = vpop.f32.mrb[152].mxu0 }
 0x4aa   :  { %v9315_v49 = vpop.f32.mrb[160].mxu1  ;;  %v9281_v38 = vpop.f32.mrb[153].mxu0 }
 0x4ab   :  { %v9282_v33 = vadd.f32 %v9281_v38, %v9280_v1  ;;  %v9316_v24 = vpop.f32.mrb[161].mxu1 }
 0x4ac   :  { %v9317_v16 = vadd.f32 %v9316_v24, %v9315_v49 }
 0x4ad   :  { %v8027_v3 = vsel %vm7971_vm1, %v9282_v33, 0.0 }
 0x4ae   :  { %v8028_v44 = vadd.f32 %v8027_v3, %v8026_v36  ;;  %v8029_v23 = vsel %vm7971_vm1, %v9317_v16, 0.0 }
 0x4b0   :  { %v8030_v18 = vadd.f32 %v8029_v23, %v8028_v44 }
 0x4c9   :  { %v9350_v30 = vpop.f32.mrb[154].mxu0 }
 0x4ca   :  { %v9385_v0 = vpop.f32.mrb[162].mxu1  ;;  %v9351_v42 = vpop.f32.mrb[155].mxu0 }
 0x4cb   :  { %v9352_v54 = vadd.f32 %v9351_v42, %v9350_v30  ;;  %v9386_v60 = vpop.f32.mrb[163].mxu1 }
 0x4cc   :  { %v9387_v20 = vadd.f32 %v9386_v60, %v9385_v0 }
 0x4cd   :  { %v8031_v41 = vsel %vm7971_vm1, %v9352_v54, 0.0 }
 0x4ce   :  { %v8032_v2 = vadd.f32 %v8031_v41, %v8030_v18  ;;  %v8033_v47 = vsel %vm7971_vm1, %v9387_v20, 0.0 }
 0x4d0   :  { %v8034_v39 = vadd.f32 %v8033_v47, %v8032_v2 }
 0x4d2   :  { %v8042_v52 = vadd.f32 %v8265_v37, %v8034_v39 }
 0x4d4   :  { %v8043_v58 = vmax.f32 %v8042_v52, 0.0 }
 0x4d6   :  { %9414 = vmatmul.mubr.msk.f32.vlgmr.msra.gmra.mrb[156].mxu0 %vm7971_vm1, %v8043_v58 }
 0x5a9   :  { %v8128_v27 = vpop.f32.mrb[156].mxu0 }
 0x5aa   :  { %v8129_v61 = vadd.f32 %v8266_v57, %v8128_v27  ;;  %v9415_v10 = vpop.f32.mrb[157].mxu0 }
 0x5ac   :  { %8132 = vst [vmem:[%s18023_s7] sm:$0xff] %v8129_v61 }

</bundles_post_ra>
